<compile_context>
chip_gen: v7x
topology: tpu7x:2x2x1
jax: 0.10.0
libtpu: 0.0.40
codegen_flags: <defaults>
</compile_context>

<pallas_src>
import functools
from math import sqrt

import jax
import jax.numpy as jnp
from jax.experimental import pallas as pl
from jax.experimental.pallas import tpu as pltpu

INV_SQRT2 = 1.0 / sqrt(2.0)


def _gelu_exact(x):
    # torch.nn.GELU() default = exact erf formulation.
    return 0.5 * x * (1.0 + jax.lax.erf(x * (1.0 / sqrt(2.0))))


def _bf16(x):
    # MXU fast path: bf16 operands, f32 accumulation via preferred_element_type.
    return x.astype(jnp.bfloat16)


# ----------------------------- in-kernel helpers -----------------------------


def _group_norm(t, red, bcast, gamma, beta, eps=1e-6):
    """GroupNorm of one batch element in token layout t: [N, C].

    Matches torch.nn.GroupNorm on [1, C, H, W]. `red` is the [C, G] channel->group
    reduce matrix, `bcast` the [G, C] group->channel broadcast matrix.
    """
    n, c = t.shape
    groups = red.shape[1]
    inv_count = 1.0 / float(n * (c // groups))
    s1 = jnp.sum(t, axis=0, keepdims=True)            # [1, C]
    s2 = jnp.sum(t * t, axis=0, keepdims=True)        # [1, C]
    mean_g = jnp.dot(s1, red, preferred_element_type=jnp.float32) * inv_count   # [1, G]
    ex2_g = jnp.dot(s2, red, preferred_element_type=jnp.float32) * inv_count
    # clamp: E[x^2]-mean^2 can cancel slightly negative -> rsqrt NaN otherwise.
    var_g = jnp.maximum(ex2_g - mean_g * mean_g, 0.0)
    inv_g = jax.lax.rsqrt(var_g + eps)
    mean = jnp.dot(mean_g, bcast, preferred_element_type=jnp.float32)           # [1, C]
    inv = jnp.dot(inv_g, bcast, preferred_element_type=jnp.float32)
    return (t - mean) * inv * gamma + beta


def _attn_heads(q, k, v, wp, bp, num_heads):
    """Multi-head attention core with the output projection folded per head.

    q: [Nq, D] (already carries the 1/sqrt(D) scale), k/v: [Nk, D], wp: [D, Cout] bf16.
    No head concat: each head contributes a lane-dense [Nq, Cout] add.
    """
    d = q.shape[-1]
    hd = d // num_heads
    acc = None
    for h in range(num_heads):                       # static, tiny loop
        sl = slice(h * hd, (h + 1) * hd)
        s = jax.lax.dot_general(_bf16(q[:, sl]), _bf16(k[:, sl]),
                                (((1,), (1,)), ((), ())),
                                preferred_element_type=jnp.float32)   # [Nq, Nk]
        s = s - jnp.max(s, axis=-1, keepdims=True)
        e = jnp.exp(s)
        inv = pl.reciprocal(jnp.sum(e, axis=-1, keepdims=True), approx=True)   # EUP
        o = jnp.dot(_bf16(e), _bf16(v[:, sl]),
                    preferred_element_type=jnp.float32) * inv                  # [Nq, hd]
        contrib = jnp.dot(_bf16(o), wp[sl, :], preferred_element_type=jnp.float32)
        acc = contrib if acc is None else acc + contrib
    return acc + bp


def _cross_attn(a_n, b_n, wq, bq, wkv, bkv, wp, bp, num_heads):
    """Queries from b_n, keys/values from a_n. wq/bq carry the 1/sqrt(D) scale."""
    q = jnp.dot(_bf16(b_n), wq, preferred_element_type=jnp.float32) + bq      # [Nb, D]
    kv = jnp.dot(_bf16(a_n), wkv, preferred_element_type=jnp.float32) + bkv   # [Na, 2D]
    d = wq.shape[-1]
    return _attn_heads(q, kv[:, :d], kv[:, d:], wp, bp, num_heads)


def _self_attn(x_n, wqkv, bqkv, wp, bp, num_heads):
    qkv = jnp.dot(_bf16(x_n), wqkv, preferred_element_type=jnp.float32) + bqkv
    d = wqkv.shape[-1] // 3
    return _attn_heads(qkv[:, :d], qkv[:, d:2 * d], qkv[:, 2 * d:], wp, bp, num_heads)


def _ff(t_n, w1, b1, w2, b2):
    h = jnp.dot(_bf16(t_n), w1, preferred_element_type=jnp.float32) + b1
    h = _gelu_exact(h)
    return jnp.dot(_bf16(h), w2, preferred_element_type=jnp.float32) + b2


# --------------------------------- fused kernel ---------------------------------

_PARAM_KEYS = (
    # GroupNorm group-reduce / group-broadcast matrices ([C,G] / [G,C], not [C,C])
    "gn_red_x", "gn_bcast_x", "gn_red_c", "gn_bcast_c",
    # phase 1: MHCrossAttn(x -> cells)
    "ca1_gna_g", "ca1_gna_b", "ca1_gnb_g", "ca1_gnb_b",
    "ca1_wq", "ca1_bq", "ca1_wkv", "ca1_bkv", "ca1_wp", "ca1_bp",
    # phase 2: MHSelfAttn(cells)
    "sa_gn_g", "sa_gn_b", "sa_wqkv", "sa_bqkv", "sa_wp", "sa_bp",
    # phase 3: FF over cells
    "ffc_gn_g", "ffc_gn_b", "ffc_w1", "ffc_b1", "ffc_w2", "ffc_b2",
    # phase 4: MHCrossAttn(cells -> x)
    "ca2_gna_g", "ca2_gna_b", "ca2_gnb_g", "ca2_gnb_b",
    "ca2_wq", "ca2_bq", "ca2_wkv", "ca2_bkv", "ca2_wp", "ca2_bp",
    # phase 5: FF over x
    "ffx_gn_g", "ffx_gn_b", "ffx_w1", "ffx_b1", "ffx_w2", "ffx_b2",
)


def _layer_kernel(x_ref, c_ref, *refs, num_heads, rescale):
    n_params = len(_PARAM_KEYS)
    P = {k: refs[i][...] for i, k in enumerate(_PARAM_KEYS)}
    x_out_ref = refs[n_params]
    c_out_ref = refs[n_params + 1]

    x = x_ref[0].astype(jnp.float32)     # [Nx, C]   (one batch element per grid step)
    c = c_ref[0].astype(jnp.float32)     # [Nc, Cm]
    rx, bx = P["gn_red_x"], P["gn_bcast_x"]
    rc, bc = P["gn_red_c"], P["gn_bcast_c"]

    def res(skip, h):
        out = skip + h
        return out * INV_SQRT2 if rescale else out

    # 1. cells <- mhca(x, cells)
    x_n = _group_norm(x, rx, bx, P["ca1_gna_g"], P["ca1_gna_b"])
    c_n = _group_norm(c, rc, bc, P["ca1_gnb_g"], P["ca1_gnb_b"])
    h = _cross_attn(x_n, c_n, P["ca1_wq"], P["ca1_bq"], P["ca1_wkv"], P["ca1_bkv"],
                    P["ca1_wp"], P["ca1_bp"], num_heads)
    c1 = res(c, h)

    # 2. cells <- mhsa(cells)
    c1_n = _group_norm(c1, rc, bc, P["sa_gn_g"], P["sa_gn_b"])
    h = _self_attn(c1_n, P["sa_wqkv"], P["sa_bqkv"], P["sa_wp"], P["sa_bp"], num_heads)
    c2 = res(c1, h)

    # 3. FF over cells; skip connection from the ORIGINAL cells input.
    c2_n = _group_norm(c2, rc, bc, P["ffc_gn_g"], P["ffc_gn_b"])
    h = _ff(c2_n, P["ffc_w1"], P["ffc_b1"], P["ffc_w2"], P["ffc_b2"])
    c3 = res(c, h)

    # 4. x <- mhca2(cells, x)
    c3_n = _group_norm(c3, rc, bc, P["ca2_gna_g"], P["ca2_gna_b"])
    x_n2 = _group_norm(x, rx, bx, P["ca2_gnb_g"], P["ca2_gnb_b"])
    h = _cross_attn(c3_n, x_n2, P["ca2_wq"], P["ca2_bq"], P["ca2_wkv"], P["ca2_bkv"],
                    P["ca2_wp"], P["ca2_bp"], num_heads)
    x1 = res(x, h)

    # 5. FF over x; skip connection is x1 itself.
    x1_n = _group_norm(x1, rx, bx, P["ffx_gn_g"], P["ffx_gn_b"])
    h = _ff(x1_n, P["ffx_w1"], P["ffx_b1"], P["ffx_w2"], P["ffx_b2"])
    x2 = res(x1, h)

    x_out_ref[0] = x2.astype(x_out_ref.dtype)
    c_out_ref[0] = c3.astype(c_out_ref.dtype)


# --------------------------- param packing for the kernel ---------------------------


def _group_matrices(c, groups):
    gid = jnp.arange(c) // (c // groups)
    red = (gid[:, None] == jnp.arange(groups)[None, :]).astype(jnp.float32)   # [C, G]
    return red, jnp.transpose(red)                                            # [G, C]


def prepare_kernel_params(params):
    """Pack / pre-scale / pre-cast the raw (torch-layout) params for the fused kernel.

    Matmul weights -> bf16 (MXU operands); biases / GroupNorm params stay f32.
    Self-attn QKV packed into [C, 3D]; cross-attn KV packed into [Ca, 2D].
    The 1/sqrt(D) attention score scale is folded into wq / bq.
    """
    mhca, mhsa = params["mhca"], params["mhsa"]
    ffc, mhca2, ffx = params["ff_cells"], params["mhca2"], params["ff_x"]
    dim = mhca["gna_g"].shape[1]       # x channels (= dimA of mhca)
    memdim = mhca["gnb_g"].shape[1]    # cells channels
    red_x, bcast_x = _group_matrices(dim, min(dim // 4, 32))
    red_c, bcast_c = _group_matrices(memdim, min(memdim // 4, 32))

    out = dict(gn_red_x=red_x, gn_bcast_x=bcast_x, gn_red_c=red_c, gn_bcast_c=bcast_c)

    def bf(w):
        return w.astype(jnp.bfloat16)

    def pack_cross(p, px):
        scale = 1.0 / sqrt(p["wq"].shape[1])
        out[px + "_gna_g"], out[px + "_gna_b"] = p["gna_g"], p["gna_b"]
        out[px + "_gnb_g"], out[px + "_gnb_b"] = p["gnb_g"], p["gnb_b"]
        out[px + "_wq"] = bf(p["wq"] * scale)
        out[px + "_bq"] = p["bq"] * scale
        out[px + "_wkv"] = bf(jnp.concatenate([p["wk"], p["wv"]], axis=1))
        out[px + "_bkv"] = jnp.concatenate([p["bk"], p["bv"]], axis=1)
        out[px + "_wp"], out[px + "_bp"] = bf(p["wp"]), p["bp"]

    pack_cross(mhca, "ca1")
    pack_cross(mhca2, "ca2")

    scale = 1.0 / sqrt(mhsa["wq"].shape[1])
    out["sa_gn_g"], out["sa_gn_b"] = mhsa["gn_g"], mhsa["gn_b"]
    out["sa_wqkv"] = bf(jnp.concatenate([mhsa["wq"] * scale, mhsa["wk"], mhsa["wv"]], axis=1))
    out["sa_bqkv"] = jnp.concatenate([mhsa["bq"] * scale, mhsa["bk"], mhsa["bv"]], axis=1)
    out["sa_wp"], out["sa_bp"] = bf(mhsa["wp"]), mhsa["bp"]

    for p, px in ((ffc, "ffc"), (ffx, "ffx")):
        out[px + "_gn_g"], out[px + "_gn_b"] = p["gn_g"], p["gn_b"]
        out[px + "_w1"], out[px + "_b1"] = bf(p["w1"]), p["b1"]
        out[px + "_w2"], out[px + "_b2"] = bf(p["w2"]), p["b2"]
    return out


# ------------------------------- pallas_call wrapper --------------------------------


def _to_tokens(img):
    b, c, h, w = img.shape
    return jnp.transpose(img, (0, 2, 3, 1)).reshape(b, h * w, c)


def _from_tokens(tok, h, w):
    b, n, c = tok.shape
    return jnp.transpose(tok.reshape(b, h, w, c), (0, 3, 1, 2))


def _batched_spec(n, c):
    return pl.BlockSpec((1, n, c), lambda i: (i, 0, 0))


def _resident_spec(arr):
    # Same block every grid step -> stays VMEM-resident (no per-step re-DMA).
    # TODO(synk): on v7x at production channel dims, add pipeline_mode=pl.Buffered(1) so
    # resident weights are single- instead of double-buffered (halves weight VMEM).
    zeros = (0,) * arr.ndim
    return pl.BlockSpec(arr.shape, lambda i, _z=zeros: _z)


def special_transformer_layer(x, cells, params, *, num_heads, skip_rescale=True):
    """Pallas forward of SpecialTransformerLayer (non-adaptive path).

    x: [B, dim, H, W]; cells: [B, memdim, Hm, Wm]. Returns (x_out, cells_out).
    """
    # TODO(synk): adaptive GroupNorm (stepemb/zemb -> AdaptiveGroupNorm) and the add_pos
    # positional-embedding branch are not implemented (forward uses stepemb=None,
    # zemb=None, add_pos=False).
    # TODO(synk): for large H*W, split phases 4/5 into a second kernel gridded over
    # query-token tiles with flash-style key tiling (v7x core balance + VMEM scaling);
    # at these shapes full fusion is the win.
    B, C, H, W = x.shape
    _, Cm, Hm, Wm = cells.shape
    Nx, Nc = H * W, Hm * Wm
    D = params["mhca"]["wq"].shape[1]

    x_tok = _to_tokens(x)        # [B, Nx, dim]
    c_tok = _to_tokens(cells)    # [B, Nc, memdim]
    kp = prepare_kernel_params(params)
    param_arrays = [kp[k] for k in _PARAM_KEYS]

    kern = functools.partial(_layer_kernel, num_heads=num_heads, rescale=skip_rescale)

    in_specs = [_batched_spec(Nx, C), _batched_spec(Nc, Cm)]
    in_specs += [_resident_spec(a) for a in param_arrays]
    out_shape = (jax.ShapeDtypeStruct((B, Nx, C), x.dtype),
                 jax.ShapeDtypeStruct((B, Nc, Cm), cells.dtype))
    out_specs = (_batched_spec(Nx, C), _batched_spec(Nc, Cm))

    # Explicit scoped-VMEM budget: double-buffered token/output blocks + resident params
    # (x2 buffers) + headroom for f32 intermediates.  Floor raises v5e's 16 MiB default;
    # cap stays safely under v7x's 64 MiB physical VMEM.
    tok_bytes = 4 * (Nx * C + Nc * Cm)
    param_bytes = sum(int(a.size) * a.dtype.itemsize for a in param_arrays)
    need = 8 * tok_bytes + 2 * param_bytes + (8 << 20)
    vmem_limit = int(min(max(need, 32 << 20), 48 << 20))

    # Advisory cost estimate so XLA schedules sensibly around the custom call.
    flops_cells = (2 * Nc * Cm * D + 4 * Nx * C * D + 4 * Nc * Nx * D + 2 * Nc * D * Cm
                   + 6 * Nc * Cm * Cm + 4 * Nc * Nc * Cm + 2 * Nc * Cm * Cm
                   + 8 * Nc * Cm * Cm)
    flops_x = (2 * Nx * C * D + 4 * Nc * Cm * D + 4 * Nx * Nc * D + 2 * Nx * D * C
               + 8 * Nx * C * C)
    flops = B * (flops_cells + flops_x)
    trans = B * (num_heads * (2 * Nc * Nx + Nc * Nc) + 2 * Nc * Cm + 2 * Nx * C)
    nbytes = 4 * (x_tok.size + c_tok.size) + param_bytes + 4 * B * (Nx * C + Nc * Cm)

    x_out_tok, c_out_tok = pl.pallas_call(
        kern,
        out_shape=out_shape,
        grid_spec=pltpu.PrefetchScalarGridSpec(
            num_scalar_prefetch=0,
            grid=(B,),
            in_specs=in_specs,
            out_specs=out_specs),
        compiler_params=pltpu.CompilerParams(
            dimension_semantics=("parallel",),
            vmem_limit_bytes=vmem_limit),
        cost_estimate=pl.CostEstimate(flops=int(flops), transcendentals=int(trans),
                                      bytes_accessed=int(nbytes)),
    )(x_tok, c_tok, *param_arrays)

    return _from_tokens(x_out_tok, H, W), _from_tokens(c_out_tok, Hm, Wm)


# ------------------------------ params & reference ------------------------------


def _init_linear(key, fan_in, fan_out):
    kw, kb = jax.random.split(key)
    lim = 1.0 / sqrt(fan_in)
    w = jax.random.uniform(kw, (fan_in, fan_out), jnp.float32, -lim, lim)
    b = jax.random.uniform(kb, (1, fan_out), jnp.float32, -lim, lim)
    return w, b


def _init_groupnorm(key, c):
    kg, kb = jax.random.split(key)
    return (1.0 + 0.1 * jax.random.normal(kg, (1, c), jnp.float32),
            0.1 * jax.random.normal(kb, (1, c), jnp.float32))


def make_mhca_params(key, dim_a, dim_b, dim_attn):
    keys = jax.random.split(key, 6)
    gna_g, gna_b = _init_groupnorm(keys[0], dim_a)
    gnb_g, gnb_b = _init_groupnorm(keys[1], dim_b)
    wq, bq = _init_linear(keys[2], dim_b, dim_attn)
    wk, bk = _init_linear(keys[3], dim_a, dim_attn)
    wv, bv = _init_linear(keys[4], dim_a, dim_attn)
    wp, bp = _init_linear(keys[5], dim_attn, dim_b)
    return dict(gna_g=gna_g, gna_b=gna_b, gnb_g=gnb_g, gnb_b=gnb_b,
                wq=wq, bq=bq, wk=wk, bk=bk, wv=wv, bv=bv, wp=wp, bp=bp)


def make_mhsa_params(key, dim):
    keys = jax.random.split(key, 5)
    gn_g, gn_b = _init_groupnorm(keys[0], dim)
    wq, bq = _init_linear(keys[1], dim, dim)
    wk, bk = _init_linear(keys[2], dim, dim)
    wv, bv = _init_linear(keys[3], dim, dim)
    wp, bp = _init_linear(keys[4], dim, dim)
    return dict(gn_g=gn_g, gn_b=gn_b, wq=wq, bq=bq, wk=wk, bk=bk, wv=wv, bv=bv,
                wp=wp, bp=bp)


def make_ff_params(key, c):
    keys = jax.random.split(key, 3)
    gn_g, gn_b = _init_groupnorm(keys[0], c)
    w1, b1 = _init_linear(keys[1], c, 2 * c)
    w2, b2 = _init_linear(keys[2], 2 * c, c)
    return dict(gn_g=gn_g, gn_b=gn_b, w1=w1, b1=b1, w2=w2, b2=b2)


def _group_norm_ref(x, gamma, beta, groups, eps=1e-6):
    b, c, h, w = x.shape
    xg = x.reshape(b, groups, (c // groups) * h * w)
    mean = xg.mean(axis=-1, keepdims=True)
    var = jnp.mean((xg - mean) ** 2, axis=-1, keepdims=True)
    xn = ((xg - mean) / jnp.sqrt(var + eps)).reshape(b, c, h, w)
    return xn * gamma.reshape(1, c, 1, 1) + beta.reshape(1, c, 1, 1)


def _lin_ch_ref(x, w, bias):
    return jnp.einsum("bchw,cd->bdhw", x, w) + bias.reshape(1, -1, 1, 1)


def _mhca_ref(a, b, p, num_heads, rescale):
    B, Ca, Ha, Wa = a.shape
    _, Cb, Hb, Wb = b.shape
    D = p["wq"].shape[1]
    hd = D // num_heads
    skip = b
    an = _group_norm_ref(a, p["gna_g"], p["gna_b"], min(Ca // 4, 32))
    bn = _group_norm_ref(b, p["gnb_g"], p["gnb_b"], min(Cb // 4, 32))
    q = _lin_ch_ref(bn, p["wq"], p["bq"]).reshape(B, num_heads, hd, Hb, Wb)
    k = _lin_ch_ref(an, p["wk"], p["bk"]).reshape(B, num_heads, hd, Ha, Wa)
    v = _lin_ch_ref(an, p["wv"], p["bv"]).reshape(B, num_heads, hd, Ha, Wa)
    s = jnp.einsum("bhdxy,bhdij->bhxyij", q, k) / sqrt(D)
    s = s.reshape(B, num_heads, Hb, Wb, Ha * Wa)
    att = jax.nn.softmax(s, axis=-1).reshape(B, num_heads, Hb, Wb, Ha, Wa)
    h = jnp.einsum("bhxyij,bhdij->bhdxy", att, v).reshape(B, D, Hb, Wb)
    h = _lin_ch_ref(h, p["wp"], p["bp"])
    ret = skip + h
    return ret / sqrt(2.0) if rescale else ret


def _mhsa_ref(x, p, num_heads, rescale):
    pc = dict(p)
    pc["gna_g"], pc["gna_b"] = p["gn_g"], p["gn_b"]
    pc["gnb_g"], pc["gnb_b"] = p["gn_g"], p["gn_b"]
    return _mhca_ref(x, x, pc, num_heads, rescale)


def _ff_ref(t, skip, p, rescale):
    tn = _group_norm_ref(t, p["gn_g"], p["gn_b"], min(t.shape[1] // 4, 32))
    h = _lin_ch_ref(tn, p["w1"], p["b1"])
    h = _gelu_exact(h)
    h = _lin_ch_ref(h, p["w2"], p["b2"])
    ret = h + skip
    return ret / sqrt(2.0) if rescale else ret


def special_transformer_layer_ref(x, cells, params, *, num_heads, skip_rescale=True):
    skip_cells = cells
    c = _mhca_ref(x, cells, params["mhca"], num_heads, skip_rescale)
    c = _mhsa_ref(c, params["mhsa"], num_heads, skip_rescale)
    c = _ff_ref(c, skip_cells, params["ff_cells"], skip_rescale)
    x1 = _mhca_ref(c, x, params["mhca2"], num_heads, skip_rescale)
    x_out = _ff_ref(x1, x1, params["ff_x"], skip_rescale)
    return x_out, c


if __name__ == "__main__":
    # Feature dims are multiples of 128 -> lane-dense loads/stores/matmuls.
    dim, memdim, numheads = 128, 128, 2
    attn_dim = 64                 # MHCrossAttn's internal `dim` default (layer doesn't override)
    B, H, W = 2, 8, 8             # image:  [2, 128, 8, 8] -> 64 tokens
    Hm, Wm = 4, 4                 # memory: [2, 128, 4, 4] -> 16 tokens

    key = jax.random.PRNGKey(0)
    kx, kc, k1, k2, k3, k4, k5 = jax.random.split(key, 7)

    x = jax.random.normal(kx, (B, dim, H, W), dtype=jnp.float32)
    cells = jax.random.normal(kc, (B, memdim, Hm, Wm), dtype=jnp.float32)

    params = dict(
        mhca=make_mhca_params(k1, dim_a=dim, dim_b=memdim, dim_attn=attn_dim),
        mhsa=make_mhsa_params(k2, memdim),
        ff_cells=make_ff_params(k3, memdim),
        mhca2=make_mhca_params(k4, dim_a=memdim, dim_b=dim, dim_attn=attn_dim),
        ff_x=make_ff_params(k5, dim),
    )

    x_out, c_out = special_transformer_layer(x, cells, params, num_heads=numheads)
    x_out = jax.block_until_ready(x_out)
    c_out = jax.block_until_ready(c_out)

    x_ref, c_ref = special_transformer_layer_ref(x, cells, params, num_heads=numheads)

    assert x_out.shape == x.shape and c_out.shape == cells.shape
    # Kernel uses bf16 MXU operands (f32 accumulation) + approx reciprocal; ref is f32.
    assert jnp.allclose(c_out, c_ref, atol=3e-2, rtol=3e-2), "cells mismatch vs reference"
    assert jnp.allclose(x_out, x_ref, atol=3e-2, rtol=3e-2), "x mismatch vs reference"

    print("KERNEL_OK")
</pallas_src>

<mosaic_0001>
module attributes {stable_mosaic.version = 11 : i64} {
  func.func @_layer_kernel(%arg0: i32, %arg1: memref<1x64x128xf32, #tpu.memory_space<vmem>>, %arg2: memref<1x16x128xf32, #tpu.memory_space<vmem>>, %arg3: memref<128x32xf32, #tpu.memory_space<vmem>>, %arg4: memref<32x128xf32, #tpu.memory_space<vmem>>, %arg5: memref<128x32xf32, #tpu.memory_space<vmem>>, %arg6: memref<32x128xf32, #tpu.memory_space<vmem>>, %arg7: memref<1x128xf32, #tpu.memory_space<vmem>>, %arg8: memref<1x128xf32, #tpu.memory_space<vmem>>, %arg9: memref<1x128xf32, #tpu.memory_space<vmem>>, %arg10: memref<1x128xf32, #tpu.memory_space<vmem>>, %arg11: memref<128x64xbf16, #tpu.memory_space<vmem>>, %arg12: memref<1x64xf32, #tpu.memory_space<vmem>>, %arg13: memref<128x128xbf16, #tpu.memory_space<vmem>>, %arg14: memref<1x128xf32, #tpu.memory_space<vmem>>, %arg15: memref<64x128xbf16, #tpu.memory_space<vmem>>, %arg16: memref<1x128xf32, #tpu.memory_space<vmem>>, %arg17: memref<1x128xf32, #tpu.memory_space<vmem>>, %arg18: memref<1x128xf32, #tpu.memory_space<vmem>>, %arg19: memref<128x384xbf16, #tpu.memory_space<vmem>>, %arg20: memref<1x384xf32, #tpu.memory_space<vmem>>, %arg21: memref<128x128xbf16, #tpu.memory_space<vmem>>, %arg22: memref<1x128xf32, #tpu.memory_space<vmem>>, %arg23: memref<1x128xf32, #tpu.memory_space<vmem>>, %arg24: memref<1x128xf32, #tpu.memory_space<vmem>>, %arg25: memref<128x256xbf16, #tpu.memory_space<vmem>>, %arg26: memref<1x256xf32, #tpu.memory_space<vmem>>, %arg27: memref<256x128xbf16, #tpu.memory_space<vmem>>, %arg28: memref<1x128xf32, #tpu.memory_space<vmem>>, %arg29: memref<1x128xf32, #tpu.memory_space<vmem>>, %arg30: memref<1x128xf32, #tpu.memory_space<vmem>>, %arg31: memref<1x128xf32, #tpu.memory_space<vmem>>, %arg32: memref<1x128xf32, #tpu.memory_space<vmem>>, %arg33: memref<128x64xbf16, #tpu.memory_space<vmem>>, %arg34: memref<1x64xf32, #tpu.memory_space<vmem>>, %arg35: memref<128x128xbf16, #tpu.memory_space<vmem>>, %arg36: memref<1x128xf32, #tpu.memory_space<vmem>>, %arg37: memref<64x128xbf16, #tpu.memory_space<vmem>>, %arg38: memref<1x128xf32, #tpu.memory_space<vmem>>, %arg39: memref<1x128xf32, #tpu.memory_space<vmem>>, %arg40: memref<1x128xf32, #tpu.memory_space<vmem>>, %arg41: memref<128x256xbf16, #tpu.memory_space<vmem>>, %arg42: memref<1x256xf32, #tpu.memory_space<vmem>>, %arg43: memref<256x128xbf16, #tpu.memory_space<vmem>>, %arg44: memref<1x128xf32, #tpu.memory_space<vmem>>, %arg45: memref<1x64x128xf32, #tpu.memory_space<vmem>>, %arg46: memref<1x16x128xf32, #tpu.memory_space<vmem>>) attributes {dimension_semantics = [#tpu.dimension_semantics<parallel>], iteration_bounds = array<i64: 2>, scalar_prefetch = 0 : i64, scratch_operands = 0 : i64, tpu.core_type = #tpu.core_type<tc>, window_params = [{transform_indices = @transform_0, window_bounds = array<i64: 1, 64, 128>}, {transform_indices = @transform_1, window_bounds = array<i64: 1, 16, 128>}, {pipeline_mode = #tpu.pipeline_mode<synchronous>, transform_indices = @transform_2, window_bounds = array<i64: 128, 32>}, {pipeline_mode = #tpu.pipeline_mode<synchronous>, transform_indices = @transform_3, window_bounds = array<i64: 32, 128>}, {pipeline_mode = #tpu.pipeline_mode<synchronous>, transform_indices = @transform_4, window_bounds = array<i64: 128, 32>}, {pipeline_mode = #tpu.pipeline_mode<synchronous>, transform_indices = @transform_5, window_bounds = array<i64: 32, 128>}, {pipeline_mode = #tpu.pipeline_mode<synchronous>, transform_indices = @transform_6, window_bounds = array<i64: 1, 128>}, {pipeline_mode = #tpu.pipeline_mode<synchronous>, transform_indices = @transform_7, window_bounds = array<i64: 1, 128>}, {pipeline_mode = #tpu.pipeline_mode<synchronous>, transform_indices = @transform_8, window_bounds = array<i64: 1, 128>}, {pipeline_mode = #tpu.pipeline_mode<synchronous>, transform_indices = @transform_9, window_bounds = array<i64: 1, 128>}, {pipeline_mode = #tpu.pipeline_mode<synchronous>, transform_indices = @transform_10, window_bounds = array<i64: 128, 64>}, {pipeline_mode = #tpu.pipeline_mode<synchronous>, transform_indices = @transform_11, window_bounds = array<i64: 1, 64>}, {pipeline_mode = #tpu.pipeline_mode<synchronous>, transform_indices = @transform_12, window_bounds = array<i64: 128, 128>}, {pipeline_mode = #tpu.pipeline_mode<synchronous>, transform_indices = @transform_13, window_bounds = array<i64: 1, 128>}, {pipeline_mode = #tpu.pipeline_mode<synchronous>, transform_indices = @transform_14, window_bounds = array<i64: 64, 128>}, {pipeline_mode = #tpu.pipeline_mode<synchronous>, transform_indices = @transform_15, window_bounds = array<i64: 1, 128>}, {pipeline_mode = #tpu.pipeline_mode<synchronous>, transform_indices = @transform_16, window_bounds = array<i64: 1, 128>}, {pipeline_mode = #tpu.pipeline_mode<synchronous>, transform_indices = @transform_17, window_bounds = array<i64: 1, 128>}, {pipeline_mode = #tpu.pipeline_mode<synchronous>, transform_indices = @transform_18, window_bounds = array<i64: 128, 384>}, {pipeline_mode = #tpu.pipeline_mode<synchronous>, transform_indices = @transform_19, window_bounds = array<i64: 1, 384>}, {pipeline_mode = #tpu.pipeline_mode<synchronous>, transform_indices = @transform_20, window_bounds = array<i64: 128, 128>}, {pipeline_mode = #tpu.pipeline_mode<synchronous>, transform_indices = @transform_21, window_bounds = array<i64: 1, 128>}, {pipeline_mode = #tpu.pipeline_mode<synchronous>, transform_indices = @transform_22, window_bounds = array<i64: 1, 128>}, {pipeline_mode = #tpu.pipeline_mode<synchronous>, transform_indices = @transform_23, window_bounds = array<i64: 1, 128>}, {pipeline_mode = #tpu.pipeline_mode<synchronous>, transform_indices = @transform_24, window_bounds = array<i64: 128, 256>}, {pipeline_mode = #tpu.pipeline_mode<synchronous>, transform_indices = @transform_25, window_bounds = array<i64: 1, 256>}, {pipeline_mode = #tpu.pipeline_mode<synchronous>, transform_indices = @transform_26, window_bounds = array<i64: 256, 128>}, {pipeline_mode = #tpu.pipeline_mode<synchronous>, transform_indices = @transform_27, window_bounds = array<i64: 1, 128>}, {pipeline_mode = #tpu.pipeline_mode<synchronous>, transform_indices = @transform_28, window_bounds = array<i64: 1, 128>}, {pipeline_mode = #tpu.pipeline_mode<synchronous>, transform_indices = @transform_29, window_bounds = array<i64: 1, 128>}, {pipeline_mode = #tpu.pipeline_mode<synchronous>, transform_indices = @transform_30, window_bounds = array<i64: 1, 128>}, {pipeline_mode = #tpu.pipeline_mode<synchronous>, transform_indices = @transform_31, window_bounds = array<i64: 1, 128>}, {pipeline_mode = #tpu.pipeline_mode<synchronous>, transform_indices = @transform_32, window_bounds = array<i64: 128, 64>}, {pipeline_mode = #tpu.pipeline_mode<synchronous>, transform_indices = @transform_33, window_bounds = array<i64: 1, 64>}, {pipeline_mode = #tpu.pipeline_mode<synchronous>, transform_indices = @transform_34, window_bounds = array<i64: 128, 128>}, {pipeline_mode = #tpu.pipeline_mode<synchronous>, transform_indices = @transform_35, window_bounds = array<i64: 1, 128>}, {pipeline_mode = #tpu.pipeline_mode<synchronous>, transform_indices = @transform_36, window_bounds = array<i64: 64, 128>}, {pipeline_mode = #tpu.pipeline_mode<synchronous>, transform_indices = @transform_37, window_bounds = array<i64: 1, 128>}, {pipeline_mode = #tpu.pipeline_mode<synchronous>, transform_indices = @transform_38, window_bounds = array<i64: 1, 128>}, {pipeline_mode = #tpu.pipeline_mode<synchronous>, transform_indices = @transform_39, window_bounds = array<i64: 1, 128>}, {pipeline_mode = #tpu.pipeline_mode<synchronous>, transform_indices = @transform_40, window_bounds = array<i64: 128, 256>}, {pipeline_mode = #tpu.pipeline_mode<synchronous>, transform_indices = @transform_41, window_bounds = array<i64: 1, 256>}, {pipeline_mode = #tpu.pipeline_mode<synchronous>, transform_indices = @transform_42, window_bounds = array<i64: 256, 128>}, {pipeline_mode = #tpu.pipeline_mode<synchronous>, transform_indices = @transform_43, window_bounds = array<i64: 1, 128>}, {transform_indices = @transform_44, window_bounds = array<i64: 1, 64, 128>}, {transform_indices = @transform_45, window_bounds = array<i64: 1, 16, 128>}]} {
    %c0 = arith.constant 0 : index
    %c0_0 = arith.constant 0 : index
    %0 = vector.load %arg3[%c0, %c0_0] : memref<128x32xf32, #tpu.memory_space<vmem>>, vector<128x32xf32>
    %c0_1 = arith.constant 0 : index
    %c0_2 = arith.constant 0 : index
    %1 = vector.load %arg4[%c0_1, %c0_2] : memref<32x128xf32, #tpu.memory_space<vmem>>, vector<32x128xf32>
    %c0_3 = arith.constant 0 : index
    %c0_4 = arith.constant 0 : index
    %2 = vector.load %arg5[%c0_3, %c0_4] : memref<128x32xf32, #tpu.memory_space<vmem>>, vector<128x32xf32>
    %c0_5 = arith.constant 0 : index
    %c0_6 = arith.constant 0 : index
    %3 = vector.load %arg6[%c0_5, %c0_6] : memref<32x128xf32, #tpu.memory_space<vmem>>, vector<32x128xf32>
    %c0_7 = arith.constant 0 : index
    %c0_8 = arith.constant 0 : index
    %4 = vector.load %arg7[%c0_7, %c0_8] : memref<1x128xf32, #tpu.memory_space<vmem>>, vector<1x128xf32>
    %c0_9 = arith.constant 0 : index
    %c0_10 = arith.constant 0 : index
    %5 = vector.load %arg8[%c0_9, %c0_10] : memref<1x128xf32, #tpu.memory_space<vmem>>, vector<1x128xf32>
    %c0_11 = arith.constant 0 : index
    %c0_12 = arith.constant 0 : index
    %6 = vector.load %arg9[%c0_11, %c0_12] : memref<1x128xf32, #tpu.memory_space<vmem>>, vector<1x128xf32>
    %c0_13 = arith.constant 0 : index
    %c0_14 = arith.constant 0 : index
    %7 = vector.load %arg10[%c0_13, %c0_14] : memref<1x128xf32, #tpu.memory_space<vmem>>, vector<1x128xf32>
    %c0_15 = arith.constant 0 : index
    %c0_16 = arith.constant 0 : index
    %8 = vector.load %arg11[%c0_15, %c0_16] : memref<128x64xbf16, #tpu.memory_space<vmem>>, vector<128x64xbf16>
    %c0_17 = arith.constant 0 : index
    %c0_18 = arith.constant 0 : index
    %9 = vector.load %arg12[%c0_17, %c0_18] : memref<1x64xf32, #tpu.memory_space<vmem>>, vector<1x64xf32>
    %c0_19 = arith.constant 0 : index
    %c0_20 = arith.constant 0 : index
    %10 = vector.load %arg13[%c0_19, %c0_20] : memref<128x128xbf16, #tpu.memory_space<vmem>>, vector<128x128xbf16>
    %c0_21 = arith.constant 0 : index
    %c0_22 = arith.constant 0 : index
    %11 = vector.load %arg14[%c0_21, %c0_22] : memref<1x128xf32, #tpu.memory_space<vmem>>, vector<1x128xf32>
    %c0_23 = arith.constant 0 : index
    %c0_24 = arith.constant 0 : index
    %12 = vector.load %arg15[%c0_23, %c0_24] : memref<64x128xbf16, #tpu.memory_space<vmem>>, vector<64x128xbf16>
    %c0_25 = arith.constant 0 : index
    %c0_26 = arith.constant 0 : index
    %13 = vector.load %arg16[%c0_25, %c0_26] : memref<1x128xf32, #tpu.memory_space<vmem>>, vector<1x128xf32>
    %c0_27 = arith.constant 0 : index
    %c0_28 = arith.constant 0 : index
    %14 = vector.load %arg17[%c0_27, %c0_28] : memref<1x128xf32, #tpu.memory_space<vmem>>, vector<1x128xf32>
    %c0_29 = arith.constant 0 : index
    %c0_30 = arith.constant 0 : index
    %15 = vector.load %arg18[%c0_29, %c0_30] : memref<1x128xf32, #tpu.memory_space<vmem>>, vector<1x128xf32>
    %c0_31 = arith.constant 0 : index
    %c0_32 = arith.constant 0 : index
    %16 = vector.load %arg19[%c0_31, %c0_32] : memref<128x384xbf16, #tpu.memory_space<vmem>>, vector<128x384xbf16>
    %c0_33 = arith.constant 0 : index
    %c0_34 = arith.constant 0 : index
    %17 = vector.load %arg20[%c0_33, %c0_34] : memref<1x384xf32, #tpu.memory_space<vmem>>, vector<1x384xf32>
    %c0_35 = arith.constant 0 : index
    %c0_36 = arith.constant 0 : index
    %18 = vector.load %arg21[%c0_35, %c0_36] : memref<128x128xbf16, #tpu.memory_space<vmem>>, vector<128x128xbf16>
    %c0_37 = arith.constant 0 : index
    %c0_38 = arith.constant 0 : index
    %19 = vector.load %arg22[%c0_37, %c0_38] : memref<1x128xf32, #tpu.memory_space<vmem>>, vector<1x128xf32>
    %c0_39 = arith.constant 0 : index
    %c0_40 = arith.constant 0 : index
    %20 = vector.load %arg23[%c0_39, %c0_40] : memref<1x128xf32, #tpu.memory_space<vmem>>, vector<1x128xf32>
    %c0_41 = arith.constant 0 : index
    %c0_42 = arith.constant 0 : index
    %21 = vector.load %arg24[%c0_41, %c0_42] : memref<1x128xf32, #tpu.memory_space<vmem>>, vector<1x128xf32>
    %c0_43 = arith.constant 0 : index
    %c0_44 = arith.constant 0 : index
    %22 = vector.load %arg25[%c0_43, %c0_44] : memref<128x256xbf16, #tpu.memory_space<vmem>>, vector<128x256xbf16>
    %c0_45 = arith.constant 0 : index
    %c0_46 = arith.constant 0 : index
    %23 = vector.load %arg26[%c0_45, %c0_46] : memref<1x256xf32, #tpu.memory_space<vmem>>, vector<1x256xf32>
    %c0_47 = arith.constant 0 : index
    %c0_48 = arith.constant 0 : index
    %24 = vector.load %arg27[%c0_47, %c0_48] : memref<256x128xbf16, #tpu.memory_space<vmem>>, vector<256x128xbf16>
    %c0_49 = arith.constant 0 : index
    %c0_50 = arith.constant 0 : index
    %25 = vector.load %arg28[%c0_49, %c0_50] : memref<1x128xf32, #tpu.memory_space<vmem>>, vector<1x128xf32>
    %c0_51 = arith.constant 0 : index
    %c0_52 = arith.constant 0 : index
    %26 = vector.load %arg29[%c0_51, %c0_52] : memref<1x128xf32, #tpu.memory_space<vmem>>, vector<1x128xf32>
    %c0_53 = arith.constant 0 : index
    %c0_54 = arith.constant 0 : index
    %27 = vector.load %arg30[%c0_53, %c0_54] : memref<1x128xf32, #tpu.memory_space<vmem>>, vector<1x128xf32>
    %c0_55 = arith.constant 0 : index
    %c0_56 = arith.constant 0 : index
    %28 = vector.load %arg31[%c0_55, %c0_56] : memref<1x128xf32, #tpu.memory_space<vmem>>, vector<1x128xf32>
    %c0_57 = arith.constant 0 : index
    %c0_58 = arith.constant 0 : index
    %29 = vector.load %arg32[%c0_57, %c0_58] : memref<1x128xf32, #tpu.memory_space<vmem>>, vector<1x128xf32>
    %c0_59 = arith.constant 0 : index
    %c0_60 = arith.constant 0 : index
    %30 = vector.load %arg33[%c0_59, %c0_60] : memref<128x64xbf16, #tpu.memory_space<vmem>>, vector<128x64xbf16>
    %c0_61 = arith.constant 0 : index
    %c0_62 = arith.constant 0 : index
    %31 = vector.load %arg34[%c0_61, %c0_62] : memref<1x64xf32, #tpu.memory_space<vmem>>, vector<1x64xf32>
    %c0_63 = arith.constant 0 : index
    %c0_64 = arith.constant 0 : index
    %32 = vector.load %arg35[%c0_63, %c0_64] : memref<128x128xbf16, #tpu.memory_space<vmem>>, vector<128x128xbf16>
    %c0_65 = arith.constant 0 : index
    %c0_66 = arith.constant 0 : index
    %33 = vector.load %arg36[%c0_65, %c0_66] : memref<1x128xf32, #tpu.memory_space<vmem>>, vector<1x128xf32>
    %c0_67 = arith.constant 0 : index
    %c0_68 = arith.constant 0 : index
    %34 = vector.load %arg37[%c0_67, %c0_68] : memref<64x128xbf16, #tpu.memory_space<vmem>>, vector<64x128xbf16>
    %c0_69 = arith.constant 0 : index
    %c0_70 = arith.constant 0 : index
    %35 = vector.load %arg38[%c0_69, %c0_70] : memref<1x128xf32, #tpu.memory_space<vmem>>, vector<1x128xf32>
    %c0_71 = arith.constant 0 : index
    %c0_72 = arith.constant 0 : index
    %36 = vector.load %arg39[%c0_71, %c0_72] : memref<1x128xf32, #tpu.memory_space<vmem>>, vector<1x128xf32>
    %c0_73 = arith.constant 0 : index
    %c0_74 = arith.constant 0 : index
    %37 = vector.load %arg40[%c0_73, %c0_74] : memref<1x128xf32, #tpu.memory_space<vmem>>, vector<1x128xf32>
    %c0_75 = arith.constant 0 : index
    %c0_76 = arith.constant 0 : index
    %38 = vector.load %arg41[%c0_75, %c0_76] : memref<128x256xbf16, #tpu.memory_space<vmem>>, vector<128x256xbf16>
    %c0_77 = arith.constant 0 : index
    %c0_78 = arith.constant 0 : index
    %39 = vector.load %arg42[%c0_77, %c0_78] : memref<1x256xf32, #tpu.memory_space<vmem>>, vector<1x256xf32>
    %c0_79 = arith.constant 0 : index
    %c0_80 = arith.constant 0 : index
    %40 = vector.load %arg43[%c0_79, %c0_80] : memref<256x128xbf16, #tpu.memory_space<vmem>>, vector<256x128xbf16>
    %c0_81 = arith.constant 0 : index
    %c0_82 = arith.constant 0 : index
    %41 = vector.load %arg44[%c0_81, %c0_82] : memref<1x128xf32, #tpu.memory_space<vmem>>, vector<1x128xf32>
    %c0_83 = arith.constant 0 : index
    %c0_84 = arith.constant 0 : index
    %c0_85 = arith.constant 0 : index
    %42 = vector.load %arg1[%c0_83, %c0_84, %c0_85] : memref<1x64x128xf32, #tpu.memory_space<vmem>>, vector<1x64x128xf32>
    %43 = vector.shape_cast %42 : vector<1x64x128xf32> to vector<64x128xf32>
    %c0_86 = arith.constant 0 : index
    %c0_87 = arith.constant 0 : index
    %c0_88 = arith.constant 0 : index
    %44 = vector.load %arg2[%c0_86, %c0_87, %c0_88] : memref<1x16x128xf32, #tpu.memory_space<vmem>>, vector<1x16x128xf32>
    %45 = vector.shape_cast %44 : vector<1x16x128xf32> to vector<16x128xf32>
    %cst = arith.constant dense<0.000000e+00> : vector<128xf32>
    %46 = vector.multi_reduction <add>, %43, %cst [0] : vector<64x128xf32> to vector<128xf32>
    %47 = vector.shape_cast %46 : vector<128xf32> to vector<1x128xf32>
    %48 = arith.mulf %43, %43 : vector<64x128xf32>
    %cst_89 = arith.constant dense<0.000000e+00> : vector<128xf32>
    %49 = vector.multi_reduction <add>, %48, %cst_89 [0] : vector<64x128xf32> to vector<128xf32>
    %50 = vector.shape_cast %49 : vector<128xf32> to vector<1x128xf32>
    %cst_90 = arith.constant dense<0.000000e+00> : vector<1x32xf32>
    %51 = tpu.matmul %47, %0, %cst_90 {dimension_numbers = #tpu.dot_dimension_numbers<[1], [0], [0], [1], [0, 0, 1, 1], [], []>} : vector<1x128xf32>, vector<128x32xf32>, vector<1x32xf32> -> vector<1x32xf32>
    %cst_91 = arith.constant 3.906250e-03 : f32
    %52 = vector.broadcast %cst_91 : f32 to vector<1x32xf32>
    %53 = arith.mulf %51, %52 : vector<1x32xf32>
    %cst_92 = arith.constant dense<0.000000e+00> : vector<1x32xf32>
    %54 = tpu.matmul %50, %0, %cst_92 {dimension_numbers = #tpu.dot_dimension_numbers<[1], [0], [0], [1], [0, 0, 1, 1], [], []>} : vector<1x128xf32>, vector<128x32xf32>, vector<1x32xf32> -> vector<1x32xf32>
    %cst_93 = arith.constant 3.906250e-03 : f32
    %55 = vector.broadcast %cst_93 : f32 to vector<1x32xf32>
    %56 = arith.mulf %54, %55 : vector<1x32xf32>
    %57 = arith.mulf %53, %53 : vector<1x32xf32>
    %58 = arith.subf %56, %57 : vector<1x32xf32>
    %cst_94 = arith.constant 0.000000e+00 : f32
    %59 = vector.broadcast %cst_94 : f32 to vector<1x32xf32>
    %60 = arith.maximumf %58, %59 : vector<1x32xf32>
    %cst_95 = arith.constant 9.99999997E-7 : f32
    %61 = vector.broadcast %cst_95 : f32 to vector<1x32xf32>
    %62 = arith.addf %60, %61 : vector<1x32xf32>
    %63 = math.rsqrt %62 : vector<1x32xf32>
    %cst_96 = arith.constant dense<0.000000e+00> : vector<1x128xf32>
    %64 = tpu.matmul %53, %1, %cst_96 {dimension_numbers = #tpu.dot_dimension_numbers<[1], [0], [0], [1], [0, 0, 1, 1], [], []>} : vector<1x32xf32>, vector<32x128xf32>, vector<1x128xf32> -> vector<1x128xf32>
    %cst_97 = arith.constant dense<0.000000e+00> : vector<1x128xf32>
    %65 = tpu.matmul %63, %1, %cst_97 {dimension_numbers = #tpu.dot_dimension_numbers<[1], [0], [0], [1], [0, 0, 1, 1], [], []>} : vector<1x32xf32>, vector<32x128xf32>, vector<1x128xf32> -> vector<1x128xf32>
    %66 = vector.broadcast %64 : vector<1x128xf32> to vector<64x128xf32>
    %67 = arith.subf %43, %66 : vector<64x128xf32>
    %68 = vector.broadcast %65 : vector<1x128xf32> to vector<64x128xf32>
    %69 = arith.mulf %67, %68 : vector<64x128xf32>
    %70 = vector.broadcast %4 : vector<1x128xf32> to vector<64x128xf32>
    %71 = arith.mulf %69, %70 : vector<64x128xf32>
    %72 = vector.broadcast %5 : vector<1x128xf32> to vector<64x128xf32>
    %73 = arith.addf %71, %72 : vector<64x128xf32>
    %cst_98 = arith.constant dense<0.000000e+00> : vector<128xf32>
    %74 = vector.multi_reduction <add>, %45, %cst_98 [0] : vector<16x128xf32> to vector<128xf32>
    %75 = vector.shape_cast %74 : vector<128xf32> to vector<1x128xf32>
    %76 = arith.mulf %45, %45 : vector<16x128xf32>
    %cst_99 = arith.constant dense<0.000000e+00> : vector<128xf32>
    %77 = vector.multi_reduction <add>, %76, %cst_99 [0] : vector<16x128xf32> to vector<128xf32>
    %78 = vector.shape_cast %77 : vector<128xf32> to vector<1x128xf32>
    %cst_100 = arith.constant dense<0.000000e+00> : vector<1x32xf32>
    %79 = tpu.matmul %75, %2, %cst_100 {dimension_numbers = #tpu.dot_dimension_numbers<[1], [0], [0], [1], [0, 0, 1, 1], [], []>} : vector<1x128xf32>, vector<128x32xf32>, vector<1x32xf32> -> vector<1x32xf32>
    %cst_101 = arith.constant 1.562500e-02 : f32
    %80 = vector.broadcast %cst_101 : f32 to vector<1x32xf32>
    %81 = arith.mulf %79, %80 : vector<1x32xf32>
    %cst_102 = arith.constant dense<0.000000e+00> : vector<1x32xf32>
    %82 = tpu.matmul %78, %2, %cst_102 {dimension_numbers = #tpu.dot_dimension_numbers<[1], [0], [0], [1], [0, 0, 1, 1], [], []>} : vector<1x128xf32>, vector<128x32xf32>, vector<1x32xf32> -> vector<1x32xf32>
    %cst_103 = arith.constant 1.562500e-02 : f32
    %83 = vector.broadcast %cst_103 : f32 to vector<1x32xf32>
    %84 = arith.mulf %82, %83 : vector<1x32xf32>
    %85 = arith.mulf %81, %81 : vector<1x32xf32>
    %86 = arith.subf %84, %85 : vector<1x32xf32>
    %cst_104 = arith.constant 0.000000e+00 : f32
    %87 = vector.broadcast %cst_104 : f32 to vector<1x32xf32>
    %88 = arith.maximumf %86, %87 : vector<1x32xf32>
    %cst_105 = arith.constant 9.99999997E-7 : f32
    %89 = vector.broadcast %cst_105 : f32 to vector<1x32xf32>
    %90 = arith.addf %88, %89 : vector<1x32xf32>
    %91 = math.rsqrt %90 : vector<1x32xf32>
    %cst_106 = arith.constant dense<0.000000e+00> : vector<1x128xf32>
    %92 = tpu.matmul %81, %3, %cst_106 {dimension_numbers = #tpu.dot_dimension_numbers<[1], [0], [0], [1], [0, 0, 1, 1], [], []>} : vector<1x32xf32>, vector<32x128xf32>, vector<1x128xf32> -> vector<1x128xf32>
    %cst_107 = arith.constant dense<0.000000e+00> : vector<1x128xf32>
    %93 = tpu.matmul %91, %3, %cst_107 {dimension_numbers = #tpu.dot_dimension_numbers<[1], [0], [0], [1], [0, 0, 1, 1], [], []>} : vector<1x32xf32>, vector<32x128xf32>, vector<1x128xf32> -> vector<1x128xf32>
    %94 = vector.broadcast %92 : vector<1x128xf32> to vector<16x128xf32>
    %95 = arith.subf %45, %94 : vector<16x128xf32>
    %96 = vector.broadcast %93 : vector<1x128xf32> to vector<16x128xf32>
    %97 = arith.mulf %95, %96 : vector<16x128xf32>
    %98 = vector.broadcast %6 : vector<1x128xf32> to vector<16x128xf32>
    %99 = arith.mulf %97, %98 : vector<16x128xf32>
    %100 = vector.broadcast %7 : vector<1x128xf32> to vector<16x128xf32>
    %101 = arith.addf %99, %100 : vector<16x128xf32>
    %102 = arith.truncf %101 : vector<16x128xf32> to vector<16x128xbf16>
    %cst_108 = arith.constant dense<0.000000e+00> : vector<16x64xf32>
    %103 = tpu.matmul %102, %8, %cst_108 {dimension_numbers = #tpu.dot_dimension_numbers<[1], [0], [0], [1], [0, 0, 1, 1], [], []>} : vector<16x128xbf16>, vector<128x64xbf16>, vector<16x64xf32> -> vector<16x64xf32>
    %104 = vector.broadcast %9 : vector<1x64xf32> to vector<16x64xf32>
    %105 = arith.addf %103, %104 : vector<16x64xf32>
    %106 = arith.truncf %73 : vector<64x128xf32> to vector<64x128xbf16>
    %cst_109 = arith.constant dense<0.000000e+00> : vector<64x128xf32>
    %107 = tpu.matmul %106, %10, %cst_109 {dimension_numbers = #tpu.dot_dimension_numbers<[1], [0], [0], [1], [0, 0, 1, 1], [], []>} : vector<64x128xbf16>, vector<128x128xbf16>, vector<64x128xf32> -> vector<64x128xf32>
    %108 = vector.broadcast %11 : vector<1x128xf32> to vector<64x128xf32>
    %109 = arith.addf %107, %108 : vector<64x128xf32>
    %110 = vector.extract_strided_slice %109 {offsets = [0, 0], sizes = [64, 64], strides = [1, 1]} : vector<64x128xf32> to vector<64x64xf32>
    %111 = vector.extract_strided_slice %109 {offsets = [0, 64], sizes = [64, 64], strides = [1, 1]} : vector<64x128xf32> to vector<64x64xf32>
    %112 = vector.extract_strided_slice %105 {offsets = [0, 0], sizes = [16, 32], strides = [1, 1]} : vector<16x64xf32> to vector<16x32xf32>
    %113 = arith.truncf %112 : vector<16x32xf32> to vector<16x32xbf16>
    %114 = vector.extract_strided_slice %110 {offsets = [0, 0], sizes = [64, 32], strides = [1, 1]} : vector<64x64xf32> to vector<64x32xf32>
    %115 = arith.truncf %114 : vector<64x32xf32> to vector<64x32xbf16>
    %cst_110 = arith.constant dense<0.000000e+00> : vector<16x64xf32>
    %116 = tpu.matmul %113, %115, %cst_110 {dimension_numbers = #tpu.dot_dimension_numbers<[1], [1], [0], [0], [0, 0, 1, 0], [], []>} : vector<16x32xbf16>, vector<64x32xbf16>, vector<16x64xf32> -> vector<16x64xf32>
    %cst_111 = arith.constant dense<0xFF800000> : vector<16xf32>
    %117 = vector.multi_reduction <maximumf>, %116, %cst_111 [1] : vector<16x64xf32> to vector<16xf32>
    %118 = vector.shape_cast %117 : vector<16xf32> to vector<16x1xf32>
    %119 = vector.broadcast %118 : vector<16x1xf32> to vector<16x64xf32>
    %120 = arith.subf %116, %119 : vector<16x64xf32>
    %121 = math.exp %120 : vector<16x64xf32>
    %cst_112 = arith.constant dense<0.000000e+00> : vector<16xf32>
    %122 = vector.multi_reduction <add>, %121, %cst_112 [1] : vector<16x64xf32> to vector<16xf32>
    %123 = vector.shape_cast %122 : vector<16xf32> to vector<16x1xf32>
    %124 = tpu.reciprocal %123 {approx = true} : vector<16x1xf32> -> vector<16x1xf32>
    %125 = arith.truncf %121 : vector<16x64xf32> to vector<16x64xbf16>
    %126 = vector.extract_strided_slice %111 {offsets = [0, 0], sizes = [64, 32], strides = [1, 1]} : vector<64x64xf32> to vector<64x32xf32>
    %127 = arith.truncf %126 : vector<64x32xf32> to vector<64x32xbf16>
    %cst_113 = arith.constant dense<0.000000e+00> : vector<16x32xf32>
    %128 = tpu.matmul %125, %127, %cst_113 {dimension_numbers = #tpu.dot_dimension_numbers<[1], [0], [0], [1], [0, 0, 1, 1], [], []>} : vector<16x64xbf16>, vector<64x32xbf16>, vector<16x32xf32> -> vector<16x32xf32>
    %129 = vector.broadcast %124 : vector<16x1xf32> to vector<16x32xf32>
    %130 = arith.mulf %128, %129 : vector<16x32xf32>
    %131 = arith.truncf %130 : vector<16x32xf32> to vector<16x32xbf16>
    %132 = vector.extract_strided_slice %12 {offsets = [0, 0], sizes = [32, 128], strides = [1, 1]} : vector<64x128xbf16> to vector<32x128xbf16>
    %cst_114 = arith.constant dense<0.000000e+00> : vector<16x128xf32>
    %133 = tpu.matmul %131, %132, %cst_114 {dimension_numbers = #tpu.dot_dimension_numbers<[1], [0], [0], [1], [0, 0, 1, 1], [], []>} : vector<16x32xbf16>, vector<32x128xbf16>, vector<16x128xf32> -> vector<16x128xf32>
    %134 = vector.extract_strided_slice %105 {offsets = [0, 32], sizes = [16, 32], strides = [1, 1]} : vector<16x64xf32> to vector<16x32xf32>
    %135 = arith.truncf %134 : vector<16x32xf32> to vector<16x32xbf16>
    %136 = vector.extract_strided_slice %110 {offsets = [0, 32], sizes = [64, 32], strides = [1, 1]} : vector<64x64xf32> to vector<64x32xf32>
    %137 = arith.truncf %136 : vector<64x32xf32> to vector<64x32xbf16>
    %cst_115 = arith.constant dense<0.000000e+00> : vector<16x64xf32>
    %138 = tpu.matmul %135, %137, %cst_115 {dimension_numbers = #tpu.dot_dimension_numbers<[1], [1], [0], [0], [0, 0, 1, 0], [], []>} : vector<16x32xbf16>, vector<64x32xbf16>, vector<16x64xf32> -> vector<16x64xf32>
    %cst_116 = arith.constant dense<0xFF800000> : vector<16xf32>
    %139 = vector.multi_reduction <maximumf>, %138, %cst_116 [1] : vector<16x64xf32> to vector<16xf32>
    %140 = vector.shape_cast %139 : vector<16xf32> to vector<16x1xf32>
    %141 = vector.broadcast %140 : vector<16x1xf32> to vector<16x64xf32>
    %142 = arith.subf %138, %141 : vector<16x64xf32>
    %143 = math.exp %142 : vector<16x64xf32>
    %cst_117 = arith.constant dense<0.000000e+00> : vector<16xf32>
    %144 = vector.multi_reduction <add>, %143, %cst_117 [1] : vector<16x64xf32> to vector<16xf32>
    %145 = vector.shape_cast %144 : vector<16xf32> to vector<16x1xf32>
    %146 = tpu.reciprocal %145 {approx = true} : vector<16x1xf32> -> vector<16x1xf32>
    %147 = arith.truncf %143 : vector<16x64xf32> to vector<16x64xbf16>
    %148 = vector.extract_strided_slice %111 {offsets = [0, 32], sizes = [64, 32], strides = [1, 1]} : vector<64x64xf32> to vector<64x32xf32>
    %149 = arith.truncf %148 : vector<64x32xf32> to vector<64x32xbf16>
    %cst_118 = arith.constant dense<0.000000e+00> : vector<16x32xf32>
    %150 = tpu.matmul %147, %149, %cst_118 {dimension_numbers = #tpu.dot_dimension_numbers<[1], [0], [0], [1], [0, 0, 1, 1], [], []>} : vector<16x64xbf16>, vector<64x32xbf16>, vector<16x32xf32> -> vector<16x32xf32>
    %151 = vector.broadcast %146 : vector<16x1xf32> to vector<16x32xf32>
    %152 = arith.mulf %150, %151 : vector<16x32xf32>
    %153 = arith.truncf %152 : vector<16x32xf32> to vector<16x32xbf16>
    %154 = vector.extract_strided_slice %12 {offsets = [32, 0], sizes = [32, 128], strides = [1, 1]} : vector<64x128xbf16> to vector<32x128xbf16>
    %cst_119 = arith.constant dense<0.000000e+00> : vector<16x128xf32>
    %155 = tpu.matmul %153, %154, %cst_119 {dimension_numbers = #tpu.dot_dimension_numbers<[1], [0], [0], [1], [0, 0, 1, 1], [], []>} : vector<16x32xbf16>, vector<32x128xbf16>, vector<16x128xf32> -> vector<16x128xf32>
    %156 = arith.addf %133, %155 : vector<16x128xf32>
    %157 = vector.broadcast %13 : vector<1x128xf32> to vector<16x128xf32>
    %158 = arith.addf %156, %157 : vector<16x128xf32>
    %159 = arith.addf %45, %158 : vector<16x128xf32>
    %cst_120 = arith.constant 0.707106769 : f32
    %160 = vector.broadcast %cst_120 : f32 to vector<16x128xf32>
    %161 = arith.mulf %159, %160 : vector<16x128xf32>
    %cst_121 = arith.constant dense<0.000000e+00> : vector<128xf32>
    %162 = vector.multi_reduction <add>, %161, %cst_121 [0] : vector<16x128xf32> to vector<128xf32>
    %163 = vector.shape_cast %162 : vector<128xf32> to vector<1x128xf32>
    %164 = arith.mulf %161, %161 : vector<16x128xf32>
    %cst_122 = arith.constant dense<0.000000e+00> : vector<128xf32>
    %165 = vector.multi_reduction <add>, %164, %cst_122 [0] : vector<16x128xf32> to vector<128xf32>
    %166 = vector.shape_cast %165 : vector<128xf32> to vector<1x128xf32>
    %cst_123 = arith.constant dense<0.000000e+00> : vector<1x32xf32>
    %167 = tpu.matmul %163, %2, %cst_123 {dimension_numbers = #tpu.dot_dimension_numbers<[1], [0], [0], [1], [0, 0, 1, 1], [], []>} : vector<1x128xf32>, vector<128x32xf32>, vector<1x32xf32> -> vector<1x32xf32>
    %cst_124 = arith.constant 1.562500e-02 : f32
    %168 = vector.broadcast %cst_124 : f32 to vector<1x32xf32>
    %169 = arith.mulf %167, %168 : vector<1x32xf32>
    %cst_125 = arith.constant dense<0.000000e+00> : vector<1x32xf32>
    %170 = tpu.matmul %166, %2, %cst_125 {dimension_numbers = #tpu.dot_dimension_numbers<[1], [0], [0], [1], [0, 0, 1, 1], [], []>} : vector<1x128xf32>, vector<128x32xf32>, vector<1x32xf32> -> vector<1x32xf32>
    %cst_126 = arith.constant 1.562500e-02 : f32
    %171 = vector.broadcast %cst_126 : f32 to vector<1x32xf32>
    %172 = arith.mulf %170, %171 : vector<1x32xf32>
    %173 = arith.mulf %169, %169 : vector<1x32xf32>
    %174 = arith.subf %172, %173 : vector<1x32xf32>
    %cst_127 = arith.constant 0.000000e+00 : f32
    %175 = vector.broadcast %cst_127 : f32 to vector<1x32xf32>
    %176 = arith.maximumf %174, %175 : vector<1x32xf32>
    %cst_128 = arith.constant 9.99999997E-7 : f32
    %177 = vector.broadcast %cst_128 : f32 to vector<1x32xf32>
    %178 = arith.addf %176, %177 : vector<1x32xf32>
    %179 = math.rsqrt %178 : vector<1x32xf32>
    %cst_129 = arith.constant dense<0.000000e+00> : vector<1x128xf32>
    %180 = tpu.matmul %169, %3, %cst_129 {dimension_numbers = #tpu.dot_dimension_numbers<[1], [0], [0], [1], [0, 0, 1, 1], [], []>} : vector<1x32xf32>, vector<32x128xf32>, vector<1x128xf32> -> vector<1x128xf32>
    %cst_130 = arith.constant dense<0.000000e+00> : vector<1x128xf32>
    %181 = tpu.matmul %179, %3, %cst_130 {dimension_numbers = #tpu.dot_dimension_numbers<[1], [0], [0], [1], [0, 0, 1, 1], [], []>} : vector<1x32xf32>, vector<32x128xf32>, vector<1x128xf32> -> vector<1x128xf32>
    %182 = vector.broadcast %180 : vector<1x128xf32> to vector<16x128xf32>
    %183 = arith.subf %161, %182 : vector<16x128xf32>
    %184 = vector.broadcast %181 : vector<1x128xf32> to vector<16x128xf32>
    %185 = arith.mulf %183, %184 : vector<16x128xf32>
    %186 = vector.broadcast %14 : vector<1x128xf32> to vector<16x128xf32>
    %187 = arith.mulf %185, %186 : vector<16x128xf32>
    %188 = vector.broadcast %15 : vector<1x128xf32> to vector<16x128xf32>
    %189 = arith.addf %187, %188 : vector<16x128xf32>
    %190 = arith.truncf %189 : vector<16x128xf32> to vector<16x128xbf16>
    %cst_131 = arith.constant dense<0.000000e+00> : vector<16x384xf32>
    %191 = tpu.matmul %190, %16, %cst_131 {dimension_numbers = #tpu.dot_dimension_numbers<[1], [0], [0], [1], [0, 0, 1, 1], [], []>} : vector<16x128xbf16>, vector<128x384xbf16>, vector<16x384xf32> -> vector<16x384xf32>
    %192 = vector.broadcast %17 : vector<1x384xf32> to vector<16x384xf32>
    %193 = arith.addf %191, %192 : vector<16x384xf32>
    %194 = vector.extract_strided_slice %193 {offsets = [0, 0], sizes = [16, 128], strides = [1, 1]} : vector<16x384xf32> to vector<16x128xf32>
    %195 = vector.extract_strided_slice %193 {offsets = [0, 128], sizes = [16, 128], strides = [1, 1]} : vector<16x384xf32> to vector<16x128xf32>
    %196 = vector.extract_strided_slice %193 {offsets = [0, 256], sizes = [16, 128], strides = [1, 1]} : vector<16x384xf32> to vector<16x128xf32>
    %197 = vector.extract_strided_slice %194 {offsets = [0, 0], sizes = [16, 64], strides = [1, 1]} : vector<16x128xf32> to vector<16x64xf32>
    %198 = arith.truncf %197 : vector<16x64xf32> to vector<16x64xbf16>
    %199 = vector.extract_strided_slice %195 {offsets = [0, 0], sizes = [16, 64], strides = [1, 1]} : vector<16x128xf32> to vector<16x64xf32>
    %200 = arith.truncf %199 : vector<16x64xf32> to vector<16x64xbf16>
    %cst_132 = arith.constant dense<0.000000e+00> : vector<16x16xf32>
    %201 = tpu.matmul %198, %200, %cst_132 {dimension_numbers = #tpu.dot_dimension_numbers<[1], [1], [0], [0], [0, 0, 1, 0], [], []>} : vector<16x64xbf16>, vector<16x64xbf16>, vector<16x16xf32> -> vector<16x16xf32>
    %cst_133 = arith.constant dense<0xFF800000> : vector<16xf32>
    %202 = vector.multi_reduction <maximumf>, %201, %cst_133 [1] : vector<16x16xf32> to vector<16xf32>
    %203 = vector.shape_cast %202 : vector<16xf32> to vector<16x1xf32>
    %204 = vector.broadcast %203 : vector<16x1xf32> to vector<16x16xf32>
    %205 = arith.subf %201, %204 : vector<16x16xf32>
    %206 = math.exp %205 : vector<16x16xf32>
    %cst_134 = arith.constant dense<0.000000e+00> : vector<16xf32>
    %207 = vector.multi_reduction <add>, %206, %cst_134 [1] : vector<16x16xf32> to vector<16xf32>
    %208 = vector.shape_cast %207 : vector<16xf32> to vector<16x1xf32>
    %209 = tpu.reciprocal %208 {approx = true} : vector<16x1xf32> -> vector<16x1xf32>
    %210 = arith.truncf %206 : vector<16x16xf32> to vector<16x16xbf16>
    %211 = vector.extract_strided_slice %196 {offsets = [0, 0], sizes = [16, 64], strides = [1, 1]} : vector<16x128xf32> to vector<16x64xf32>
    %212 = arith.truncf %211 : vector<16x64xf32> to vector<16x64xbf16>
    %cst_135 = arith.constant dense<0.000000e+00> : vector<16x64xf32>
    %213 = tpu.matmul %210, %212, %cst_135 {dimension_numbers = #tpu.dot_dimension_numbers<[1], [0], [0], [1], [0, 0, 1, 1], [], []>} : vector<16x16xbf16>, vector<16x64xbf16>, vector<16x64xf32> -> vector<16x64xf32>
    %214 = vector.broadcast %209 : vector<16x1xf32> to vector<16x64xf32>
    %215 = arith.mulf %213, %214 : vector<16x64xf32>
    %216 = arith.truncf %215 : vector<16x64xf32> to vector<16x64xbf16>
    %217 = vector.extract_strided_slice %18 {offsets = [0, 0], sizes = [64, 128], strides = [1, 1]} : vector<128x128xbf16> to vector<64x128xbf16>
    %cst_136 = arith.constant dense<0.000000e+00> : vector<16x128xf32>
    %218 = tpu.matmul %216, %217, %cst_136 {dimension_numbers = #tpu.dot_dimension_numbers<[1], [0], [0], [1], [0, 0, 1, 1], [], []>} : vector<16x64xbf16>, vector<64x128xbf16>, vector<16x128xf32> -> vector<16x128xf32>
    %219 = vector.extract_strided_slice %194 {offsets = [0, 64], sizes = [16, 64], strides = [1, 1]} : vector<16x128xf32> to vector<16x64xf32>
    %220 = arith.truncf %219 : vector<16x64xf32> to vector<16x64xbf16>
    %221 = vector.extract_strided_slice %195 {offsets = [0, 64], sizes = [16, 64], strides = [1, 1]} : vector<16x128xf32> to vector<16x64xf32>
    %222 = arith.truncf %221 : vector<16x64xf32> to vector<16x64xbf16>
    %cst_137 = arith.constant dense<0.000000e+00> : vector<16x16xf32>
    %223 = tpu.matmul %220, %222, %cst_137 {dimension_numbers = #tpu.dot_dimension_numbers<[1], [1], [0], [0], [0, 0, 1, 0], [], []>} : vector<16x64xbf16>, vector<16x64xbf16>, vector<16x16xf32> -> vector<16x16xf32>
    %cst_138 = arith.constant dense<0xFF800000> : vector<16xf32>
    %224 = vector.multi_reduction <maximumf>, %223, %cst_138 [1] : vector<16x16xf32> to vector<16xf32>
    %225 = vector.shape_cast %224 : vector<16xf32> to vector<16x1xf32>
    %226 = vector.broadcast %225 : vector<16x1xf32> to vector<16x16xf32>
    %227 = arith.subf %223, %226 : vector<16x16xf32>
    %228 = math.exp %227 : vector<16x16xf32>
    %cst_139 = arith.constant dense<0.000000e+00> : vector<16xf32>
    %229 = vector.multi_reduction <add>, %228, %cst_139 [1] : vector<16x16xf32> to vector<16xf32>
    %230 = vector.shape_cast %229 : vector<16xf32> to vector<16x1xf32>
    %231 = tpu.reciprocal %230 {approx = true} : vector<16x1xf32> -> vector<16x1xf32>
    %232 = arith.truncf %228 : vector<16x16xf32> to vector<16x16xbf16>
    %233 = vector.extract_strided_slice %196 {offsets = [0, 64], sizes = [16, 64], strides = [1, 1]} : vector<16x128xf32> to vector<16x64xf32>
    %234 = arith.truncf %233 : vector<16x64xf32> to vector<16x64xbf16>
    %cst_140 = arith.constant dense<0.000000e+00> : vector<16x64xf32>
    %235 = tpu.matmul %232, %234, %cst_140 {dimension_numbers = #tpu.dot_dimension_numbers<[1], [0], [0], [1], [0, 0, 1, 1], [], []>} : vector<16x16xbf16>, vector<16x64xbf16>, vector<16x64xf32> -> vector<16x64xf32>
    %236 = vector.broadcast %231 : vector<16x1xf32> to vector<16x64xf32>
    %237 = arith.mulf %235, %236 : vector<16x64xf32>
    %238 = arith.truncf %237 : vector<16x64xf32> to vector<16x64xbf16>
    %239 = vector.extract_strided_slice %18 {offsets = [64, 0], sizes = [64, 128], strides = [1, 1]} : vector<128x128xbf16> to vector<64x128xbf16>
    %cst_141 = arith.constant dense<0.000000e+00> : vector<16x128xf32>
    %240 = tpu.matmul %238, %239, %cst_141 {dimension_numbers = #tpu.dot_dimension_numbers<[1], [0], [0], [1], [0, 0, 1, 1], [], []>} : vector<16x64xbf16>, vector<64x128xbf16>, vector<16x128xf32> -> vector<16x128xf32>
    %241 = arith.addf %218, %240 : vector<16x128xf32>
    %242 = vector.broadcast %19 : vector<1x128xf32> to vector<16x128xf32>
    %243 = arith.addf %241, %242 : vector<16x128xf32>
    %244 = arith.addf %161, %243 : vector<16x128xf32>
    %cst_142 = arith.constant 0.707106769 : f32
    %245 = vector.broadcast %cst_142 : f32 to vector<16x128xf32>
    %246 = arith.mulf %244, %245 : vector<16x128xf32>
    %cst_143 = arith.constant dense<0.000000e+00> : vector<128xf32>
    %247 = vector.multi_reduction <add>, %246, %cst_143 [0] : vector<16x128xf32> to vector<128xf32>
    %248 = vector.shape_cast %247 : vector<128xf32> to vector<1x128xf32>
    %249 = arith.mulf %246, %246 : vector<16x128xf32>
    %cst_144 = arith.constant dense<0.000000e+00> : vector<128xf32>
    %250 = vector.multi_reduction <add>, %249, %cst_144 [0] : vector<16x128xf32> to vector<128xf32>
    %251 = vector.shape_cast %250 : vector<128xf32> to vector<1x128xf32>
    %cst_145 = arith.constant dense<0.000000e+00> : vector<1x32xf32>
    %252 = tpu.matmul %248, %2, %cst_145 {dimension_numbers = #tpu.dot_dimension_numbers<[1], [0], [0], [1], [0, 0, 1, 1], [], []>} : vector<1x128xf32>, vector<128x32xf32>, vector<1x32xf32> -> vector<1x32xf32>
    %cst_146 = arith.constant 1.562500e-02 : f32
    %253 = vector.broadcast %cst_146 : f32 to vector<1x32xf32>
    %254 = arith.mulf %252, %253 : vector<1x32xf32>
    %cst_147 = arith.constant dense<0.000000e+00> : vector<1x32xf32>
    %255 = tpu.matmul %251, %2, %cst_147 {dimension_numbers = #tpu.dot_dimension_numbers<[1], [0], [0], [1], [0, 0, 1, 1], [], []>} : vector<1x128xf32>, vector<128x32xf32>, vector<1x32xf32> -> vector<1x32xf32>
    %cst_148 = arith.constant 1.562500e-02 : f32
    %256 = vector.broadcast %cst_148 : f32 to vector<1x32xf32>
    %257 = arith.mulf %255, %256 : vector<1x32xf32>
    %258 = arith.mulf %254, %254 : vector<1x32xf32>
    %259 = arith.subf %257, %258 : vector<1x32xf32>
    %cst_149 = arith.constant 0.000000e+00 : f32
    %260 = vector.broadcast %cst_149 : f32 to vector<1x32xf32>
    %261 = arith.maximumf %259, %260 : vector<1x32xf32>
    %cst_150 = arith.constant 9.99999997E-7 : f32
    %262 = vector.broadcast %cst_150 : f32 to vector<1x32xf32>
    %263 = arith.addf %261, %262 : vector<1x32xf32>
    %264 = math.rsqrt %263 : vector<1x32xf32>
    %cst_151 = arith.constant dense<0.000000e+00> : vector<1x128xf32>
    %265 = tpu.matmul %254, %3, %cst_151 {dimension_numbers = #tpu.dot_dimension_numbers<[1], [0], [0], [1], [0, 0, 1, 1], [], []>} : vector<1x32xf32>, vector<32x128xf32>, vector<1x128xf32> -> vector<1x128xf32>
    %cst_152 = arith.constant dense<0.000000e+00> : vector<1x128xf32>
    %266 = tpu.matmul %264, %3, %cst_152 {dimension_numbers = #tpu.dot_dimension_numbers<[1], [0], [0], [1], [0, 0, 1, 1], [], []>} : vector<1x32xf32>, vector<32x128xf32>, vector<1x128xf32> -> vector<1x128xf32>
    %267 = vector.broadcast %265 : vector<1x128xf32> to vector<16x128xf32>
    %268 = arith.subf %246, %267 : vector<16x128xf32>
    %269 = vector.broadcast %266 : vector<1x128xf32> to vector<16x128xf32>
    %270 = arith.mulf %268, %269 : vector<16x128xf32>
    %271 = vector.broadcast %20 : vector<1x128xf32> to vector<16x128xf32>
    %272 = arith.mulf %270, %271 : vector<16x128xf32>
    %273 = vector.broadcast %21 : vector<1x128xf32> to vector<16x128xf32>
    %274 = arith.addf %272, %273 : vector<16x128xf32>
    %275 = arith.truncf %274 : vector<16x128xf32> to vector<16x128xbf16>
    %cst_153 = arith.constant dense<0.000000e+00> : vector<16x256xf32>
    %276 = tpu.matmul %275, %22, %cst_153 {dimension_numbers = #tpu.dot_dimension_numbers<[1], [0], [0], [1], [0, 0, 1, 1], [], []>} : vector<16x128xbf16>, vector<128x256xbf16>, vector<16x256xf32> -> vector<16x256xf32>
    %277 = vector.broadcast %23 : vector<1x256xf32> to vector<16x256xf32>
    %278 = arith.addf %276, %277 : vector<16x256xf32>
    %cst_154 = arith.constant 5.000000e-01 : f32
    %279 = vector.broadcast %cst_154 : f32 to vector<16x256xf32>
    %280 = arith.mulf %279, %278 : vector<16x256xf32>
    %cst_155 = arith.constant 0.707106769 : f32
    %281 = vector.broadcast %cst_155 : f32 to vector<16x256xf32>
    %282 = arith.mulf %278, %281 : vector<16x256xf32>
    %283 = math.erf %282 : vector<16x256xf32>
    %cst_156 = arith.constant 1.000000e+00 : f32
    %284 = vector.broadcast %cst_156 : f32 to vector<16x256xf32>
    %285 = arith.addf %284, %283 : vector<16x256xf32>
    %286 = arith.mulf %280, %285 : vector<16x256xf32>
    %287 = arith.truncf %286 : vector<16x256xf32> to vector<16x256xbf16>
    %cst_157 = arith.constant dense<0.000000e+00> : vector<16x128xf32>
    %288 = tpu.matmul %287, %24, %cst_157 {dimension_numbers = #tpu.dot_dimension_numbers<[1], [0], [0], [1], [0, 0, 1, 1], [], []>} : vector<16x256xbf16>, vector<256x128xbf16>, vector<16x128xf32> -> vector<16x128xf32>
    %289 = vector.broadcast %25 : vector<1x128xf32> to vector<16x128xf32>
    %290 = arith.addf %288, %289 : vector<16x128xf32>
    %291 = arith.addf %45, %290 : vector<16x128xf32>
    %cst_158 = arith.constant 0.707106769 : f32
    %292 = vector.broadcast %cst_158 : f32 to vector<16x128xf32>
    %293 = arith.mulf %291, %292 : vector<16x128xf32>
    %cst_159 = arith.constant dense<0.000000e+00> : vector<128xf32>
    %294 = vector.multi_reduction <add>, %293, %cst_159 [0] : vector<16x128xf32> to vector<128xf32>
    %295 = vector.shape_cast %294 : vector<128xf32> to vector<1x128xf32>
    %296 = arith.mulf %293, %293 : vector<16x128xf32>
    %cst_160 = arith.constant dense<0.000000e+00> : vector<128xf32>
    %297 = vector.multi_reduction <add>, %296, %cst_160 [0] : vector<16x128xf32> to vector<128xf32>
    %298 = vector.shape_cast %297 : vector<128xf32> to vector<1x128xf32>
    %cst_161 = arith.constant dense<0.000000e+00> : vector<1x32xf32>
    %299 = tpu.matmul %295, %2, %cst_161 {dimension_numbers = #tpu.dot_dimension_numbers<[1], [0], [0], [1], [0, 0, 1, 1], [], []>} : vector<1x128xf32>, vector<128x32xf32>, vector<1x32xf32> -> vector<1x32xf32>
    %cst_162 = arith.constant 1.562500e-02 : f32
    %300 = vector.broadcast %cst_162 : f32 to vector<1x32xf32>
    %301 = arith.mulf %299, %300 : vector<1x32xf32>
    %cst_163 = arith.constant dense<0.000000e+00> : vector<1x32xf32>
    %302 = tpu.matmul %298, %2, %cst_163 {dimension_numbers = #tpu.dot_dimension_numbers<[1], [0], [0], [1], [0, 0, 1, 1], [], []>} : vector<1x128xf32>, vector<128x32xf32>, vector<1x32xf32> -> vector<1x32xf32>
    %cst_164 = arith.constant 1.562500e-02 : f32
    %303 = vector.broadcast %cst_164 : f32 to vector<1x32xf32>
    %304 = arith.mulf %302, %303 : vector<1x32xf32>
    %305 = arith.mulf %301, %301 : vector<1x32xf32>
    %306 = arith.subf %304, %305 : vector<1x32xf32>
    %cst_165 = arith.constant 0.000000e+00 : f32
    %307 = vector.broadcast %cst_165 : f32 to vector<1x32xf32>
    %308 = arith.maximumf %306, %307 : vector<1x32xf32>
    %cst_166 = arith.constant 9.99999997E-7 : f32
    %309 = vector.broadcast %cst_166 : f32 to vector<1x32xf32>
    %310 = arith.addf %308, %309 : vector<1x32xf32>
    %311 = math.rsqrt %310 : vector<1x32xf32>
    %cst_167 = arith.constant dense<0.000000e+00> : vector<1x128xf32>
    %312 = tpu.matmul %301, %3, %cst_167 {dimension_numbers = #tpu.dot_dimension_numbers<[1], [0], [0], [1], [0, 0, 1, 1], [], []>} : vector<1x32xf32>, vector<32x128xf32>, vector<1x128xf32> -> vector<1x128xf32>
    %cst_168 = arith.constant dense<0.000000e+00> : vector<1x128xf32>
    %313 = tpu.matmul %311, %3, %cst_168 {dimension_numbers = #tpu.dot_dimension_numbers<[1], [0], [0], [1], [0, 0, 1, 1], [], []>} : vector<1x32xf32>, vector<32x128xf32>, vector<1x128xf32> -> vector<1x128xf32>
    %314 = vector.broadcast %312 : vector<1x128xf32> to vector<16x128xf32>
    %315 = arith.subf %293, %314 : vector<16x128xf32>
    %316 = vector.broadcast %313 : vector<1x128xf32> to vector<16x128xf32>
    %317 = arith.mulf %315, %316 : vector<16x128xf32>
    %318 = vector.broadcast %26 : vector<1x128xf32> to vector<16x128xf32>
    %319 = arith.mulf %317, %318 : vector<16x128xf32>
    %320 = vector.broadcast %27 : vector<1x128xf32> to vector<16x128xf32>
    %321 = arith.addf %319, %320 : vector<16x128xf32>
    %cst_169 = arith.constant dense<0.000000e+00> : vector<128xf32>
    %322 = vector.multi_reduction <add>, %43, %cst_169 [0] : vector<64x128xf32> to vector<128xf32>
    %323 = vector.shape_cast %322 : vector<128xf32> to vector<1x128xf32>
    %324 = arith.mulf %43, %43 : vector<64x128xf32>
    %cst_170 = arith.constant dense<0.000000e+00> : vector<128xf32>
    %325 = vector.multi_reduction <add>, %324, %cst_170 [0] : vector<64x128xf32> to vector<128xf32>
    %326 = vector.shape_cast %325 : vector<128xf32> to vector<1x128xf32>
    %cst_171 = arith.constant dense<0.000000e+00> : vector<1x32xf32>
    %327 = tpu.matmul %323, %0, %cst_171 {dimension_numbers = #tpu.dot_dimension_numbers<[1], [0], [0], [1], [0, 0, 1, 1], [], []>} : vector<1x128xf32>, vector<128x32xf32>, vector<1x32xf32> -> vector<1x32xf32>
    %cst_172 = arith.constant 3.906250e-03 : f32
    %328 = vector.broadcast %cst_172 : f32 to vector<1x32xf32>
    %329 = arith.mulf %327, %328 : vector<1x32xf32>
    %cst_173 = arith.constant dense<0.000000e+00> : vector<1x32xf32>
    %330 = tpu.matmul %326, %0, %cst_173 {dimension_numbers = #tpu.dot_dimension_numbers<[1], [0], [0], [1], [0, 0, 1, 1], [], []>} : vector<1x128xf32>, vector<128x32xf32>, vector<1x32xf32> -> vector<1x32xf32>
    %cst_174 = arith.constant 3.906250e-03 : f32
    %331 = vector.broadcast %cst_174 : f32 to vector<1x32xf32>
    %332 = arith.mulf %330, %331 : vector<1x32xf32>
    %333 = arith.mulf %329, %329 : vector<1x32xf32>
    %334 = arith.subf %332, %333 : vector<1x32xf32>
    %cst_175 = arith.constant 0.000000e+00 : f32
    %335 = vector.broadcast %cst_175 : f32 to vector<1x32xf32>
    %336 = arith.maximumf %334, %335 : vector<1x32xf32>
    %cst_176 = arith.constant 9.99999997E-7 : f32
    %337 = vector.broadcast %cst_176 : f32 to vector<1x32xf32>
    %338 = arith.addf %336, %337 : vector<1x32xf32>
    %339 = math.rsqrt %338 : vector<1x32xf32>
    %cst_177 = arith.constant dense<0.000000e+00> : vector<1x128xf32>
    %340 = tpu.matmul %329, %1, %cst_177 {dimension_numbers = #tpu.dot_dimension_numbers<[1], [0], [0], [1], [0, 0, 1, 1], [], []>} : vector<1x32xf32>, vector<32x128xf32>, vector<1x128xf32> -> vector<1x128xf32>
    %cst_178 = arith.constant dense<0.000000e+00> : vector<1x128xf32>
    %341 = tpu.matmul %339, %1, %cst_178 {dimension_numbers = #tpu.dot_dimension_numbers<[1], [0], [0], [1], [0, 0, 1, 1], [], []>} : vector<1x32xf32>, vector<32x128xf32>, vector<1x128xf32> -> vector<1x128xf32>
    %342 = vector.broadcast %340 : vector<1x128xf32> to vector<64x128xf32>
    %343 = arith.subf %43, %342 : vector<64x128xf32>
    %344 = vector.broadcast %341 : vector<1x128xf32> to vector<64x128xf32>
    %345 = arith.mulf %343, %344 : vector<64x128xf32>
    %346 = vector.broadcast %28 : vector<1x128xf32> to vector<64x128xf32>
    %347 = arith.mulf %345, %346 : vector<64x128xf32>
    %348 = vector.broadcast %29 : vector<1x128xf32> to vector<64x128xf32>
    %349 = arith.addf %347, %348 : vector<64x128xf32>
    %350 = arith.truncf %349 : vector<64x128xf32> to vector<64x128xbf16>
    %cst_179 = arith.constant dense<0.000000e+00> : vector<64x64xf32>
    %351 = tpu.matmul %350, %30, %cst_179 {dimension_numbers = #tpu.dot_dimension_numbers<[1], [0], [0], [1], [0, 0, 1, 1], [], []>} : vector<64x128xbf16>, vector<128x64xbf16>, vector<64x64xf32> -> vector<64x64xf32>
    %352 = vector.broadcast %31 : vector<1x64xf32> to vector<64x64xf32>
    %353 = arith.addf %351, %352 : vector<64x64xf32>
    %354 = arith.truncf %321 : vector<16x128xf32> to vector<16x128xbf16>
    %cst_180 = arith.constant dense<0.000000e+00> : vector<16x128xf32>
    %355 = tpu.matmul %354, %32, %cst_180 {dimension_numbers = #tpu.dot_dimension_numbers<[1], [0], [0], [1], [0, 0, 1, 1], [], []>} : vector<16x128xbf16>, vector<128x128xbf16>, vector<16x128xf32> -> vector<16x128xf32>
    %356 = vector.broadcast %33 : vector<1x128xf32> to vector<16x128xf32>
    %357 = arith.addf %355, %356 : vector<16x128xf32>
    %358 = vector.extract_strided_slice %357 {offsets = [0, 0], sizes = [16, 64], strides = [1, 1]} : vector<16x128xf32> to vector<16x64xf32>
    %359 = vector.extract_strided_slice %357 {offsets = [0, 64], sizes = [16, 64], strides = [1, 1]} : vector<16x128xf32> to vector<16x64xf32>
    %360 = vector.extract_strided_slice %353 {offsets = [0, 0], sizes = [64, 32], strides = [1, 1]} : vector<64x64xf32> to vector<64x32xf32>
    %361 = arith.truncf %360 : vector<64x32xf32> to vector<64x32xbf16>
    %362 = vector.extract_strided_slice %358 {offsets = [0, 0], sizes = [16, 32], strides = [1, 1]} : vector<16x64xf32> to vector<16x32xf32>
    %363 = arith.truncf %362 : vector<16x32xf32> to vector<16x32xbf16>
    %cst_181 = arith.constant dense<0.000000e+00> : vector<64x16xf32>
    %364 = tpu.matmul %361, %363, %cst_181 {dimension_numbers = #tpu.dot_dimension_numbers<[1], [1], [0], [0], [0, 0, 1, 0], [], []>} : vector<64x32xbf16>, vector<16x32xbf16>, vector<64x16xf32> -> vector<64x16xf32>
    %cst_182 = arith.constant dense<0xFF800000> : vector<64xf32>
    %365 = vector.multi_reduction <maximumf>, %364, %cst_182 [1] : vector<64x16xf32> to vector<64xf32>
    %366 = vector.shape_cast %365 : vector<64xf32> to vector<64x1xf32>
    %367 = vector.broadcast %366 : vector<64x1xf32> to vector<64x16xf32>
    %368 = arith.subf %364, %367 : vector<64x16xf32>
    %369 = math.exp %368 : vector<64x16xf32>
    %cst_183 = arith.constant dense<0.000000e+00> : vector<64xf32>
    %370 = vector.multi_reduction <add>, %369, %cst_183 [1] : vector<64x16xf32> to vector<64xf32>
    %371 = vector.shape_cast %370 : vector<64xf32> to vector<64x1xf32>
    %372 = tpu.reciprocal %371 {approx = true} : vector<64x1xf32> -> vector<64x1xf32>
    %373 = arith.truncf %369 : vector<64x16xf32> to vector<64x16xbf16>
    %374 = vector.extract_strided_slice %359 {offsets = [0, 0], sizes = [16, 32], strides = [1, 1]} : vector<16x64xf32> to vector<16x32xf32>
    %375 = arith.truncf %374 : vector<16x32xf32> to vector<16x32xbf16>
    %cst_184 = arith.constant dense<0.000000e+00> : vector<64x32xf32>
    %376 = tpu.matmul %373, %375, %cst_184 {dimension_numbers = #tpu.dot_dimension_numbers<[1], [0], [0], [1], [0, 0, 1, 1], [], []>} : vector<64x16xbf16>, vector<16x32xbf16>, vector<64x32xf32> -> vector<64x32xf32>
    %377 = vector.broadcast %372 : vector<64x1xf32> to vector<64x32xf32>
    %378 = arith.mulf %376, %377 : vector<64x32xf32>
    %379 = arith.truncf %378 : vector<64x32xf32> to vector<64x32xbf16>
    %380 = vector.extract_strided_slice %34 {offsets = [0, 0], sizes = [32, 128], strides = [1, 1]} : vector<64x128xbf16> to vector<32x128xbf16>
    %cst_185 = arith.constant dense<0.000000e+00> : vector<64x128xf32>
    %381 = tpu.matmul %379, %380, %cst_185 {dimension_numbers = #tpu.dot_dimension_numbers<[1], [0], [0], [1], [0, 0, 1, 1], [], []>} : vector<64x32xbf16>, vector<32x128xbf16>, vector<64x128xf32> -> vector<64x128xf32>
    %382 = vector.extract_strided_slice %353 {offsets = [0, 32], sizes = [64, 32], strides = [1, 1]} : vector<64x64xf32> to vector<64x32xf32>
    %383 = arith.truncf %382 : vector<64x32xf32> to vector<64x32xbf16>
    %384 = vector.extract_strided_slice %358 {offsets = [0, 32], sizes = [16, 32], strides = [1, 1]} : vector<16x64xf32> to vector<16x32xf32>
    %385 = arith.truncf %384 : vector<16x32xf32> to vector<16x32xbf16>
    %cst_186 = arith.constant dense<0.000000e+00> : vector<64x16xf32>
    %386 = tpu.matmul %383, %385, %cst_186 {dimension_numbers = #tpu.dot_dimension_numbers<[1], [1], [0], [0], [0, 0, 1, 0], [], []>} : vector<64x32xbf16>, vector<16x32xbf16>, vector<64x16xf32> -> vector<64x16xf32>
    %cst_187 = arith.constant dense<0xFF800000> : vector<64xf32>
    %387 = vector.multi_reduction <maximumf>, %386, %cst_187 [1] : vector<64x16xf32> to vector<64xf32>
    %388 = vector.shape_cast %387 : vector<64xf32> to vector<64x1xf32>
    %389 = vector.broadcast %388 : vector<64x1xf32> to vector<64x16xf32>
    %390 = arith.subf %386, %389 : vector<64x16xf32>
    %391 = math.exp %390 : vector<64x16xf32>
    %cst_188 = arith.constant dense<0.000000e+00> : vector<64xf32>
    %392 = vector.multi_reduction <add>, %391, %cst_188 [1] : vector<64x16xf32> to vector<64xf32>
    %393 = vector.shape_cast %392 : vector<64xf32> to vector<64x1xf32>
    %394 = tpu.reciprocal %393 {approx = true} : vector<64x1xf32> -> vector<64x1xf32>
    %395 = arith.truncf %391 : vector<64x16xf32> to vector<64x16xbf16>
    %396 = vector.extract_strided_slice %359 {offsets = [0, 32], sizes = [16, 32], strides = [1, 1]} : vector<16x64xf32> to vector<16x32xf32>
    %397 = arith.truncf %396 : vector<16x32xf32> to vector<16x32xbf16>
    %cst_189 = arith.constant dense<0.000000e+00> : vector<64x32xf32>
    %398 = tpu.matmul %395, %397, %cst_189 {dimension_numbers = #tpu.dot_dimension_numbers<[1], [0], [0], [1], [0, 0, 1, 1], [], []>} : vector<64x16xbf16>, vector<16x32xbf16>, vector<64x32xf32> -> vector<64x32xf32>
    %399 = vector.broadcast %394 : vector<64x1xf32> to vector<64x32xf32>
    %400 = arith.mulf %398, %399 : vector<64x32xf32>
    %401 = arith.truncf %400 : vector<64x32xf32> to vector<64x32xbf16>
    %402 = vector.extract_strided_slice %34 {offsets = [32, 0], sizes = [32, 128], strides = [1, 1]} : vector<64x128xbf16> to vector<32x128xbf16>
    %cst_190 = arith.constant dense<0.000000e+00> : vector<64x128xf32>
    %403 = tpu.matmul %401, %402, %cst_190 {dimension_numbers = #tpu.dot_dimension_numbers<[1], [0], [0], [1], [0, 0, 1, 1], [], []>} : vector<64x32xbf16>, vector<32x128xbf16>, vector<64x128xf32> -> vector<64x128xf32>
    %404 = arith.addf %381, %403 : vector<64x128xf32>
    %405 = vector.broadcast %35 : vector<1x128xf32> to vector<64x128xf32>
    %406 = arith.addf %404, %405 : vector<64x128xf32>
    %407 = arith.addf %43, %406 : vector<64x128xf32>
    %cst_191 = arith.constant 0.707106769 : f32
    %408 = vector.broadcast %cst_191 : f32 to vector<64x128xf32>
    %409 = arith.mulf %407, %408 : vector<64x128xf32>
    %cst_192 = arith.constant dense<0.000000e+00> : vector<128xf32>
    %410 = vector.multi_reduction <add>, %409, %cst_192 [0] : vector<64x128xf32> to vector<128xf32>
    %411 = vector.shape_cast %410 : vector<128xf32> to vector<1x128xf32>
    %412 = arith.mulf %409, %409 : vector<64x128xf32>
    %cst_193 = arith.constant dense<0.000000e+00> : vector<128xf32>
    %413 = vector.multi_reduction <add>, %412, %cst_193 [0] : vector<64x128xf32> to vector<128xf32>
    %414 = vector.shape_cast %413 : vector<128xf32> to vector<1x128xf32>
    %cst_194 = arith.constant dense<0.000000e+00> : vector<1x32xf32>
    %415 = tpu.matmul %411, %0, %cst_194 {dimension_numbers = #tpu.dot_dimension_numbers<[1], [0], [0], [1], [0, 0, 1, 1], [], []>} : vector<1x128xf32>, vector<128x32xf32>, vector<1x32xf32> -> vector<1x32xf32>
    %cst_195 = arith.constant 3.906250e-03 : f32
    %416 = vector.broadcast %cst_195 : f32 to vector<1x32xf32>
    %417 = arith.mulf %415, %416 : vector<1x32xf32>
    %cst_196 = arith.constant dense<0.000000e+00> : vector<1x32xf32>
    %418 = tpu.matmul %414, %0, %cst_196 {dimension_numbers = #tpu.dot_dimension_numbers<[1], [0], [0], [1], [0, 0, 1, 1], [], []>} : vector<1x128xf32>, vector<128x32xf32>, vector<1x32xf32> -> vector<1x32xf32>
    %cst_197 = arith.constant 3.906250e-03 : f32
    %419 = vector.broadcast %cst_197 : f32 to vector<1x32xf32>
    %420 = arith.mulf %418, %419 : vector<1x32xf32>
    %421 = arith.mulf %417, %417 : vector<1x32xf32>
    %422 = arith.subf %420, %421 : vector<1x32xf32>
    %cst_198 = arith.constant 0.000000e+00 : f32
    %423 = vector.broadcast %cst_198 : f32 to vector<1x32xf32>
    %424 = arith.maximumf %422, %423 : vector<1x32xf32>
    %cst_199 = arith.constant 9.99999997E-7 : f32
    %425 = vector.broadcast %cst_199 : f32 to vector<1x32xf32>
    %426 = arith.addf %424, %425 : vector<1x32xf32>
    %427 = math.rsqrt %426 : vector<1x32xf32>
    %cst_200 = arith.constant dense<0.000000e+00> : vector<1x128xf32>
    %428 = tpu.matmul %417, %1, %cst_200 {dimension_numbers = #tpu.dot_dimension_numbers<[1], [0], [0], [1], [0, 0, 1, 1], [], []>} : vector<1x32xf32>, vector<32x128xf32>, vector<1x128xf32> -> vector<1x128xf32>
    %cst_201 = arith.constant dense<0.000000e+00> : vector<1x128xf32>
    %429 = tpu.matmul %427, %1, %cst_201 {dimension_numbers = #tpu.dot_dimension_numbers<[1], [0], [0], [1], [0, 0, 1, 1], [], []>} : vector<1x32xf32>, vector<32x128xf32>, vector<1x128xf32> -> vector<1x128xf32>
    %430 = vector.broadcast %428 : vector<1x128xf32> to vector<64x128xf32>
    %431 = arith.subf %409, %430 : vector<64x128xf32>
    %432 = vector.broadcast %429 : vector<1x128xf32> to vector<64x128xf32>
    %433 = arith.mulf %431, %432 : vector<64x128xf32>
    %434 = vector.broadcast %36 : vector<1x128xf32> to vector<64x128xf32>
    %435 = arith.mulf %433, %434 : vector<64x128xf32>
    %436 = vector.broadcast %37 : vector<1x128xf32> to vector<64x128xf32>
    %437 = arith.addf %435, %436 : vector<64x128xf32>
    %438 = arith.truncf %437 : vector<64x128xf32> to vector<64x128xbf16>
    %cst_202 = arith.constant dense<0.000000e+00> : vector<64x256xf32>
    %439 = tpu.matmul %438, %38, %cst_202 {dimension_numbers = #tpu.dot_dimension_numbers<[1], [0], [0], [1], [0, 0, 1, 1], [], []>} : vector<64x128xbf16>, vector<128x256xbf16>, vector<64x256xf32> -> vector<64x256xf32>
    %440 = vector.broadcast %39 : vector<1x256xf32> to vector<64x256xf32>
    %441 = arith.addf %439, %440 : vector<64x256xf32>
    %cst_203 = arith.constant 5.000000e-01 : f32
    %442 = vector.broadcast %cst_203 : f32 to vector<64x256xf32>
    %443 = arith.mulf %442, %441 : vector<64x256xf32>
    %cst_204 = arith.constant 0.707106769 : f32
    %444 = vector.broadcast %cst_204 : f32 to vector<64x256xf32>
    %445 = arith.mulf %441, %444 : vector<64x256xf32>
    %446 = math.erf %445 : vector<64x256xf32>
    %cst_205 = arith.constant 1.000000e+00 : f32
    %447 = vector.broadcast %cst_205 : f32 to vector<64x256xf32>
    %448 = arith.addf %447, %446 : vector<64x256xf32>
    %449 = arith.mulf %443, %448 : vector<64x256xf32>
    %450 = arith.truncf %449 : vector<64x256xf32> to vector<64x256xbf16>
    %cst_206 = arith.constant dense<0.000000e+00> : vector<64x128xf32>
    %451 = tpu.matmul %450, %40, %cst_206 {dimension_numbers = #tpu.dot_dimension_numbers<[1], [0], [0], [1], [0, 0, 1, 1], [], []>} : vector<64x256xbf16>, vector<256x128xbf16>, vector<64x128xf32> -> vector<64x128xf32>
    %452 = vector.broadcast %41 : vector<1x128xf32> to vector<64x128xf32>
    %453 = arith.addf %451, %452 : vector<64x128xf32>
    %454 = arith.addf %409, %453 : vector<64x128xf32>
    %cst_207 = arith.constant 0.707106769 : f32
    %455 = vector.broadcast %cst_207 : f32 to vector<64x128xf32>
    %456 = arith.mulf %454, %455 : vector<64x128xf32>
    %c0_208 = arith.constant 0 : index
    %c0_209 = arith.constant 0 : index
    %c0_210 = arith.constant 0 : index
    %457 = vector.load %arg45[%c0_208, %c0_209, %c0_210] : memref<1x64x128xf32, #tpu.memory_space<vmem>>, vector<1x64x128xf32>
    %458 = vector.shape_cast %457 : vector<1x64x128xf32> to vector<64x128xf32>
    %459 = vector.shape_cast %456 : vector<64x128xf32> to vector<1x64x128xf32>
    tpu.vector_store %arg45[%c0_208, %c0_209, %c0_210], %459 {strides = array<i32>} : memref<1x64x128xf32, #tpu.memory_space<vmem>>, vector<1x64x128xf32>,
    %c0_211 = arith.constant 0 : index
    %c0_212 = arith.constant 0 : index
    %c0_213 = arith.constant 0 : index
    %460 = vector.load %arg46[%c0_211, %c0_212, %c0_213] : memref<1x16x128xf32, #tpu.memory_space<vmem>>, vector<1x16x128xf32>
    %461 = vector.shape_cast %460 : vector<1x16x128xf32> to vector<16x128xf32>
    %462 = vector.shape_cast %293 : vector<16x128xf32> to vector<1x16x128xf32>
    tpu.vector_store %arg46[%c0_211, %c0_212, %c0_213], %462 {strides = array<i32>} : memref<1x16x128xf32, #tpu.memory_space<vmem>>, vector<1x16x128xf32>,
    return
  }
  func.func @transform_0(%arg0: i32) -> (i32, i32, i32) {
    %c0_i32 = arith.constant 0 : i32
    %c0_i32_0 = arith.constant 0 : i32
    %c0_i32_1 = arith.constant 0 : i32
    return %arg0, %c0_i32, %c0_i32_0 : i32, i32, i32
  }
  func.func @transform_1(%arg0: i32) -> (i32, i32, i32) {
    %c0_i32 = arith.constant 0 : i32
    %c0_i32_0 = arith.constant 0 : i32
    %c0_i32_1 = arith.constant 0 : i32
    return %arg0, %c0_i32, %c0_i32_0 : i32, i32, i32
  }
  func.func @transform_2(%arg0: i32) -> (i32, i32) {
    %c0_i32 = arith.constant 0 : i32
    %c0_i32_0 = arith.constant 0 : i32
    %c0_i32_1 = arith.constant 0 : i32
    return %c0_i32, %c0_i32_0 : i32, i32
  }
  func.func @transform_3(%arg0: i32) -> (i32, i32) {
    %c0_i32 = arith.constant 0 : i32
    %c0_i32_0 = arith.constant 0 : i32
    %c0_i32_1 = arith.constant 0 : i32
    return %c0_i32, %c0_i32_0 : i32, i32
  }
  func.func @transform_4(%arg0: i32) -> (i32, i32) {
    %c0_i32 = arith.constant 0 : i32
    %c0_i32_0 = arith.constant 0 : i32
    %c0_i32_1 = arith.constant 0 : i32
    return %c0_i32, %c0_i32_0 : i32, i32
  }
  func.func @transform_5(%arg0: i32) -> (i32, i32) {
    %c0_i32 = arith.constant 0 : i32
    %c0_i32_0 = arith.constant 0 : i32
    %c0_i32_1 = arith.constant 0 : i32
    return %c0_i32, %c0_i32_0 : i32, i32
  }
  func.func @transform_6(%arg0: i32) -> (i32, i32) {
    %c0_i32 = arith.constant 0 : i32
    %c0_i32_0 = arith.constant 0 : i32
    %c0_i32_1 = arith.constant 0 : i32
    return %c0_i32, %c0_i32_0 : i32, i32
  }
  func.func @transform_7(%arg0: i32) -> (i32, i32) {
    %c0_i32 = arith.constant 0 : i32
    %c0_i32_0 = arith.constant 0 : i32
    %c0_i32_1 = arith.constant 0 : i32
    return %c0_i32, %c0_i32_0 : i32, i32
  }
  func.func @transform_8(%arg0: i32) -> (i32, i32) {
    %c0_i32 = arith.constant 0 : i32
    %c0_i32_0 = arith.constant 0 : i32
    %c0_i32_1 = arith.constant 0 : i32
    return %c0_i32, %c0_i32_0 : i32, i32
  }
  func.func @transform_9(%arg0: i32) -> (i32, i32) {
    %c0_i32 = arith.constant 0 : i32
    %c0_i32_0 = arith.constant 0 : i32
    %c0_i32_1 = arith.constant 0 : i32
    return %c0_i32, %c0_i32_0 : i32, i32
  }
  func.func @transform_10(%arg0: i32) -> (i32, i32) {
    %c0_i32 = arith.constant 0 : i32
    %c0_i32_0 = arith.constant 0 : i32
    %c0_i32_1 = arith.constant 0 : i32
    return %c0_i32, %c0_i32_0 : i32, i32
  }
  func.func @transform_11(%arg0: i32) -> (i32, i32) {
    %c0_i32 = arith.constant 0 : i32
    %c0_i32_0 = arith.constant 0 : i32
    %c0_i32_1 = arith.constant 0 : i32
    return %c0_i32, %c0_i32_0 : i32, i32
  }
  func.func @transform_12(%arg0: i32) -> (i32, i32) {
    %c0_i32 = arith.constant 0 : i32
    %c0_i32_0 = arith.constant 0 : i32
    %c0_i32_1 = arith.constant 0 : i32
    return %c0_i32, %c0_i32_0 : i32, i32
  }
  func.func @transform_13(%arg0: i32) -> (i32, i32) {
    %c0_i32 = arith.constant 0 : i32
    %c0_i32_0 = arith.constant 0 : i32
    %c0_i32_1 = arith.constant 0 : i32
    return %c0_i32, %c0_i32_0 : i32, i32
  }
  func.func @transform_14(%arg0: i32) -> (i32, i32) {
    %c0_i32 = arith.constant 0 : i32
    %c0_i32_0 = arith.constant 0 : i32
    %c0_i32_1 = arith.constant 0 : i32
    return %c0_i32, %c0_i32_0 : i32, i32
  }
  func.func @transform_15(%arg0: i32) -> (i32, i32) {
    %c0_i32 = arith.constant 0 : i32
    %c0_i32_0 = arith.constant 0 : i32
    %c0_i32_1 = arith.constant 0 : i32
    return %c0_i32, %c0_i32_0 : i32, i32
  }
  func.func @transform_16(%arg0: i32) -> (i32, i32) {
    %c0_i32 = arith.constant 0 : i32
    %c0_i32_0 = arith.constant 0 : i32
    %c0_i32_1 = arith.constant 0 : i32
    return %c0_i32, %c0_i32_0 : i32, i32
  }
  func.func @transform_17(%arg0: i32) -> (i32, i32) {
    %c0_i32 = arith.constant 0 : i32
    %c0_i32_0 = arith.constant 0 : i32
    %c0_i32_1 = arith.constant 0 : i32
    return %c0_i32, %c0_i32_0 : i32, i32
  }
  func.func @transform_18(%arg0: i32) -> (i32, i32) {
    %c0_i32 = arith.constant 0 : i32
    %c0_i32_0 = arith.constant 0 : i32
    %c0_i32_1 = arith.constant 0 : i32
    return %c0_i32, %c0_i32_0 : i32, i32
  }
  func.func @transform_19(%arg0: i32) -> (i32, i32) {
    %c0_i32 = arith.constant 0 : i32
    %c0_i32_0 = arith.constant 0 : i32
    %c0_i32_1 = arith.constant 0 : i32
    return %c0_i32, %c0_i32_0 : i32, i32
  }
  func.func @transform_20(%arg0: i32) -> (i32, i32) {
    %c0_i32 = arith.constant 0 : i32
    %c0_i32_0 = arith.constant 0 : i32
    %c0_i32_1 = arith.constant 0 : i32
    return %c0_i32, %c0_i32_0 : i32, i32
  }
  func.func @transform_21(%arg0: i32) -> (i32, i32) {
    %c0_i32 = arith.constant 0 : i32
    %c0_i32_0 = arith.constant 0 : i32
    %c0_i32_1 = arith.constant 0 : i32
    return %c0_i32, %c0_i32_0 : i32, i32
  }
  func.func @transform_22(%arg0: i32) -> (i32, i32) {
    %c0_i32 = arith.constant 0 : i32
    %c0_i32_0 = arith.constant 0 : i32
    %c0_i32_1 = arith.constant 0 : i32
    return %c0_i32, %c0_i32_0 : i32, i32
  }
  func.func @transform_23(%arg0: i32) -> (i32, i32) {
    %c0_i32 = arith.constant 0 : i32
    %c0_i32_0 = arith.constant 0 : i32
    %c0_i32_1 = arith.constant 0 : i32
    return %c0_i32, %c0_i32_0 : i32, i32
  }
  func.func @transform_24(%arg0: i32) -> (i32, i32) {
    %c0_i32 = arith.constant 0 : i32
    %c0_i32_0 = arith.constant 0 : i32
    %c0_i32_1 = arith.constant 0 : i32
    return %c0_i32, %c0_i32_0 : i32, i32
  }
  func.func @transform_25(%arg0: i32) -> (i32, i32) {
    %c0_i32 = arith.constant 0 : i32
    %c0_i32_0 = arith.constant 0 : i32
    %c0_i32_1 = arith.constant 0 : i32
    return %c0_i32, %c0_i32_0 : i32, i32
  }
  func.func @transform_26(%arg0: i32) -> (i32, i32) {
    %c0_i32 = arith.constant 0 : i32
    %c0_i32_0 = arith.constant 0 : i32
    %c0_i32_1 = arith.constant 0 : i32
    return %c0_i32, %c0_i32_0 : i32, i32
  }
  func.func @transform_27(%arg0: i32) -> (i32, i32) {
    %c0_i32 = arith.constant 0 : i32
    %c0_i32_0 = arith.constant 0 : i32
    %c0_i32_1 = arith.constant 0 : i32
    return %c0_i32, %c0_i32_0 : i32, i32
  }
  func.func @transform_28(%arg0: i32) -> (i32, i32) {
    %c0_i32 = arith.constant 0 : i32
    %c0_i32_0 = arith.constant 0 : i32
    %c0_i32_1 = arith.constant 0 : i32
    return %c0_i32, %c0_i32_0 : i32, i32
  }
  func.func @transform_29(%arg0: i32) -> (i32, i32) {
    %c0_i32 = arith.constant 0 : i32
    %c0_i32_0 = arith.constant 0 : i32
    %c0_i32_1 = arith.constant 0 : i32
    return %c0_i32, %c0_i32_0 : i32, i32
  }
  func.func @transform_30(%arg0: i32) -> (i32, i32) {
    %c0_i32 = arith.constant 0 : i32
    %c0_i32_0 = arith.constant 0 : i32
    %c0_i32_1 = arith.constant 0 : i32
    return %c0_i32, %c0_i32_0 : i32, i32
  }
  func.func @transform_31(%arg0: i32) -> (i32, i32) {
    %c0_i32 = arith.constant 0 : i32
    %c0_i32_0 = arith.constant 0 : i32
    %c0_i32_1 = arith.constant 0 : i32
    return %c0_i32, %c0_i32_0 : i32, i32
  }
  func.func @transform_32(%arg0: i32) -> (i32, i32) {
    %c0_i32 = arith.constant 0 : i32
    %c0_i32_0 = arith.constant 0 : i32
    %c0_i32_1 = arith.constant 0 : i32
    return %c0_i32, %c0_i32_0 : i32, i32
  }
  func.func @transform_33(%arg0: i32) -> (i32, i32) {
    %c0_i32 = arith.constant 0 : i32
    %c0_i32_0 = arith.constant 0 : i32
    %c0_i32_1 = arith.constant 0 : i32
    return %c0_i32, %c0_i32_0 : i32, i32
  }
  func.func @transform_34(%arg0: i32) -> (i32, i32) {
    %c0_i32 = arith.constant 0 : i32
    %c0_i32_0 = arith.constant 0 : i32
    %c0_i32_1 = arith.constant 0 : i32
    return %c0_i32, %c0_i32_0 : i32, i32
  }
  func.func @transform_35(%arg0: i32) -> (i32, i32) {
    %c0_i32 = arith.constant 0 : i32
    %c0_i32_0 = arith.constant 0 : i32
    %c0_i32_1 = arith.constant 0 : i32
    return %c0_i32, %c0_i32_0 : i32, i32
  }
  func.func @transform_36(%arg0: i32) -> (i32, i32) {
    %c0_i32 = arith.constant 0 : i32
    %c0_i32_0 = arith.constant 0 : i32
    %c0_i32_1 = arith.constant 0 : i32
    return %c0_i32, %c0_i32_0 : i32, i32
  }
  func.func @transform_37(%arg0: i32) -> (i32, i32) {
    %c0_i32 = arith.constant 0 : i32
    %c0_i32_0 = arith.constant 0 : i32
    %c0_i32_1 = arith.constant 0 : i32
    return %c0_i32, %c0_i32_0 : i32, i32
  }
  func.func @transform_38(%arg0: i32) -> (i32, i32) {
    %c0_i32 = arith.constant 0 : i32
    %c0_i32_0 = arith.constant 0 : i32
    %c0_i32_1 = arith.constant 0 : i32
    return %c0_i32, %c0_i32_0 : i32, i32
  }
  func.func @transform_39(%arg0: i32) -> (i32, i32) {
    %c0_i32 = arith.constant 0 : i32
    %c0_i32_0 = arith.constant 0 : i32
    %c0_i32_1 = arith.constant 0 : i32
    return %c0_i32, %c0_i32_0 : i32, i32
  }
  func.func @transform_40(%arg0: i32) -> (i32, i32) {
    %c0_i32 = arith.constant 0 : i32
    %c0_i32_0 = arith.constant 0 : i32
    %c0_i32_1 = arith.constant 0 : i32
    return %c0_i32, %c0_i32_0 : i32, i32
  }
  func.func @transform_41(%arg0: i32) -> (i32, i32) {
    %c0_i32 = arith.constant 0 : i32
    %c0_i32_0 = arith.constant 0 : i32
    %c0_i32_1 = arith.constant 0 : i32
    return %c0_i32, %c0_i32_0 : i32, i32
  }
  func.func @transform_42(%arg0: i32) -> (i32, i32) {
    %c0_i32 = arith.constant 0 : i32
    %c0_i32_0 = arith.constant 0 : i32
    %c0_i32_1 = arith.constant 0 : i32
    return %c0_i32, %c0_i32_0 : i32, i32
  }
  func.func @transform_43(%arg0: i32) -> (i32, i32) {
    %c0_i32 = arith.constant 0 : i32
    %c0_i32_0 = arith.constant 0 : i32
    %c0_i32_1 = arith.constant 0 : i32
    return %c0_i32, %c0_i32_0 : i32, i32
  }
  func.func @transform_44(%arg0: i32) -> (i32, i32, i32) {
    %c0_i32 = arith.constant 0 : i32
    %c0_i32_0 = arith.constant 0 : i32
    %c0_i32_1 = arith.constant 0 : i32
    return %arg0, %c0_i32, %c0_i32_0 : i32, i32, i32
  }
  func.func @transform_45(%arg0: i32) -> (i32, i32, i32) {
    %c0_i32 = arith.constant 0 : i32
    %c0_i32_0 = arith.constant 0 : i32
    %c0_i32_1 = arith.constant 0 : i32
    return %arg0, %c0_i32, %c0_i32_0 : i32, i32, i32
  }
}

</mosaic_0001>

<bundles_post_ra>
// kernel: tpu_custom_call.1
= control target key start
LH: loop header
LB: loop body
LE: loop exit
PB: predicated region body
PF: predicated region fallthrough
CT: control target
= control target key end

     0   :  { %s11325_s6 = smov 1   ;;  %s11326_s10 = smov 2   ;;  %s13347_s0 = inlined_call_operand.smem [shape: u32[46], index: -1, kind: input, shape index: {}] }
   0x1   :  { %s11423_s5 = sld [smem:[%s13347_s0]]   ;;  %s11327_s14 = smov 3  }
   0x2   :  { %s11428_s9 = sld [smem:[%s13347_s0 + %s11325_s6]]   ;;  %s11328_s18 = smov 4  }
   0x3   :  { %s11433_s13 = sld [smem:[%s13347_s0 + %s11326_s10]]   ;;  %s11329_s22 = smov 5  }
   0x4   :  { %s11438_s17 = sld [smem:[%s13347_s0 + %s11327_s14]]   ;;  %s11330_s26 = smov 6  }
   0x5   :  { %s11443_s21 = sld [smem:[%s13347_s0 + %s11328_s18]]   ;;  %s11331_s30 = smov 7  }
   0x6   :  { %s11448_s25 = sld [smem:[%s13347_s0 + %s11329_s22]]   ;;  %s11332_s4 = smov 8  }
   0x7   :  { %13414 = sst [smem:[#allocation70_spill]] %s11423_s5  ;;  %s11333_s10 = smov 9  }
   0x8   :  { %13415 = sst [smem:[#allocation71_spill]] %s11428_s9  ;;  %s11334_s15 = smov 10  }
   0x9   :  { %13416 = sst [smem:[#allocation72_spill]] %s11433_s13  ;;  %s11335_s20 = smov 11  }
   0xa   :  { %13417 = sst [smem:[#allocation73_spill]] %s11438_s17  ;;  %s11337_s1 = smov 13  }
   0xb   :  { %13418 = sst [smem:[#allocation74_spill]] %s11443_s21  ;;  %s11338_s7 = smov 14  }
   0xc   :  { %13419 = sst [smem:[#allocation75_spill]] %s11448_s25  ;;  %s11340_s22 = smov 16  }
   0xd   :  { %s11453_s29 = sld [smem:[%s13347_s0 + %s11330_s26]]   ;;  %s11336_s26 = smov 12  }
   0xe   :  { %s11458_s3 = sld [smem:[%s13347_s0 + %s11331_s30]]   ;;  %s11341_s28 = smov 17  }
   0xf   :  { %s11463_s8 = sld [smem:[%s13347_s0 + %s11332_s4]]  }
  0x10   :  { %s11468_s14 = sld [smem:[%s13347_s0 + %s11333_s10]]  }
  0x11   :  { %s11473_s19 = sld [smem:[%s13347_s0 + %s11334_s15]]   ;;  %s11339_s15 = smov 15  }
  0x12   :  { %s11478_s24 = sld [smem:[%s13347_s0 + %s11335_s20]]  }
  0x13   :  { %s11483_s30 = sld [smem:[%s13347_s0 + %s11336_s26]]  }
  0x14   :  { %13420 = sst [smem:[#allocation76_spill]] %s11458_s3 }
  0x15   :  { %13421 = sst [smem:[#allocation77_spill]] %s11463_s8 }
  0x16   :  { %13422 = sst [smem:[#allocation78_spill]] %s11468_s14 }
  0x17   :  { %13423 = sst [smem:[#allocation79_spill]] %s11473_s19 }
  0x18   :  { %s11488_s6 = sld [smem:[%s13347_s0 + %s11337_s1]]  }
  0x19   :  { %13424 = sst [smem:[#allocation80_spill]] %s11483_s30 }
  0x1a   :  { %s11493_s12 = sld [smem:[%s13347_s0 + %s11338_s7]]   ;;  %s11342_s7 = smov 18  }
  0x1b   :  { %s11498_s20 = sld [smem:[%s13347_s0 + %s11339_s15]]   ;;  %s11343_s15 = smov 19  }
  0x1c   :  { %s11503_s27 = sld [smem:[%s13347_s0 + %s11340_s22]]   ;;  %s11344_s22 = smov 20  }
  0x1d   :  { %s11508_s4 = sld [smem:[%s13347_s0 + %s11341_s28]]   ;;  %s11345_s28 = smov 21  }
  0x1e   :  { %13425 = sst [smem:[#allocation81_spill]] %s11488_s6 }
  0x1f   :  { %s11513_s19 = sld [smem:[%s13347_s0 + %s11342_s7]]   ;;  %s11346_s7 = smov 22  }
  0x20   :  { %13426 = sst [smem:[#allocation82_spill]] %s11493_s12 }
  0x21   :  { %s11518_s21 = sld [smem:[%s13347_s0 + %s11343_s15]]   ;;  %s11347_s15 = smov 23  }
  0x22   :  { %13427 = sst [smem:[#allocation83_spill]] %s11503_s27 }
  0x23   :  { %13428 = sst [smem:[#allocation84_spill]] %s11508_s4 }
  0x24   :  { %s11523_s5 = sld [smem:[%s13347_s0 + %s11344_s22]]   ;;  %s11348_s22 = smov 24  }
  0x25   :  { %13429 = sst [smem:[#allocation85_spill]] %s11513_s19 }
  0x26   :  { %s11528_s13 = sld [smem:[%s13347_s0 + %s11345_s28]]   ;;  %s11349_s28 = smov 25  }
  0x27   :  { %13430 = sst [smem:[#allocation86_spill]] %s11518_s21 }
  0x28   :  { %s11533_s19 = sld [smem:[%s13347_s0 + %s11346_s7]]   ;;  %s11350_s7 = smov 26  }
  0x29   :  { %s11538_s9 = sld [smem:[%s13347_s0 + %s11347_s15]]   ;;  %s11351_s15 = smov 27  }
  0x2a   :  { %13431 = sst [smem:[#allocation87_spill]] %s11523_s5 }
  0x2b   :  { %s11543_s21 = sld [smem:[%s13347_s0 + %s11348_s22]]   ;;  %s11352_s22 = smov 28  }
  0x2c   :  { %13432 = sst [smem:[#allocation88_spill]] %s11528_s13 }
  0x2d   :  { %s11548_s13 = sld [smem:[%s13347_s0 + %s11349_s28]]   ;;  %s11353_s28 = smov 29  }
  0x2e   :  { %13433 = sst [smem:[#allocation89_spill]] %s11533_s19 }
  0x2f   :  { %13434 = sst [smem:[#allocation90_spill]] %s11538_s9 }
  0x30   :  { %s11553_s27 = sld [smem:[%s13347_s0 + %s11350_s7]]   ;;  %s11354_s7 = smov 30  }
  0x31   :  { %13435 = sst [smem:[#allocation91_spill]] %s11543_s21 }
  0x32   :  { %s11558_s9 = sld [smem:[%s13347_s0 + %s11351_s15]]   ;;  %s11355_s15 = smov 31  }
  0x33   :  { %13436 = sst [smem:[#allocation92_spill]] %s11548_s13 }
  0x34   :  { %s11563_s21 = sld [smem:[%s13347_s0 + %s11352_s22]]   ;;  %s11356_s22 = smov 32  }
  0x35   :  { %s11568_s12 = sld [smem:[%s13347_s0 + %s11353_s28]]   ;;  %s11357_s28 = smov 33  }
  0x36   :  { %13437 = sst [smem:[#allocation93_spill]] %s11553_s27 }
  0x37   :  { %s11573_s27 = sld [smem:[%s13347_s0 + %s11354_s7]]   ;;  %s11358_s7 = smov 34  }
  0x38   :  { %13438 = sst [smem:[#allocation94_spill]] %s11558_s9 }
  0x39   :  { %s11578_s9 = sld [smem:[%s13347_s0 + %s11355_s15]]   ;;  %s11359_s15 = smov 35  }
  0x3a   :  { %s11583_s30 = sld [smem:[%s13347_s0 + %s11356_s22]]   ;;  %s11360_s22 = smov 36  }
  0x3b   :  { %13439 = sst [smem:[#allocation95_spill]] %s11568_s12 }
  0x3c   :  { %s11588_s12 = sld [smem:[%s13347_s0 + %s11357_s28]]   ;;  %s11361_s28 = smov 37  }
  0x3d   :  { %s11593_s14 = sld [smem:[%s13347_s0 + %s11358_s7]]   ;;  %s11362_s7 = smov 38  }
  0x3e   :  { %s11608_s3 = sld [smem:[%s13347_s0 + %s11361_s28]]   ;;  %s11365_s28 = smov 41  }
  0x3f   :  { %13440 = sst [smem:[#allocation96_spill]] %s11578_s9 }
  0x40   :  { %13441 = sst [smem:[#allocation97_spill]] %s11583_s30 }
  0x41   :  { %s11598_s9 = sld [smem:[%s13347_s0 + %s11359_s15]]   ;;  %s11363_s15 = smov 39  }
  0x42   :  { %13442 = sst [smem:[#allocation98_spill]] %s11588_s12 }
  0x43   :  { %13443 = sst [smem:[#allocation99_spill]] %s11593_s14 }
  0x44   :  { %s11603_s30 = sld [smem:[%s13347_s0 + %s11360_s22]]   ;;  %s11364_s22 = smov 40  }
  0x45   :  { %13445 = sst [smem:[#allocation101_spill]] %s11608_s3 }
  0x46   :  { %s11613_s14 = sld [smem:[%s13347_s0 + %s11362_s7]]   ;;  %s11366_s7 = smov 42  }
  0x47   :  { %13444 = sst [smem:[#allocation100_spill]] %s11598_s9 }
  0x48   :  { %s11618_s9 = sld [smem:[%s13347_s0 + %s11363_s15]]   ;;  %s11367_s15 = smov 43  }
  0x49   :  { %s11623_s25 = sld [smem:[%s13347_s0 + %s11364_s22]]   ;;  %s11368_s22 = smov 44  }
  0x4a   :  { %s11628_s3 = sld [smem:[%s13347_s0 + %s11365_s28]]   ;;  %s11369_s28 = smov 45  }
  0x4c   :  { %13446 = sst [smem:[#allocation102_spill]] %s11613_s14 }
  0x4d   :  { %s11633_s14 = sld [smem:[%s13347_s0 + %s11366_s7]]  }
  0x4e   :  { %13447 = sst [smem:[#allocation103_spill]] %s11618_s9 }
  0x4f   :  { %13448 = sst [smem:[#allocation104_spill]] %s11623_s25 }
  0x50   :  { %13449 = sst [smem:[#allocation105_spill]] %s11628_s3 }
  0x51   :  { %s11638_s9 = sld [smem:[%s13347_s0 + %s11367_s15]]  }
  0x52   :  { %s11643_s25 = sld [smem:[%s13347_s0 + %s11368_s22]]  }
  0x53   :  { %13450 = sst [smem:[#allocation106_spill]] %s11633_s14 }
  0x54   :  { %s11648_s3 = sld [smem:[%s13347_s0 + %s11369_s28]]  }
  0x57   :  { %13451 = sst [smem:[#allocation107_spill]] %s11638_s9 }
  0x58   :  { %13452 = sst [smem:[#allocation108_spill]] %s11643_s25 }
  0x5a   :  { %13453 = sst [smem:[#allocation109_spill]] %s11648_s3 }
  0x5b   :  { %97 = vsyncpa [#allocation3], 0 }
  0x5c   :  { %99 = vsyncpa [#allocation3 + $0x1], 0 }
  0x5d   :  { %100 = vsyncpa [#allocation6], 0 }
  0x5e   :  { %101 = vsyncpa [#allocation9], 0 }
  0x5f   :  { %102 = vsyncpa [#allocation12], 0 }
  0x60   :  { %103 = vsyncpa [#allocation15], 0 }
  0x61   :  { %104 = vsyncpa [#allocation18], 0 }
  0x62   :  { %105 = vsyncpa [#allocation21], 0 }
  0x63   :  { %106 = vsyncpa [#allocation24], 0 }
  0x64   :  { %107 = vsyncpa [#allocation27], 0 }
  0x65   :  { %108 = vsyncpa [#allocation30], 0 }
  0x66   :  { %109 = vsyncpa [#allocation33], 0 }
  0x67   :  { %110 = vsyncpa [#allocation36], 0 }
  0x68   :  { %111 = vsyncpa [#allocation39], 0 }
  0x69   :  { %112 = vsyncpa [#allocation42], 0 }
  0x6a   :  { %113 = vsyncpa [#allocation45], 0 }
  0x6b   :  { %114 = vsyncpa [#allocation48], 0 }
  0x6c   :  { %115 = vsyncpa [#allocation4], 0 }
  0x6d   :  { %117 = vsyncpa [#allocation4 + $0x1], 0 }
  0x6e   :  { %118 = vsyncpa [#allocation51], 0 }
  0x6f   :  { %120 = vsyncpa [#allocation51 + $0x1], 0  ;;  %s11650_s0 = smov 0   ;;  %s11652_s7 = smov 0  }
  0x70   :  { %s11654_s10 = smov 0   ;;  %s11656_s11 = smov 0  }
  0x71 LB: > { %s13454_s14 = sld [smem:[#allocation106_spill]]  ;;  %s13455_s19 = sld [smem:[#allocation89_spill]]  ;;  %s11311_s0 = sphi %s11650_s0, %s13541_s0   ;;  %s11323_s11 = sphi %s11656_s11, %s13544_s11   ;;  %s11319_s10 = sphi %s11654_s10, %s13543_s10   ;;  %s11315_s7 = sphi %s11652_s7, %s13542_s7  }
  0x72   : > { %s13456_s17 = sld [smem:[#allocation73_spill]]  ;;  %s13457_s13 = sld [smem:[#allocation92_spill]] }
  0x73   : > { %s13458_s12 = sld [smem:[#allocation98_spill]]  ;;  %s13459_s8 = sld [smem:[#allocation77_spill]] }
  0x74   : > { %s13460_s6 = sld [smem:[#allocation81_spill]]  ;;  %s13461_s5 = sld [smem:[#allocation87_spill]] }
  0x75   : > { %s13462_s4 = sld [smem:[#allocation84_spill]]  ;;  %s11370_s15 = smov [#allocation5]  }
  0x76   : > { %s1132_s16 = sshll.u32 %s11370_s15, 4  ;;  %s11671_s18 = sadd.s32 4294967295, %s11323_s11   ;;  %s11676_s16 = int_to_ptr.vmem [resolvable:$true] %s1132_s16 }
  0x77   : > { %p7658_p0 = scmp.ge.s32.totalorder %s11323_s11, 1  ;;  %p13372_p1 = scmp.eq.s32.totalorder %s11671_s18, 0 }
  0x78   : > { %p1117_p2 = scmp.lt.s32.totalorder %s11323_s11, 3  ;;  %s11371_s23 = smov [#allocation8]  }
  0x79   : > { %s1162_s26 = sshll.u32 %s11371_s23, 4  ;;  %s11372_s1 = smov [#allocation11]   ;;  %s11691_s26 = int_to_ptr.vmem [resolvable:$true] %s1162_s26 }
  0x7a   : > { %p11678_p3 = pnand %p7658_p0, %p1117_p2  ;;  %s1184_s2 = sshll.u32 %s11372_s1, 4  ;;  %s11693_s2 = int_to_ptr.vmem [resolvable:$true] %s1184_s2 }
  0x7b   : > { %s10323_s15 = scalar_lea.hbm %s13456_s17, 512 }
  0x7c   : > { %s13463_s22 = scalar_select %p11678_p3, 1, 0 }
  0x7d   : > { %p9727_p5 = pneg %p11678_p3  ;;  %p10324_p7 = scmp.ne.s32.totalorder %s13456_s17, %s10323_s15 }
  0x7e   : > { %p10330_p11 = scmp.lt.u32.totalorder %s10323_s15, %s13456_s17 }
  0x7f   : > { %p11687_p6 = pnand %p9727_p5, %p13372_p1 }
  0x81   : > { %p11699_p8 = pneg %p11687_p6 }
  0x83   : > { %p10326_p9 = pnand %p11699_p8, %p10324_p7 }
  0x85   : > { %p10327_p10 = pneg %p10326_p9 }
  0x87   : > { %p10332_p12 = pnand %p10330_p11, %p10327_p10 }
  0x89   : > { %10335 = shalt.err (!%p10332_p12)
}
  0x8a   : > { %s10336_s23 = scalar_lea.vmem %s11676_s16, 512  ;;  %p10344_p5 = scmp.lt.s32.totalorder %s11676_s16, %s11676_s16 }
  0x8b   : > { %p10337_p13 = scmp.ne.s32.totalorder %s11676_s16, %s10336_s23  ;;  %p10345_p4 = scmp.lt.s32.totalorder %s10336_s23, %s10336_s23 }
  0x8d   : > { %p10339_p0 = pnand %p10337_p13, %p11699_p8  ;;  %p10346_p1 = por %p10345_p4, %p10344_p5 }
  0x8f   : > { %p10340_p2 = pneg %p10339_p0 }
  0x91   : > { %p10347_p3 = pnand %p10346_p1, %p10340_p2 }
  0x93   : > { %10350 = shalt.err (!%p10347_p3)
}
  0x94   : > { %s13375_s1 = smov 128   ;;  %s13377_s15 = smov 8  }
  0x95   : > { %9730 = dma.hbm_to_vmem [thread:$0]  (!%p11687_p6), %s13456_s17, 512, %s11676_s16, [#allocation6], %s13375_s1, %s13375_s1, %s13377_s15  }
  0x96   : > { %s10351_s9 = scalar_lea.hbm %s11453_s29, 16 }
  0x97   : > { %p10352_p7 = scmp.ne.s32.totalorder %s11453_s29, %s10351_s9  ;;  %p10358_p3 = scmp.lt.u32.totalorder %s10351_s9, %s11453_s29 }
  0x99   : > { %p10354_p4 = pnand %p10352_p7, %p11699_p8 }
  0x9b   : > { %p10355_p1 = pneg %p10354_p4 }
  0x9d   : > { %p10360_p9 = pnand %p10358_p3, %p10355_p1 }
  0x9f   : > { %10363 = shalt.err (!%p10360_p9)
}
  0xa0   : > { %s10364_s23 = scalar_lea.vmem %s11691_s26, 16  ;;  %s10371_s3 = scalar_lea.vmem %s11691_s26, 32 }
  0xa1   : > { %p10365_p10 = scmp.ne.s32.totalorder %s11691_s26, %s10364_s23  ;;  %p10372_p13 = scmp.lt.s32.totalorder %s11691_s26, %s11691_s26 }
  0xa2   : > { %p10373_p0 = scmp.lt.s32.totalorder %s10371_s3, %s10364_s23 }
  0xa3   : > { %p10367_p11 = pnand %p10365_p10, %p11699_p8 }
  0xa4   : > { %p10374_p2 = por %p10373_p0, %p10372_p13 }
  0xa5   : > { %p10368_p12 = pneg %p10367_p11 }
  0xa7   : > { %p10375_p5 = pnand %p10374_p2, %p10368_p12 }
  0xa9   : > { %10378 = shalt.err (!%p10375_p5)
}
  0xaa   : > { %9736 = dma.hbm_to_vmem [thread:$0]  (!%p11687_p6), %s11453_s29, 16, %s11691_s26, [#allocation9]  }
  0xab   : > { %s10379_s9 = scalar_lea.hbm %s13459_s8, 16 }
  0xac   : > { %p10380_p7 = scmp.ne.s32.totalorder %s13459_s8, %s10379_s9  ;;  %p10386_p3 = scmp.lt.u32.totalorder %s10379_s9, %s13459_s8 }
  0xae   : > { %p10382_p4 = pnand %p10380_p7, %p11699_p8 }
  0xb0   : > { %p10383_p1 = pneg %p10382_p4 }
  0xb2   : > { %p10388_p9 = pnand %p10386_p3, %p10383_p1 }
  0xb4   : > { %10391 = shalt.err (!%p10388_p9)
}
  0xb5   : > { %s10392_s3 = scalar_lea.vmem %s11693_s2, 16  ;;  %s10399_s16 = scalar_lea.vmem %s11693_s2, 32 }
  0xb6   : > { %p10393_p10 = scmp.ne.s32.totalorder %s11693_s2, %s10392_s3  ;;  %p10400_p13 = scmp.lt.s32.totalorder %s11693_s2, %s11693_s2 }
  0xb7   : > { %p10401_p0 = scmp.lt.s32.totalorder %s10399_s16, %s10392_s3 }
  0xb8   : > { %p10395_p11 = pnand %p10393_p10, %p11699_p8 }
  0xb9   : > { %p10402_p2 = por %p10401_p0, %p10400_p13 }
  0xba   : > { %p10396_p12 = pneg %p10395_p11 }
  0xbc   : > { %p10403_p5 = pnand %p10402_p2, %p10396_p12 }
  0xbe   : > { %10406 = shalt.err (!%p10403_p5)
}
  0xbf   : > { %9742 = dma.hbm_to_vmem [thread:$0]  (!%p11687_p6), %s13459_s8, 16, %s11693_s2, [#allocation12]  }
  0xc0   : > { %s11375_s26 = smov [#allocation14]   ;;  %s11376_s9 = smov [#allocation17]  }
  0xc1   : > { %s1209_s23 = sshll.u32 %s11375_s26, 4  ;;  %s1233_s1 = sshll.u32 %s11376_s9, 4  ;;  %s1210_s23 = int_to_ptr.vmem [resolvable:$true] %s1209_s23  ;;  %s1234_s1 = int_to_ptr.vmem [resolvable:$true] %s1233_s1 }
  0xc2   : > { %s10407_s15 = scalar_lea.hbm %s11478_s24, 16 }
  0xc3   : > { %p10408_p7 = scmp.ne.s32.totalorder %s11478_s24, %s10407_s15  ;;  %p10414_p3 = scmp.lt.u32.totalorder %s10407_s15, %s11478_s24 }
  0xc5   : > { %p10410_p4 = pnand %p10408_p7, %p11699_p8 }
  0xc7   : > { %p10411_p1 = pneg %p10410_p4 }
  0xc9   : > { %p10416_p9 = pnand %p10414_p3, %p10411_p1 }
  0xcb   : > { %10419 = shalt.err (!%p10416_p9)
}
  0xcc   : > { %s10420_s3 = scalar_lea.vmem %s1210_s23, 16  ;;  %s10427_s2 = scalar_lea.vmem %s1210_s23, 32 }
  0xcd   : > { %p10421_p10 = scmp.ne.s32.totalorder %s1210_s23, %s10420_s3  ;;  %p10428_p13 = scmp.lt.s32.totalorder %s1210_s23, %s1210_s23 }
  0xce   : > { %p10429_p0 = scmp.lt.s32.totalorder %s10427_s2, %s10420_s3 }
  0xcf   : > { %p10423_p11 = pnand %p10421_p10, %p11699_p8 }
  0xd0   : > { %p10430_p2 = por %p10429_p0, %p10428_p13 }
  0xd1   : > { %p10424_p12 = pneg %p10423_p11 }
  0xd3   : > { %p10431_p5 = pnand %p10430_p2, %p10424_p12 }
  0xd5   : > { %10434 = shalt.err (!%p10431_p5)
}
  0xd6   : > { %9748 = dma.hbm_to_vmem [thread:$0]  (!%p11687_p6), %s11478_s24, 16, %s1210_s23, [#allocation15]  }
  0xd7   : > { %s10435_s15 = scalar_lea.hbm %s13460_s6, 16 }
  0xd8   : > { %p10436_p7 = scmp.ne.s32.totalorder %s13460_s6, %s10435_s15  ;;  %p10442_p3 = scmp.lt.u32.totalorder %s10435_s15, %s13460_s6 }
  0xda   : > { %p10438_p4 = pnand %p10436_p7, %p11699_p8 }
  0xdc   : > { %p10439_p1 = pneg %p10438_p4 }
  0xde   : > { %p10444_p9 = pnand %p10442_p3, %p10439_p1 }
  0xe0   : > { %10447 = shalt.err (!%p10444_p9)
}
  0xe1   : > { %s10448_s16 = scalar_lea.vmem %s1234_s1, 16  ;;  %s10455_s26 = scalar_lea.vmem %s1234_s1, 32 }
  0xe2   : > { %p10449_p10 = scmp.ne.s32.totalorder %s1234_s1, %s10448_s16  ;;  %p10456_p13 = scmp.lt.s32.totalorder %s1234_s1, %s1234_s1 }
  0xe3   : > { %p10457_p0 = scmp.lt.s32.totalorder %s10455_s26, %s10448_s16 }
  0xe4   : > { %p10451_p11 = pnand %p10449_p10, %p11699_p8 }
  0xe5   : > { %p10458_p2 = por %p10457_p0, %p10456_p13 }
  0xe6   : > { %p10452_p12 = pneg %p10451_p11 }
  0xe8   : > { %p10459_p5 = pnand %p10458_p2, %p10452_p12 }
  0xea   : > { %10462 = shalt.err (!%p10459_p5)
}
  0xeb   : > { %9754 = dma.hbm_to_vmem [thread:$0]  (!%p11687_p6), %s13460_s6, 16, %s1234_s1, [#allocation18]  }
  0xec   : > { %s11377_s23 = smov [#allocation20]   ;;  %s11378_s3 = smov [#allocation23]  }
  0xed   : > { %s1257_s9 = sshll.u32 %s11377_s23, 4  ;;  %s1279_s2 = sshll.u32 %s11378_s3, 4  ;;  %s1258_s9 = int_to_ptr.vmem [resolvable:$true] %s1257_s9  ;;  %s1280_s2 = int_to_ptr.vmem [resolvable:$true] %s1279_s2 }
  0xee   : > { %s10463_s15 = scalar_lea.hbm %s11498_s20, 16 }
  0xef   : > { %p10464_p7 = scmp.ne.s32.totalorder %s11498_s20, %s10463_s15  ;;  %p10470_p3 = scmp.lt.u32.totalorder %s10463_s15, %s11498_s20 }
  0xf1   : > { %p10466_p4 = pnand %p10464_p7, %p11699_p8 }
  0xf3   : > { %p10467_p1 = pneg %p10466_p4 }
  0xf5   : > { %p10472_p9 = pnand %p10470_p3, %p10467_p1 }
  0xf7   : > { %10475 = shalt.err (!%p10472_p9)
}
  0xf8   : > { %s10476_s16 = scalar_lea.vmem %s1258_s9, 16  ;;  %s10483_s1 = scalar_lea.vmem %s1258_s9, 32 }
  0xf9   : > { %p10477_p10 = scmp.ne.s32.totalorder %s1258_s9, %s10476_s16  ;;  %p10484_p13 = scmp.lt.s32.totalorder %s1258_s9, %s1258_s9 }
  0xfa   : > { %p10485_p0 = scmp.lt.s32.totalorder %s10483_s1, %s10476_s16 }
  0xfb   : > { %p10479_p11 = pnand %p10477_p10, %p11699_p8 }
  0xfc   : > { %p10486_p2 = por %p10485_p0, %p10484_p13 }
  0xfd   : > { %p10480_p12 = pneg %p10479_p11 }
  0xff   : > { %p10487_p5 = pnand %p10486_p2, %p10480_p12 }
 0x101   : > { %10490 = shalt.err (!%p10487_p5)
}
 0x102   : > { %9760 = dma.hbm_to_vmem [thread:$0]  (!%p11687_p6), %s11498_s20, 16, %s1258_s9, [#allocation21]  }
 0x103   : > { %s10491_s26 = scalar_lea.hbm %s13462_s4, 16 }
 0x104   : > { %p10492_p7 = scmp.ne.s32.totalorder %s13462_s4, %s10491_s26  ;;  %p10498_p3 = scmp.lt.u32.totalorder %s10491_s26, %s13462_s4 }
 0x106   : > { %p10494_p4 = pnand %p10492_p7, %p11699_p8 }
 0x108   : > { %p10495_p1 = pneg %p10494_p4 }
 0x10a   : > { %p10500_p9 = pnand %p10498_p3, %p10495_p1 }
 0x10c   : > { %10503 = shalt.err (!%p10500_p9)
}
 0x10d   : > { %s10504_s23 = scalar_lea.vmem %s1280_s2, 16  ;;  %s10511_s3 = scalar_lea.vmem %s1280_s2, 32 }
 0x10e   : > { %p10505_p10 = scmp.ne.s32.totalorder %s1280_s2, %s10504_s23  ;;  %p10512_p13 = scmp.lt.s32.totalorder %s1280_s2, %s1280_s2 }
 0x10f   : > { %p10513_p0 = scmp.lt.s32.totalorder %s10511_s3, %s10504_s23 }
 0x110   : > { %p10507_p11 = pnand %p10505_p10, %p11699_p8 }
 0x111   : > { %p10514_p2 = por %p10513_p0, %p10512_p13 }
 0x112   : > { %p10508_p12 = pneg %p10507_p11 }
 0x114   : > { %p10515_p5 = pnand %p10514_p2, %p10508_p12 }
 0x116   : > { %10518 = shalt.err (!%p10515_p5)
}
 0x117   : > { %9766 = dma.hbm_to_vmem [thread:$0]  (!%p11687_p6), %s13462_s4, 16, %s1280_s2, [#allocation24]  }
 0x118   : > { %s11379_s9 = smov [#allocation26]   ;;  %s11380_s16 = smov [#allocation29]  }
 0x119   : > { %s1303_s15 = sshll.u32 %s11379_s9, 4  ;;  %s1328_s1 = sshll.u32 %s11380_s16, 4  ;;  %s1304_s15 = int_to_ptr.vmem [resolvable:$true] %s1303_s15  ;;  %s1329_s1 = int_to_ptr.vmem [resolvable:$true] %s1328_s1 }
 0x11a   : > { %s10519_s26 = scalar_lea.hbm %s13461_s5, 1024 }
 0x11b   : > { %p10520_p7 = scmp.ne.s32.totalorder %s13461_s5, %s10519_s26  ;;  %p10526_p3 = scmp.lt.u32.totalorder %s10519_s26, %s13461_s5 }
 0x11d   : > { %p10522_p4 = pnand %p10520_p7, %p11699_p8 }
 0x11f   : > { %p10523_p1 = pneg %p10522_p4 }
 0x121   : > { %p10528_p9 = pnand %p10526_p3, %p10523_p1 }
 0x123   : > { %10531 = shalt.err (!%p10528_p9)
}
 0x124   : > { %s10532_s23 = scalar_lea.vmem %s1304_s15, 1024  ;;  %p10540_p13 = scmp.lt.s32.totalorder %s1304_s15, %s1304_s15 }
 0x125   : > { %p10533_p10 = scmp.ne.s32.totalorder %s1304_s15, %s10532_s23  ;;  %p10541_p0 = scmp.lt.s32.totalorder %s10532_s23, %s10532_s23 }
 0x127   : > { %p10535_p11 = pnand %p10533_p10, %p11699_p8  ;;  %p10542_p2 = por %p10541_p0, %p10540_p13 }
 0x129   : > { %p10536_p12 = pneg %p10535_p11 }
 0x12b   : > { %p10543_p5 = pnand %p10542_p2, %p10536_p12 }
 0x12d   : > { %10546 = shalt.err (!%p10543_p5)
}
 0x12e   : > { %s13379_s2 = smov 64   ;;  %s13381_s3 = smov 4  }
 0x12f   : > { %9772 = dma.hbm_to_vmem [thread:$0]  (!%p11687_p6), %s13461_s5, 1024, %s1304_s15, [#allocation27], %s13379_s2, %s13379_s2, %s13381_s3  }
 0x130   : > { %s10547_s9 = scalar_lea.hbm %s13455_s19, 16 }
 0x131   : > { %p10548_p7 = scmp.ne.s32.totalorder %s13455_s19, %s10547_s9  ;;  %p10554_p3 = scmp.lt.u32.totalorder %s10547_s9, %s13455_s19 }
 0x133   : > { %p10550_p4 = pnand %p10548_p7, %p11699_p8 }
 0x135   : > { %p10551_p1 = pneg %p10550_p4 }
 0x137   : > { %p10556_p9 = pnand %p10554_p3, %p10551_p1 }
 0x139   : > { %10559 = shalt.err (!%p10556_p9)
}
 0x13a   : > { %s10560_s16 = scalar_lea.vmem %s1329_s1, 16  ;;  %s10567_s26 = scalar_lea.vmem %s1329_s1, 32 }
 0x13b   : > { %p10561_p10 = scmp.ne.s32.totalorder %s1329_s1, %s10560_s16  ;;  %p10568_p13 = scmp.lt.s32.totalorder %s1329_s1, %s1329_s1 }
 0x13c   : > { %p10569_p0 = scmp.lt.s32.totalorder %s10567_s26, %s10560_s16 }
 0x13d   : > { %p10563_p11 = pnand %p10561_p10, %p11699_p8 }
 0x13e   : > { %p10570_p2 = por %p10569_p0, %p10568_p13 }
 0x13f   : > { %p10564_p12 = pneg %p10563_p11 }
 0x141   : > { %p10571_p5 = pnand %p10570_p2, %p10564_p12 }
 0x143   : > { %10574 = shalt.err (!%p10571_p5)
}
 0x144   : > { %9778 = dma.hbm_to_vmem [thread:$0]  (!%p11687_p6), %s13455_s19, 16, %s1329_s1, [#allocation30]  }
 0x145   : > { %s11383_s15 = smov [#allocation32]   ;;  %s11384_s9 = smov [#allocation35]  }
 0x146   : > { %s1353_s23 = sshll.u32 %s11383_s15, 4  ;;  %s1378_s2 = sshll.u32 %s11384_s9, 4  ;;  %s1354_s23 = int_to_ptr.vmem [resolvable:$true] %s1353_s23  ;;  %s1379_s2 = int_to_ptr.vmem [resolvable:$true] %s1378_s2 }
 0x147   : > { %s10575_s3 = scalar_lea.hbm %s13457_s13, 32 }
 0x148   : > { %p10576_p7 = scmp.ne.s32.totalorder %s13457_s13, %s10575_s3  ;;  %p10582_p3 = scmp.lt.u32.totalorder %s10575_s3, %s13457_s13 }
 0x14a   : > { %p10578_p4 = pnand %p10576_p7, %p11699_p8 }
 0x14c   : > { %p10579_p1 = pneg %p10578_p4 }
 0x14e   : > { %p10584_p9 = pnand %p10582_p3, %p10579_p1 }
 0x150   : > { %10587 = shalt.err (!%p10584_p9)
}
 0x151   : > { %s10588_s16 = scalar_lea.vmem %s1354_s23, 32  ;;  %p10596_p13 = scmp.lt.s32.totalorder %s1354_s23, %s1354_s23 }
 0x152   : > { %p10589_p10 = scmp.ne.s32.totalorder %s1354_s23, %s10588_s16  ;;  %p10597_p0 = scmp.lt.s32.totalorder %s10588_s16, %s10588_s16 }
 0x154   : > { %p10591_p11 = pnand %p10589_p10, %p11699_p8  ;;  %p10598_p2 = por %p10597_p0, %p10596_p13 }
 0x156   : > { %p10592_p12 = pneg %p10591_p11 }
 0x158   : > { %p10599_p5 = pnand %p10598_p2, %p10592_p12 }
 0x15a   : > { %10602 = shalt.err (!%p10599_p5)
}
 0x15b   : > { %9784 = dma.hbm_to_vmem [thread:$0]  (!%p11687_p6), %s13457_s13, 32, %s1354_s23, [#allocation33]  }
 0x15c   : > { %s10603_s1 = scalar_lea.hbm %s11563_s21, 16 }
 0x15d   : > { %p10604_p7 = scmp.ne.s32.totalorder %s11563_s21, %s10603_s1  ;;  %p10610_p3 = scmp.lt.u32.totalorder %s10603_s1, %s11563_s21 }
 0x15f   : > { %p10606_p4 = pnand %p10604_p7, %p11699_p8 }
 0x161   : > { %p10607_p1 = pneg %p10606_p4 }
 0x163   : > { %p10612_p9 = pnand %p10610_p3, %p10607_p1 }
 0x165   : > { %10615 = shalt.err (!%p10612_p9)
}
 0x166   : > { %s10616_s3 = scalar_lea.vmem %s1379_s2, 16  ;;  %s10623_s26 = scalar_lea.vmem %s1379_s2, 32 }
 0x167   : > { %p10617_p10 = scmp.ne.s32.totalorder %s1379_s2, %s10616_s3  ;;  %p10624_p13 = scmp.lt.s32.totalorder %s1379_s2, %s1379_s2 }
 0x168   : > { %p10625_p0 = scmp.lt.s32.totalorder %s10623_s26, %s10616_s3 }
 0x169   : > { %p10619_p11 = pnand %p10617_p10, %p11699_p8 }
 0x16a   : > { %p10626_p2 = por %p10625_p0, %p10624_p13 }
 0x16b   : > { %p10620_p12 = pneg %p10619_p11 }
 0x16d   : > { %p10627_p5 = pnand %p10626_p2, %p10620_p12 }
 0x16f   : > { %10630 = shalt.err (!%p10627_p5)
}
 0x170   : > { %9790 = dma.hbm_to_vmem [thread:$0]  (!%p11687_p6), %s11563_s21, 16, %s1379_s2, [#allocation36]  }
 0x171   : > { %s11385_s15 = smov [#allocation38]   ;;  %s11386_s9 = smov [#allocation41]  }
 0x172   : > { %s1400_s23 = sshll.u32 %s11385_s15, 4  ;;  %s1425_s16 = sshll.u32 %s11386_s9, 4  ;;  %s1401_s23 = int_to_ptr.vmem [resolvable:$true] %s1400_s23  ;;  %s1426_s16 = int_to_ptr.vmem [resolvable:$true] %s1425_s16 }
 0x173   : > { %s10631_s1 = scalar_lea.hbm %s11573_s27, 16 }
 0x174   : > { %p10632_p7 = scmp.ne.s32.totalorder %s11573_s27, %s10631_s1  ;;  %p10638_p3 = scmp.lt.u32.totalorder %s10631_s1, %s11573_s27 }
 0x176   : > { %p10634_p4 = pnand %p10632_p7, %p11699_p8 }
 0x178   : > { %p10635_p1 = pneg %p10634_p4 }
 0x17a   : > { %p10640_p9 = pnand %p10638_p3, %p10635_p1 }
 0x17c   : > { %10643 = shalt.err (!%p10640_p9)
}
 0x17d   : > { %s10644_s3 = scalar_lea.vmem %s1401_s23, 16  ;;  %s10651_s2 = scalar_lea.vmem %s1401_s23, 32 }
 0x17e   : > { %p10645_p10 = scmp.ne.s32.totalorder %s1401_s23, %s10644_s3  ;;  %p10652_p13 = scmp.lt.s32.totalorder %s1401_s23, %s1401_s23 }
 0x17f   : > { %p10653_p0 = scmp.lt.s32.totalorder %s10651_s2, %s10644_s3 }
 0x180   : > { %p10647_p11 = pnand %p10645_p10, %p11699_p8 }
 0x181   : > { %p10654_p2 = por %p10653_p0, %p10652_p13 }
 0x182   : > { %p10648_p12 = pneg %p10647_p11 }
 0x184   : > { %p10655_p5 = pnand %p10654_p2, %p10648_p12 }
 0x186   : > { %10658 = shalt.err (!%p10655_p5)
}
 0x187   : > { %9796 = dma.hbm_to_vmem [thread:$0]  (!%p11687_p6), %s11573_s27, 16, %s1401_s23, [#allocation39]  }
 0x188   : > { %s10659_s26 = scalar_lea.hbm %s13458_s12, 16 }
 0x189   : > { %p10660_p7 = scmp.ne.s32.totalorder %s13458_s12, %s10659_s26  ;;  %p10666_p3 = scmp.lt.u32.totalorder %s10659_s26, %s13458_s12 }
 0x18b   : > { %p10662_p4 = pnand %p10660_p7, %p11699_p8 }
 0x18d   : > { %p10663_p1 = pneg %p10662_p4 }
 0x18f   : > { %p10668_p9 = pnand %p10666_p3, %p10663_p1 }
 0x191   : > { %10671 = shalt.err (!%p10668_p9)
}
 0x192   : > { %s10672_s15 = scalar_lea.vmem %s1426_s16, 16  ;;  %s10679_s9 = scalar_lea.vmem %s1426_s16, 32 }
 0x193   : > { %p10673_p10 = scmp.ne.s32.totalorder %s1426_s16, %s10672_s15  ;;  %p10680_p13 = scmp.lt.s32.totalorder %s1426_s16, %s1426_s16 }
 0x194   : > { %p10681_p0 = scmp.lt.s32.totalorder %s10679_s9, %s10672_s15 }
 0x195   : > { %p10675_p11 = pnand %p10673_p10, %p11699_p8 }
 0x196   : > { %p10682_p2 = por %p10681_p0, %p10680_p13 }
 0x197   : > { %p10676_p12 = pneg %p10675_p11 }
 0x199   : > { %p10683_p5 = pnand %p10682_p2, %p10676_p12 }
 0x19b   : > { %10686 = shalt.err (!%p10683_p5)
}
 0x19c   : > { %9802 = dma.hbm_to_vmem [thread:$0]  (!%p11687_p6), %s13458_s12, 16, %s1426_s16, [#allocation42]  }
 0x19d   : > { %s11387_s23 = smov [#allocation44]   ;;  %s11388_s3 = smov [#allocation7]  }
 0x19e   : > { %s1449_s1 = sshll.u32 %s11387_s23, 4  ;;  %s1148_s2 = sshll.u32 %s11388_s3, 4  ;;  %s1450_s1 = int_to_ptr.vmem [resolvable:$true] %s1449_s1  ;;  %s1149_s2 = int_to_ptr.vmem [resolvable:$true] %s1148_s2 }
 0x19f   : > { %s10687_s26 = scalar_lea.hbm %s11603_s30, 512 }
 0x1a0   : > { %p10688_p7 = scmp.ne.s32.totalorder %s11603_s30, %s10687_s26  ;;  %p10694_p3 = scmp.lt.u32.totalorder %s10687_s26, %s11603_s30 }
 0x1a2   : > { %p10690_p4 = pnand %p10688_p7, %p11699_p8 }
 0x1a4   : > { %p10691_p1 = pneg %p10690_p4 }
 0x1a6   : > { %p10696_p9 = pnand %p10694_p3, %p10691_p1 }
 0x1a8   : > { %10699 = shalt.err (!%p10696_p9)
}
 0x1a9   : > { %s10700_s15 = scalar_lea.vmem %s1450_s1, 512  ;;  %p10708_p13 = scmp.lt.s32.totalorder %s1450_s1, %s1450_s1 }
 0x1aa   : > { %p10701_p10 = scmp.ne.s32.totalorder %s1450_s1, %s10700_s15  ;;  %p10709_p0 = scmp.lt.s32.totalorder %s10700_s15, %s10700_s15 }
 0x1ac   : > { %p10703_p11 = pnand %p10701_p10, %p11699_p8  ;;  %p10710_p2 = por %p10709_p0, %p10708_p13 }
 0x1ae   : > { %p10704_p12 = pneg %p10703_p11 }
 0x1b0   : > { %p10711_p5 = pnand %p10710_p2, %p10704_p12 }
 0x1b2   : > { %10714 = shalt.err (!%p10711_p5)
}
 0x1b3   : > { %s13466_s16 = smov 4   ;;  %s13467_s9 = smov 64  }
 0x1b4   : > { %s13468_s23 = sld [smem:[#allocation75_spill]] }
 0x1b5   : > { %9808 = dma.hbm_to_vmem [thread:$0]  (!%p11687_p6), %s11603_s30, 512, %s1450_s1, [#allocation45], %s13467_s9, %s13467_s9, %s13466_s16  }
 0x1ba   : > { %s10715_s3 = scalar_lea.hbm %s13468_s23, 512 }
 0x1bb   : > { %p10716_p7 = scmp.ne.s32.totalorder %s13468_s23, %s10715_s3  ;;  %p10722_p3 = scmp.lt.u32.totalorder %s10715_s3, %s13468_s23 }
 0x1bd   : > { %p10718_p4 = pnand %p10716_p7, %p11699_p8 }
 0x1bf   : > { %p10719_p1 = pneg %p10718_p4 }
 0x1c1   : > { %p10724_p9 = pnand %p10722_p3, %p10719_p1 }
 0x1c3   : > { %10727 = shalt.err (!%p10724_p9)
}
 0x1c4   : > { %s10728_s26 = scalar_lea.vmem %s1149_s2, 512  ;;  %p10736_p13 = scmp.lt.s32.totalorder %s1149_s2, %s1149_s2 }
 0x1c5   : > { %p10729_p10 = scmp.ne.s32.totalorder %s1149_s2, %s10728_s26  ;;  %p10737_p0 = scmp.lt.s32.totalorder %s10728_s26, %s10728_s26 }
 0x1c7   : > { %p10731_p11 = pnand %p10729_p10, %p11699_p8  ;;  %p10738_p2 = por %p10737_p0, %p10736_p13 }
 0x1c9   : > { %p10732_p12 = pneg %p10731_p11 }
 0x1cb   : > { %p10739_p5 = pnand %p10738_p2, %p10732_p12 }
 0x1cd   : > { %10742 = shalt.err (!%p10739_p5)
}
 0x1ce   : > { %s13469_s1 = smov 8   ;;  %s13470_s15 = smov 128  }
 0x1cf   : > { %s13471_s3 = sld [smem:[#allocation76_spill]]  ;;  %s11389_s4 = smov [#allocation10]  }
 0x1d0   : > { %9733 = dma.hbm_to_vmem [thread:$0]  (!%p11687_p6), %s13468_s23, 512, %s1149_s2, [#allocation6], %s13470_s15, %s13470_s15, %s13469_s1  }
 0x1d1   : > { %s1173_s5 = sshll.u32 %s11389_s4, 4  ;;  %s11390_s6 = smov [#allocation13]   ;;  %s1174_s5 = int_to_ptr.vmem [resolvable:$true] %s1173_s5 }
 0x1d2   : > { %s1195_s8 = sshll.u32 %s11390_s6, 4  ;;  %s1196_s8 = int_to_ptr.vmem [resolvable:$true] %s1195_s8 }
 0x1d5   : > { %s10743_s26 = scalar_lea.hbm %s13471_s3, 16 }
 0x1d6   : > { %p10744_p7 = scmp.ne.s32.totalorder %s13471_s3, %s10743_s26  ;;  %p10750_p3 = scmp.lt.u32.totalorder %s10743_s26, %s13471_s3 }
 0x1d8   : > { %p10746_p4 = pnand %p10744_p7, %p11699_p8 }
 0x1da   : > { %p10747_p1 = pneg %p10746_p4 }
 0x1dc   : > { %p10752_p9 = pnand %p10750_p3, %p10747_p1 }
 0x1de   : > { %10755 = shalt.err (!%p10752_p9)
}
 0x1df   : > { %s10756_s12 = scalar_lea.vmem %s1174_s5, 16  ;;  %s10763_s2 = scalar_lea.vmem %s1174_s5, 32 }
 0x1e0   : > { %p10757_p10 = scmp.ne.s32.totalorder %s1174_s5, %s10756_s12  ;;  %p10764_p13 = scmp.lt.s32.totalorder %s1174_s5, %s1174_s5 }
 0x1e1   : > { %p10765_p0 = scmp.lt.s32.totalorder %s10763_s2, %s10756_s12 }
 0x1e2   : > { %p10759_p11 = pnand %p10757_p10, %p11699_p8 }
 0x1e3   : > { %p10766_p2 = por %p10765_p0, %p10764_p13 }
 0x1e4   : > { %p10760_p12 = pneg %p10759_p11 }
 0x1e6   : > { %p10767_p5 = pnand %p10766_p2, %p10760_p12 }
 0x1e8   : > { %10770 = shalt.err (!%p10767_p5)
}
 0x1e9   : > { %s13472_s6 = sld [smem:[#allocation78_spill]] }
 0x1ea   : > { %9739 = dma.hbm_to_vmem [thread:$0]  (!%p11687_p6), %s13471_s3, 16, %s1174_s5, [#allocation9]  }
 0x1ef   : > { %s10771_s4 = scalar_lea.hbm %s13472_s6, 16 }
 0x1f0   : > { %p10772_p7 = scmp.ne.s32.totalorder %s13472_s6, %s10771_s4  ;;  %p10778_p3 = scmp.lt.u32.totalorder %s10771_s4, %s13472_s6 }
 0x1f2   : > { %p10774_p4 = pnand %p10772_p7, %p11699_p8 }
 0x1f4   : > { %p10775_p1 = pneg %p10774_p4 }
 0x1f6   : > { %p10780_p9 = pnand %p10778_p3, %p10775_p1 }
 0x1f8   : > { %10783 = shalt.err (!%p10780_p9)
}
 0x1f9   : > { %s10784_s12 = scalar_lea.vmem %s1196_s8, 16  ;;  %s10791_s26 = scalar_lea.vmem %s1196_s8, 32 }
 0x1fa   : > { %p10785_p10 = scmp.ne.s32.totalorder %s1196_s8, %s10784_s12  ;;  %p10792_p13 = scmp.lt.s32.totalorder %s1196_s8, %s1196_s8 }
 0x1fb   : > { %p10793_p0 = scmp.lt.s32.totalorder %s10791_s26, %s10784_s12 }
 0x1fc   : > { %p10787_p11 = pnand %p10785_p10, %p11699_p8 }
 0x1fd   : > { %p10794_p2 = por %p10793_p0, %p10792_p13 }
 0x1fe   : > { %p10788_p12 = pneg %p10787_p11 }
 0x200   : > { %p10795_p5 = pnand %p10794_p2, %p10788_p12 }
 0x202   : > { %10798 = shalt.err (!%p10795_p5)
}
 0x203   : > { %s13473_s5 = sld [smem:[#allocation80_spill]]  ;;  %s11391_s2 = smov [#allocation16]  }
 0x204   : > { %9745 = dma.hbm_to_vmem [thread:$0]  (!%p11687_p6), %s13472_s6, 16, %s1196_s8, [#allocation12]  }
 0x205   : > { %s1219_s4 = sshll.u32 %s11391_s2, 4  ;;  %s11392_s3 = smov [#allocation19]   ;;  %s1220_s4 = int_to_ptr.vmem [resolvable:$true] %s1219_s4 }
 0x206   : > { %s1243_s13 = sshll.u32 %s11392_s3, 4  ;;  %s1244_s13 = int_to_ptr.vmem [resolvable:$true] %s1243_s13 }
 0x209   : > { %s10799_s17 = scalar_lea.hbm %s13473_s5, 1024 }
 0x20a   : > { %p10800_p7 = scmp.ne.s32.totalorder %s13473_s5, %s10799_s17  ;;  %p10806_p3 = scmp.lt.u32.totalorder %s10799_s17, %s13473_s5 }
 0x20c   : > { %p10802_p4 = pnand %p10800_p7, %p11699_p8 }
 0x20e   : > { %p10803_p1 = pneg %p10802_p4 }
 0x210   : > { %p10808_p9 = pnand %p10806_p3, %p10803_p1 }
 0x212   : > { %10811 = shalt.err (!%p10808_p9)
}
 0x213   : > { %s10812_s12 = scalar_lea.vmem %s1220_s4, 1024  ;;  %p10820_p13 = scmp.lt.s32.totalorder %s1220_s4, %s1220_s4 }
 0x214   : > { %p10813_p10 = scmp.ne.s32.totalorder %s1220_s4, %s10812_s12  ;;  %p10821_p0 = scmp.lt.s32.totalorder %s10812_s12, %s10812_s12 }
 0x216   : > { %p10815_p11 = pnand %p10813_p10, %p11699_p8  ;;  %p10822_p2 = por %p10821_p0, %p10820_p13 }
 0x218   : > { %p10816_p12 = pneg %p10815_p11 }
 0x21a   : > { %p10823_p5 = pnand %p10822_p2, %p10816_p12 }
 0x21c   : > { %10826 = shalt.err (!%p10823_p5)
}
 0x21d   : > { %s13474_s17 = sld [smem:[#allocation82_spill]] }
 0x21e   : > { %9751 = dma.hbm_to_vmem [thread:$0]  (!%p11687_p6), %s13473_s5, 1024, %s1220_s4, [#allocation15], %s13467_s9, %s13467_s9, %s13466_s16  }
 0x223   : > { %s10827_s8 = scalar_lea.hbm %s13474_s17, 512 }
 0x224   : > { %p10828_p7 = scmp.ne.s32.totalorder %s13474_s17, %s10827_s8  ;;  %p10834_p3 = scmp.lt.u32.totalorder %s10827_s8, %s13474_s17 }
 0x226   : > { %p10830_p4 = pnand %p10828_p7, %p11699_p8 }
 0x228   : > { %p10831_p1 = pneg %p10830_p4 }
 0x22a   : > { %p10836_p9 = pnand %p10834_p3, %p10831_p1 }
 0x22c   : > { %10839 = shalt.err (!%p10836_p9)
}
 0x22d   : > { %s10840_s3 = scalar_lea.vmem %s1244_s13, 512  ;;  %p10848_p13 = scmp.lt.s32.totalorder %s1244_s13, %s1244_s13 }
 0x22e   : > { %p10841_p10 = scmp.ne.s32.totalorder %s1244_s13, %s10840_s3  ;;  %p10849_p0 = scmp.lt.s32.totalorder %s10840_s3, %s10840_s3 }
 0x230   : > { %p10843_p11 = pnand %p10841_p10, %p11699_p8  ;;  %p10850_p2 = por %p10849_p0, %p10848_p13 }
 0x232   : > { %p10844_p12 = pneg %p10843_p11 }
 0x234   : > { %p10851_p5 = pnand %p10850_p2, %p10844_p12 }
 0x236   : > { %10854 = shalt.err (!%p10851_p5)
}
 0x237   : > { %s13475_s26 = sld [smem:[#allocation83_spill]]  ;;  %s11393_s2 = smov [#allocation22]  }
 0x238   : > { %9757 = dma.hbm_to_vmem [thread:$0]  (!%p11687_p6), %s13474_s17, 512, %s1244_s13, [#allocation18], %s13467_s9, %s13467_s9, %s13466_s16  }
 0x239   : > { %s1268_s4 = sshll.u32 %s11393_s2, 4  ;;  %s11394_s12 = smov [#allocation25]   ;;  %s1269_s4 = int_to_ptr.vmem [resolvable:$true] %s1268_s4 }
 0x23a   : > { %s1293_s8 = sshll.u32 %s11394_s12, 4  ;;  %s1294_s8 = int_to_ptr.vmem [resolvable:$true] %s1293_s8 }
 0x23d   : > { %s10855_s3 = scalar_lea.hbm %s13475_s26, 16 }
 0x23e   : > { %p10856_p7 = scmp.ne.s32.totalorder %s13475_s26, %s10855_s3  ;;  %p10862_p3 = scmp.lt.u32.totalorder %s10855_s3, %s13475_s26 }
 0x240   : > { %p10858_p4 = pnand %p10856_p7, %p11699_p8 }
 0x242   : > { %p10859_p1 = pneg %p10858_p4 }
 0x244   : > { %p10864_p9 = pnand %p10862_p3, %p10859_p1 }
 0x246   : > { %10867 = shalt.err (!%p10864_p9)
}
 0x247   : > { %s10868_s5 = scalar_lea.vmem %s1269_s4, 16  ;;  %s10875_s13 = scalar_lea.vmem %s1269_s4, 32 }
 0x248   : > { %p10869_p10 = scmp.ne.s32.totalorder %s1269_s4, %s10868_s5  ;;  %p10876_p13 = scmp.lt.s32.totalorder %s1269_s4, %s1269_s4 }
 0x249   : > { %p10877_p0 = scmp.lt.s32.totalorder %s10875_s13, %s10868_s5 }
 0x24a   : > { %p10871_p11 = pnand %p10869_p10, %p11699_p8 }
 0x24b   : > { %p10878_p2 = por %p10877_p0, %p10876_p13 }
 0x24c   : > { %p10872_p12 = pneg %p10871_p11 }
 0x24e   : > { %p10879_p5 = pnand %p10878_p2, %p10872_p12 }
 0x250   : > { %10882 = shalt.err (!%p10879_p5)
}
 0x251   : > { %s13476_s2 = sld [smem:[#allocation86_spill]] }
 0x252   : > { %9763 = dma.hbm_to_vmem [thread:$0]  (!%p11687_p6), %s13475_s26, 16, %s1269_s4, [#allocation21]  }
 0x257   : > { %s10883_s12 = scalar_lea.hbm %s13476_s2, 48 }
 0x258   : > { %p10884_p7 = scmp.ne.s32.totalorder %s13476_s2, %s10883_s12  ;;  %p10890_p3 = scmp.lt.u32.totalorder %s10883_s12, %s13476_s2 }
 0x25a   : > { %p10886_p4 = pnand %p10884_p7, %p11699_p8 }
 0x25c   : > { %p10887_p1 = pneg %p10886_p4 }
 0x25e   : > { %p10892_p9 = pnand %p10890_p3, %p10887_p1 }
 0x260   : > { %10895 = shalt.err (!%p10892_p9)
}
 0x261   : > { %s10896_s5 = scalar_lea.vmem %s1294_s8, 48  ;;  %s10903_s3 = scalar_lea.vmem %s1294_s8, 64 }
 0x262   : > { %p10897_p10 = scmp.ne.s32.totalorder %s1294_s8, %s10896_s5  ;;  %p10904_p13 = scmp.lt.s32.totalorder %s1294_s8, %s1294_s8 }
 0x263   : > { %p10905_p0 = scmp.lt.s32.totalorder %s10903_s3, %s10896_s5 }
 0x264   : > { %p10899_p11 = pnand %p10897_p10, %p11699_p8 }
 0x265   : > { %p10906_p2 = por %p10905_p0, %p10904_p13 }
 0x266   : > { %p10900_p12 = pneg %p10899_p11 }
 0x268   : > { %p10907_p5 = pnand %p10906_p2, %p10900_p12 }
 0x26a   : > { %10910 = shalt.err (!%p10907_p5)
}
 0x26b   : > { %s13477_s4 = sld [smem:[#allocation88_spill]]  ;;  %s11395_s13 = smov [#allocation28]  }
 0x26c   : > { %9769 = dma.hbm_to_vmem [thread:$0]  (!%p11687_p6), %s13476_s2, 48, %s1294_s8, [#allocation24]  }
 0x26d   : > { %s1317_s12 = sshll.u32 %s11395_s13, 4  ;;  %s11396_s6 = smov [#allocation31]   ;;  %s1318_s12 = int_to_ptr.vmem [resolvable:$true] %s1317_s12 }
 0x26e   : > { %s1339_s17 = sshll.u32 %s11396_s6, 4  ;;  %s1340_s17 = int_to_ptr.vmem [resolvable:$true] %s1339_s17 }
 0x271   : > { %s10911_s19 = scalar_lea.hbm %s13477_s4, 16 }
 0x272   : > { %p10912_p7 = scmp.ne.s32.totalorder %s13477_s4, %s10911_s19  ;;  %p10918_p3 = scmp.lt.u32.totalorder %s10911_s19, %s13477_s4 }
 0x274   : > { %p10914_p4 = pnand %p10912_p7, %p11699_p8 }
 0x276   : > { %p10915_p1 = pneg %p10914_p4 }
 0x278   : > { %p10920_p9 = pnand %p10918_p3, %p10915_p1 }
 0x27a   : > { %10923 = shalt.err (!%p10920_p9)
}
 0x27b   : > { %s10924_s5 = scalar_lea.vmem %s1318_s12, 16  ;;  %s10931_s8 = scalar_lea.vmem %s1318_s12, 32 }
 0x27c   : > { %p10925_p10 = scmp.ne.s32.totalorder %s1318_s12, %s10924_s5  ;;  %p10932_p13 = scmp.lt.s32.totalorder %s1318_s12, %s1318_s12 }
 0x27d   : > { %p10933_p0 = scmp.lt.s32.totalorder %s10931_s8, %s10924_s5 }
 0x27e   : > { %p10927_p11 = pnand %p10925_p10, %p11699_p8 }
 0x27f   : > { %p10934_p2 = por %p10933_p0, %p10932_p13 }
 0x280   : > { %p10928_p12 = pneg %p10927_p11 }
 0x282   : > { %p10935_p5 = pnand %p10934_p2, %p10928_p12 }
 0x284   : > { %10938 = shalt.err (!%p10935_p5)
}
 0x285   : > { %s13478_s6 = sld [smem:[#allocation90_spill]] }
 0x286   : > { %9775 = dma.hbm_to_vmem [thread:$0]  (!%p11687_p6), %s13477_s4, 16, %s1318_s12, [#allocation27]  }
 0x28b   : > { %s10939_s19 = scalar_lea.hbm %s13478_s6, 16 }
 0x28c   : > { %p10940_p7 = scmp.ne.s32.totalorder %s13478_s6, %s10939_s19  ;;  %p10946_p3 = scmp.lt.u32.totalorder %s10939_s19, %s13478_s6 }
 0x28e   : > { %p10942_p4 = pnand %p10940_p7, %p11699_p8 }
 0x290   : > { %p10943_p1 = pneg %p10942_p4 }
 0x292   : > { %p10948_p9 = pnand %p10946_p3, %p10943_p1 }
 0x294   : > { %10951 = shalt.err (!%p10948_p9)
}
 0x295   : > { %s10952_s3 = scalar_lea.vmem %s1340_s17, 16  ;;  %s10959_s13 = scalar_lea.vmem %s1340_s17, 32 }
 0x296   : > { %p10953_p10 = scmp.ne.s32.totalorder %s1340_s17, %s10952_s3  ;;  %p10960_p13 = scmp.lt.s32.totalorder %s1340_s17, %s1340_s17 }
 0x297   : > { %p10961_p0 = scmp.lt.s32.totalorder %s10959_s13, %s10952_s3 }
 0x298   : > { %p10955_p11 = pnand %p10953_p10, %p11699_p8 }
 0x299   : > { %p10962_p2 = por %p10961_p0, %p10960_p13 }
 0x29a   : > { %p10956_p12 = pneg %p10955_p11 }
 0x29c   : > { %p10963_p5 = pnand %p10962_p2, %p10956_p12 }
 0x29e   : > { %10966 = shalt.err (!%p10963_p5)
}
 0x29f   : > { %s13479_s12 = sld [smem:[#allocation94_spill]]  ;;  %s11397_s5 = smov [#allocation34]  }
 0x2a0   : > { %9781 = dma.hbm_to_vmem [thread:$0]  (!%p11687_p6), %s13478_s6, 16, %s1340_s17, [#allocation30]  }
 0x2a1   : > { %s1367_s8 = sshll.u32 %s11397_s5, 4  ;;  %s11398_s19 = smov [#allocation37]   ;;  %s1368_s8 = int_to_ptr.vmem [resolvable:$true] %s1367_s8 }
 0x2a2   : > { %s1389_s2 = sshll.u32 %s11398_s19, 4  ;;  %s1390_s2 = int_to_ptr.vmem [resolvable:$true] %s1389_s2 }
 0x2a5   : > { %s10967_s4 = scalar_lea.hbm %s13479_s12, 16 }
 0x2a6   : > { %p10968_p7 = scmp.ne.s32.totalorder %s13479_s12, %s10967_s4  ;;  %p10974_p3 = scmp.lt.u32.totalorder %s10967_s4, %s13479_s12 }
 0x2a8   : > { %p10970_p4 = pnand %p10968_p7, %p11699_p8 }
 0x2aa   : > { %p10971_p1 = pneg %p10970_p4 }
 0x2ac   : > { %p10976_p9 = pnand %p10974_p3, %p10971_p1 }
 0x2ae   : > { %10979 = shalt.err (!%p10976_p9)
}
 0x2af   : > { %s10980_s3 = scalar_lea.vmem %s1368_s8, 16  ;;  %s10987_s17 = scalar_lea.vmem %s1368_s8, 32 }
 0x2b0   : > { %p10981_p10 = scmp.ne.s32.totalorder %s1368_s8, %s10980_s3  ;;  %p10988_p13 = scmp.lt.s32.totalorder %s1368_s8, %s1368_s8 }
 0x2b1   : > { %p10989_p0 = scmp.lt.s32.totalorder %s10987_s17, %s10980_s3 }
 0x2b2   : > { %p10983_p11 = pnand %p10981_p10, %p11699_p8 }
 0x2b3   : > { %p10990_p2 = por %p10989_p0, %p10988_p13 }
 0x2b4   : > { %p10984_p12 = pneg %p10983_p11 }
 0x2b6   : > { %p10991_p5 = pnand %p10990_p2, %p10984_p12 }
 0x2b8   : > { %10994 = shalt.err (!%p10991_p5)
}
 0x2b9   : > { %s13480_s13 = sld [smem:[#allocation95_spill]] }
 0x2ba   : > { %9787 = dma.hbm_to_vmem [thread:$0]  (!%p11687_p6), %s13479_s12, 16, %s1368_s8, [#allocation33]  }
 0x2bf   : > { %s10995_s4 = scalar_lea.hbm %s13480_s13, 16 }
 0x2c0   : > { %p10996_p7 = scmp.ne.s32.totalorder %s13480_s13, %s10995_s4  ;;  %p11002_p3 = scmp.lt.u32.totalorder %s10995_s4, %s13480_s13 }
 0x2c2   : > { %p10998_p4 = pnand %p10996_p7, %p11699_p8 }
 0x2c4   : > { %p10999_p1 = pneg %p10998_p4 }
 0x2c6   : > { %p11004_p9 = pnand %p11002_p3, %p10999_p1 }
 0x2c8   : > { %11007 = shalt.err (!%p11004_p9)
}
 0x2c9   : > { %s11008_s5 = scalar_lea.vmem %s1390_s2, 16  ;;  %s11015_s19 = scalar_lea.vmem %s1390_s2, 32 }
 0x2ca   : > { %p11009_p10 = scmp.ne.s32.totalorder %s1390_s2, %s11008_s5  ;;  %p11016_p13 = scmp.lt.s32.totalorder %s1390_s2, %s1390_s2 }
 0x2cb   : > { %p11017_p0 = scmp.lt.s32.totalorder %s11015_s19, %s11008_s5 }
 0x2cc   : > { %p11011_p11 = pnand %p11009_p10, %p11699_p8 }
 0x2cd   : > { %p11018_p2 = por %p11017_p0, %p11016_p13 }
 0x2ce   : > { %p11012_p12 = pneg %p11011_p11 }
 0x2d0   : > { %p11019_p5 = pnand %p11018_p2, %p11012_p12 }
 0x2d2   : > { %11022 = shalt.err (!%p11019_p5)
}
 0x2d3   : > { %s13481_s8 = sld [smem:[#allocation96_spill]]  ;;  %s11399_s3 = smov [#allocation40]  }
 0x2d4   : > { %9793 = dma.hbm_to_vmem [thread:$0]  (!%p11687_p6), %s13480_s13, 16, %s1390_s2, [#allocation36]  }
 0x2d5   : > { %s1411_s17 = sshll.u32 %s11399_s3, 4  ;;  %s11400_s4 = smov [#allocation43]   ;;  %s1412_s17 = int_to_ptr.vmem [resolvable:$true] %s1411_s17 }
 0x2d6   : > { %s1439_s6 = sshll.u32 %s11400_s4, 4  ;;  %s1440_s6 = int_to_ptr.vmem [resolvable:$true] %s1439_s6 }
 0x2d9   : > { %s11023_s12 = scalar_lea.hbm %s13481_s8, 16 }
 0x2da   : > { %p11024_p7 = scmp.ne.s32.totalorder %s13481_s8, %s11023_s12  ;;  %p11030_p3 = scmp.lt.u32.totalorder %s11023_s12, %s13481_s8 }
 0x2dc   : > { %p11026_p4 = pnand %p11024_p7, %p11699_p8 }
 0x2de   : > { %p11027_p1 = pneg %p11026_p4 }
 0x2e0   : > { %p11032_p9 = pnand %p11030_p3, %p11027_p1 }
 0x2e2   : > { %11035 = shalt.err (!%p11032_p9)
}
 0x2e3   : > { %s11036_s5 = scalar_lea.vmem %s1412_s17, 16  ;;  %s11043_s2 = scalar_lea.vmem %s1412_s17, 32 }
 0x2e4   : > { %p11037_p10 = scmp.ne.s32.totalorder %s1412_s17, %s11036_s5  ;;  %p11044_p13 = scmp.lt.s32.totalorder %s1412_s17, %s1412_s17 }
 0x2e5   : > { %p11045_p0 = scmp.lt.s32.totalorder %s11043_s2, %s11036_s5 }
 0x2e6   : > { %p11039_p11 = pnand %p11037_p10, %p11699_p8 }
 0x2e7   : > { %p11046_p2 = por %p11045_p0, %p11044_p13 }
 0x2e8   : > { %p11040_p12 = pneg %p11039_p11 }
 0x2ea   : > { %p11047_p5 = pnand %p11046_p2, %p11040_p12 }
 0x2ec   : > { %11050 = shalt.err (!%p11047_p5)
}
 0x2ed   : > { %s13482_s19 = sld [smem:[#allocation100_spill]] }
 0x2ee   : > { %9799 = dma.hbm_to_vmem [thread:$0]  (!%p11687_p6), %s13481_s8, 16, %s1412_s17, [#allocation39]  }
 0x2f3   : > { %s11051_s12 = scalar_lea.hbm %s13482_s19, 16 }
 0x2f4   : > { %p11052_p7 = scmp.ne.s32.totalorder %s13482_s19, %s11051_s12  ;;  %p11058_p3 = scmp.lt.u32.totalorder %s11051_s12, %s13482_s19 }
 0x2f6   : > { %p11054_p4 = pnand %p11052_p7, %p11699_p8 }
 0x2f8   : > { %p11055_p1 = pneg %p11054_p4 }
 0x2fa   : > { %p11060_p9 = pnand %p11058_p3, %p11055_p1 }
 0x2fc   : > { %11063 = shalt.err (!%p11060_p9)
}
 0x2fd   : > { %s11064_s3 = scalar_lea.vmem %s1440_s6, 16  ;;  %s11071_s4 = scalar_lea.vmem %s1440_s6, 32 }
 0x2fe   : > { %p11065_p10 = scmp.ne.s32.totalorder %s1440_s6, %s11064_s3  ;;  %p11072_p13 = scmp.lt.s32.totalorder %s1440_s6, %s1440_s6 }
 0x2ff   : > { %p11073_p0 = scmp.lt.s32.totalorder %s11071_s4, %s11064_s3 }
 0x300   : > { %p11067_p11 = pnand %p11065_p10, %p11699_p8 }
 0x301   : > { %p11074_p2 = por %p11073_p0, %p11072_p13 }
 0x302   : > { %p11068_p12 = pneg %p11067_p11 }
 0x304   : > { %p11075_p5 = pnand %p11074_p2, %p11068_p12 }
 0x306   : > { %11078 = shalt.err (!%p11075_p5)
}
 0x307   : > { %s13483_s17 = sld [smem:[#allocation104_spill]]  ;;  %s11401_s5 = smov [#allocation46]  }
 0x308   : > { %9805 = dma.hbm_to_vmem [thread:$0]  (!%p11687_p6), %s13482_s19, 16, %s1440_s6, [#allocation42]  }
 0x309   : > { %s1471_s2 = sshll.u32 %s11401_s5, 4  ;;  %s11402_s12 = smov [#allocation47]   ;;  %s1472_s2 = int_to_ptr.vmem [resolvable:$true] %s1471_s2 }
 0x30a   : > { %s1487_s8 = sshll.u32 %s11402_s12, 4  ;;  %s1488_s8 = int_to_ptr.vmem [resolvable:$true] %s1487_s8 }
 0x30d   : > { %s11079_s13 = scalar_lea.hbm %s13483_s17, 2048 }
 0x30e   : > { %p11080_p7 = scmp.ne.s32.totalorder %s13483_s17, %s11079_s13  ;;  %p11086_p3 = scmp.lt.u32.totalorder %s11079_s13, %s13483_s17 }
 0x310   : > { %p11082_p4 = pnand %p11080_p7, %p11699_p8 }
 0x312   : > { %p11083_p1 = pneg %p11082_p4 }
 0x314   : > { %p11088_p9 = pnand %p11086_p3, %p11083_p1 }
 0x316   : > { %11091 = shalt.err (!%p11088_p9)
}
 0x317   : > { %s11092_s3 = scalar_lea.vmem %s1472_s2, 2048  ;;  %p11100_p13 = scmp.lt.s32.totalorder %s1472_s2, %s1472_s2 }
 0x318   : > { %p11093_p10 = scmp.ne.s32.totalorder %s1472_s2, %s11092_s3  ;;  %p11101_p0 = scmp.lt.s32.totalorder %s11092_s3, %s11092_s3 }
 0x31a   : > { %p11095_p11 = pnand %p11093_p10, %p11699_p8  ;;  %p11102_p2 = por %p11101_p0, %p11100_p13 }
 0x31c   : > { %p11096_p12 = pneg %p11095_p11 }
 0x31e   : > { %p11103_p5 = pnand %p11102_p2, %p11096_p12 }
 0x320   : > { %11106 = shalt.err (!%p11103_p5)
}
 0x321   : > { %9811 = dma.hbm_to_vmem [thread:$0]  (!%p11687_p6), %s13483_s17, 2048, %s1472_s2, [#allocation45], %s13470_s15, %s13470_s15, %s13469_s1  }
 0x322   : > { %s11107_s6 = scalar_lea.hbm %s13454_s14, 2048 }
 0x323   : > { %p11108_p7 = scmp.ne.s32.totalorder %s13454_s14, %s11107_s6  ;;  %p11114_p3 = scmp.lt.u32.totalorder %s11107_s6, %s13454_s14 }
 0x325   : > { %p11110_p4 = pnand %p11108_p7, %p11699_p8 }
 0x327   : > { %p11111_p1 = pneg %p11110_p4 }
 0x329   : > { %p11116_p9 = pnand %p11114_p3, %p11111_p1 }
 0x32b   : > { %11119 = shalt.err (!%p11116_p9)
}
 0x32c   : > { %s11120_s13 = scalar_lea.vmem %s1488_s8, 2048  ;;  %p11128_p13 = scmp.lt.s32.totalorder %s1488_s8, %s1488_s8 }
 0x32d   : > { %p11121_p10 = scmp.ne.s32.totalorder %s1488_s8, %s11120_s13  ;;  %p11129_p0 = scmp.lt.s32.totalorder %s11120_s13, %s11120_s13 }
 0x32f   : > { %p11123_p11 = pnand %p11121_p10, %p11699_p8  ;;  %p11130_p2 = por %p11129_p0, %p11128_p13 }
 0x331   : > { %p11124_p12 = pneg %p11123_p11 }
 0x333   : > { %p11131_p5 = pnand %p11130_p2, %p11124_p12 }
 0x335   : > { %11134 = shalt.err (!%p11131_p5)
}
 0x336   : > { %9814 = dma.hbm_to_vmem [thread:$0]  (!%p11687_p6), %s13454_s14, 2048, %s1488_s8, [#allocation48], %s13467_s9, %s13467_s9, %s13466_s16  }
 0x337   : > { %s7657_s25 = sadd.s32 4294967294, %s11323_s11   ;;  %s12034_s28 = sadd.s32 1, %s11323_s11  }
 0x338   : > { %s159_s4 = sadd.s32 1, %s11319_s10  ;;  %s156_s5 = ssub.s32 %s11323_s11, %s12034_s28 }
 0x339   : > { %s13484_s2 = sld [smem:[#allocation71_spill]]  ;;  %p166_p8 = scmp.ne.s32.totalorder %s11319_s10, %s11315_s7 }
 0x33a   : > { %p157_p7 = scmp.eq.s32.totalorder %s156_s5, 0  ;;  %p167_p4 = scmp.eq.s32.totalorder %s11323_s11, 0 }
 0x33b   : > { %p172_p1 = scmp.ne.s32.totalorder %s11315_s7, %s11311_s0  ;;  %p1078_p3 = scmp.eq.s32.totalorder %s11671_s18, 1 }
 0x33c   : > { %s12046_s12 = scalar_select %p157_p7, %s11319_s10, %s159_s4  }
 0x33d   : > { %p168_p9 = por %p167_p4, %p166_p8  ;;  %p13485_p10 = scmp.eq.s32.totalorder %s11671_s18, 0 }
 0x33e   : > { %p12054_p6 = por %p1078_p3, %p166_p8  ;;  %p1084_p12 = scmp.eq.s32.totalorder %s7657_s25, 1 }
 0x33f   : > { %p12050_p11 = por %p13485_p10, %p172_p1  ;;  %p9855_p13 = scmp.lt.s32.totalorder %s11323_s11, 2 }
 0x340   : > { %s13487_s9 = scalar_select %p12054_p6, 1, 0 }
 0x341   : > { %s13486_s16 = scalar_select %p12050_p11, 1, 0 }
 0x342   : > { %s1512_s8 = sand.u32 1, %s11319_s10   ;;  %p12060_p0 = por %p1084_p12, %p172_p1 }
 0x343   : > { %s7689_s6 = sshll.u32 %s1512_s8, 4  ;;  %s7942_s13 = sshll.u32 %s11323_s11, 8 }
 0x344   : > { %s13488_s3 = scalar_select %p12060_p0, 1, 0 }
 0x345   : > { %s12066_s4 = scalar_lea.hbm %s13484_s2, %s7942_s13  ;;  %s1516_s5 = scalar_lea.vmem [#allocation2], %s7689_s6 }
 0x346   : > { %s1523_s14 = sshll.u32 %s1516_s5, 4  ;;  %p12068_p2 = pnand %p9855_p13, %p168_p9  ;;  %s12072_s14 = int_to_ptr.vmem [resolvable:$true] %s1523_s14 }
 0x347   : > { %s12074_s17 = scalar_lea.sflag [#allocation3], %s1512_s8  ;;  %s11135_s19 = scalar_lea.hbm %s12066_s4, 256 }
 0x348   : > { %p11136_p5 = scmp.ne.s32.totalorder %s12066_s4, %s11135_s19  ;;  %p11137_p8 = pneg %p12068_p2 }
 0x349   : > { %s11140_s6 = scalar_lea.hbm %s13484_s2, 512  ;;  %p11141_p1 = scmp.lt.u32.totalorder %s12066_s4, %s13484_s2 }
 0x34a   : > { %p11138_p7 = pnand %p11137_p8, %p11136_p5  ;;  %p11142_p3 = scmp.lt.u32.totalorder %s11140_s6, %s11135_s19 }
 0x34b   : > { %p11144_p10 = scmp.lt.u32.totalorder %s11135_s19, %s12066_s4 }
 0x34c   : > { %p11139_p4 = pneg %p11138_p7  ;;  %p11143_p9 = por %p11142_p3, %p11141_p1 }
 0x34e   : > { %p11145_p12 = por %p11144_p10, %p11143_p9 }
 0x350   : > { %p11146_p13 = pnand %p11145_p12, %p11139_p4 }
 0x352   : > { %11149 = shalt.err (!%p11146_p13)
}
 0x353   : > { %s11150_s8 = scalar_lea.vmem %s12072_s14, 256  ;;  %s11403_s13 = smov [#allocation2]  }
 0x354   : > { %p11151_p0 = scmp.ne.s32.totalorder %s12072_s14, %s11150_s8  ;;  %s11155_s5 = sshll.u32 %s11403_s13, 4  ;;  %s11156_s5 = int_to_ptr.vmem [resolvable:$false] %s11155_s5 }
 0x355   : > { %s11157_s2 = scalar_lea.vmem %s11156_s5, 512  ;;  %p11158_p5 = scmp.lt.s32.totalorder %s12072_s14, %s11156_s5 }
 0x356   : > { %p11153_p6 = pnand %p11151_p0, %p11137_p8  ;;  %p11159_p7 = scmp.lt.s32.totalorder %s11157_s2, %s11150_s8 }
 0x358   : > { %p11154_p11 = pneg %p11153_p6  ;;  %p11160_p1 = por %p11159_p7, %p11158_p5 }
 0x35a   : > { %p11161_p3 = pnand %p11160_p1, %p11154_p11 }
 0x35c   : > { %11164 = shalt.err (!%p11161_p3)
}
 0x35d   : > { %9818 = dma.hbm_to_vmem [thread:$0]  (!%p12068_p2), %s12066_s4, 256, %s12072_s14, %s12074_s17, %s13470_s15, %s13470_s15, %s13469_s1  }
 0x35e   : > { %p13490_p6 = scmp.ne.s32.totalorder %s13463_s22, 0 }
 0x35f   : > { %s12104_s19 = sand.u32 (!%p13490_p6), 1, %s11315_s7   ;;  %p13491_p11 = scmp.ne.s32.totalorder (!%p13490_p6), %s13486_s16, 0 }
 0x360   : > { %1535 = sbr.rel (%p13490_p6) target bundleno = 8307 (0x2073), region = 196  ;;  %s7693_s2 = sshll.u32 (!%p13490_p6), %s12104_s19, 4 }
 0x361   : > { %s1538_s6 = scalar_lea.sflag (!%p13490_p6), [#allocation3], %s12104_s19  ;;  %s12110_s25 = scalar_lea.vmem (!%p13490_p6), [#allocation2], %s7693_s2 }
 0x367   : > { %11238 = dma.done.wait (%p13491_p11), %s1538_s6, 256  }
 0x368   : > { %11240 = vsyncadd (%p13491_p11), %s1538_s6, 4294967040  ;;  %p13492_p0 = scmp.eq.s32.totalorder %s11671_s18, 0 }
 0x36a   : > { %11242 = dma.done.wait (%p13492_p0), [#allocation6], 1024   ;;  %p13493_p2 = pmov %p13492_p0 }
 0x36b   : > { %p13494_p8 = pmov %p13492_p0 }
 0x36c   : > { %11244 = vsyncadd (%p13493_p2), [#allocation6], 4294966272 }
 0x36d   : > { %11246 = dma.done.wait (%p13494_p8), [#allocation9], 32   ;;  %p13495_p4 = pmov %p13492_p0 }
 0x36e   : > { %p13496_p9 = pmov %p13492_p0 }
 0x36f   : > { %11248 = vsyncadd (%p13495_p4), [#allocation9], 4294967264 }
 0x370   : > { %11250 = dma.done.wait (%p13496_p9), [#allocation12], 32   ;;  %p13497_p10 = pmov %p13492_p0 }
 0x371   : > { %p13498_p12 = pmov %p13492_p0 }
 0x372   : > { %11252 = vsyncadd (%p13497_p10), [#allocation12], 4294967264 }
 0x373   : > { %11254 = dma.done.wait (%p13498_p12), [#allocation15], 1040   ;;  %p13499_p13 = pmov %p13492_p0 }
 0x374   : > { %p13500_p5 = pmov %p13492_p0 }
 0x375   : > { %11256 = vsyncadd (%p13499_p13), [#allocation15], 4294966256 }
 0x376   : > { %11258 = dma.done.wait (%p13500_p5), [#allocation18], 528   ;;  %p13501_p7 = pmov %p13492_p0 }
 0x377   : > { %p13502_p1 = pmov %p13492_p0 }
 0x378   : > { %11260 = vsyncadd (%p13501_p7), [#allocation18], 4294966768 }
 0x379   : > { %11262 = dma.done.wait (%p13502_p1), [#allocation21], 32   ;;  %p13503_p3 = pmov %p13492_p0 }
 0x37a   : > { %p13504_p6 = pmov %p13492_p0 }
 0x37b   : > { %11264 = vsyncadd (%p13503_p3), [#allocation21], 4294967264 }
 0x37c   : > { %11266 = dma.done.wait (%p13504_p6), [#allocation24], 64   ;;  %p13505_p11 = pmov %p13492_p0 }
 0x37e   : > { %11268 = vsyncadd (%p13505_p11), [#allocation24], 4294967232 }
 0x37f   : > { %11270 = dma.done.wait (%p13492_p0), [#allocation27], 1040   ;;  %p13506_p2 = pmov %p13492_p0 }
 0x380   : > { %p13507_p8 = pmov %p13492_p0 }
 0x381   : > { %11272 = vsyncadd (%p13506_p2), [#allocation27], 4294966256 }
 0x382   : > { %11274 = dma.done.wait (%p13507_p8), [#allocation30], 32   ;;  %p13508_p4 = pmov %p13492_p0 }
 0x383   : > { %p13509_p9 = pmov %p13492_p0 }
 0x384   : > { %11276 = vsyncadd (%p13508_p4), [#allocation30], 4294967264 }
 0x385   : > { %11278 = dma.done.wait (%p13509_p9), [#allocation33], 48   ;;  %p13510_p10 = pmov %p13492_p0 }
 0x386   : > { %p13511_p12 = pmov %p13492_p0 }
 0x387   : > { %11280 = vsyncadd (%p13510_p10), [#allocation33], 4294967248 }
 0x388   : > { %11282 = dma.done.wait (%p13511_p12), [#allocation36], 32   ;;  %p13512_p13 = pmov %p13492_p0 }
 0x389   : > { %p13513_p5 = pmov %p13492_p0 }
 0x38a   : > { %11284 = vsyncadd (%p13512_p13), [#allocation36], 4294967264 }
 0x38b   : > { %11286 = dma.done.wait (%p13513_p5), [#allocation39], 32   ;;  %p13514_p7 = pmov %p13492_p0 }
 0x38c   : > { %p13515_p1 = pmov %p13492_p0 }
 0x38d   : > { %11288 = vsyncadd (%p13514_p7), [#allocation39], 4294967264 }
 0x38e   : > { %11290 = dma.done.wait (%p13515_p1), [#allocation42], 32   ;;  %p13516_p3 = pmov %p13492_p0 }
 0x38f   : > { %p13517_p6 = pmov %p13492_p0 }
 0x390   : > { %11292 = vsyncadd (%p13516_p3), [#allocation42], 4294967264 }
 0x391   : > { %11294 = dma.done.wait (%p13517_p6), [#allocation45], 2560   ;;  %p13518_p11 = pmov %p13492_p0 }
 0x393   : > { %11296 = vsyncadd (%p13518_p11), [#allocation45], 4294964736 }
 0x394   : > { %11298 = dma.done.wait (%p13492_p0), [#allocation48], 2048   ;;  %p13519_p2 = pmov %p13492_p0 }
 0x395   : > { %s13520_s14 = sld [smem:[#allocation72_spill]]  ;;  %s13521_s22 = sld [smem:[#allocation70_spill]]  ;;  %v11404_v0 = vmov 0.0|0.0   ;;  %vm11405_vm0 = vmmov 0   ;;  %v11406_v1 = vmov 0.0   ;;  %v1796_v61 = vld [vmem:[#allocation5] sm:$0xff] }
 0x396   : > { %11300 = vsyncadd (%p13519_p2), [#allocation48], 4294965248  ;;  %p1774_p8 = scmp.lt.s32.totalorder %s11671_s18, 1  ;;  %9235 = vmatprep.subr.bf16.mxu0 %v11404_v0  ;;  %9259 = vmatprep.subr.bf16.mxu1 %v11404_v0  ;;  %v1797_v62 = vld [vmem:[#allocation5 + $0x8] sm:$0xff]  ;;  %s13522_s16 = sld [smem:[#allocation74_spill]]  ;;  %vm2261_vm1 = vcmask 261120  }
 0x397   : > { %8431 = vmatprep.mubr.msk.f32.mxu0 %vm11405_vm0, %v11406_v1  ;;  %8466 = vmatprep.mubr.msk.f32.mxu1 %vm11405_vm0, %v11406_v1  ;;  %s13523_s4 = sld [smem:[#allocation79_spill]]  ;;  %s11407_s8 = smov 64   ;;  %vm3077_vm2 = vcmask 523264   ;;  %vm4048_vm3 = vcmask 130048  }
 0x398   : > { %s1775_s1 = scalar_select %p1774_p8, %s11671_s18, 1 }
 0x399   : > { %s11408_s13 = smov 96   ;;  %s11409_s5 = smov 32  }
 0x39a   : > { %s7943_s15 = sshll.u32 %s1775_s1, 6  ;;  %s13524_s6 = sld [smem:[#allocation85_spill]] }
 0x39b   : > { %v1780_v2 = vld [vmem:[%s13520_s14] sm:$0xff]  ;;  %v1781_v3 = vld [vmem:[%s13520_s14 + $0x8] sm:$0xff]  ;;  %v1782_v4 = vld [vmem:[%s13520_s14 + $0x10] sm:$0xff]  ;;  %s12191_s17 = scalar_lea.vmem %s13521_s22, %s7943_s15  ;;  %s13525_s22 = sld [smem:[#allocation91_spill]] }
 0x39c   : > { %v12187_v5 = vpack.c.bf16 %v1781_v3, %v1780_v2  ;;  %v1783_v6 = vld [vmem:[%s13520_s14 + $0x18] sm:$0xff]  ;;  %v1784_v8 = vld [vmem:[%s13520_s14 + $0x20] sm:$0xff]  ;;  %v1785_v9 = vld [vmem:[%s13520_s14 + $0x28] sm:$0xff]  ;;  %s13526_s1 = sld [smem:[#allocation93_spill]]  ;;  %s12870_s15 = scalar_lea.vmem [#allocation50], %s7693_s2 }
 0x39d   : > { %v12195_v7 = vpack.c.bf16 %v1783_v6, %v1782_v4  ;;  %v12202_v10 = vld [vmem:[%s12191_s17] sm:$0xff]  ;;  %v12205_v11 = vld [vmem:[%s12191_s17 + $0x8] sm:$0xff]  ;;  %v12208_v12 = vld [vmem:[%s12191_s17 + $0x10] sm:$0xff]  ;;  %v12221_v17 = vpack.c.bf16 %v1785_v9, %v1784_v8  ;;  %v12297_v9 = vpack.c.bf16 %v1797_v62, %v1796_v61  ;;  %s13527_s2 = sld [smem:[#allocation97_spill]]  ;;  %p13534_p9 = scmp.ne.s32.totalorder %s13487_s9, 0 }
 0x39e   : > { %9237 = vmatpush3.bf16.msra.mxu0 %v12187_v5  ;;  %9261 = vmatpush3.bf16.msra.mxu1 %v12187_v5  ;;  %v12211_v13 = vld [vmem:[%s12191_s17 + $0x18] sm:$0xff]  ;;  %v2080_v14 = vadd.f32 %v12205_v11, %v12202_v10  ;;  %v2093_v15 = vmul.f32 %v12202_v10, %v12202_v10  ;;  %v2094_v16 = vmul.f32 %v12205_v11, %v12205_v11  ;;  %v1786_v18 = vld [vmem:[%s13520_s14 + $0x30] sm:$0xff]  ;;  %v12230_v21 = vld [vmem:[%s12191_s17 + $0x20] sm:$0xff] }
 0x39f   : > { %9238 = vmatprep.subr.bf16.mxu0 %v11404_v0  ;;  %9262 = vmatprep.subr.bf16.mxu1 %v11404_v0  ;;  %v1787_v19 = vld [vmem:[%s13520_s14 + $0x38] sm:$0xff]  ;;  %v2095_v20 = vmul.f32 %v12208_v12, %v12208_v12  ;;  %v12233_v22 = vld [vmem:[%s12191_s17 + $0x28] sm:$0xff]  ;;  %v2096_v24 = vmul.f32 %v12211_v13, %v12211_v13  ;;  %v1788_v26 = vld [vmem:[%s13520_s14 + $0x40] sm:$0xff]  ;;  %v2097_v31 = vmul.f32 %v12230_v21, %v12230_v21 }
 0x3a0   : > { %v2081_v23 = vadd.f32 %v2080_v14, %v12208_v12  ;;  %v2101_v25 = vadd.f32 %v2094_v16, %v2093_v15  ;;  %v1789_v27 = vld [vmem:[%s13520_s14 + $0x48] sm:$0xff]  ;;  %v12241_v28 = vld [vmem:[%s12191_s17 + $0x30] sm:$0xff]  ;;  %v12246_v30 = vpack.c.bf16 %v1787_v19, %v1786_v18  ;;  %v12253_v33 = vld [vmem:[%s12191_s17 + $0x38] sm:$0xff]  ;;  %v2098_v35 = vmul.f32 %v12233_v22, %v12233_v22 }
 0x3a1   : > { %v1790_v37 = vld [vmem:[%s13520_s14 + $0x50] sm:$0xff]  ;;  %v1791_v38 = vld [vmem:[%s13520_s14 + $0x58] sm:$0xff]  ;;  %v12263_v40 = vpack.c.bf16 %v1789_v27, %v1788_v26  ;;  %v2099_v41 = vmul.f32 %v12241_v28, %v12241_v28  ;;  %v2100_v44 = vmul.f32 %v12253_v33, %v12253_v33  ;;  %v1792_v46 = vld [vmem:[%s13520_s14 + $0x60] sm:$0xff] }
 0x3a2   : > { %9240 = vmatpush3.bf16.msra.mxu0 %v12195_v7  ;;  %9264 = vmatpush3.bf16.msra.mxu1 %v12195_v7  ;;  %v2082_v29 = vadd.f32 %v2081_v23, %v12211_v13  ;;  %v2102_v32 = vadd.f32 %v2101_v25, %v2095_v20  ;;  %v1793_v47 = vld [vmem:[%s13520_s14 + $0x68] sm:$0xff]  ;;  %v12277_v49 = vpack.c.bf16 %v1791_v38, %v1790_v37  ;;  %v1794_v53 = vld [vmem:[%s13520_s14 + $0x70] sm:$0xff]  ;;  %v1795_v54 = vld [vmem:[%s13520_s14 + $0x78] sm:$0xff] }
 0x3a3   : > { %9241 = vmatprep.subr.bf16.mxu0 %v11404_v0  ;;  %9265 = vmatprep.subr.bf16.mxu1 %v11404_v0  ;;  %v12285_v56 = vpack.c.bf16 %v1793_v47, %v1792_v46  ;;  %v12291_v63 = vpack.c.bf16 %v1795_v54, %v1794_v53  ;;  %v1798_v15 = vld [vmem:[#allocation5 + $0x10] sm:$0xff]  ;;  %v1799_v16 = vld [vmem:[#allocation5 + $0x18] sm:$0xff]  ;;  %v1800_v19 = vld [vmem:[%s13522_s16] sm:$0xff] }
 0x3a4   : > { %v2083_v34 = vadd.f32 %v2082_v29, %v12230_v21  ;;  %v2103_v36 = vadd.f32 %v2102_v32, %v2096_v24  ;;  %v12309_v18 = vpack.c.bf16 %v1799_v16, %v1798_v15  ;;  %v1801_v20 = vld [vmem:[%s13522_s16 + $0x8] sm:$0xff]  ;;  %v1802_v29 = vld [vmem:[%s13522_s16 + $0x10] sm:$0xff]  ;;  %v1812_v62 = vld [vmem:[%s13522_s16 + $0x60] sm:$0xff] }
 0x3a5   : > { %v12317_v24 = vpack.c.bf16 %v1801_v20, %v1800_v19  ;;  %v12328_v37 = vld [vmem:[%s12110_s25] sm:$0xff]  ;;  %v12331_v38 = vld [vmem:[%s12110_s25 + $0x8] sm:$0xff] }
 0x3a6   : > { %9243 = vmatpush3.bf16.msra.mxu0 %v12221_v17  ;;  %9267 = vmatpush3.bf16.msra.mxu1 %v12221_v17  ;;  %v2084_v39 = vadd.f32 %v2083_v34, %v12233_v22  ;;  %v2104_v42 = vadd.f32 %v2103_v36, %v2097_v31  ;;  %v1803_v31 = vld [vmem:[%s13522_s16 + $0x18] sm:$0xff]  ;;  %v1806_v47 = vld [vmem:[%s13522_s16 + $0x30] sm:$0xff]  ;;  %v1809_v53 = vld [vmem:[%s13522_s16 + $0x48] sm:$0xff] }
 0x3a7   : > { %9244 = vmatprep.subr.bf16.mxu0 %v11404_v0  ;;  %9268 = vmatprep.subr.bf16.mxu1 %v11404_v0  ;;  %v12323_v36 = vpack.c.bf16 %v1803_v31, %v1802_v29  ;;  %v1815_v15 = vld [vmem:[%s13522_s16 + $0x78] sm:$0xff] }
 0x3a8   : > { %v2085_v43 = vadd.f32 %v2084_v39, %v12241_v28  ;;  %v2105_v45 = vadd.f32 %v2104_v42, %v2098_v35  ;;  %v1805_v42 = vld [vmem:[%s13522_s16 + $0x28] sm:$0xff] }
 0x3aa   : > { %9246 = vmatpush3.bf16.msra.mxu0 %v12246_v30  ;;  %9270 = vmatpush3.bf16.msra.mxu1 %v12246_v30  ;;  %v2086_v48 = vadd.f32 %v2085_v43, %v12253_v33  ;;  %v2106_v50 = vadd.f32 %v2105_v45, %v2099_v41  ;;  %v1804_v41 = vld [vmem:[%s13522_s16 + $0x20] sm:$0xff] }
 0x3ab   : > { %9247 = vmatprep.subr.bf16.mxu0 %v11404_v0  ;;  %9271 = vmatprep.subr.bf16.mxu1 %v11404_v0  ;;  %v12339_v45 = vpack.c.bf16 %v1805_v42, %v1804_v41  ;;  %v1818_v41 = vld [vmem:[#allocation7 + $0x10] sm:$0xff]  ;;  %v1819_v42 = vld [vmem:[#allocation7 + $0x18] sm:$0xff] }
 0x3ac   : > { %v2087_v51 = vrot.slane %v2086_v48, 4  ;;  %v2107_v52 = vadd.f32 %v2106_v50, %v2100_v44  ;;  %v2460_v44 = vadd.f32 %v12331_v38, %v12328_v37 }
 0x3ae   : > { %9249 = vmatpush3.bf16.msra.mxu0 %v12263_v40  ;;  %9273 = vmatpush3.bf16.msra.mxu1 %v12263_v40  ;;  %v2088_v55 = vadd.f32 %v2087_v51, %v2086_v48  ;;  %v2108_v57 = vrot.slane %v2107_v52, 4  ;;  %v1807_v48 = vld [vmem:[%s13522_s16 + $0x38] sm:$0xff]  ;;  %v2461_v50 = vrot.slane %v2460_v44, 4 }
 0x3af   : > { %9250 = vmatprep.subr.bf16.mxu0 %v11404_v0  ;;  %9274 = vmatprep.subr.bf16.mxu1 %v11404_v0  ;;  %v12345_v51 = vpack.c.bf16 %v1807_v48, %v1806_v47  ;;  %v2408_v48 = vlaneseq }
 0x3b0   : > { %v2089_v58 = vrot.slane %v2088_v55, 2  ;;  %v2109_v59 = vadd.f32 %v2108_v57, %v2107_v52  ;;  %v1808_v52 = vld [vmem:[%s13522_s16 + $0x40] sm:$0xff]  ;;  %v2462_v54 = vadd.f32 %v2461_v50, %v2460_v44  ;;  %v1810_v57 = vld [vmem:[%s13522_s16 + $0x50] sm:$0xff] }
 0x3b1   : > { %v12412_v44 = vld [vmem:[#allocation16] sm:$0xff]   ;;  %v12415_v50 = vshrl.u32 %v2408_v48, 7 }
 0x3b2   : > { %9252 = vmatpush3.bf16.msra.mxu0 %v12277_v49  ;;  %9276 = vmatpush3.bf16.msra.mxu1 %v12277_v49  ;;  %v2090_v60 = vadd.f32 %v2089_v58, %v2088_v55  ;;  %v2110_v2 = vrot.slane %v2109_v59, 2  ;;  %v12351_v55 = vpack.c.bf16 %v1809_v53, %v1808_v52  ;;  %v1811_v58 = vld [vmem:[%s13522_s16 + $0x58] sm:$0xff] }
 0x3b3   : > { %9253 = vmatprep.subr.bf16.mxu0 %v11404_v0  ;;  %9277 = vmatprep.subr.bf16.mxu1 %v11404_v0  ;;  %v12418_v52 = vsub.s32 0, %v12415_v50 }
 0x3b4   : > { %v2091_v3 = vrot.slane %v2090_v60, 1  ;;  %v2111_v4 = vadd.f32 %v2110_v2, %v2109_v59  ;;  %v2463_v59 = vrot.slane %v2462_v54, 2  ;;  %v1813_v2 = vld [vmem:[%s13522_s16 + $0x68] sm:$0xff] }
 0x3b6   : > { %9255 = vmatpush3.bf16.msra.mxu0 %v12285_v56  ;;  %9279 = vmatpush3.bf16.msra.mxu1 %v12285_v56  ;;  %v2092_v6 = vadd.f32 %v2091_v3, %v2090_v60  ;;  %v2112_v8 = vrot.slane %v2111_v4, 1  ;;  %v12357_v60 = vpack.c.bf16 %v1811_v58, %v1810_v57  ;;  %v2467_v3 = vmul.f32 %v12328_v37, %v12328_v37 }
 0x3b7   : > { %9256 = vmatprep.subr.bf16.mxu0 %v11404_v0  ;;  %9280 = vmatprep.subr.bf16.mxu1 %v11404_v0 }
 0x3b8   : > { %v2113_v14 = vadd.f32 %v2112_v8, %v2111_v4  ;;  %v2468_v4 = vmul.f32 %v12331_v38, %v12331_v38  ;;  %v12372_v8 = vpack.c.bf16 %v1813_v2, %v1812_v62 }
 0x3ba   : > { %9258 = vmatpush3.bf16.msra.mxu0 %v12291_v63  ;;  %9282 = vmatpush3.bf16.msra.mxu1 %v12291_v63  ;;  %v2469_v16 = vadd.f32 %v2468_v4, %v2467_v3  ;;  %v7729_v3 = vld [vmem:[#allocation8] ss:$0 sm:$0xff] }
 0x3bb   : > { %9283 = vmatprep.subr.bf16.mxu0 %v11404_v0  ;;  %9289 = vmatprep.subr.bf16.mxu1 %v11404_v0 }
 0x3bd   : > { %8432 = vmatmul.mubr.f32.vlgmr.msra.gmra.mrb[0].mxu0 %v2092_v6  ;;  %8467 = vmatmul.mubr.f32.vlgmr.msra.gmra.mrb[0].mxu1 %v2113_v14  ;;  %v2464_v6 = vadd.f32 %v2463_v59, %v2462_v54  ;;  %v1814_v14 = vld [vmem:[%s13522_s16 + $0x70] sm:$0xff] }
 0x3be   : > { %9285 = vmatpush3.bf16.msra.mxu0 %v12297_v9  ;;  %8477 = vmatprep.mubr.msk.f32.mxu0 %vm11405_vm0, %v11406_v1  ;;  %v12380_v20 = vpack.c.bf16 %v1815_v15, %v1814_v14 }
 0x3bf   : > { %9286 = vmatprep.subr.bf16.mxu0 %v11404_v0  ;;  %9291 = vmatpush3.bf16.msra.mxu1 %v12297_v9  ;;  %v2465_v19 = vrot.slane %v2464_v6, 1 }
 0x3c0   : > { %8488 = vmatprep.mubr.msk.f32.mxu1 %vm11405_vm0, %v11406_v1  ;;  %9292 = vmatprep.subr.bf16.mxu1 %v11404_v0 }
 0x3c2   : > { %9288 = vmatpush3.bf16.msra.mxu0 %v12309_v18 }
 0x3c3   : > { %9294 = vmatpush3.bf16.msra.mxu1 %v12309_v18  ;;  %9295 = vmatprep.subr.bf16.mxu0 %v11404_v0 }
 0x3c4   : > { %9319 = vmatprep.subr.bf16.mxu1 %v11404_v0 }
 0x490   : > { %v2180_v23 = vpop.f32.mrb[0].mxu0  ;;  %v2251_v27 = vpop.f32.mrb[0].mxu1 }
 0x491   : > { %v2184_v25 = vmul.f32 0.00390625, %v2180_v23  ;;  %v8433_v26 = vpop.f32.mrb[1].mxu0  ;;  %v2255_v32 = vmul.f32 0.00390625, %v2251_v27  ;;  %v8468_v34 = vpop.f32.mrb[1].mxu1  ;;  %v2470_v23 = vrot.slane %v2469_v16, 4 }
 0x492   : > { %v1816_v34 = vld [vmem:[#allocation7] sm:$0xff] }
 0x493   : > { %v2256_v35 = vmul.f32 %v2184_v25, %v2184_v25  ;;  %8478 = vmatmul.mubr.msk.f32.vlgmr.msra.gmra.mrb[2].mxu0 %vm2261_vm1, %v2184_v25  ;;  %v2466_v25 = vadd.f32 %v2465_v19, %v2464_v6  ;;  %v2471_v26 = vadd.f32 %v2470_v23, %v2469_v16 }
 0x494   : > { %9297 = vmatpush3.bf16.msra.mxu0 %v12317_v24  ;;  %8523 = vmatprep.mubr.msk.f32.mxu0 %vm11405_vm0, %v11406_v1 }
 0x495   : > { %v2257_v39 = vsub.f32 %v2255_v32, %v2256_v35  ;;  %9298 = vmatprep.subr.bf16.mxu0 %v11404_v0  ;;  %v2472_v27 = vrot.slane %v2471_v26, 2  ;;  %v1817_v35 = vld [vmem:[#allocation7 + $0x8] sm:$0xff] }
 0x497   : > { %v2258_v43 = vmax.f32 %v2257_v39, 0.0  ;;  %v2473_v29 = vadd.f32 %v2472_v27, %v2471_v26  ;;  %v12401_v39 = vpack.c.bf16 %v1817_v35, %v1816_v34 }
 0x498   : > { %9300 = vmatpush3.bf16.msra.mxu0 %v12323_v36 }
 0x499   : > { %v2259_v46 = vadd.f32 1e-06, %v2258_v43  ;;  %9301 = vmatprep.subr.bf16.mxu0 %v11404_v0  ;;  %v2474_v31 = vrot.slane %v2473_v29, 1  ;;  %v12407_v43 = vpack.c.bf16 %v1819_v42, %v1818_v41 }
 0x49b   : > { %10165 = vrsqrt.f32 %v2259_v46  ;;  %v2475_v32 = vadd.f32 %v2474_v31, %v2473_v29 }
 0x49c   : > { %9303 = vmatpush3.bf16.msra.mxu0 %v12339_v45 }
 0x49d   : > { %9304 = vmatprep.subr.bf16.mxu0 %v11404_v0 }
 0x4a0   : > { %9306 = vmatpush3.bf16.msra.mxu0 %v12345_v51 }
 0x4a1   : > { %9307 = vmatprep.subr.bf16.mxu0 %v11404_v0 }
 0x4a4   : > { %9309 = vmatpush3.bf16.msra.mxu0 %v12351_v55 }
 0x4a5   : > { %v10166_v61 = vpop.eup %10165  ;;  %9310 = vmatprep.subr.bf16.mxu0 %v11404_v0 }
 0x4a6   : > { %8489 = vmatmul.mubr.msk.f32.vlgmr.msra.gmra.mrb[2].mxu1 %vm2261_vm1, %v10166_v61 }
 0x4a7   : > { %9321 = vmatpush3.bf16.msra.mxu1 %v12317_v24  ;;  %8558 = vmatprep.mubr.msk.f32.mxu1 %vm11405_vm0, %v11406_v1 }
 0x4a8   : > { %9322 = vmatprep.subr.bf16.mxu1 %v11404_v0  ;;  %9312 = vmatpush3.bf16.msra.mxu0 %v12357_v60 }
 0x4a9   : > { %9313 = vmatprep.subr.bf16.mxu0 %v11404_v0 }
 0x4ab   : > { %9324 = vmatpush3.bf16.msra.mxu1 %v12323_v36 }
 0x4ac   : > { %9325 = vmatprep.subr.bf16.mxu1 %v11404_v0  ;;  %9315 = vmatpush3.bf16.msra.mxu0 %v12372_v8 }
 0x4ad   : > { %9316 = vmatprep.subr.bf16.mxu0 %v11404_v0 }
 0x4af   : > { %9327 = vmatpush3.bf16.msra.mxu1 %v12339_v45 }
 0x4b0   : > { %9328 = vmatprep.subr.bf16.mxu1 %v11404_v0  ;;  %9318 = vmatpush3.bf16.msra.mxu0 %v12380_v20 }
 0x4b1   : > { %9343 = vmatprep.subr.bf16.mxu0 %v11404_v0 }
 0x4b3   : > { %9330 = vmatpush3.bf16.msra.mxu1 %v12345_v51  ;;  %8524 = vmatmul.mubr.f32.vlgmr.msra.gmra.mrb[4].mxu0 %v2466_v25  ;;  %v7730_v25 = vld [vmem:[#allocation10] ss:$0 sm:$0xff] }
 0x4b4   : > { %9331 = vmatprep.subr.bf16.mxu1 %v11404_v0  ;;  %8569 = vmatprep.mubr.msk.f32.mxu0 %vm11405_vm0, %v11406_v1 }
 0x4b5   : > { %9345 = vmatpush3.bf16.msra.mxu0 %v12401_v39 }
 0x4b6   : > { %9346 = vmatprep.subr.bf16.mxu0 %v11404_v0 }
 0x4b7   : > { %9333 = vmatpush3.bf16.msra.mxu1 %v12351_v55 }
 0x4b8   : > { %9334 = vmatprep.subr.bf16.mxu1 %v11404_v0 }
 0x4b9   : > { %9348 = vmatpush3.bf16.msra.mxu0 %v12407_v43 }
 0x4ba   : > { %8583 = vmatprep.subr.bf16.mxu0 %v11406_v1 }
 0x4bb   : > { %9336 = vmatpush3.bf16.msra.mxu1 %v12357_v60 }
 0x4bc   : > { %9337 = vmatprep.subr.bf16.mxu1 %v11404_v0 }
 0x4bf   : > { %9339 = vmatpush3.bf16.msra.mxu1 %v12372_v8 }
 0x4c0   : > { %9340 = vmatprep.subr.bf16.mxu1 %v11404_v0 }
 0x4c3   : > { %9342 = vmatpush3.bf16.msra.mxu1 %v12380_v20 }
 0x4c4   : > { %9349 = vmatprep.subr.bf16.mxu1 %v11404_v0 }
 0x4c6   : > { %8559 = vmatmul.mubr.f32.vlgmr.msra.gmra.mrb[4].mxu1 %v2475_v32 }
 0x4c7   : > { %8580 = vmatprep.mubr.msk.f32.mxu1 %vm11405_vm0, %v11406_v1  ;;  %9351 = vmatpush3.bf16.msra.mxu1 %v12401_v39 }
 0x4c8   : > { %9352 = vmatprep.subr.bf16.mxu1 %v11404_v0 }
 0x4cb   : > { %9354 = vmatpush3.bf16.msra.mxu1 %v12407_v43 }
 0x4cc   : > { %8603 = vmatprep.subr.bf16.mxu1 %v12412_v44 }
 0x566   : > { %v2331_v46 = vpop.f32.mrb[2].mxu0 }
 0x567   : > { %v8479_v47 = vpop.f32.mrb[3].mxu0  ;;  %v2411_v53 = vrot.slane %v2331_v46, %v12418_v52 }
 0x569   : > { %v2412_v57 = vsub.f32 %v12202_v10, %v2411_v53  ;;  %v2413_v61 = vsub.f32 %v12205_v11, %v2411_v53  ;;  %v2414_v62 = vsub.f32 %v12208_v12, %v2411_v53  ;;  %v2415_v2 = vsub.f32 %v12211_v13, %v2411_v53 }
 0x56a   : > { %v2416_v4 = vsub.f32 %v12230_v21, %v2411_v53  ;;  %v2417_v6 = vsub.f32 %v12233_v22, %v2411_v53  ;;  %v2418_v14 = vsub.f32 %v12241_v28, %v2411_v53  ;;  %v2419_v15 = vsub.f32 %v12253_v33, %v2411_v53  ;;  %v7848_v28 = vld [vmem:[#allocation38] ss:$0 sm:$0xff] }
 0x579   : > { %v2404_v54 = vpop.f32.mrb[2].mxu1 }
 0x57a   : > { %v2423_v58 = vrot.slane %v2404_v54, %v12418_v52  ;;  %v8490_v59 = vpop.f32.mrb[3].mxu1 }
 0x57c   : > { %v2424_v16 = vmul.f32 %v2423_v58, %v2412_v57  ;;  %v2425_v10 = vmul.f32 %v2423_v58, %v2413_v61  ;;  %v2426_v19 = vmul.f32 %v2423_v58, %v2414_v62  ;;  %v2427_v23 = vmul.f32 %v2423_v58, %v2415_v2  ;;  %v7849_v57 = vld [vmem:[#allocation40] ss:$0 sm:$0xff] }
 0x57d   : > { %v2428_v26 = vmul.f32 %v2423_v58, %v2416_v4  ;;  %v2429_v11 = vmul.f32 %v2423_v58, %v2417_v6  ;;  %v2430_v27 = vmul.f32 %v2423_v58, %v2418_v14  ;;  %v2431_v12 = vmul.f32 %v2423_v58, %v2419_v15 }
 0x57e   : > { %v2438_v29 = vmul.f32 %v7729_v3, %v2424_v16  ;;  %v2439_v13 = vmul.f32 %v7729_v3, %v2425_v10  ;;  %v2440_v31 = vmul.f32 %v7729_v3, %v2426_v19  ;;  %v2441_v32 = vmul.f32 %v7729_v3, %v2427_v23 }
 0x57f   : > { %v2442_v21 = vmul.f32 %v7729_v3, %v2428_v26  ;;  %v2443_v34 = vmul.f32 %v7729_v3, %v2429_v11  ;;  %v2444_v22 = vmul.f32 %v7729_v3, %v2430_v27  ;;  %v2445_v35 = vmul.f32 %v7729_v3, %v2431_v12 }
 0x580   : > { %v2452_v41 = vadd.f32 %v7730_v25, %v2438_v29  ;;  %v2453_v33 = vadd.f32 %v7730_v25, %v2439_v13  ;;  %v12430_v42 = vadd.f32 %v7730_v25, %v2440_v31  ;;  %v12432_v46 = vadd.f32 %v7730_v25, %v2441_v32 }
 0x581   : > { %v12434_v47 = vadd.f32 %v7730_v25, %v2442_v21  ;;  %v12436_v48 = vadd.f32 %v7730_v25, %v2443_v34  ;;  %v12438_v53 = vadd.f32 %v7730_v25, %v2444_v22  ;;  %v12440_v54 = vadd.f32 %v7730_v25, %v2445_v35 }
 0x582   : > { %v2893_v58 = vpack.c.bf16 %v2453_v33, %v2452_v41  ;;  %v2894_v59 = vpack.c.bf16 %v12432_v46, %v12430_v42  ;;  %v5375_v61 = vmul.f32 %v7848_v28, %v2424_v16  ;;  %v5376_v62 = vmul.f32 %v7848_v28, %v2425_v10 }
 0x583   : > { %v2895_v2 = vpack.c.bf16 %v12436_v48, %v12434_v47  ;;  %v2896_v3 = vpack.c.bf16 %v12440_v54, %v12438_v53  ;;  %v5377_v4 = vmul.f32 %v7848_v28, %v2426_v19  ;;  %v5378_v6 = vmul.f32 %v7848_v28, %v2427_v23  ;;  %v10006_v53 = vld [vmem:[#allocation16 + $0x8] sm:$0xff]  }
 0x584   : > { %v12448_v14 = vadd.f32 %v7849_v57, %v5375_v61  ;;  %v12450_v15 = vadd.f32 %v7849_v57, %v5376_v62  ;;  %v5379_v25 = vmul.f32 %v7848_v28, %v2428_v26  ;;  %v5380_v29 = vmul.f32 %v7848_v28, %v2429_v11  ;;  %v10008_v61 = vld [vmem:[#allocation16 + $0x18] sm:$0xff]   ;;  %v10009_v62 = vld [vmem:[#allocation16 + $0x20] sm:$0xff]  }
 0x585   : > { %v12452_v13 = vadd.f32 %v7849_v57, %v5377_v4  ;;  %v12454_v31 = vadd.f32 %v7849_v57, %v5378_v6  ;;  %v5381_v16 = vmul.f32 %v7848_v28, %v2430_v27  ;;  %v5382_v10 = vmul.f32 %v7848_v28, %v2431_v12  ;;  %v10010_v4 = vld [vmem:[#allocation16 + $0x28] sm:$0xff]   ;;  %v10011_v6 = vld [vmem:[#allocation16 + $0x30] sm:$0xff]  }
 0x586   : > { %v2542_v32 = vpop.f32.mrb[4].mxu0  ;;  %v5397_v21 = vpack.c.bf16 %v12450_v15, %v12448_v14  ;;  %v12458_v34 = vadd.f32 %v7849_v57, %v5379_v25  ;;  %v12460_v19 = vadd.f32 %v7849_v57, %v5380_v29  ;;  %v10014_v25 = vld [vmem:[%s13523_s4 + $0x8] sm:$0xff]   ;;  %v10015_v29 = vld [vmem:[%s13523_s4 + $0x10] sm:$0xff]  }
 0x587   : > { %v2546_v23 = vmul.f32 0.015625, %v2542_v32  ;;  %v8525_v22 = vpop.f32.mrb[5].mxu0  ;;  %v5398_v26 = vpack.c.bf16 %v12454_v31, %v12452_v13  ;;  %v12464_v11 = vadd.f32 %v7849_v57, %v5381_v16  ;;  %v12466_v35 = vadd.f32 %v7849_v57, %v5382_v10  ;;  %v10007_v57 = vld [vmem:[#allocation16 + $0x10] sm:$0xff]   ;;  %v10110_v14 = vld [vmem:[%s13527_s2 + $0x28] sm:$0xff]  }
 0x588   : > { %v5399_v27 = vpack.c.bf16 %v12460_v19, %v12458_v34  ;;  %v10016_v16 = vld [vmem:[%s13523_s4 + $0x18] sm:$0xff]  }
 0x589   : > { %8570 = vmatmul.mubr.msk.f32.vlgmr.msra.gmra.mrb[6].mxu0 %vm2261_vm1, %v2546_v23  ;;  %v5400_v12 = vpack.c.bf16 %v12466_v35, %v12464_v11  ;;  %v2618_v28 = vmul.f32 %v2546_v23, %v2546_v23  ;;  %v10020_v10 = vld [vmem:[%s13523_s4 + $0x38] sm:$0xff]  }
 0x58a   : > { %8599 = vmatprep.mubr.msk.bf16.mxu0 %vm11405_vm0, %v11406_v1 }
 0x599   : > { %v2613_v41 = vpop.f32.mrb[4].mxu1 }
 0x59a   : > { %v2617_v33 = vmul.f32 0.015625, %v2613_v41  ;;  %v8560_v42 = vpop.f32.mrb[5].mxu1 }
 0x59c   : > { %v2619_v46 = vsub.f32 %v2617_v33, %v2618_v28 }
 0x59e   : > { %v2620_v47 = vmax.f32 %v2619_v46, 0.0 }
 0x5a0   : > { %v2621_v48 = vadd.f32 1e-06, %v2620_v47  ;;  %v7733_v47 = vld [vmem:[#allocation11] ss:$0 sm:$0xff] }
 0x5a2   : > { %10167 = vrsqrt.f32 %v2621_v48 }
 0x5ac   : > { %v10168_v54 = vpop.eup %10167 }
 0x5ad   : > { %8581 = vmatmul.mubr.msk.f32.vlgmr.msra.gmra.mrb[6].mxu1 %vm2261_vm1, %v10168_v54  ;;  %v7734_v54 = vld [vmem:[#allocation13] ss:$0 sm:$0xff] }
 0x5ae   : > { %8604 = vmatpush3.bf16.msra.mxu1 %v12412_v44  ;;  %8619 = vmatprep.mubr.bf16.mxu1 %v2893_v58  ;;  %v10012_v44 = vld [vmem:[#allocation16 + $0x38] sm:$0xff]  }
 0x5af   : > { %8605 = vmatprep.subr.bf16.mxu1 %v10006_v53  ;;  %v10013_v58 = vld [vmem:[%s13523_s4] sm:$0xff]  }
 0x5b0   : > { %8584 = vmatpush3.bf16.msra.mxu0 %v10013_v58  ;;  %v7744_v58 = vld [vmem:[#allocation17] ss:$0 sm:$0xff] }
 0x5b1   : > { %8585 = vmatprep.subr.bf16.mxu0 %v11406_v1 }
 0x5b2   : > { %8606 = vmatpush3.bf16.msra.mxu1 %v10006_v53 }
 0x5b3   : > { %8607 = vmatprep.subr.bf16.mxu1 %v10007_v57 }
 0x5b4   : > { %8586 = vmatpush3.bf16.msra.mxu0 %v10014_v25 }
 0x5b5   : > { %8587 = vmatprep.subr.bf16.mxu0 %v11406_v1 }
 0x5b6   : > { %8608 = vmatpush3.bf16.msra.mxu1 %v10007_v57 }
 0x5b7   : > { %8609 = vmatprep.subr.bf16.mxu1 %v10008_v61 }
 0x5b8   : > { %8588 = vmatpush3.bf16.msra.mxu0 %v10015_v29 }
 0x5b9   : > { %8589 = vmatprep.subr.bf16.mxu0 %v11406_v1 }
 0x5ba   : > { %8610 = vmatpush3.bf16.msra.mxu1 %v10008_v61 }
 0x5bb   : > { %8611 = vmatprep.subr.bf16.mxu1 %v10009_v62 }
 0x5bc   : > { %8590 = vmatpush3.bf16.msra.mxu0 %v10016_v16 }
 0x5bd   : > { %8591 = vmatprep.subr.bf16.mxu0 %v11406_v1 }
 0x5be   : > { %8612 = vmatpush3.bf16.msra.mxu1 %v10009_v62 }
 0x5bf   : > { %8613 = vmatprep.subr.bf16.mxu1 %v10010_v4 }
 0x5c2   : > { %8614 = vmatpush3.bf16.msra.mxu1 %v10010_v4 }
 0x5c3   : > { %8615 = vmatprep.subr.bf16.mxu1 %v10011_v6 }
 0x5c6   : > { %8616 = vmatpush3.bf16.msra.mxu1 %v10011_v6 }
 0x5c7   : > { %8617 = vmatprep.subr.bf16.mxu1 %v10012_v44 }
 0x5ca   : > { %8618 = vmatpush3.bf16.msra.mxu1 %v10012_v44 }
 0x5cb   : > { %8639 = vmatprep.subr.bf16.mxu1 %v11406_v1 }
 0x5cd   : > { %8620 = vmatmul.mubr.bf16.vlgmr.msra.gmra.mrb[8].mxu1 %v2894_v59  ;;  %v10017_v59 = vld [vmem:[%s13523_s4 + $0x20] sm:$0xff]  }
 0x5ce   : > { %8623 = vmatprep.mubr.bf16.mxu1 %v2895_v2  ;;  %8592 = vmatpush3.bf16.msra.mxu0 %v10017_v59  ;;  %v10018_v2 = vld [vmem:[%s13523_s4 + $0x28] sm:$0xff]  }
 0x5cf   : > { %8593 = vmatprep.subr.bf16.mxu0 %v11406_v1 }
 0x5d2   : > { %8594 = vmatpush3.bf16.msra.mxu0 %v10018_v2 }
 0x5d3   : > { %8595 = vmatprep.subr.bf16.mxu0 %v11406_v1 }
 0x5d5   : > { %8624 = vmatmul.mubr.bf16.gmra.mrb[12].mxu1 %v2896_v3  ;;  %v10019_v3 = vld [vmem:[%s13523_s4 + $0x30] sm:$0xff]   ;;  %s11411_s4 = smov [#allocation50]  }
 0x5d6   : > { %8647 = vmatprep.mubr.msk.bf16.mxu1 %vm11405_vm0, %v11406_v1  ;;  %8596 = vmatpush3.bf16.msra.mxu0 %v10019_v3 }
 0x5d7   : > { %8597 = vmatprep.subr.bf16.mxu0 %v11406_v1 }
 0x5da   : > { %8598 = vmatpush3.bf16.msra.mxu0 %v10020_v10 }
 0x5db   : > { %8627 = vmatprep.subr.bf16.mxu0 %v11406_v1 }
 0x65c   : > { %v2692_v32 = vpop.f32.mrb[6].mxu0 }
 0x65d   : > { %v8571_v23 = vpop.f32.mrb[7].mxu0  ;;  %v2772_v22 = vrot.slane %v2692_v32, %v12418_v52 }
 0x65f   : > { %v2773_v41 = vsub.f32 %v12328_v37, %v2772_v22  ;;  %v2774_v33 = vsub.f32 %v12331_v38, %v2772_v22 }
 0x680   : > { %v2765_v28 = vpop.f32.mrb[6].mxu1 }
 0x681   : > { %v2778_v42 = vrot.slane %v2765_v28, %v12418_v52  ;;  %v8582_v46 = vpop.f32.mrb[7].mxu1 }
 0x683   : > { %v2779_v48 = vmul.f32 %v2778_v42, %v2773_v41  ;;  %v2780_v53 = vmul.f32 %v2778_v42, %v2774_v33 }
 0x685   : > { %v2787_v57 = vmul.f32 %v7733_v47, %v2779_v48  ;;  %v2788_v61 = vmul.f32 %v7733_v47, %v2780_v53 }
 0x687   : > { %v2795_v62 = vadd.f32 %v7734_v54, %v2787_v57  ;;  %v2796_v4 = vadd.f32 %v7734_v54, %v2788_v61 }
 0x689   : > { %v2797_v6 = vpack.c.bf16 %v2796_v4, %v2795_v62 }
 0x68b   : > { %8600 = vmatmul.mubr.bf16.vlgmr.msra.gmra.mrb[8].mxu0 %v2797_v6 }
 0x68c   : > { %8635 = vmatprep.mubr.msk.bf16.mxu0 %vm11405_vm0, %v11406_v1 }
 0x6a0   : > { %v8621_v44 = vpop.f32.mrb[8].mxu1 }
 0x6a1   : > { %v2985_v25 = vpop.f32.mrb[9].mxu1  ;;  %v2994_v16 = vadd.f32 %v8621_v44, %v7744_v58 }
 0x6a2   : > { %v8622_v29 = vpop.f32.mrb[10].mxu1  ;;  %v2986_v3 = vadd.f32 %v7744_v58, %v2985_v25 }
 0x6a3   : > { %v2997_v59 = vadd.f32 %v8622_v29, %v7744_v58  ;;  %v2988_v2 = vpop.f32.mrb[11].mxu1 }
 0x6a4   : > { %v2989_v10 = vadd.f32 %v7744_v58, %v2988_v2 }
 0x6a5   : > { %v3018_v32 = vpack.c.bf16 %v2997_v59, %v2994_v16 }
 0x6a6   : > { %v3017_v23 = vpack.c.bf16 %v2989_v10, %v2986_v3 }
 0x6a7   : > { %v3028_v61 = vsel %vm2261_vm1, %v3018_v32, 0 }
 0x6a8   : > { %v8625_v22 = vpop.f32.mrb[12].mxu1  ;;  %3103 = vrot.lane.b32.xlu1 %v3017_v23, %s11407_s8  ;;  %v3025_v28 = vsel %vm2261_vm1, %v3017_v23, 0 }
 0x6a9   : > { %v3001_v41 = vpop.f32.mrb[13].mxu1  ;;  %8628 = vmatpush3.bf16.xpose.msra.mxu0 %v3025_v28  ;;  %v3010_v42 = vadd.f32 %v8625_v22, %v7744_v58 }
 0x6aa   : > { %v8626_v33 = vpop.f32.mrb[14].mxu1  ;;  %8629 = vmatprep.subr.bf16.mxu0 %v11406_v1  ;;  %v3002_v48 = vadd.f32 %v7744_v58, %v3001_v41 }
 0x6ab   : > { %v3013_v46 = vadd.f32 %v8626_v33, %v7744_v58  ;;  %v3004_v47 = vpop.f32.mrb[15].mxu1 }
 0x6ac   : > { %v3005_v53 = vadd.f32 %v7744_v58, %v3004_v47  ;;  %3105 = vrot.lane.b32.xlu1 %v3018_v32, %s11407_s8  ;;  %v7735_v58 = vld [vmem:[#allocation14] ss:$0 sm:$0xff] }
 0x6ad   : > { %v12506_v54 = vpack.c.bf16 %v3013_v46, %v3010_v42 }
 0x6ae   : > { %v12508_v57 = vpack.c.bf16 %v3005_v53, %v3002_v48 }
 0x6af   : > { %v3034_v4 = vsel %vm2261_vm1, %v12506_v54, 0 }
 0x6b0   : > { %3109 = vrot.lane.b32.xlu1 %v12506_v54, %s11407_s8  ;;  %v3031_v62 = vsel %vm2261_vm1, %v12508_v57, 0 }
 0x6b1   : > { %8630 = vmatpush3.bf16.xpose.msra.mxu0 %v3028_v61 }
 0x6b2   : > { %8631 = vmatprep.subr.bf16.mxu0 %v11406_v1 }
 0x6b4   : > { %3165 = vrot.lane.b32.xlu1 %v3017_v23, %s11408_s13 }
 0x6b8   : > { %3167 = vrot.lane.b32.xlu1 %v3018_v32, %s11408_s13 }
 0x6b9   : > { %8632 = vmatpush3.bf16.xpose.msra.mxu0 %v3031_v62 }
 0x6ba   : > { %8633 = vmatprep.subr.bf16.mxu0 %v11406_v1 }
 0x6bc   : > { %3169 = vrot.lane.b32.xlu1 %v12508_v57, %s11408_s13 }
 0x6c0   : > { %3171 = vrot.lane.b32.xlu1 %v12506_v54, %s11408_s13 }
 0x6c1   : > { %8634 = vmatpush3.bf16.xpose.msra.mxu0 %v3034_v4 }
 0x6c2   : > { %8663 = vmatprep.subr.bf16.mxu0 %v11406_v1 }
 0x71a   : > { %v3104_v6 = vpop.permute.xlu1 %3103 }
 0x71b   : > { %8640 = vmatpush3.bf16.msra.mxu1 %v3104_v6 }
 0x71c   : > { %8641 = vmatprep.subr.bf16.mxu1 %v11406_v1 }
 0x71e   : > { %v3106_v44 = vpop.permute.xlu1 %3105 }
 0x71f   : > { %8642 = vmatpush3.bf16.msra.mxu1 %v3106_v44 }
 0x720   : > { %8643 = vmatprep.subr.bf16.mxu1 %v11406_v1 }
 0x722   : > { %v3110_v47 = vpop.permute.xlu1 %3109 }
 0x726   : > { %v3166_v48 = vpop.permute.xlu1 %3165 }
 0x72a   : > { %v3168_v53 = vpop.permute.xlu1 %3167 }
 0x75e   : > { %v2886_v25 = vpop.f32.mrb[8].mxu0 }
 0x75f   : > { %v8601_v29 = vpop.f32.mrb[9].mxu0  ;;  %v2887_v59 = vadd.f32 %v7735_v58, %v2886_v25 }
 0x760   : > { %v2889_v16 = vpop.f32.mrb[10].mxu0 }
 0x761   : > { %v2890_v2 = vadd.f32 %v7735_v58, %v2889_v16  ;;  %v8602_v3 = vpop.f32.mrb[11].mxu0 }
 0x763   : > { %v3016_v10 = vpack.c.bf16 %v2890_v2, %v2887_v59 }
 0x765   : > { %3163 = vrot.lane.b32.xlu1 %v3016_v10, %s11408_s13  ;;  %8636 = vmatmul.mubr.msk.bf16.vlgmr.msra.gmra.mrb[12].mxu0 %vm2261_vm1, %v3016_v10 }
 0x766   : > { %8671 = vmatprep.mubr.msk.bf16.mxu0 %vm11405_vm0, %v11406_v1 }
 0x769   : > { %3252 = vrot.lane.b32.xlu1 %v3018_v32, %s11409_s5  ;;  %v3170_v32 = vpop.permute.xlu1 %3169 }
 0x76d   : > { %v3172_v58 = vpop.permute.xlu1 %3171 }
 0x7d7   : > { %v3164_v16 = vpop.permute.xlu1 %3163 }
 0x838   : > { %v3070_v22 = vpop.f32.mrb[12].mxu0 }
 0x839   : > { %v8637_v28 = vpop.f32.mrb[13].mxu0  ;;  %v3078_v41 = vsel %vm3077_vm2, %v3070_v22, -inf }
 0x83a   : > { %3079 = vmax.xlane.f32.xlu0 %v3078_v41  ;;  %v3073_v33 = vpop.f32.mrb[14].mxu0  ;;  %v3180_v28 = vsel %vm2261_vm1, %v3168_v53, 0  ;;  %v3183_v41 = vsel %vm2261_vm1, %v3170_v32, 0 }
 0x83b   : > { %v8638_v42 = vpop.f32.mrb[15].mxu0  ;;  %v3081_v46 = vsel %vm3077_vm2, %v3073_v33, -inf }
 0x83e   : > { %3082 = vmax.xlane.f32.xlu0 %v3081_v46 }
 0x854   : > { %3107 = vrot.lane.b32.xlu0 %v12508_v57, %s11407_s8 }
 0x858   : > { %3250 = vrot.lane.b32.xlu0 %v3017_v23, %s11409_s5  ;;  %v3253_v23 = vpop.permute.xlu1 %3252 }
 0x8c7   : > { %v3080_v61 = vpop.xlane.xlu0 %3079 }
 0x8c8   : > { %v3084_v62 = vsub.f32 %v3070_v22, %v3080_v61  ;;  %v3177_v22 = vsel %vm2261_vm1, %v3166_v48, 0 }
 0x8ca   : > { %v3086_v4 = vmul.f32 1.442695, %v3084_v62 }
 0x8cb   : > { %v3083_v6 = vpop.xlane.xlu0 %3082 }
 0x8cc   : > { %v3085_v44 = vsub.f32 %v3073_v33, %v3083_v6  ;;  %10169 = vpow2.f32 %v3086_v4  ;;  %v3186_v33 = vsel %vm2261_vm1, %v3172_v58, 0 }
 0x8ce   : > { %v3088_v25 = vmul.f32 1.442695, %v3085_v44 }
 0x8cf   : > { %v3108_v29 = vpop.permute.xlu0 %3107 }
 0x8d0   : > { %10171 = vpow2.f32 %v3088_v25  ;;  %8644 = vmatpush3.bf16.msra.mxu1 %v3108_v29  ;;  %v10021_v25 = vld [vmem:[#allocation19] sm:$0xff]   ;;  %v10022_v29 = vld [vmem:[#allocation19 + $0x8] sm:$0xff]  }
 0x8d1   : > { %8645 = vmatprep.subr.bf16.mxu1 %v11406_v1 }
 0x8d3   : > { %v3251_v59 = vpop.permute.xlu0 %3250 }
 0x8d4   : > { %8646 = vmatpush3.bf16.msra.mxu1 %v3110_v47  ;;  %8664 = vmatpush3.bf16.msra.mxu0 %v3251_v59 }
 0x8d5   : > { %8665 = vmatprep.subr.bf16.mxu0 %v11406_v1  ;;  %8651 = vmatprep.subr.bf16.mxu1 %v11406_v1 }
 0x8d6   : > { %v10170_v2 = vpop.eup %10169 }
 0x8d7   : > { %v3090_v44 = vsel %vm3077_vm2, %v10170_v2, 0.0 }
 0x8d8   : > { %8666 = vmatpush3.bf16.msra.mxu0 %v3253_v23 }
 0x8d9   : > { %8667 = vmatprep.subr.bf16.mxu0 %v11406_v1 }
 0x8da   : > { %v10172_v3 = vpop.eup %10171 }
 0x8db   : > { %v3098_v10 = vpack.c.bf16 %v10172_v3, %v10170_v2  ;;  %v3093_v58 = vsel %vm3077_vm2, %v10172_v3, 0.0 }
 0x8dd   : > { %8648 = vmatmul.mubr.msk.bf16.vlgmr.msra.gmra.mrb[16].mxu1 %vm3077_vm2, %v3098_v10 }
 0x8de   : > { %8652 = vmatpush3.bf16.xpose.msra.mxu1 %v3177_v22  ;;  %8659 = vmatprep.mubr.msk.bf16.mxu1 %vm11405_vm0, %v11406_v1 }
 0x8df   : > { %8653 = vmatprep.subr.bf16.mxu1 %v11406_v1 }
 0x8e6   : > { %8654 = vmatpush3.bf16.xpose.msra.mxu1 %v3180_v28 }
 0x8e7   : > { %8655 = vmatprep.subr.bf16.mxu1 %v11406_v1 }
 0x8ee   : > { %8656 = vmatpush3.bf16.xpose.msra.mxu1 %v3183_v41 }
 0x8ef   : > { %8657 = vmatprep.subr.bf16.mxu1 %v11406_v1 }
 0x8f6   : > { %8658 = vmatpush3.bf16.xpose.msra.mxu1 %v3186_v33 }
 0x8f7   : > { %8683 = vmatprep.subr.bf16.mxu1 %v11406_v1 }
 0x8fd   : > { %8660 = vmatmul.mubr.msk.bf16.vlgmr.msra.gmra.mrb[20].mxu1 %vm2261_vm1, %v3164_v16 }
 0x8fe   : > { %8687 = vmatprep.mubr.msk.bf16.mxu1 %vm11405_vm0, %v11406_v1  ;;  %8684 = vmatpush3.bf16.msra.mxu1 %v10021_v25 }
 0x8ff   : > { %8685 = vmatprep.subr.bf16.mxu1 %v11406_v1 }
 0x902   : > { %8686 = vmatpush3.bf16.msra.mxu1 %v10022_v29 }
 0x903   : > { %9379 = vmatprep.subr.bf16.mxu1 %v11404_v0 }
 0x9b0   : > { %v3152_v42 = vpop.f32.mrb[16].mxu1 }
 0x9b1   : > { %v8649_v46 = vpop.f32.mrb[17].mxu1 }
 0x9b2   : > { %v3155_v47 = vpop.f32.mrb[18].mxu1 }
 0x9b3   : > { %v8650_v48 = vpop.f32.mrb[19].mxu1 }
 0x9d0   : > { %v3222_v53 = vpop.f32.mrb[20].mxu1 }
 0x9d1   : > { %v8661_v61 = vpop.f32.mrb[21].mxu1  ;;  %v3229_v32 = vsel %vm3077_vm2, %v3222_v53, -inf }
 0x9d2   : > { %3230 = vmax.xlane.f32.xlu0 %v3229_v32  ;;  %v3225_v62 = vpop.f32.mrb[22].mxu1 }
 0x9d3   : > { %v8662_v4 = vpop.f32.mrb[23].mxu1  ;;  %v3232_v6 = vsel %vm3077_vm2, %v3225_v62, -inf }
 0x9d4   : > { %3233 = vmax.xlane.f32.xlu1 %v3232_v6 }
 0x9e5   : > { %3256 = vrot.lane.b32.xlu1 %v12506_v54, %s11409_s5 }
 0x9e8   : > { %3254 = vrot.lane.b32.xlu0 %v12508_v57, %s11409_s5 }
 0xa07   : > { %3091 = vadd.xlane.f32.xlu0 %v3090_v44 }
 0xa09   : > { %3094 = vadd.xlane.f32.xlu1 %v3093_v58 }
 0xa5f   : > { %v3231_v16 = vpop.xlane.xlu0 %3230 }
 0xa60   : > { %v3235_v59 = vsub.f32 %v3222_v53, %v3231_v16 }
 0xa61   : > { %v3234_v54 = vpop.xlane.xlu1 %3233 }
 0xa62   : > { %v3237_v23 = vmul.f32 1.442695, %v3235_v59  ;;  %v3236_v10 = vsub.f32 %v3225_v62, %v3234_v54 }
 0xa63   : > { %v3255_v57 = vpop.permute.xlu0 %3254 }
 0xa64   : > { %10173 = vpow2.f32 %v3237_v23  ;;  %v3239_v2 = vmul.f32 1.442695, %v3236_v10  ;;  %8668 = vmatpush3.bf16.msra.mxu0 %v3255_v57 }
 0xa65   : > { %8669 = vmatprep.subr.bf16.mxu0 %v11406_v1  ;;  %v3257_v3 = vpop.permute.xlu1 %3256 }
 0xa66   : > { %10175 = vpow2.f32 %v3239_v2 }
 0xa68   : > { %8670 = vmatpush3.bf16.msra.mxu0 %v3257_v3 }
 0xa69   : > { %8675 = vmatprep.subr.bf16.mxu0 %v11406_v1 }
 0xa6e   : > { %v10174_v22 = vpop.eup %10173 }
 0xa6f   : > { %v3241_v28 = vsel %vm3077_vm2, %v10174_v22, 0.0 }
 0xa70   : > { %v10176_v41 = vpop.eup %10175  ;;  %3242 = vadd.xlane.f32.xlu0 %v3241_v28 }
 0xa71   : > { %v3249_v33 = vpack.c.bf16 %v10176_v41, %v10174_v22  ;;  %v3244_v46 = vsel %vm3077_vm2, %v10176_v41, 0.0 }
 0xa73   : > { %8672 = vmatmul.mubr.msk.bf16.vlgmr.msra.gmra.mrb[16].mxu0 %vm3077_vm2, %v3249_v33  ;;  %v7763_v33 = vld [vmem:[#allocation20] ss:$0 sm:$0xff] }
 0xa74   : > { %3245 = vadd.xlane.f32.xlu0 %v3244_v46  ;;  %8679 = vmatprep.mubr.msk.bf16.mxu0 %vm11405_vm0, %v11406_v1 }
 0xa94   : > { %v3092_v48 = vpop.xlane.xlu0 %3091 }
 0xa95   : > { %10177 = vrcp.f32 %v3092_v48 }
 0xa96   : > { %v3095_v53 = vpop.xlane.xlu1 %3094 }
 0xa97   : > { %10179 = vrcp.f32 %v3095_v53 }
 0xa9f   : > { %v10178_v61 = vpop.eup %10177 }
 0xaa0   : > { %v3159_v62 = vmul.f32 %v10178_v61, %v3152_v42  ;;  %v10023_v42 = vld [vmem:[#allocation19 + $0x10] sm:$0xff]  }
 0xaa1   : > { %v10180_v32 = vpop.eup %10179  ;;  %8676 = vmatpush3.bf16.msra.mxu0 %v10023_v42 }
 0xaa2   : > { %v3160_v4 = vmul.f32 %v10180_v32, %v3155_v47  ;;  %8677 = vmatprep.subr.bf16.mxu0 %v11406_v1  ;;  %v10024_v47 = vld [vmem:[#allocation19 + $0x18] sm:$0xff]  }
 0xaa4   : > { %v3161_v6 = vpack.c.bf16 %v3160_v4, %v3159_v62 }
 0xaa5   : > { %8678 = vmatpush3.bf16.msra.mxu0 %v10024_v47 }
 0xaa6   : > { %8688 = vmatmul.mubr.msk.bf16.vlgmr.msra.gmra.mrb[24].mxu1 %vm2261_vm1, %v3161_v6  ;;  %9355 = vmatprep.subr.bf16.mxu0 %v11404_v0 }
 0xaa7   : > { %9381 = vmatpush3.bf16.msra.mxu1 %v12317_v24  ;;  %8758 = vmatprep.mubr.msk.f32.mxu1 %vm11405_vm0, %v11406_v1 }
 0xaa8   : > { %9382 = vmatprep.subr.bf16.mxu1 %v11404_v0 }
 0xaab   : > { %9384 = vmatpush3.bf16.msra.mxu1 %v12323_v36 }
 0xaac   : > { %9385 = vmatprep.subr.bf16.mxu1 %v11404_v0 }
 0xaaf   : > { %9387 = vmatpush3.bf16.msra.mxu1 %v12339_v45 }
 0xab0   : > { %9388 = vmatprep.subr.bf16.mxu1 %v11404_v0 }
 0xab3   : > { %9390 = vmatpush3.bf16.msra.mxu1 %v12345_v51 }
 0xab4   : > { %9391 = vmatprep.subr.bf16.mxu1 %v11404_v0 }
 0xab7   : > { %9393 = vmatpush3.bf16.msra.mxu1 %v12351_v55 }
 0xab8   : > { %9394 = vmatprep.subr.bf16.mxu1 %v11404_v0 }
 0xabb   : > { %9396 = vmatpush3.bf16.msra.mxu1 %v12357_v60 }
 0xabc   : > { %9397 = vmatprep.subr.bf16.mxu1 %v11404_v0 }
 0xabf   : > { %9399 = vmatpush3.bf16.msra.mxu1 %v12372_v8 }
 0xac0   : > { %9400 = vmatprep.subr.bf16.mxu1 %v11404_v0 }
 0xac3   : > { %9402 = vmatpush3.bf16.msra.mxu1 %v12380_v20 }
 0xac4   : > { %9409 = vmatprep.subr.bf16.mxu1 %v11404_v0 }
 0xafd   : > { %v3243_v44 = vpop.xlane.xlu0 %3242 }
 0xafe   : > { %10181 = vrcp.f32 %v3243_v44 }
 0xb01   : > { %v3246_v58 = vpop.xlane.xlu0 %3245 }
 0xb02   : > { %10183 = vrcp.f32 %v3246_v58 }
 0xb08   : > { %v10182_v29 = vpop.eup %10181 }
 0xb0c   : > { %v10184_v59 = vpop.eup %10183 }
 0xb46   : > { %v3299_v25 = vpop.f32.mrb[16].mxu0 }
 0xb47   : > { %v8673_v16 = vpop.f32.mrb[17].mxu0  ;;  %v3306_v23 = vmul.f32 %v10182_v29, %v3299_v25 }
 0xb48   : > { %v3302_v54 = vpop.f32.mrb[18].mxu0 }
 0xb49   : > { %v3307_v10 = vmul.f32 %v10184_v59, %v3302_v54  ;;  %v8674_v57 = vpop.f32.mrb[19].mxu0 }
 0xb4b   : > { %v3308_v2 = vpack.c.bf16 %v3307_v10, %v3306_v23 }
 0xb4d   : > { %8680 = vmatmul.mubr.msk.bf16.vlgmr.msra.gmra.mrb[20].mxu0 %vm2261_vm1, %v3308_v2 }
 0xb4e   : > { %9357 = vmatpush3.bf16.msra.mxu0 %v12317_v24  ;;  %8723 = vmatprep.mubr.msk.f32.mxu0 %vm11405_vm0, %v11406_v1 }
 0xb4f   : > { %9358 = vmatprep.subr.bf16.mxu0 %v11404_v0 }
 0xb52   : > { %9360 = vmatpush3.bf16.msra.mxu0 %v12323_v36 }
 0xb53   : > { %9361 = vmatprep.subr.bf16.mxu0 %v11404_v0 }
 0xb56   : > { %9363 = vmatpush3.bf16.msra.mxu0 %v12339_v45 }
 0xb57   : > { %9364 = vmatprep.subr.bf16.mxu0 %v11404_v0 }
 0xb5a   : > { %9366 = vmatpush3.bf16.msra.mxu0 %v12345_v51 }
 0xb5b   : > { %9367 = vmatprep.subr.bf16.mxu0 %v11404_v0 }
 0xb5e   : > { %9369 = vmatpush3.bf16.msra.mxu0 %v12351_v55 }
 0xb5f   : > { %9370 = vmatprep.subr.bf16.mxu0 %v11404_v0 }
 0xb62   : > { %9372 = vmatpush3.bf16.msra.mxu0 %v12357_v60 }
 0xb63   : > { %9373 = vmatprep.subr.bf16.mxu0 %v11404_v0 }
 0xb66   : > { %9375 = vmatpush3.bf16.msra.mxu0 %v12372_v8 }
 0xb67   : > { %9376 = vmatprep.subr.bf16.mxu0 %v11404_v0 }
 0xb6a   : > { %9378 = vmatpush3.bf16.msra.mxu0 %v12380_v20 }
 0xb6b   : > { %9403 = vmatprep.subr.bf16.mxu0 %v11404_v0 }
 0xb79   : > { %v3414_v3 = vpop.f32.mrb[24].mxu1 }
 0xb7a   : > { %v8689_v22 = vpop.f32.mrb[25].mxu1 }
 0xb7b   : > { %v3417_v28 = vpop.f32.mrb[26].mxu1 }
 0xb7c   : > { %v8690_v41 = vpop.f32.mrb[27].mxu1 }
 0xc20   : > { %v3358_v46 = vpop.f32.mrb[20].mxu0 }
 0xc21   : > { %v3415_v48 = vadd.f32 %v3414_v3, %v3358_v46  ;;  %v8681_v53 = vpop.f32.mrb[21].mxu0  ;;  %v10027_v46 = vld [vmem:[%s13524_s6 + $0x4] ss:$12 sps:$4 sm:$0xff]  }
 0xc22   : > { %v3361_v61 = vpop.f32.mrb[22].mxu0  ;;  %v10025_v53 = vld [vmem:[%s13524_s6] ss:$12 sps:$4 sm:$0xff]  }
 0xc23   : > { %v3427_v32 = vadd.f32 %v7763_v33, %v3415_v48  ;;  %v3418_v62 = vadd.f32 %v3417_v28, %v3361_v61  ;;  %v8682_v4 = vpop.f32.mrb[23].mxu0 }
 0xc25   : > { %v3429_v6 = vadd.f32 %v3427_v32, %v12328_v37  ;;  %v3428_v42 = vadd.f32 %v7763_v33, %v3418_v62 }
 0xc27   : > { %v12614_v47 = vmul.f32 0.70710677, %v3429_v6  ;;  %v3430_v44 = vadd.f32 %v3428_v42, %v12331_v38 }
 0xc29   : > { %v12617_v58 = vmul.f32 0.70710677, %v3430_v44  ;;  %v3440_v25 = vmul.f32 %v12614_v47, %v12614_v47 }
 0xc2b   : > { %v3433_v29 = vadd.f32 %v12617_v58, %v12614_v47  ;;  %v3441_v16 = vmul.f32 %v12617_v58, %v12617_v58 }
 0xc2d   : > { %v3434_v59 = vrot.slane %v3433_v29, 4  ;;  %v3442_v54 = vadd.f32 %v3441_v16, %v3440_v25  ;;  %v10028_v16 = vld [vmem:[%s13524_s6 + $0x8] ss:$12 sps:$4 sm:$0xff]  }
 0xc2f   : > { %v3435_v23 = vadd.f32 %v3434_v59, %v3433_v29  ;;  %v3443_v37 = vrot.slane %v3442_v54, 4 }
 0xc31   : > { %v3436_v10 = vrot.slane %v3435_v23, 2  ;;  %v3444_v57 = vadd.f32 %v3443_v37, %v3442_v54  ;;  %v10031_v54 = vld [vmem:[%s13524_s6 + $0x1c] ss:$12 sps:$4 sm:$0xff]   ;;  %v10032_v37 = vld [vmem:[%s13524_s6 + $0x20] ss:$12 sps:$4 sm:$0xff]  }
 0xc33   : > { %v3437_v2 = vadd.f32 %v3436_v10, %v3435_v23  ;;  %v3445_v3 = vrot.slane %v3444_v57, 2  ;;  %v10029_v23 = vld [vmem:[%s13524_s6 + $0x18] ss:$12 sps:$4 sm:$0xff]   ;;  %v10033_v10 = vld [vmem:[%s13524_s6 + $0x30] ss:$12 sps:$4 sm:$0xff]  }
 0xc35   : > { %v3438_v38 = vrot.slane %v3437_v2, 1  ;;  %v3446_v22 = vadd.f32 %v3445_v3, %v3444_v57  ;;  %v10035_v57 = vld [vmem:[%s13524_s6 + $0x34] ss:$12 sps:$4 sm:$0xff]   ;;  %v10039_v3 = vld [vmem:[%s13524_s6 + $0x4c] ss:$12 sps:$4 sm:$0xff]  }
 0xc37   : > { %v3439_v28 = vadd.f32 %v3438_v38, %v3437_v2  ;;  %v3447_v41 = vrot.slane %v3446_v22, 1  ;;  %v10036_v2 = vld [vmem:[%s13524_s6 + $0x38] ss:$12 sps:$4 sm:$0xff]   ;;  %v10037_v38 = vld [vmem:[%s13524_s6 + $0x48] ss:$12 sps:$4 sm:$0xff]  }
 0xc39   : > { %8724 = vmatmul.mubr.f32.vlgmr.msra.gmra.mrb[24].mxu0 %v3439_v28  ;;  %v3448_v33 = vadd.f32 %v3447_v41, %v3446_v22  ;;  %v10040_v22 = vld [vmem:[%s13524_s6 + $0x50] ss:$12 sps:$4 sm:$0xff]   ;;  %v10041_v41 = vld [vmem:[%s13524_s6 + $0x60] ss:$12 sps:$4 sm:$0xff]  }
 0xc3a   : > { %9405 = vmatpush3.bf16.msra.mxu0 %v12401_v39  ;;  %8769 = vmatprep.mubr.msk.f32.mxu0 %vm11405_vm0, %v11406_v1  ;;  %v10043_v28 = vld [vmem:[%s13524_s6 + $0x64] ss:$12 sps:$4 sm:$0xff]  }
 0xc3b   : > { %8759 = vmatmul.mubr.f32.vlgmr.msra.gmra.mrb[28].mxu1 %v3448_v33  ;;  %9406 = vmatprep.subr.bf16.mxu0 %v11404_v0  ;;  %v10044_v33 = vld [vmem:[%s13524_s6 + $0x68] ss:$12 sps:$4 sm:$0xff]  }
 0xc3c   : > { %9411 = vmatpush3.bf16.msra.mxu1 %v12401_v39  ;;  %8780 = vmatprep.mubr.msk.f32.mxu1 %vm11405_vm0, %v11406_v1 }
 0xc3d   : > { %9412 = vmatprep.subr.bf16.mxu1 %v11404_v0 }
 0xc3e   : > { %9408 = vmatpush3.bf16.msra.mxu0 %v12407_v43 }
 0xc3f   : > { %3915 = vmatprep.subr.bf16.mxu0 %v10027_v46  ;;  %v10047_v46 = vld [vmem:[%s13524_s6 + $0x7c] ss:$12 sps:$4 sm:$0xff]  }
 0xc40   : > { %9414 = vmatpush3.bf16.msra.mxu1 %v12407_v43 }
 0xc41   : > { %8783 = vmatprep.subr.bf16.mxu1 %v11406_v1 }
 0xd0c   : > { %v3515_v48 = vpop.f32.mrb[24].mxu0 }
 0xd0d   : > { %v3519_v61 = vmul.f32 0.015625, %v3515_v48  ;;  %v8725_v32 = vpop.f32.mrb[25].mxu0  ;;  %v10045_v48 = vld [vmem:[%s13524_s6 + $0x78] ss:$12 sps:$4 sm:$0xff]  }
 0xd0e   : > { %v3586_v62 = vpop.f32.mrb[28].mxu1  ;;  %v10049_v32 = vld [vmem:[%s13524_s6 + $0x90] ss:$12 sps:$4 sm:$0xff]  }
 0xd0f   : > { %v3591_v4 = vmul.f32 %v3519_v61, %v3519_v61  ;;  %v3590_v6 = vmul.f32 0.015625, %v3586_v62  ;;  %v8760_v42 = vpop.f32.mrb[29].mxu1  ;;  %8770 = vmatmul.mubr.msk.f32.vlgmr.msra.gmra.mrb[26].mxu0 %vm2261_vm1, %v3519_v61  ;;  %v10051_v61 = vld [vmem:[%s13524_s6 + $0x94] ss:$12 sps:$4 sm:$0xff]   ;;  %v10052_v62 = vld [vmem:[%s13524_s6 + $0x98] ss:$12 sps:$4 sm:$0xff]  }
 0xd10   : > { %3916 = vmatpush1.bf16.msra.mxu0 %v10025_v53  ;;  %v10048_v53 = vld [vmem:[%s13524_s6 + $0x80] ss:$12 sps:$4 sm:$0xff]   ;;  %v10056_v42 = vld [vmem:[%s13524_s6 + $0xb0] ss:$12 sps:$4 sm:$0xff]  }
 0xd11   : > { %v3592_v44 = vsub.f32 %v3590_v6, %v3591_v4  ;;  %3917 = vmatprep.subr.bf16.mxu0 %v10031_v54  ;;  %v10055_v4 = vld [vmem:[%s13524_s6 + $0xac] ss:$12 sps:$4 sm:$0xff]   ;;  %v10053_v6 = vld [vmem:[%s13524_s6 + $0xa8] ss:$12 sps:$4 sm:$0xff]   ;;  %s11169_s6 = sshll.u32 %s11411_s4, 4  ;;  %s11170_s6 = int_to_ptr.vmem [resolvable:$false] %s11169_s6 }
 0xd12   : > { %s11171_s14 = scalar_lea.vmem %s11170_s6, 512 }
 0xd13   : > { %v3593_v25 = vmax.f32 %v3592_v44, 0.0  ;;  %v11410_v44 = vmov 0  }
 0xd14   : > { %3918 = vmatpush1.bf16.msra.mxu0 %v10029_v23  ;;  %3947 = vmatprep.mubr.bf16.mxu0 %v11410_v44 }
 0xd15   : > { %v3594_v29 = vadd.f32 1e-06, %v3593_v25  ;;  %3919 = vmatprep.subr.bf16.mxu0 %v10035_v57  ;;  %v7766_v57 = vld [vmem:[#allocation22] ss:$0 sm:$0xff] }
 0xd17   : > { %10185 = vrsqrt.f32 %v3594_v29 }
 0xd18   : > { %3920 = vmatpush1.bf16.msra.mxu0 %v10033_v10 }
 0xd19   : > { %3921 = vmatprep.subr.bf16.mxu0 %v10039_v3 }
 0xd1c   : > { %3922 = vmatpush1.bf16.msra.mxu0 %v10037_v38  ;;  %v7767_v38 = vld [vmem:[#allocation23] ss:$0 sm:$0xff] }
 0xd1d   : > { %3923 = vmatprep.subr.bf16.mxu0 %v10043_v28 }
 0xd20   : > { %3924 = vmatpush1.bf16.msra.mxu0 %v10041_v41 }
 0xd21   : > { %v10186_v59 = vpop.eup %10185  ;;  %3925 = vmatprep.subr.bf16.mxu0 %v10047_v46 }
 0xd22   : > { %8781 = vmatmul.mubr.msk.f32.vlgmr.msra.gmra.mrb[30].mxu1 %vm2261_vm1, %v10186_v59 }
 0xd23   : > { %8784 = vmatpush3.bf16.msra.mxu1 %v10028_v16  ;;  %8799 = vmatprep.mubr.msk.bf16.mxu1 %vm11405_vm0, %v11406_v1 }
 0xd24   : > { %8785 = vmatprep.subr.bf16.mxu1 %v11406_v1  ;;  %3926 = vmatpush1.bf16.msra.mxu0 %v10045_v48  ;;  %v3782_v48 = vsub.s32 2, %v12415_v50 }
 0xd25   : > { %3927 = vmatprep.subr.bf16.mxu0 %v10051_v61  ;;  %v12684_v61 = vsub.s32 1, %v12415_v50 }
 0xd27   : > { %8786 = vmatpush3.bf16.msra.mxu1 %v10032_v37 }
 0xd28   : > { %8787 = vmatprep.subr.bf16.mxu1 %v11406_v1  ;;  %3928 = vmatpush1.bf16.msra.mxu0 %v10049_v32 }
 0xd29   : > { %3929 = vmatprep.subr.bf16.mxu0 %v10055_v4 }
 0xd2b   : > { %8788 = vmatpush3.bf16.msra.mxu1 %v10036_v2 }
 0xd2c   : > { %8789 = vmatprep.subr.bf16.mxu1 %v11406_v1  ;;  %3930 = vmatpush1.bf16.msra.mxu0 %v10053_v6 }
 0xd2d   : > { %8803 = vmatprep.subr.bf16.mxu0 %v11406_v1 }
 0xd2f   : > { %8790 = vmatpush3.bf16.msra.mxu1 %v10040_v22 }
 0xd30   : > { %8791 = vmatprep.subr.bf16.mxu1 %v11406_v1 }
 0xd33   : > { %8792 = vmatpush3.bf16.msra.mxu1 %v10044_v33 }
 0xd34   : > { %8793 = vmatprep.subr.bf16.mxu1 %v11406_v1 }
 0xd37   : > { %8794 = vmatpush3.bf16.msra.mxu1 %v10048_v53  ;;  %v1901_v53 = vld [vmem:[#allocation25] sm:$0x7] }
 0xd38   : > { %8795 = vmatprep.subr.bf16.mxu1 %v11406_v1  ;;  %v3775_v32 = vrot.slane %v1901_v53, %v12418_v52 }
 0xd3b   : > { %8796 = vmatpush3.bf16.msra.mxu1 %v10052_v62  ;;  %v3783_v62 = vrot.slane %v1901_v53, %v3782_v48 }
 0xd3c   : > { %8797 = vmatprep.subr.bf16.mxu1 %v11406_v1 }
 0xd3f   : > { %8798 = vmatpush3.bf16.msra.mxu1 %v10056_v42  ;;  %v3779_v42 = vrot.slane %v1901_v53, %v12684_v61 }
 0xd40   : > { %8809 = vmatprep.subr.bf16.mxu1 %v11406_v1 }
 0xde2   : > { %v3665_v25 = vpop.f32.mrb[26].mxu0 }
 0xde3   : > { %v8771_v29 = vpop.f32.mrb[27].mxu0  ;;  %v3745_v16 = vrot.slane %v3665_v25, %v12418_v52 }
 0xde5   : > { %v3746_v54 = vsub.f32 %v12614_v47, %v3745_v16  ;;  %v3747_v23 = vsub.f32 %v12617_v58, %v3745_v16 }
 0xdf5   : > { %v3738_v59 = vpop.f32.mrb[30].mxu1 }
 0xdf6   : > { %v3751_v37 = vrot.slane %v3738_v59, %v12418_v52  ;;  %v8782_v10 = vpop.f32.mrb[31].mxu1 }
 0xdf8   : > { %v3752_v2 = vmul.f32 %v3751_v37, %v3746_v54  ;;  %v3753_v3 = vmul.f32 %v3751_v37, %v3747_v23 }
 0xdfa   : > { %v3760_v22 = vmul.f32 %v7766_v57, %v3752_v2  ;;  %v3761_v28 = vmul.f32 %v7766_v57, %v3753_v3 }
 0xdfc   : > { %v3768_v41 = vadd.f32 %v7767_v38, %v3760_v22  ;;  %v3769_v33 = vadd.f32 %v7767_v38, %v3761_v28 }
 0xdfe   : > { %v3770_v46 = vpack.c.bf16 %v3769_v33, %v3768_v41 }
 0xe00   : > { %3948 = vmatmul.mubr.bf16.vlgmr.msra.gmra.mrb[28].mxu0 %v3770_v46  ;;  %8800 = vmatmul.mubr.bf16.vlgmr.msra.gmra.mrb[32].mxu1 %v3770_v46 }
 0xe01   : > { %8805 = vmatprep.mubr.msk.bf16.mxu0 %vm11405_vm0, %v11406_v1  ;;  %8811 = vmatprep.mubr.msk.bf16.mxu1 %vm11405_vm0, %v11406_v1 }
 0xed3   : > { %v3949_v4 = vpop.f32.mrb[28].mxu0  ;;  %v3992_v6 = vpop.f32.mrb[32].mxu1 }
 0xed4   : > { %v3951_v25 = vpop.f32.mrb[29].mxu0  ;;  %v8801_v29 = vpop.f32.mrb[33].mxu1  ;;  %v3950_v54 = vadd.f32 %v3949_v4, %v3775_v32  ;;  %v3993_v23 = vadd.f32 %v3992_v6, %v3783_v62 }
 0xed5   : > { %v3953_v16 = vpop.f32.mrb[30].mxu0  ;;  %v3995_v59 = vpop.f32.mrb[34].mxu1  ;;  %v3952_v3 = vadd.f32 %v3951_v25, %v3779_v42 }
 0xed6   : > { %v3954_v37 = vadd.f32 %v3953_v16, %v3775_v32  ;;  %v3996_v10 = vadd.f32 %v3995_v59, %v3783_v62  ;;  %v3955_v57 = vpop.f32.mrb[31].mxu0  ;;  %v8802_v2 = vpop.f32.mrb[35].mxu1 }
 0xed7   : > { %v3956_v50 = vadd.f32 %v3955_v57, %v3779_v42 }
 0xed8   : > { %v3999_v38 = vpack.c.bf16 %v3954_v37, %v3950_v54  ;;  %v4070_v22 = vpack.c.bf16 %v3996_v10, %v3993_v23 }
 0xed9   : > { %v4000_v28 = vpack.c.bf16 %v3956_v50, %v3952_v3 }
 0xeda   : > { %8810 = vmatpush3.bf16.msra.mxu1 %v4070_v22  ;;  %4119 = vrot.lane.b32.xlu0 %v3999_v38, %s11407_s8 }
 0xedb   : > { %4122 = vrot.lane.b32.xlu1 %v4000_v28, %s11407_s8  ;;  %v4005_v41 = vsel %vm3077_vm2, %v4000_v28, 0  ;;  %8821 = vmatprep.subr.bf16.mxu1 %v11406_v1 }
 0xedc   : > { %8804 = vmatpush3.bf16.xpose.msra.mxu0 %v4005_v41 }
 0xedd   : > { %8815 = vmatprep.subr.bf16.mxu0 %v11406_v1 }
 0xee3   : > { %8806 = vmatmul.mubr.msk.bf16.vlgmr.msra.gmra.mrb[32].mxu0 %vm3077_vm2, %v3999_v38 }
 0xee4   : > { %8817 = vmatprep.mubr.msk.bf16.mxu0 %vm11405_vm0, %v11406_v1 }
 0xf4c   : > { %v4120_v48 = vpop.permute.xlu0 %4119 }
 0xf4d   : > { %v4123_v33 = vpop.permute.xlu1 %4122 }
 0xf4e   : > { %v4128_v46 = vsel %vm3077_vm2, %v4123_v33, 0 }
 0xf4f   : > { %8816 = vmatpush3.bf16.xpose.msra.mxu0 %v4128_v46 }
 0xf50   : > { %8827 = vmatprep.subr.bf16.mxu0 %v11406_v1 }
 0xf56   : > { %8818 = vmatmul.mubr.msk.bf16.vlgmr.msra.gmra.mrb[36].mxu0 %vm3077_vm2, %v4120_v48 }
 0xf57   : > { %8835 = vmatprep.mubr.msk.bf16.mxu0 %vm11405_vm0, %v11406_v1 }
 0xfb6   : > { %v4041_v53 = vpop.f32.mrb[32].mxu0 }
 0xfb7   : > { %v8807_v32 = vpop.f32.mrb[33].mxu0  ;;  %v4049_v62 = vsel %vm4048_vm3, %v4041_v53, -inf }
 0xfb8   : > { %4050 = vmax.xlane.f32.xlu1 %v4049_v62  ;;  %v4044_v4 = vpop.f32.mrb[34].mxu0 }
 0xfb9   : > { %v8808_v6 = vpop.f32.mrb[35].mxu0  ;;  %v4052_v42 = vsel %vm4048_vm3, %v4044_v4, -inf }
 0xfba   : > { %4053 = vmax.xlane.f32.xlu0 %v4052_v42 }
0x1029   : > { %v4164_v25 = vpop.f32.mrb[36].mxu0 }
0x102a   : > { %v8819_v29 = vpop.f32.mrb[37].mxu0  ;;  %v4171_v16 = vsel %vm4048_vm3, %v4164_v25, -inf }
0x102b   : > { %4172 = vmax.xlane.f32.xlu1 %v4171_v16  ;;  %v4167_v59 = vpop.f32.mrb[38].mxu0 }
0x102c   : > { %v8820_v54 = vpop.f32.mrb[39].mxu0  ;;  %v4174_v23 = vsel %vm4048_vm3, %v4167_v59, -inf }
0x102d   : > { %4175 = vmax.xlane.f32.xlu0 %v4174_v23  ;;  %v10057_v54 = vld [vmem:[#allocation26] sm:$0xff]  }
0x103c   : > { %4193 = vrot.lane.b32.xlu1 %v4070_v22, %s11407_s8 }
0x1045   : > { %v4051_v37 = vpop.xlane.xlu1 %4050 }
0x1046   : > { %v4055_v10 = vsub.f32 %v4041_v53, %v4051_v37  ;;  %v10059_v37 = vld [vmem:[#allocation26 + $0x10] sm:$0xff]  }
0x1047   : > { %v4054_v57 = vpop.xlane.xlu0 %4053 }
0x1048   : > { %v4057_v2 = vmul.f32 1.442695, %v4055_v10  ;;  %v4056_v3 = vsub.f32 %v4044_v4, %v4054_v57  ;;  %v10060_v10 = vld [vmem:[#allocation26 + $0x18] sm:$0xff]   ;;  %v10061_v57 = vld [vmem:[#allocation26 + $0x20] sm:$0xff]  }
0x1049   : > { %8828 = vmatpush3.bf16.msra.mxu0 %v10061_v57 }
0x104a   : > { %10187 = vpow2.f32 %v4057_v2  ;;  %v4059_v50 = vmul.f32 1.442695, %v4056_v3  ;;  %v10062_v2 = vld [vmem:[#allocation26 + $0x28] sm:$0xff]   ;;  %8829 = vmatprep.subr.bf16.mxu0 %v11406_v1 }
0x104c   : > { %10189 = vpow2.f32 %v4059_v50  ;;  %v10063_v50 = vld [vmem:[#allocation26 + $0x30] sm:$0xff]  }
0x104d   : > { %8830 = vmatpush3.bf16.msra.mxu0 %v10062_v2 }
0x104e   : > { %8831 = vmatprep.subr.bf16.mxu0 %v11406_v1 }
0x1051   : > { %8832 = vmatpush3.bf16.msra.mxu0 %v10063_v50 }
0x1052   : > { %8833 = vmatprep.subr.bf16.mxu0 %v11406_v1 }
0x1054   : > { %v10188_v38 = vpop.eup %10187 }
0x1055   : > { %v4061_v28 = vsel %vm4048_vm3, %v10188_v38, 0.0 }
0x1056   : > { %v10190_v41 = vpop.eup %10189  ;;  %4062 = vadd.xlane.f32.xlu0 %v4061_v28  ;;  %v10064_v28 = vld [vmem:[#allocation26 + $0x38] sm:$0xff]  }
0x1057   : > { %v4069_v33 = vpack.c.bf16 %v10190_v41, %v10188_v38  ;;  %v4064_v46 = vsel %vm4048_vm3, %v10190_v41, 0.0  ;;  %8834 = vmatpush3.bf16.msra.mxu0 %v10064_v28  ;;  %v7806_v28 = vld [vmem:[#allocation28] ss:$0 sm:$0xff] }
0x1058   : > { %9415 = vmatprep.subr.bf16.mxu0 %v11404_v0 }
0x1059   : > { %8812 = vmatmul.mubr.msk.bf16.vlgmr.msra.gmra.mrb[36].mxu1 %vm4048_vm3, %v4069_v33 }
0x105a   : > { %4065 = vadd.xlane.f32.xlu0 %v4064_v46  ;;  %8823 = vmatprep.mubr.msk.bf16.mxu1 %vm11405_vm0, %v11406_v1 }
0x10b8   : > { %v4173_v22 = vpop.xlane.xlu1 %4172 }
0x10b9   : > { %v4177_v48 = vsub.f32 %v4164_v25, %v4173_v22 }
0x10ba   : > { %v4176_v53 = vpop.xlane.xlu0 %4175 }
0x10bb   : > { %v4179_v32 = vmul.f32 1.442695, %v4177_v48  ;;  %v4178_v62 = vsub.f32 %v4167_v59, %v4176_v53  ;;  %v10058_v59 = vld [vmem:[#allocation26 + $0x8] sm:$0xff]  }
0x10bc   : > { %v4194_v4 = vpop.permute.xlu1 %4193 }
0x10bd   : > { %10191 = vpow2.f32 %v4179_v32  ;;  %v4181_v6 = vmul.f32 1.442695, %v4178_v62  ;;  %8822 = vmatpush3.bf16.msra.mxu1 %v4194_v4 }
0x10be   : > { %8839 = vmatprep.subr.bf16.mxu1 %v11406_v1 }
0x10bf   : > { %10193 = vpow2.f32 %v4181_v6 }
0x10c7   : > { %v10192_v42 = vpop.eup %10191 }
0x10c8   : > { %v4183_v29 = vsel %vm4048_vm3, %v10192_v42, 0.0 }
0x10c9   : > { %v10194_v16 = vpop.eup %10193  ;;  %4184 = vadd.xlane.f32.xlu0 %v4183_v29 }
0x10ca   : > { %v4191_v23 = vpack.c.bf16 %v10194_v16, %v10192_v42  ;;  %v4186_v25 = vsel %vm4048_vm3, %v10194_v16, 0.0 }
0x10cc   : > { %8824 = vmatmul.mubr.msk.bf16.vlgmr.msra.gmra.mrb[40].mxu1 %vm4048_vm3, %v4191_v23 }
0x10cd   : > { %4187 = vadd.xlane.f32.xlu0 %v4186_v25  ;;  %8840 = vmatpush3.bf16.msra.mxu1 %v10057_v54 }
0x10ce   : > { %8841 = vmatprep.subr.bf16.mxu1 %v11406_v1  ;;  %8847 = vmatprep.mubr.msk.bf16.mxu1 %vm11405_vm0, %v11406_v1 }
0x10d1   : > { %8842 = vmatpush3.bf16.msra.mxu1 %v10058_v59 }
0x10d2   : > { %8843 = vmatprep.subr.bf16.mxu1 %v11406_v1 }
0x10d5   : > { %8844 = vmatpush3.bf16.msra.mxu1 %v10059_v37 }
0x10d6   : > { %8845 = vmatprep.subr.bf16.mxu1 %v11406_v1 }
0x10d9   : > { %8846 = vmatpush3.bf16.msra.mxu1 %v10060_v10 }
0x10da   : > { %9439 = vmatprep.subr.bf16.mxu1 %v11404_v0 }
0x10e3   : > { %v4063_v3 = vpop.xlane.xlu0 %4062 }
0x10e4   : > { %10195 = vrcp.f32 %v4063_v3 }
0x10e7   : > { %v4066_v38 = vpop.xlane.xlu0 %4065 }
0x10e8   : > { %10197 = vrcp.f32 %v4066_v38 }
0x10ee   : > { %v10196_v33 = vpop.eup %10195 }
0x10f2   : > { %v10198_v22 = vpop.eup %10197 }
0x112c   : > { %v4108_v41 = vpop.f32.mrb[36].mxu1 }
0x112d   : > { %v8813_v46 = vpop.f32.mrb[37].mxu1  ;;  %v4115_v53 = vmul.f32 %v10196_v33, %v4108_v41 }
0x112e   : > { %v4111_v48 = vpop.f32.mrb[38].mxu1 }
0x112f   : > { %v4116_v32 = vmul.f32 %v10198_v22, %v4111_v48  ;;  %v8814_v62 = vpop.f32.mrb[39].mxu1 }
0x1131   : > { %v4117_v4 = vpack.c.bf16 %v4116_v32, %v4115_v53 }
0x1133   : > { %8848 = vmatmul.mubr.msk.bf16.vlgmr.msra.gmra.mrb[44].mxu1 %vm3077_vm2, %v4117_v4 }
0x1134   : > { %9441 = vmatpush3.bf16.msra.mxu1 %v12317_v24  ;;  %8918 = vmatprep.mubr.msk.f32.mxu1 %vm11405_vm0, %v11406_v1 }
0x1135   : > { %9442 = vmatprep.subr.bf16.mxu1 %v11404_v0 }
0x1138   : > { %9444 = vmatpush3.bf16.msra.mxu1 %v12323_v36 }
0x1139   : > { %9445 = vmatprep.subr.bf16.mxu1 %v11404_v0 }
0x113c   : > { %9447 = vmatpush3.bf16.msra.mxu1 %v12339_v45 }
0x113d   : > { %9448 = vmatprep.subr.bf16.mxu1 %v11404_v0 }
0x1140   : > { %9450 = vmatpush3.bf16.msra.mxu1 %v12345_v51 }
0x1141   : > { %9451 = vmatprep.subr.bf16.mxu1 %v11404_v0 }
0x1144   : > { %9453 = vmatpush3.bf16.msra.mxu1 %v12351_v55 }
0x1145   : > { %9454 = vmatprep.subr.bf16.mxu1 %v11404_v0 }
0x1148   : > { %9456 = vmatpush3.bf16.msra.mxu1 %v12357_v60 }
0x1149   : > { %9457 = vmatprep.subr.bf16.mxu1 %v11404_v0 }
0x114c   : > { %9459 = vmatpush3.bf16.msra.mxu1 %v12372_v8 }
0x114d   : > { %9460 = vmatprep.subr.bf16.mxu1 %v11404_v0 }
0x1150   : > { %9462 = vmatpush3.bf16.msra.mxu1 %v12380_v20 }
0x1151   : > { %9469 = vmatprep.subr.bf16.mxu1 %v11404_v0 }
0x1156   : > { %v4185_v6 = vpop.xlane.xlu0 %4184 }
0x1157   : > { %10199 = vrcp.f32 %v4185_v6 }
0x115a   : > { %v4188_v42 = vpop.xlane.xlu0 %4187 }
0x115b   : > { %10201 = vrcp.f32 %v4188_v42 }
0x1161   : > { %v10200_v16 = vpop.eup %10199 }
0x1165   : > { %v10202_v23 = vpop.eup %10201 }
0x119f   : > { %v4233_v29 = vpop.f32.mrb[40].mxu1 }
0x11a0   : > { %v8825_v54 = vpop.f32.mrb[41].mxu1  ;;  %v4240_v59 = vmul.f32 %v10200_v16, %v4233_v29 }
0x11a1   : > { %v4236_v25 = vpop.f32.mrb[42].mxu1 }
0x11a2   : > { %v4241_v37 = vmul.f32 %v10202_v23, %v4236_v25  ;;  %v8826_v10 = vpop.f32.mrb[43].mxu1 }
0x11a4   : > { %v4242_v57 = vpack.c.bf16 %v4241_v37, %v4240_v59 }
0x11a6   : > { %8836 = vmatmul.mubr.msk.bf16.vlgmr.msra.gmra.mrb[40].mxu0 %vm3077_vm2, %v4242_v57 }
0x11a7   : > { %9417 = vmatpush3.bf16.msra.mxu0 %v12317_v24  ;;  %8883 = vmatprep.mubr.msk.f32.mxu0 %vm11405_vm0, %v11406_v1 }
0x11a8   : > { %9418 = vmatprep.subr.bf16.mxu0 %v11404_v0 }
0x11ab   : > { %9420 = vmatpush3.bf16.msra.mxu0 %v12323_v36 }
0x11ac   : > { %9421 = vmatprep.subr.bf16.mxu0 %v11404_v0 }
0x11af   : > { %9423 = vmatpush3.bf16.msra.mxu0 %v12339_v45 }
0x11b0   : > { %9424 = vmatprep.subr.bf16.mxu0 %v11404_v0 }
0x11b3   : > { %9426 = vmatpush3.bf16.msra.mxu0 %v12345_v51 }
0x11b4   : > { %9427 = vmatprep.subr.bf16.mxu0 %v11404_v0 }
0x11b7   : > { %9429 = vmatpush3.bf16.msra.mxu0 %v12351_v55 }
0x11b8   : > { %9430 = vmatprep.subr.bf16.mxu0 %v11404_v0 }
0x11bb   : > { %9432 = vmatpush3.bf16.msra.mxu0 %v12357_v60 }
0x11bc   : > { %9433 = vmatprep.subr.bf16.mxu0 %v11404_v0 }
0x11bf   : > { %9435 = vmatpush3.bf16.msra.mxu0 %v12372_v8 }
0x11c0   : > { %9436 = vmatprep.subr.bf16.mxu0 %v11404_v0 }
0x11c3   : > { %9438 = vmatpush3.bf16.msra.mxu0 %v12380_v20 }
0x11c4   : > { %9463 = vmatprep.subr.bf16.mxu0 %v11404_v0 }
0x1206   : > { %v4372_v2 = vpop.f32.mrb[44].mxu1 }
0x1207   : > { %v8849_v3 = vpop.f32.mrb[45].mxu1 }
0x1208   : > { %v4375_v50 = vpop.f32.mrb[46].mxu1 }
0x1209   : > { %v8850_v38 = vpop.f32.mrb[47].mxu1 }
0x1279   : > { %v4304_v41 = vpop.f32.mrb[40].mxu0 }
0x127a   : > { %v4373_v33 = vadd.f32 %v4372_v2, %v4304_v41  ;;  %v8837_v46 = vpop.f32.mrb[41].mxu0 }
0x127b   : > { %v4307_v22 = vpop.f32.mrb[42].mxu0 }
0x127c   : > { %v4385_v48 = vadd.f32 %v7806_v28, %v4373_v33  ;;  %v4376_v53 = vadd.f32 %v4375_v50, %v4307_v22  ;;  %v8838_v32 = vpop.f32.mrb[43].mxu0  ;;  %v10067_v33 = vld [vmem:[%s13525_s22 + $0x4] ss:$8 sps:$4 sm:$0xff]   ;;  %v10065_v22 = vld [vmem:[%s13525_s22] ss:$8 sps:$4 sm:$0xff]  }
0x127e   : > { %v4387_v62 = vadd.f32 %v4385_v48, %v12614_v47  ;;  %v4386_v4 = vadd.f32 %v7806_v28, %v4376_v53 }
0x1280   : > { %v12764_v6 = vmul.f32 0.70710677, %v4387_v62  ;;  %v4388_v42 = vadd.f32 %v4386_v4, %v12617_v58 }
0x1282   : > { %v12767_v29 = vmul.f32 0.70710677, %v4388_v42  ;;  %v4398_v16 = vmul.f32 %v12764_v6, %v12764_v6 }
0x1284   : > { %v4391_v54 = vadd.f32 %v12767_v29, %v12764_v6  ;;  %v4399_v23 = vmul.f32 %v12767_v29, %v12767_v29 }
0x1286   : > { %v4392_v25 = vrot.slane %v4391_v54, 4  ;;  %v4400_v59 = vadd.f32 %v4399_v23, %v4398_v16 }
0x1288   : > { %v4393_v37 = vadd.f32 %v4392_v25, %v4391_v54  ;;  %v4401_v47 = vrot.slane %v4400_v59, 4 }
0x128a   : > { %v4394_v10 = vrot.slane %v4393_v37, 2  ;;  %v4402_v57 = vadd.f32 %v4401_v47, %v4400_v59  ;;  %v10070_v59 = vld [vmem:[%s13525_s22 + $0x14] ss:$8 sps:$4 sm:$0xff]   ;;  %v10071_v47 = vld [vmem:[%s13525_s22 + $0x20] ss:$8 sps:$4 sm:$0xff]  }
0x128c   : > { %v4395_v2 = vadd.f32 %v4394_v10, %v4393_v37  ;;  %v4403_v3 = vrot.slane %v4402_v57, 2  ;;  %v10068_v37 = vld [vmem:[%s13525_s22 + $0x10] ss:$8 sps:$4 sm:$0xff]   ;;  %v10073_v10 = vld [vmem:[%s13525_s22 + $0x24] ss:$8 sps:$4 sm:$0xff]  }
0x128e   : > { %v4396_v58 = vrot.slane %v4395_v2, 1  ;;  %v4404_v50 = vadd.f32 %v4403_v3, %v4402_v57  ;;  %v10076_v57 = vld [vmem:[%s13525_s22 + $0x34] ss:$8 sps:$4 sm:$0xff]   ;;  %v10079_v3 = vld [vmem:[%s13525_s22 + $0x44] ss:$8 sps:$4 sm:$0xff]  }
0x1290   : > { %v4397_v38 = vadd.f32 %v4396_v58, %v4395_v2  ;;  %v4405_v28 = vrot.slane %v4404_v50, 1  ;;  %v10074_v2 = vld [vmem:[%s13525_s22 + $0x30] ss:$8 sps:$4 sm:$0xff]   ;;  %v10077_v58 = vld [vmem:[%s13525_s22 + $0x40] ss:$8 sps:$4 sm:$0xff]  }
0x1292   : > { %8884 = vmatmul.mubr.f32.vlgmr.msra.gmra.mrb[44].mxu0 %v4397_v38  ;;  %v4406_v41 = vadd.f32 %v4405_v28, %v4404_v50  ;;  %v10082_v50 = vld [vmem:[%s13525_s22 + $0x54] ss:$8 sps:$4 sm:$0xff]   ;;  %v10080_v38 = vld [vmem:[%s13525_s22 + $0x50] ss:$8 sps:$4 sm:$0xff]   ;;  %v10085_v28 = vld [vmem:[%s13525_s22 + $0x64] ss:$8 sps:$4 sm:$0xff]  }
0x1293   : > { %9465 = vmatpush3.bf16.msra.mxu0 %v12401_v39  ;;  %8929 = vmatprep.mubr.msk.f32.mxu0 %vm11405_vm0, %v11406_v1 }
0x1294   : > { %8919 = vmatmul.mubr.f32.vlgmr.msra.gmra.mrb[48].mxu1 %v4406_v41  ;;  %9466 = vmatprep.subr.bf16.mxu0 %v11404_v0  ;;  %v10083_v41 = vld [vmem:[%s13525_s22 + $0x60] ss:$8 sps:$4 sm:$0xff]  }
0x1295   : > { %9471 = vmatpush3.bf16.msra.mxu1 %v12401_v39  ;;  %8940 = vmatprep.mubr.msk.f32.mxu1 %vm11405_vm0, %v11406_v1 }
0x1296   : > { %9472 = vmatprep.subr.bf16.mxu1 %v11404_v0 }
0x1297   : > { %9468 = vmatpush3.bf16.msra.mxu0 %v12407_v43 }
0x1298   : > { %4820 = vmatprep.subr.bf16.mxu0 %v10067_v33  ;;  %v10088_v33 = vld [vmem:[%s13525_s22 + $0x74] ss:$8 sps:$4 sm:$0xff]  }
0x1299   : > { %9474 = vmatpush3.bf16.msra.mxu1 %v12407_v43 }
0x1365   : > { %v4473_v46 = vpop.f32.mrb[44].mxu0 }
0x1366   : > { %v4477_v48 = vmul.f32 0.015625, %v4473_v46  ;;  %v8885_v53 = vpop.f32.mrb[45].mxu0  ;;  %v10086_v46 = vld [vmem:[%s13525_s22 + $0x70] ss:$8 sps:$4 sm:$0xff]  }
0x1367   : > { %v4544_v32 = vpop.f32.mrb[48].mxu1  ;;  %v10091_v53 = vld [vmem:[%s13526_s1 + $0x48] sm:$0xff]  }
0x1368   : > { %v4549_v62 = vmul.f32 %v4477_v48, %v4477_v48  ;;  %v4548_v4 = vmul.f32 0.015625, %v4544_v32  ;;  %v8920_v42 = vpop.f32.mrb[49].mxu1  ;;  %8930 = vmatmul.mubr.msk.f32.vlgmr.msra.gmra.mrb[46].mxu0 %vm2261_vm1, %v4477_v48  ;;  %v10090_v48 = vld [vmem:[%s13526_s1] sm:$0xff]   ;;  %v10092_v32 = vld [vmem:[%s13526_s1 + $0x8] sm:$0xff]  }
0x1369   : > { %4821 = vmatpush1.bf16.msra.mxu0 %v10065_v22  ;;  %4852 = vmatprep.mubr.bf16.mxu0 %v11410_v44  ;;  %v10089_v22 = vld [vmem:[%s13526_s1 + $0x40] sm:$0xff]  }
0x136a   : > { %v4550_v16 = vsub.f32 %v4548_v4, %v4549_v62  ;;  %4822 = vmatprep.subr.bf16.mxu0 %v10070_v59  ;;  %8196 = vmatprep.subr.bf16.mxu1 %v10089_v22  ;;  %v10099_v22 = vld [vmem:[%s13526_s1 + $0x68] sm:$0xff]  }
0x136c   : > { %v4551_v54 = vmax.f32 %v4550_v16, 0.0 }
0x136d   : > { %4823 = vmatpush1.bf16.msra.mxu0 %v10068_v37  ;;  %v7809_v37 = vld [vmem:[#allocation29] ss:$0 sm:$0xff] }
0x136e   : > { %v4552_v23 = vadd.f32 1e-06, %v4551_v54  ;;  %4824 = vmatprep.subr.bf16.mxu0 %v10073_v10 }
0x1370   : > { %10203 = vrsqrt.f32 %v4552_v23 }
0x1371   : > { %4825 = vmatpush1.bf16.msra.mxu0 %v10071_v47 }
0x1372   : > { %4826 = vmatprep.subr.bf16.mxu0 %v10076_v57  ;;  %v7810_v57 = vld [vmem:[#allocation31] ss:$0 sm:$0xff] }
0x1375   : > { %4827 = vmatpush1.bf16.msra.mxu0 %v10074_v2 }
0x1376   : > { %4828 = vmatprep.subr.bf16.mxu0 %v10079_v3 }
0x1379   : > { %4829 = vmatpush1.bf16.msra.mxu0 %v10077_v58 }
0x137a   : > { %v10204_v25 = vpop.eup %10203  ;;  %4830 = vmatprep.subr.bf16.mxu0 %v10082_v50 }
0x137b   : > { %8941 = vmatmul.mubr.msk.f32.vlgmr.msra.gmra.mrb[50].mxu1 %vm2261_vm1, %v10204_v25 }
0x137c   : > { %8197 = vmatpush3.bf16.msra.mxu1 %v10090_v48  ;;  %v10100_v48 = vld [vmem:[%s13526_s1 + $0x28] sm:$0xff]  }
0x137d   : > { %4831 = vmatpush1.bf16.msra.mxu0 %v10080_v38  ;;  %8198 = vmatprep.subr.bf16.mxu1 %v10091_v53  ;;  %v10101_v53 = vld [vmem:[%s13526_s1 + $0x70] sm:$0xff]  }
0x137e   : > { %4832 = vmatprep.subr.bf16.mxu0 %v10085_v28  ;;  %v10095_v28 = vld [vmem:[%s13526_s1 + $0x58] sm:$0xff]  }
0x1380   : > { %8199 = vmatpush3.bf16.msra.mxu1 %v10092_v32  ;;  %v10102_v32 = vld [vmem:[%s13526_s1 + $0x30] sm:$0xff]  }
0x1381   : > { %4833 = vmatpush1.bf16.msra.mxu0 %v10083_v41  ;;  %v10096_v41 = vld [vmem:[%s13526_s1 + $0x18] sm:$0xff]  }
0x1382   : > { %4834 = vmatprep.subr.bf16.mxu0 %v10088_v33  ;;  %v10097_v33 = vld [vmem:[%s13526_s1 + $0x60] sm:$0xff]  }
0x1385   : > { %4835 = vmatpush1.bf16.msra.mxu0 %v10086_v46  ;;  %v10098_v46 = vld [vmem:[%s13526_s1 + $0x20] sm:$0xff]  }
0x1386   : > { %9475 = vmatprep.subr.bf16.mxu0 %v11404_v0 }
0x143b   : > { %v4623_v62 = vpop.f32.mrb[46].mxu0 }
0x143c   : > { %v8931_v4 = vpop.f32.mrb[47].mxu0  ;;  %v4703_v42 = vrot.slane %v4623_v62, %v12418_v52  ;;  %v10103_v62 = vld [vmem:[%s13526_s1 + $0x78] sm:$0xff]  }
0x143d   : > { %v10104_v4 = vld [vmem:[%s13526_s1 + $0x38] sm:$0xff]  }
0x143e   : > { %v4704_v54 = vsub.f32 %v12764_v6, %v4703_v42  ;;  %v4705_v23 = vsub.f32 %v12767_v29, %v4703_v42  ;;  %v10093_v6 = vld [vmem:[%s13526_s1 + $0x50] sm:$0xff]   ;;  %v1937_v42 = vld [vmem:[#allocation32] sm:$0x3] }
0x143f   : > { %v10094_v29 = vld [vmem:[%s13526_s1 + $0x10] sm:$0xff]   ;;  %8200 = vmatprep.subr.bf16.mxu1 %v10093_v6  ;;  %s7190_s1 = scalar_lea.sflag [#allocation51], %s12104_s19 }
0x1440   : > { %8201 = vmatpush3.bf16.msra.mxu1 %v10094_v29 }
0x1441   : > { %8202 = vmatprep.subr.bf16.mxu1 %v10095_v28 }
0x1444   : > { %8203 = vmatpush3.bf16.msra.mxu1 %v10096_v41 }
0x1445   : > { %8204 = vmatprep.subr.bf16.mxu1 %v10097_v33 }
0x1448   : > { %8205 = vmatpush3.bf16.msra.mxu1 %v10098_v46 }
0x1449   : > { %8206 = vmatprep.subr.bf16.mxu1 %v10099_v22 }
0x144c   : > { %8207 = vmatpush3.bf16.msra.mxu1 %v10100_v48 }
0x144d   : > { %8208 = vmatprep.subr.bf16.mxu1 %v10101_v53 }
0x144e   : > { %v4696_v16 = vpop.f32.mrb[50].mxu1 }
0x144f   : > { %v4709_v25 = vrot.slane %v4696_v16, %v12418_v52  ;;  %v8942_v59 = vpop.f32.mrb[51].mxu1  ;;  %v4733_v16 = vrot.slane %v1937_v42, %v12418_v52 }
0x1450   : > { %8209 = vmatpush3.bf16.msra.mxu1 %v10102_v32 }
0x1451   : > { %v4710_v47 = vmul.f32 %v4709_v25, %v4704_v54  ;;  %v4711_v10 = vmul.f32 %v4709_v25, %v4705_v23  ;;  %8210 = vmatprep.subr.bf16.mxu1 %v10103_v62  ;;  %v4737_v54 = vrot.slane %v1937_v42, %v12684_v61 }
0x1453   : > { %v4718_v2 = vmul.f32 %v7809_v37, %v4710_v47  ;;  %v4719_v3 = vmul.f32 %v7809_v37, %v4711_v10 }
0x1454   : > { %8211 = vmatpush3.bf16.msra.mxu1 %v10104_v4 }
0x1455   : > { %v4726_v58 = vadd.f32 %v7810_v57, %v4718_v2  ;;  %v4727_v50 = vadd.f32 %v7810_v57, %v4719_v3  ;;  %9499 = vmatprep.subr.bf16.mxu1 %v11404_v0 }
0x1457   : > { %v4728_v38 = vpack.c.bf16 %v4727_v50, %v4726_v58 }
0x1459   : > { %4853 = vmatmul.mubr.bf16.vlgmr.msra.gmra.mrb[48].mxu0 %v4728_v38 }
0x145a   : > { %9477 = vmatpush3.bf16.msra.mxu0 %v12317_v24  ;;  %8975 = vmatprep.mubr.msk.f32.mxu0 %vm11405_vm0, %v11406_v1 }
0x145b   : > { %9478 = vmatprep.subr.bf16.mxu0 %v11404_v0 }
0x145e   : > { %9480 = vmatpush3.bf16.msra.mxu0 %v12323_v36 }
0x145f   : > { %9481 = vmatprep.subr.bf16.mxu0 %v11404_v0 }
0x1462   : > { %9483 = vmatpush3.bf16.msra.mxu0 %v12339_v45 }
0x1463   : > { %9484 = vmatprep.subr.bf16.mxu0 %v11404_v0 }
0x1466   : > { %9486 = vmatpush3.bf16.msra.mxu0 %v12345_v51 }
0x1467   : > { %9487 = vmatprep.subr.bf16.mxu0 %v11404_v0 }
0x146a   : > { %9489 = vmatpush3.bf16.msra.mxu0 %v12351_v55 }
0x146b   : > { %9490 = vmatprep.subr.bf16.mxu0 %v11404_v0 }
0x146e   : > { %9492 = vmatpush3.bf16.msra.mxu0 %v12357_v60 }
0x146f   : > { %9493 = vmatprep.subr.bf16.mxu0 %v11404_v0 }
0x1472   : > { %9495 = vmatpush3.bf16.msra.mxu0 %v12372_v8 }
0x1473   : > { %9496 = vmatprep.subr.bf16.mxu0 %v11404_v0 }
0x1476   : > { %9498 = vmatpush3.bf16.msra.mxu0 %v12380_v20 }
0x1477   : > { %9523 = vmatprep.subr.bf16.mxu0 %v11404_v0 }
0x152c   : > { %v4854_v23 = vpop.f32.mrb[48].mxu0 }
0x152d   : > { %v4855_v25 = vadd.f32 %v4854_v23, %v4733_v16  ;;  %v4856_v59 = vpop.f32.mrb[49].mxu0 }
0x152e   : > { %v4857_v37 = vadd.f32 %v4856_v59, %v4737_v54  ;;  %v4858_v47 = vpop.f32.mrb[50].mxu0 }
0x152f   : > { %v4867_v10 = vmul.f32 0.70710677, %v4855_v25  ;;  %v4859_v57 = vadd.f32 %v4858_v47, %v4733_v16  ;;  %v4860_v2 = vpop.f32.mrb[51].mxu0  ;;  %v4863_v22 = vmul.f32 0.5, %v4855_v25 }
0x1530   : > { %v4868_v3 = vmul.f32 0.70710677, %v4857_v37  ;;  %v4861_v58 = vadd.f32 %v4860_v2, %v4737_v54  ;;  %v4864_v32 = vmul.f32 0.5, %v4857_v37 }
0x1531   : > { %10205 = verf.f32 %v4867_v10  ;;  %v4869_v50 = vmul.f32 0.70710677, %v4859_v57  ;;  %v4865_v48 = vmul.f32 0.5, %v4859_v57  ;;  %v10313_v10 = vld [vmem:[%s12110_s25] sm:$0xff] }
0x1532   : > { %10207 = verf.f32 %v4868_v3  ;;  %v4870_v38 = vmul.f32 0.70710677, %v4861_v58  ;;  %v4866_v62 = vmul.f32 0.5, %v4861_v58  ;;  %v10314_v3 = vld [vmem:[%s12110_s25 + $0x8] sm:$0xff]  ;;  %s13528_s25 = sld [smem:[#allocation99_spill]] }
0x1533   : > { %10209 = verf.f32 %v4869_v50 }
0x1534   : > { %10211 = verf.f32 %v4870_v38 }
0x1538   : > { %v10113_v15 = vld [vmem:[%s13528_s25] sm:$0xff]   ;;  %v10118_v31 = vld [vmem:[%s13528_s25 + $0x28] sm:$0xff]   ;;  %v10119_v34 = vld [vmem:[%s13528_s25 + $0x30] sm:$0xff]  }
0x1539   : > { %v10117_v13 = vld [vmem:[%s13528_s25 + $0x20] sm:$0xff]   ;;  %v10120_v19 = vld [vmem:[%s13528_s25 + $0x38] sm:$0xff]  }
0x153b   : > { %v10206_v6 = vpop.eup %10205 }
0x153c   : > { %v10208_v29 = vpop.eup %10207  ;;  %v4875_v28 = vadd.f32 1.0, %v10206_v6 }
0x153d   : > { %v10210_v41 = vpop.eup %10209  ;;  %v4876_v33 = vadd.f32 1.0, %v10208_v29 }
0x153e   : > { %v10212_v46 = vpop.eup %10211  ;;  %v4877_v53 = vadd.f32 1.0, %v10210_v41  ;;  %v4879_v42 = vmul.f32 %v4875_v28, %v4863_v22 }
0x153f   : > { %v4878_v4 = vadd.f32 1.0, %v10212_v46  ;;  %v4880_v54 = vmul.f32 %v4876_v33, %v4864_v32 }
0x1540   : > { %v4881_v16 = vmul.f32 %v4877_v53, %v4865_v48 }
0x1541   : > { %v4882_v23 = vmul.f32 %v4878_v4, %v4866_v62 }
0x1542   : > { %v4883_v59 = vpack.c.bf16 %v4881_v16, %v4879_v42 }
0x1543   : > { %v4884_v47 = vpack.c.bf16 %v4882_v23, %v4880_v54  ;;  %v10105_v54 = vld [vmem:[%s13527_s2] sm:$0xff]  }
0x1545   : > { %5019 = vmatprep.mubr.bf16.mxu1 %v4884_v47 }
0x1546   : > { %5020 = vmatmul.mubr.bf16.vlgmr.msra.gmra.mrb[52].mxu1 %v4883_v59 }
0x1547   : > { %9501 = vmatpush3.bf16.msra.mxu1 %v12317_v24  ;;  %9010 = vmatprep.mubr.msk.f32.mxu1 %vm11405_vm0, %v11406_v1 }
0x1548   : > { %9502 = vmatprep.subr.bf16.mxu1 %v11404_v0 }
0x154b   : > { %9504 = vmatpush3.bf16.msra.mxu1 %v12323_v36  ;;  %v7827_v36 = vld [vmem:[#allocation34] ss:$0 sm:$0xff] }
0x154c   : > { %9505 = vmatprep.subr.bf16.mxu1 %v11404_v0 }
0x154f   : > { %9507 = vmatpush3.bf16.msra.mxu1 %v12339_v45 }
0x1550   : > { %9508 = vmatprep.subr.bf16.mxu1 %v11404_v0 }
0x1553   : > { %9510 = vmatpush3.bf16.msra.mxu1 %v12345_v51 }
0x1554   : > { %9511 = vmatprep.subr.bf16.mxu1 %v11404_v0 }
0x1557   : > { %9513 = vmatpush3.bf16.msra.mxu1 %v12351_v55 }
0x1558   : > { %9514 = vmatprep.subr.bf16.mxu1 %v11404_v0 }
0x155b   : > { %9516 = vmatpush3.bf16.msra.mxu1 %v12357_v60 }
0x155c   : > { %9517 = vmatprep.subr.bf16.mxu1 %v11404_v0 }
0x155f   : > { %9519 = vmatpush3.bf16.msra.mxu1 %v12372_v8 }
0x1560   : > { %9520 = vmatprep.subr.bf16.mxu1 %v11404_v0 }
0x1563   : > { %9522 = vmatpush3.bf16.msra.mxu1 %v12380_v20 }
0x1564   : > { %9529 = vmatprep.subr.bf16.mxu1 %v11404_v0 }
0x1619   : > { %v8212_v24 = vpop.f32.mrb[52].mxu1 }
0x161a   : > { %v8213_v45 = vpop.f32.mrb[53].mxu1 }
0x161b   : > { %v8214_v51 = vadd.f32 %v8213_v45, %v8212_v24  ;;  %v8215_v55 = vpop.f32.mrb[54].mxu1  ;;  %v10106_v24 = vld [vmem:[%s13527_s2 + $0x8] sm:$0xff]  }
0x161c   : > { %v8216_v25 = vpop.f32.mrb[55].mxu1 }
0x161d   : > { %v5022_v37 = vadd.f32 %v8214_v51, %v7827_v36  ;;  %v8217_v60 = vadd.f32 %v8216_v25, %v8215_v55  ;;  %v10107_v55 = vld [vmem:[%s13527_s2 + $0x10] sm:$0xff]  }
0x161f   : > { %v5028_v57 = vadd.f32 %v10313_v10, %v5022_v37  ;;  %v5025_v2 = vadd.f32 %v8217_v60, %v7827_v36  ;;  %v10108_v60 = vld [vmem:[%s13527_s2 + $0x18] sm:$0xff]   ;;  %v10109_v10 = vld [vmem:[%s13527_s2 + $0x20] sm:$0xff]  }
0x1621   : > { %v12865_v8 = vmul.f32 0.70710677, %v5028_v57  ;;  %v5029_v58 = vadd.f32 %v10314_v3, %v5025_v2  ;;  %v10111_v57 = vld [vmem:[%s13527_s2 + $0x30] sm:$0xff]   ;;  %v10112_v2 = vld [vmem:[%s13527_s2 + $0x38] sm:$0xff]   ;;  %v10114_v3 = vld [vmem:[%s13528_s25 + $0x8] sm:$0xff]  }
0x1623   : > { %7182 = vst [vmem:[%s12870_s15] sm:$0xff] %v12865_v8  ;;  %v12874_v20 = vmul.f32 0.70710677, %v5029_v58  ;;  %v5039_v50 = vmul.f32 %v12865_v8, %v12865_v8  ;;  %v10115_v58 = vld [vmem:[%s13528_s25 + $0x10] sm:$0xff]  }
0x1625   : > { %v5032_v38 = vadd.f32 %v12874_v20, %v12865_v8  ;;  %v5040_v6 = vmul.f32 %v12874_v20, %v12874_v20  ;;  %7183 = vst [vmem:[%s12870_s15 + $0x8] sm:$0xff] %v12874_v20 }
0x1627   : > { %v5033_v29 = vrot.slane %v5032_v38, 4  ;;  %v5041_v28 = vadd.f32 %v5040_v6, %v5039_v50  ;;  %v10116_v50 = vld [vmem:[%s13528_s25 + $0x18] sm:$0xff]  }
0x1629   : > { %v5034_v41 = vadd.f32 %v5033_v29, %v5032_v38  ;;  %v5042_v33 = vrot.slane %v5041_v28, 4 }
0x162b   : > { %v5035_v46 = vrot.slane %v5034_v41, 2  ;;  %v5043_v22 = vadd.f32 %v5042_v33, %v5041_v28  ;;  %v7846_v28 = vld [vmem:[#allocation35] ss:$0 sm:$0xff] }
0x162d   : > { %v5036_v48 = vadd.f32 %v5035_v46, %v5034_v41  ;;  %v5044_v53 = vrot.slane %v5043_v22, 2  ;;  %v7847_v46 = vld [vmem:[#allocation37] ss:$0 sm:$0xff] }
0x162f   : > { %v5037_v32 = vrot.slane %v5036_v48, 1  ;;  %v5045_v62 = vadd.f32 %v5044_v53, %v5043_v22 }
0x1631   : > { %v5038_v4 = vadd.f32 %v5037_v32, %v5036_v48  ;;  %v5046_v42 = vrot.slane %v5045_v62, 1 }
0x1633   : > { %8976 = vmatmul.mubr.f32.vlgmr.msra.gmra.mrb[52].mxu0 %v5038_v4  ;;  %v5047_v16 = vadd.f32 %v5046_v42, %v5045_v62  ;;  %v7850_v42 = vld [vmem:[#allocation41] ss:$0 sm:$0xff] }
0x1634   : > { %9525 = vmatpush3.bf16.msra.mxu0 %v12401_v39  ;;  %9021 = vmatprep.mubr.msk.f32.mxu0 %vm11405_vm0, %v11406_v1 }
0x1635   : > { %9011 = vmatmul.mubr.f32.vlgmr.msra.gmra.mrb[56].mxu1 %v5047_v16  ;;  %9526 = vmatprep.subr.bf16.mxu0 %v11404_v0 }
0x1636   : > { %9531 = vmatpush3.bf16.msra.mxu1 %v12401_v39  ;;  %9032 = vmatprep.mubr.msk.f32.mxu1 %vm11405_vm0, %v11406_v1 }
0x1637   : > { %9532 = vmatprep.subr.bf16.mxu1 %v11404_v0 }
0x1638   : > { %9528 = vmatpush3.bf16.msra.mxu0 %v12407_v43 }
0x1639   : > { %9035 = vmatprep.subr.bf16.mxu0 %v10105_v54 }
0x163a   : > { %9534 = vmatpush3.bf16.msra.mxu1 %v12407_v43 }
0x163b   : > { %9059 = vmatprep.subr.bf16.mxu1 %v11406_v1 }
0x1706   : > { %v5114_v23 = vpop.f32.mrb[52].mxu0 }
0x1707   : > { %v5118_v59 = vmul.f32 0.015625, %v5114_v23  ;;  %v8977_v47 = vpop.f32.mrb[53].mxu0 }
0x1708   : > { %v5185_v39 = vpop.f32.mrb[56].mxu1 }
0x1709   : > { %v5190_v36 = vmul.f32 %v5118_v59, %v5118_v59  ;;  %v5189_v45 = vmul.f32 0.015625, %v5185_v39  ;;  %v9012_v51 = vpop.f32.mrb[57].mxu1  ;;  %9022 = vmatmul.mubr.msk.f32.vlgmr.msra.gmra.mrb[54].mxu0 %vm2261_vm1, %v5118_v59 }
0x170a   : > { %9036 = vmatpush3.bf16.msra.mxu0 %v10105_v54  ;;  %9051 = vmatprep.mubr.bf16.mxu0 %v5397_v21 }
0x170b   : > { %v5191_v43 = vsub.f32 %v5189_v45, %v5190_v36  ;;  %9037 = vmatprep.subr.bf16.mxu0 %v10106_v24 }
0x170d   : > { %v5192_v25 = vmax.f32 %v5191_v43, 0.0 }
0x170e   : > { %9038 = vmatpush3.bf16.msra.mxu0 %v10106_v24 }
0x170f   : > { %v5193_v37 = vadd.f32 1e-06, %v5192_v25  ;;  %9039 = vmatprep.subr.bf16.mxu0 %v10107_v55 }
0x1711   : > { %10213 = vrsqrt.f32 %v5193_v37 }
0x1712   : > { %9040 = vmatpush3.bf16.msra.mxu0 %v10107_v55 }
0x1713   : > { %9041 = vmatprep.subr.bf16.mxu0 %v10108_v60 }
0x1716   : > { %9042 = vmatpush3.bf16.msra.mxu0 %v10108_v60 }
0x1717   : > { %9043 = vmatprep.subr.bf16.mxu0 %v10109_v10 }
0x171a   : > { %9044 = vmatpush3.bf16.msra.mxu0 %v10109_v10 }
0x171b   : > { %v10214_v21 = vpop.eup %10213  ;;  %9045 = vmatprep.subr.bf16.mxu0 %v10110_v14 }
0x171c   : > { %9033 = vmatmul.mubr.msk.f32.vlgmr.msra.gmra.mrb[58].mxu1 %vm2261_vm1, %v10214_v21 }
0x171d   : > { %9060 = vmatpush3.bf16.msra.mxu1 %v10113_v15  ;;  %9075 = vmatprep.mubr.msk.bf16.mxu1 %vm11405_vm0, %v11406_v1  ;;  %v7859_v15 = vld [vmem:[#allocation43] ss:$0 sm:$0xff] }
0x171e   : > { %9046 = vmatpush3.bf16.msra.mxu0 %v10110_v14  ;;  %9061 = vmatprep.subr.bf16.mxu1 %v11406_v1 }
0x171f   : > { %9047 = vmatprep.subr.bf16.mxu0 %v10111_v57 }
0x1721   : > { %9062 = vmatpush3.bf16.msra.mxu1 %v10114_v3 }
0x1722   : > { %9048 = vmatpush3.bf16.msra.mxu0 %v10111_v57  ;;  %9063 = vmatprep.subr.bf16.mxu1 %v11406_v1 }
0x1723   : > { %9049 = vmatprep.subr.bf16.mxu0 %v10112_v2 }
0x1725   : > { %9064 = vmatpush3.bf16.msra.mxu1 %v10115_v58 }
0x1726   : > { %9050 = vmatpush3.bf16.msra.mxu0 %v10112_v2  ;;  %9065 = vmatprep.subr.bf16.mxu1 %v11406_v1 }
0x1729   : > { %9052 = vmatmul.mubr.bf16.vlgmr.msra.gmra.mrb[56].mxu0 %v5398_v26  ;;  %9066 = vmatpush3.bf16.msra.mxu1 %v10116_v50 }
0x172a   : > { %9055 = vmatprep.mubr.bf16.mxu0 %v5399_v27  ;;  %9067 = vmatprep.subr.bf16.mxu1 %v11406_v1 }
0x172d   : > { %9068 = vmatpush3.bf16.msra.mxu1 %v10117_v13 }
0x172e   : > { %9069 = vmatprep.subr.bf16.mxu1 %v11406_v1 }
0x1731   : > { %9056 = vmatmul.mubr.bf16.gmra.mrb[60].mxu0 %v5400_v12  ;;  %9070 = vmatpush3.bf16.msra.mxu1 %v10118_v31 }
0x1732   : > { %9071 = vmatprep.subr.bf16.mxu1 %v11406_v1 }
0x1735   : > { %9072 = vmatpush3.bf16.msra.mxu1 %v10119_v34 }
0x1736   : > { %9073 = vmatprep.subr.bf16.mxu1 %v11406_v1 }
0x1739   : > { %9074 = vmatpush3.bf16.msra.mxu1 %v10120_v19 }
0x17dc   : > { %v5264_v26 = vpop.f32.mrb[54].mxu0 }
0x17dd   : > { %v9023_v11 = vpop.f32.mrb[55].mxu0  ;;  %v5344_v35 = vrot.slane %v5264_v26, %v12418_v52 }
0x17df   : > { %v5345_v12 = vsub.f32 %v12865_v8, %v5344_v35  ;;  %v5346_v38 = vsub.f32 %v12874_v20, %v5344_v35 }
0x17ef   : > { %v5337_v27 = vpop.f32.mrb[58].mxu1 }
0x17f0   : > { %v5350_v6 = vrot.slane %v5337_v27, %v12418_v52  ;;  %v9034_v29 = vpop.f32.mrb[59].mxu1 }
0x17f2   : > { %v5351_v41 = vmul.f32 %v5350_v6, %v5345_v12  ;;  %v5352_v33 = vmul.f32 %v5350_v6, %v5346_v38 }
0x17f4   : > { %v5359_v22 = vmul.f32 %v7846_v28, %v5351_v41  ;;  %v5360_v48 = vmul.f32 %v7846_v28, %v5352_v33 }
0x17f6   : > { %v5367_v53 = vadd.f32 %v7847_v46, %v5359_v22  ;;  %v5368_v32 = vadd.f32 %v7847_v46, %v5360_v48 }
0x17f8   : > { %v5520_v62 = vpack.c.bf16 %v5368_v32, %v5367_v53 }
0x17fa   : > { %9076 = vmatmul.mubr.bf16.vlgmr.msra.gmra.mrb[60].mxu1 %v5520_v62 }
0x17fc   : > { %v9053_v4 = vpop.f32.mrb[56].mxu0 }
0x17fd   : > { %v5489_v16 = vpop.f32.mrb[57].mxu0  ;;  %v5498_v8 = vadd.f32 %v9053_v4, %v7850_v42 }
0x17fe   : > { %v9054_v54 = vpop.f32.mrb[58].mxu0  ;;  %v5490_v59 = vadd.f32 %v7850_v42, %v5489_v16 }
0x17ff   : > { %v5501_v23 = vadd.f32 %v9054_v54, %v7850_v42  ;;  %v5492_v20 = vpop.f32.mrb[59].mxu0 }
0x1800   : > { %v5493_v47 = vadd.f32 %v7850_v42, %v5492_v20 }
0x1801   : > { %v5617_v24 = vpack.c.bf16 %v5501_v23, %v5498_v8 }
0x1802   : > { %v5616_v39 = vpack.c.bf16 %v5493_v47, %v5490_v59 }
0x1804   : > { %v9057_v36 = vpop.f32.mrb[60].mxu0  ;;  %5882 = vrot.lane.b32.xlu1 %v5616_v39, %s11408_s13  ;;  %9081 = vmatprep.mubr.msk.bf16.mxu1 %vm2261_vm1, %v5616_v39 }
0x1805   : > { %v5505_v45 = vpop.f32.mrb[61].mxu0  ;;  %v5514_v43 = vadd.f32 %v9057_v36, %v7850_v42 }
0x1806   : > { %v9058_v51 = vpop.f32.mrb[62].mxu0  ;;  %v5506_v37 = vadd.f32 %v7850_v42, %v5505_v45 }
0x1807   : > { %v5517_v55 = vadd.f32 %v9058_v51, %v7850_v42  ;;  %v5508_v25 = vpop.f32.mrb[63].mxu0 }
0x1808   : > { %v5509_v60 = vadd.f32 %v7850_v42, %v5508_v25  ;;  %5884 = vrot.lane.b32.xlu1 %v5617_v24, %s11408_s13 }
0x1809   : > { %v5619_v10 = vpack.c.bf16 %v5517_v55, %v5514_v43 }
0x180a   : > { %v5618_v14 = vpack.c.bf16 %v5509_v60, %v5506_v37 }
0x180c   : > { %5886 = vrot.lane.b32.xlu1 %v5618_v14, %s11408_s13 }
0x1810   : > { %5888 = vrot.lane.b32.xlu1 %v5619_v10, %s11408_s13 }
0x1876   : > { %v5883_v34 = vpop.permute.xlu1 %5882 }
0x187a   : > { %v5885_v11 = vpop.permute.xlu1 %5884 }
0x187e   : > { %v5887_v35 = vpop.permute.xlu1 %5886 }
0x1882   : > { %v5889_v27 = vpop.permute.xlu1 %5888 }
0x18cd   : > { %v5609_v21 = vpop.f32.mrb[60].mxu1 }
0x18ce   : > { %v9077_v57 = vpop.f32.mrb[61].mxu1  ;;  %v5610_v3 = vadd.f32 %v7859_v15, %v5609_v21 }
0x18cf   : > { %v5612_v2 = vpop.f32.mrb[62].mxu1 }
0x18d0   : > { %v5613_v58 = vadd.f32 %v7859_v15, %v5612_v2  ;;  %v9078_v50 = vpop.f32.mrb[63].mxu1 }
0x18d2   : > { %v12943_v13 = vpack.c.bf16 %v5613_v58, %v5610_v3 }
0x18d4   : > { %5890 = vrot.lane.b32.xlu0 %v12943_v13, %s11408_s13  ;;  %9603 = vmatprep.subr.msk.bf16.mxu1 %vm2261_vm1, %v12943_v13  ;;  %v5634_v31 = vsel %vm2261_vm1, %v12943_v13, 0  ;;  %s13531_s13 = sld [smem:[#allocation103_spill]] }
0x18d5   : > { %9080 = vmatpush3.bf16.xpose.msra.mxu1 %v5634_v31 }
0x18dc   : > { %9082 = vmatmul.mubr.msk.bf16.vlgmr.msra.gmra.mrb[64].mxu1 %vm2261_vm1, %v5617_v24 }
0x18dd   : > { %9085 = vmatprep.mubr.msk.bf16.mxu1 %vm2261_vm1, %v5618_v14 }
0x18e4   : > { %9086 = vmatmul.mubr.msk.bf16.gmra.mrb[68].mxu1 %vm2261_vm1, %v5619_v10 }
0x18e5   : > { %9101 = vmatprep.mubr.msk.bf16.mxu1 %vm2261_vm1, %v5883_v34 }
0x1946   : > { %v5891_v19 = vpop.permute.xlu0 %5890 }
0x1947   : > { %v5905_v26 = vsel %vm2261_vm1, %v5891_v19, 0  ;;  %9604 = vmatprep.subr.msk.bf16.mxu1 %vm2261_vm1, %v5891_v19 }
0x1948   : > { %9100 = vmatpush3.bf16.xpose.msra.mxu1 %v5905_v26 }
0x194f   : > { %9102 = vmatmul.mubr.msk.bf16.vlgmr.msra.gmra.mrb[72].mxu1 %vm2261_vm1, %v5885_v11 }
0x1950   : > { %9105 = vmatprep.mubr.msk.bf16.mxu1 %vm2261_vm1, %v5887_v35 }
0x1957   : > { %9106 = vmatmul.mubr.msk.bf16.gmra.mrb[76].mxu1 %vm2261_vm1, %v5889_v27 }
0x19af   : > { %v9083_v12 = vpop.f32.mrb[64].mxu1 }
0x19b0   : > { %v5670_v38 = vpop.f32.mrb[65].mxu1  ;;  %v5707_v6 = vsel %vm4048_vm3, %v9083_v12, -inf }
0x19b1   : > { %5708 = vmax.xlane.f32.xlu1 %v5707_v6  ;;  %v9084_v29 = vpop.f32.mrb[66].mxu1  ;;  %v5701_v33 = vsel %vm4048_vm3, %v5670_v38, -inf }
0x19b2   : > { %v5673_v28 = vpop.f32.mrb[67].mxu1  ;;  %v5710_v41 = vsel %vm4048_vm3, %v9084_v29, -inf }
0x19b3   : > { %5711 = vmax.xlane.f32.xlu0 %v5710_v41  ;;  %v5704_v46 = vsel %vm4048_vm3, %v5673_v28, -inf }
0x19b5   : > { %5702 = vmax.xlane.f32.xlu1 %v5701_v33 }
0x19b7   : > { %5705 = vmax.xlane.f32.xlu0 %v5704_v46  ;;  %v9087_v22 = vpop.f32.mrb[68].mxu1 }
0x19b8   : > { %v12964_v48 = vpop.f32.mrb[69].mxu1  ;;  %v5719_v53 = vsel %vm4048_vm3, %v9087_v22, -inf }
0x19b9   : > { %5720 = vmax.xlane.f32.xlu1 %v5719_v53  ;;  %v9088_v32 = vpop.f32.mrb[70].mxu1  ;;  %v5713_v42 = vsel %vm4048_vm3, %v12964_v48, -inf }
0x19ba   : > { %v12967_v62 = vpop.f32.mrb[71].mxu1  ;;  %v5722_v4 = vsel %vm4048_vm3, %v9088_v32, -inf }
0x19bb   : > { %5723 = vmax.xlane.f32.xlu0 %v5722_v4  ;;  %v5716_v16 = vsel %vm4048_vm3, %v12967_v62, -inf }
0x19bd   : > { %5714 = vmax.xlane.f32.xlu1 %v5713_v42 }
0x19bf   : > { %5717 = vmax.xlane.f32.xlu0 %v5716_v16 }
0x1a22   : > { %v12974_v54 = vpop.f32.mrb[72].mxu1 }
0x1a23   : > { %v12976_v8 = vpop.f32.mrb[73].mxu1  ;;  %v5978_v23 = vsel %vm4048_vm3, %v12974_v54, -inf }
0x1a24   : > { %5979 = vmax.xlane.f32.xlu1 %v5978_v23  ;;  %v12980_v20 = vpop.f32.mrb[74].mxu1  ;;  %v5972_v24 = vsel %vm4048_vm3, %v12976_v8, -inf }
0x1a25   : > { %v12982_v59 = vpop.f32.mrb[75].mxu1  ;;  %v5981_v47 = vsel %vm4048_vm3, %v12980_v20, -inf }
0x1a26   : > { %5982 = vmax.xlane.f32.xlu0 %v5981_v47  ;;  %v5975_v39 = vsel %vm4048_vm3, %v12982_v59, -inf }
0x1a28   : > { %5973 = vmax.xlane.f32.xlu1 %v5972_v24 }
0x1a2a   : > { %v12990_v36 = vpop.f32.mrb[76].mxu1  ;;  %5976 = vmax.xlane.f32.xlu0 %v5975_v39 }
0x1a2b   : > { %v12992_v45 = vpop.f32.mrb[77].mxu1  ;;  %v5990_v51 = vsel %vm4048_vm3, %v12990_v36, -inf }
0x1a2c   : > { %5991 = vmax.xlane.f32.xlu1 %v5990_v51  ;;  %v12996_v43 = vpop.f32.mrb[78].mxu1  ;;  %v5984_v37 = vsel %vm4048_vm3, %v12992_v45, -inf }
0x1a2d   : > { %v12998_v55 = vpop.f32.mrb[79].mxu1  ;;  %v5993_v25 = vsel %vm4048_vm3, %v12996_v43, -inf }
0x1a2e   : > { %5994 = vmax.xlane.f32.xlu0 %v5993_v25  ;;  %v5987_v60 = vsel %vm4048_vm3, %v12998_v55, -inf }
0x1a30   : > { %5985 = vmax.xlane.f32.xlu1 %v5984_v37 }
0x1a32   : > { %5988 = vmax.xlane.f32.xlu0 %v5987_v60 }
0x1a3e   : > { %v5709_v10 = vpop.xlane.xlu1 %5708 }
0x1a3f   : > { %v5727_v14 = vsub.f32 %v9083_v12, %v5709_v10 }
0x1a40   : > { %v5712_v15 = vpop.xlane.xlu0 %5711 }
0x1a41   : > { %v5737_v21 = vmul.f32 1.442695, %v5727_v14  ;;  %v5728_v57 = vsub.f32 %v9084_v29, %v5712_v15  ;;  %5786 = vrot.lane.b32.xlu1 %v12943_v13, %s11407_s8  ;;  %s13529_s8 = sld [smem:[#allocation101_spill]] }
0x1a42   : > { %v5703_v2 = vpop.xlane.xlu1 %5702 }
0x1a43   : > { %v5739_v3 = vmul.f32 1.442695, %v5728_v57  ;;  %v5725_v58 = vsub.f32 %v5670_v38, %v5703_v2  ;;  %10215 = vpow2.f32 %v5737_v21 }
0x1a44   : > { %v5706_v50 = vpop.xlane.xlu0 %5705 }
0x1a45   : > { %10217 = vpow2.f32 %v5739_v3  ;;  %v5733_v31 = vmul.f32 1.442695, %v5725_v58  ;;  %v5726_v34 = vsub.f32 %v5673_v28, %v5706_v50 }
0x1a46   : > { %v5721_v19 = vpop.xlane.xlu1 %5720 }
0x1a47   : > { %v5735_v26 = vmul.f32 1.442695, %v5726_v34  ;;  %v5731_v11 = vsub.f32 %v9087_v22, %v5721_v19  ;;  %10219 = vpow2.f32 %v5733_v31 }
0x1a48   : > { %v5724_v35 = vpop.xlane.xlu0 %5723  ;;  %6056 = vrot.lane.b32.xlu0 %v12943_v13, %s11409_s5  ;;  %s13532_s5 = sld [smem:[#allocation105_spill]] }
0x1a49   : > { %10221 = vpow2.f32 %v5735_v26  ;;  %v5745_v27 = vmul.f32 1.442695, %v5731_v11  ;;  %v5732_v12 = vsub.f32 %v9088_v32, %v5724_v35 }
0x1a4a   : > { %v5715_v6 = vpop.xlane.xlu1 %5714 }
0x1a4b   : > { %v5747_v29 = vmul.f32 1.442695, %v5732_v12  ;;  %v5729_v38 = vsub.f32 %v12964_v48, %v5715_v6  ;;  %10223 = vpow2.f32 %v5745_v27 }
0x1a4c   : > { %v5718_v41 = vpop.xlane.xlu0 %5717 }
0x1a4d   : > { %10225 = vpow2.f32 %v5747_v29  ;;  %v5741_v33 = vmul.f32 1.442695, %v5729_v38  ;;  %v5730_v28 = vsub.f32 %v12967_v62, %v5718_v41  ;;  %v13012_v46 = vpop.eup %10215 }
0x1a4f   : > { %v13014_v22 = vpop.eup %10217  ;;  %v5743_v53 = vmul.f32 1.442695, %v5730_v28  ;;  %10227 = vpow2.f32 %v5741_v33 }
0x1a50   : > { %v5782_v13 = vpack.c.bf16 %v13014_v22, %v13012_v46 }
0x1a51   : > { %10229 = vpow2.f32 %v5743_v53  ;;  %v13018_v32 = vpop.eup %10219 }
0x1a53   : > { %v13020_v4 = vpop.eup %10221 }
0x1a54   : > { %v5781_v48 = vpack.c.bf16 %v13020_v4, %v13018_v32 }
0x1a55   : > { %v13024_v42 = vpop.eup %10223 }
0x1a56   : > { %9091 = vmatprep.mubr.msk.bf16.mxu0 %vm4048_vm3, %v5781_v48 }
0x1a57   : > { %v13027_v62 = vpop.eup %10225 }
0x1a58   : > { %v5784_v16 = vpack.c.bf16 %v13027_v62, %v13024_v42 }
0x1a59   : > { %v13031_v23 = vpop.eup %10227 }
0x1a5b   : > { %v13033_v47 = vpop.eup %10229 }
0x1a5c   : > { %v5783_v24 = vpack.c.bf16 %v13033_v47, %v13031_v23 }
0x1ab1   : > { %v5980_v39 = vpop.xlane.xlu1 %5979 }
0x1ab2   : > { %v5998_v51 = vsub.f32 %v12974_v54, %v5980_v39 }
0x1ab3   : > { %v5983_v25 = vpop.xlane.xlu0 %5982 }
0x1ab4   : > { %v6008_v37 = vmul.f32 1.442695, %v5998_v51  ;;  %v5999_v60 = vsub.f32 %v12980_v20, %v5983_v25 }
0x1ab5   : > { %v5974_v10 = vpop.xlane.xlu1 %5973 }
0x1ab6   : > { %v6010_v14 = vmul.f32 1.442695, %v5999_v60  ;;  %v5996_v15 = vsub.f32 %v12976_v8, %v5974_v10  ;;  %10231 = vpow2.f32 %v6008_v37 }
0x1ab7   : > { %v5977_v21 = vpop.xlane.xlu0 %5976 }
0x1ab8   : > { %10233 = vpow2.f32 %v6010_v14  ;;  %v6004_v57 = vmul.f32 1.442695, %v5996_v15  ;;  %v5997_v2 = vsub.f32 %v12982_v59, %v5977_v21  ;;  %v5749_v14 = vsel %vm4048_vm3, %v13018_v32, 0.0 }
0x1ab9   : > { %v5992_v3 = vpop.xlane.xlu1 %5991  ;;  %v5755_v15 = vsel %vm4048_vm3, %v13012_v46, 0.0  ;;  %v5758_v32 = vsel %vm4048_vm3, %v13014_v22, 0.0  ;;  %v5764_v21 = vsel %vm4048_vm3, %v13033_v47, 0.0  ;;  %v5767_v46 = vsel %vm4048_vm3, %v13024_v42, 0.0  ;;  %v10121_v42 = vld [vmem:[#allocation44 + $0x10] sm:$0xff]  }
0x1aba   : > { %10235 = vpow2.f32 %v6004_v57  ;;  %v6006_v58 = vmul.f32 1.442695, %v5997_v2  ;;  %v6002_v50 = vsub.f32 %v12990_v36, %v5992_v3  ;;  %v5770_v22 = vsel %vm4048_vm3, %v13027_v62, 0.0  ;;  %9119 = vmatprep.subr.bf16.mxu1 %v10121_v42  ;;  %v10122_v62 = vld [vmem:[#allocation44 + $0x18] sm:$0xff]  }
0x1abb   : > { %v5995_v54 = vpop.xlane.xlu0 %5994  ;;  %9120 = vmatpush3.bf16.msra.mxu1 %v10121_v42 }
0x1abc   : > { %10237 = vpow2.f32 %v6006_v58  ;;  %v6016_v31 = vmul.f32 1.442695, %v6002_v50  ;;  %v6003_v20 = vsub.f32 %v12996_v43, %v5995_v54  ;;  %9121 = vmatprep.subr.bf16.mxu1 %v10122_v62 }
0x1abd   : > { %v5986_v34 = vpop.xlane.xlu1 %5985 }
0x1abe   : > { %v6018_v19 = vmul.f32 1.442695, %v6003_v20  ;;  %v6000_v8 = vsub.f32 %v12992_v45, %v5986_v34  ;;  %10239 = vpow2.f32 %v6016_v31 }
0x1abf   : > { %v5989_v26 = vpop.xlane.xlu0 %5988  ;;  %9122 = vmatpush3.bf16.msra.mxu1 %v10122_v62 }
0x1ac0   : > { %10241 = vpow2.f32 %v6018_v19  ;;  %v6012_v11 = vmul.f32 1.442695, %v6000_v8  ;;  %v6001_v59 = vsub.f32 %v12998_v55, %v5989_v26  ;;  %v10232_v35 = vpop.eup %10231 }
0x1ac1   : > { %v5787_v27 = vpop.permute.xlu1 %5786  ;;  %v6026_v28 = vsel %vm4048_vm3, %v10232_v35, 0.0 }
0x1ac2   : > { %v10234_v12 = vpop.eup %10233  ;;  %10243 = vpow2.f32 %v6012_v11  ;;  %v6014_v36 = vmul.f32 1.442695, %v6001_v59  ;;  %9089 = vmatprep.subr.bf16.mxu0 %v5787_v27 }
0x1ac3   : > { %v6053_v6 = vpack.c.bf16 %v10234_v12, %v10232_v35  ;;  %9090 = vmatpush3.bf16.msra.mxu0 %v5787_v27  ;;  %v6057_v29 = vpop.permute.xlu0 %6056  ;;  %v6029_v48 = vsel %vm4048_vm3, %v10234_v12, 0.0 }
0x1ac4   : > { %v10236_v43 = vpop.eup %10235  ;;  %10245 = vpow2.f32 %v6014_v36  ;;  %9109 = vmatprep.subr.bf16.mxu0 %v6057_v29 }
0x1ac5   : > { %v6020_v45 = vsel %vm4048_vm3, %v10236_v43, 0.0 }
0x1ac6   : > { %v10238_v38 = vpop.eup %10237  ;;  %6021 = vadd.xlane.f32.xlu1 %v6020_v45  ;;  %9092 = vmatmul.mubr.msk.bf16.vlgmr.msra.gmra.mrb[64].mxu0 %vm4048_vm3, %v5782_v13 }
0x1ac7   : > { %9095 = vmatprep.mubr.msk.bf16.mxu0 %vm4048_vm3, %v5783_v24  ;;  %9110 = vmatpush3.bf16.msra.mxu0 %v6057_v29  ;;  %v6023_v55 = vsel %vm4048_vm3, %v10238_v38, 0.0  ;;  %v6052_v41 = vpack.c.bf16 %v10238_v38, %v10236_v43 }
0x1ac8   : > { %6024 = vadd.xlane.f32.xlu0 %v6023_v55  ;;  %9535 = vmatprep.subr.bf16.mxu0 %v11404_v0  ;;  %v10240_v33 = vpop.eup %10239 }
0x1ac9   : > { %v6038_v60 = vsel %vm4048_vm3, %v10240_v33, 0.0 }
0x1aca   : > { %v10242_v53 = vpop.eup %10241  ;;  %6027 = vadd.xlane.f32.xlu1 %v6026_v28 }
0x1acb   : > { %v6055_v39 = vpack.c.bf16 %v10242_v53, %v10240_v33  ;;  %v6041_v10 = vsel %vm4048_vm3, %v10242_v53, 0.0 }
0x1acc   : > { %v10244_v51 = vpop.eup %10243  ;;  %6030 = vadd.xlane.f32.xlu0 %v6029_v48 }
0x1acd   : > { %v6032_v13 = vsel %vm4048_vm3, %v10244_v51, 0.0 }
0x1ace   : > { %v10246_v24 = vpop.eup %10245  ;;  %6033 = vadd.xlane.f32.xlu1 %v6032_v13  ;;  %9096 = vmatmul.mubr.msk.bf16.gmra.mrb[68].mxu0 %vm4048_vm3, %v5784_v16  ;;  %v5752_v16 = vsel %vm4048_vm3, %v13020_v4, 0.0  ;;  %v5761_v4 = vsel %vm4048_vm3, %v13031_v23, 0.0  ;;  %v13098_v23 = vld [vmem:[#allocation44] sm:$0xff]  }
0x1acf   : > { %9111 = vmatprep.mubr.msk.bf16.mxu0 %vm4048_vm3, %v6052_v41  ;;  %v6035_v25 = vsel %vm4048_vm3, %v10246_v24, 0.0  ;;  %v6054_v37 = vpack.c.bf16 %v10246_v24, %v10244_v51  ;;  %9131 = vmatprep.subr.bf16.mxu1 %v13098_v23 }
0x1ad0   : > { %6036 = vadd.xlane.f32.xlu0 %v6035_v25 }
0x1ad2   : > { %6039 = vadd.xlane.f32.xlu1 %v6038_v60 }
0x1ad4   : > { %6042 = vadd.xlane.f32.xlu0 %v6041_v10 }
0x1ad6   : > { %5750 = vadd.xlane.f32.xlu1 %v5749_v14  ;;  %9112 = vmatmul.mubr.msk.bf16.vlgmr.msra.gmra.mrb[72].mxu0 %vm4048_vm3, %v6053_v6 }
0x1ad7   : > { %9115 = vmatprep.mubr.msk.bf16.mxu0 %vm4048_vm3, %v6054_v37  ;;  %9537 = vmatpush3.bf16.msra.mxu0 %v12187_v5 }
0x1ad8   : > { %5753 = vadd.xlane.f32.xlu0 %v5752_v16  ;;  %9538 = vmatprep.subr.bf16.mxu0 %v11404_v0 }
0x1ada   : > { %5756 = vadd.xlane.f32.xlu1 %v5755_v15 }
0x1adb   : > { %9540 = vmatpush3.bf16.msra.mxu0 %v12195_v7 }
0x1adc   : > { %5759 = vadd.xlane.f32.xlu0 %v5758_v32  ;;  %9541 = vmatprep.subr.bf16.mxu0 %v11404_v0 }
0x1ade   : > { %5762 = vadd.xlane.f32.xlu1 %v5761_v4  ;;  %9116 = vmatmul.mubr.msk.bf16.gmra.mrb[76].mxu0 %vm4048_vm3, %v6055_v39 }
0x1adf   : > { %9543 = vmatpush3.bf16.msra.mxu0 %v12221_v17  ;;  %9175 = vmatprep.mubr.msk.f32.mxu0 %vm11405_vm0, %v11406_v1 }
0x1ae0   : > { %5765 = vadd.xlane.f32.xlu0 %v5764_v21  ;;  %9544 = vmatprep.subr.bf16.mxu0 %v11404_v0 }
0x1ae2   : > { %5768 = vadd.xlane.f32.xlu1 %v5767_v46 }
0x1ae3   : > { %9546 = vmatpush3.bf16.msra.mxu0 %v12246_v30 }
0x1ae4   : > { %5771 = vadd.xlane.f32.xlu0 %v5770_v22  ;;  %9547 = vmatprep.subr.bf16.mxu0 %v11404_v0 }
0x1ae7   : > { %9549 = vmatpush3.bf16.msra.mxu0 %v12263_v40 }
0x1ae8   : > { %9550 = vmatprep.subr.bf16.mxu0 %v11404_v0 }
0x1aeb   : > { %9552 = vmatpush3.bf16.msra.mxu0 %v12277_v49 }
0x1aec   : > { %9553 = vmatprep.subr.bf16.mxu0 %v11404_v0 }
0x1aef   : > { %9555 = vmatpush3.bf16.msra.mxu0 %v12285_v56 }
0x1af0   : > { %9556 = vmatprep.subr.bf16.mxu0 %v11404_v0 }
0x1af3   : > { %9558 = vmatpush3.bf16.msra.mxu0 %v12291_v63 }
0x1af4   : > { %9583 = vmatprep.subr.bf16.mxu0 %v11404_v0 }
0x1b53   : > { %v6022_v47 = vpop.xlane.xlu1 %6021 }
0x1b55   : > { %v6025_v57 = vpop.xlane.xlu0 %6024 }
0x1b57   : > { %v6028_v2 = vpop.xlane.xlu1 %6027 }
0x1b59   : > { %v6031_v3 = vpop.xlane.xlu0 %6030 }
0x1b5b   : > { %v6034_v58 = vpop.xlane.xlu1 %6033 }
0x1b5d   : > { %v6037_v50 = vpop.xlane.xlu0 %6036 }
0x1b5f   : > { %v6040_v54 = vpop.xlane.xlu1 %6039 }
0x1b61   : > { %v6043_v31 = vpop.xlane.xlu0 %6042 }
0x1b63   : > { %v5751_v20 = vpop.xlane.xlu1 %5750 }
0x1b64   : > { %10247 = vrcp.f32 %v5751_v20 }
0x1b65   : > { %v5754_v34 = vpop.xlane.xlu0 %5753 }
0x1b67   : > { %v5757_v19 = vpop.xlane.xlu1 %5756 }
0x1b68   : > { %10249 = vrcp.f32 %v5757_v19 }
0x1b69   : > { %v5760_v8 = vpop.xlane.xlu0 %5759 }
0x1b6a   : > { %10251 = vrcp.f32 %v5760_v8 }
0x1b6b   : > { %v5763_v26 = vpop.xlane.xlu1 %5762  ;;  %10253 = vrcp.f32 %v5754_v34 }
0x1b6c   : > { %10255 = vrcp.f32 %v5763_v26 }
0x1b6d   : > { %v5766_v11 = vpop.xlane.xlu0 %5765 }
0x1b6e   : > { %v10248_v27 = vpop.eup %10247 }
0x1b6f   : > { %v5769_v59 = vpop.xlane.xlu1 %5768 }
0x1b70   : > { %10257 = vrcp.f32 %v5769_v59  ;;  %v10124_v59 = vld [vmem:[#allocation44 + $0x8] sm:$0xff]  }
0x1b71   : > { %v5772_v35 = vpop.xlane.xlu0 %5771 }
0x1b72   : > { %10259 = vrcp.f32 %v5772_v35  ;;  %v10250_v36 = vpop.eup %10249 }
0x1b73   : > { %10261 = vrcp.f32 %v5766_v11 }
0x1b74   : > { %v10252_v29 = vpop.eup %10251  ;;  %10263 = vrcp.f32 %v6022_v47 }
0x1b75   : > { %v10254_v45 = vpop.eup %10253  ;;  %10265 = vrcp.f32 %v6028_v2 }
0x1b76   : > { %v10256_v39 = vpop.eup %10255  ;;  %10267 = vrcp.f32 %v6031_v3 }
0x1b77   : > { %10269 = vrcp.f32 %v6025_v57 }
0x1b78   : > { %10271 = vrcp.f32 %v6034_v58 }
0x1b79   : > { %10273 = vrcp.f32 %v6040_v54 }
0x1b7a   : > { %v10258_v13 = vpop.eup %10257  ;;  %10275 = vrcp.f32 %v6043_v31 }
0x1b7b   : > { %10277 = vrcp.f32 %v6037_v50 }
0x1b7c   : > { %v10260_v25 = vpop.eup %10259 }
0x1b7d   : > { %v10262_v60 = vpop.eup %10261 }
0x1b7e   : > { %v10264_v46 = vpop.eup %10263 }
0x1b7f   : > { %v10266_v42 = vpop.eup %10265 }
0x1b80   : > { %v10268_v47 = vpop.eup %10267 }
0x1b81   : > { %v10270_v2 = vpop.eup %10269 }
0x1b82   : > { %v10272_v58 = vpop.eup %10271 }
0x1b83   : > { %v10274_v54 = vpop.eup %10273 }
0x1b84   : > { %v10276_v50 = vpop.eup %10275 }
0x1b99   : > { %v9093_v12 = vpop.f32.mrb[64].mxu0 }
0x1b9a   : > { %v5835_v6 = vpop.f32.mrb[65].mxu0  ;;  %v13101_v38 = vmul.f32 %v10250_v36, %v9093_v12  ;;  %v10278_v12 = vpop.eup %10277 }
0x1b9b   : > { %v9094_v43 = vpop.f32.mrb[66].mxu0  ;;  %v13105_v33 = vmul.f32 %v10248_v27, %v5835_v6 }
0x1b9c   : > { %v13103_v55 = vmul.f32 %v10252_v29, %v9094_v43  ;;  %v5838_v41 = vpop.f32.mrb[67].mxu0 }
0x1b9d   : > { %v13107_v28 = vmul.f32 %v10254_v45, %v5838_v41  ;;  %v10315_v41 = vld [vmem:[%s12191_s17 + $0x10] sm:$0xff] }
0x1b9e   : > { %v5875_v53 = vpack.c.bf16 %v13103_v55, %v13101_v38 }
0x1b9f   : > { %v5874_v48 = vpack.c.bf16 %v13107_v28, %v13105_v33 }
0x1ba1   : > { %v9097_v51 = vpop.f32.mrb[68].mxu0 }
0x1ba2   : > { %v5851_v24 = vpop.f32.mrb[69].mxu0  ;;  %v5872_v10 = vmul.f32 %v10258_v13, %v9097_v51 }
0x1ba3   : > { %v9098_v37 = vpop.f32.mrb[70].mxu0  ;;  %v5870_v15 = vmul.f32 %v10256_v39, %v5851_v24 }
0x1ba4   : > { %v5873_v14 = vmul.f32 %v10260_v25, %v9098_v37  ;;  %v5854_v16 = vpop.f32.mrb[71].mxu0 }
0x1ba5   : > { %v5871_v32 = vmul.f32 %v10262_v60, %v5854_v16 }
0x1ba6   : > { %v5877_v4 = vpack.c.bf16 %v5873_v14, %v5872_v10 }
0x1ba7   : > { %v5876_v21 = vpack.c.bf16 %v5871_v32, %v5870_v15 }
0x1ba9   : > { %v9113_v22 = vpop.f32.mrb[72].mxu0 }
0x1baa   : > { %v6105_v62 = vpop.f32.mrb[73].mxu0  ;;  %v6138_v3 = vmul.f32 %v10266_v42, %v9113_v22  ;;  %v10319_v42 = vld [vmem:[%s12191_s17 + $0x30] sm:$0xff] }
0x1bab   : > { %v9114_v57 = vpop.f32.mrb[74].mxu0  ;;  %v6136_v19 = vmul.f32 %v10264_v46, %v6105_v62 }
0x1bac   : > { %v6139_v20 = vmul.f32 %v10268_v47, %v9114_v57  ;;  %v6108_v34 = vpop.f32.mrb[75].mxu0 }
0x1bad   : > { %v6137_v8 = vmul.f32 %v10270_v2, %v6108_v34 }
0x1bae   : > { %v6145_v26 = vpack.c.bf16 %v6139_v20, %v6138_v3  ;;  %v10320_v20 = vld [vmem:[%s12191_s17 + $0x20] sm:$0xff] }
0x1baf   : > { %v6144_v11 = vpack.c.bf16 %v6137_v8, %v6136_v19 }
0x1bb1   : > { %v9117_v35 = vpop.f32.mrb[76].mxu0  ;;  %9123 = vmatprep.mubr.msk.bf16.mxu1 %vm2261_vm1, %v6144_v11 }
0x1bb2   : > { %v6121_v31 = vpop.f32.mrb[77].mxu0  ;;  %9124 = vmatmul.mubr.msk.bf16.vlgmr.msra.gmra.mrb[80].mxu1 %vm2261_vm1, %v6145_v26  ;;  %v6142_v36 = vmul.f32 %v10274_v54, %v9117_v35  ;;  %v10321_v26 = vld [vmem:[%s12191_s17 + $0x38] sm:$0xff]  ;;  %v10322_v54 = vld [vmem:[%s12191_s17 + $0x28] sm:$0xff] }
0x1bb3   : > { %v9118_v27 = vpop.f32.mrb[78].mxu0  ;;  %9132 = vmatpush3.bf16.msra.mxu1 %v13098_v23  ;;  %v6140_v43 = vmul.f32 %v10272_v58, %v6121_v31 }
0x1bb4   : > { %v6143_v6 = vmul.f32 %v10276_v50, %v9118_v27  ;;  %v6124_v29 = vpop.f32.mrb[79].mxu0  ;;  %9133 = vmatprep.subr.bf16.mxu1 %v10124_v59 }
0x1bb5   : > { %v6141_v45 = vmul.f32 %v10278_v12, %v6124_v29 }
0x1bb6   : > { %v6147_v38 = vpack.c.bf16 %v6143_v6, %v6142_v36 }
0x1bb7   : > { %v6146_v55 = vpack.c.bf16 %v6141_v45, %v6140_v43  ;;  %9134 = vmatpush3.bf16.msra.mxu1 %v10124_v59 }
0x1bb8   : > { %9559 = vmatprep.subr.bf16.mxu1 %v11404_v0 }
0x1bb9   : > { %9127 = vmatprep.mubr.msk.bf16.mxu1 %vm2261_vm1, %v6146_v55 }
0x1bba   : > { %9128 = vmatmul.mubr.msk.bf16.gmra.mrb[84].mxu1 %vm2261_vm1, %v6147_v38 }
0x1bbb   : > { %9135 = vmatprep.mubr.msk.bf16.mxu1 %vm2261_vm1, %v5874_v48 }
0x1bc2   : > { %9136 = vmatmul.mubr.msk.bf16.vlgmr.msra.gmra.mrb[80].mxu1 %vm2261_vm1, %v5875_v53  ;;  %v10316_v53 = vld [vmem:[%s12191_s17] sm:$0xff] }
0x1bc3   : > { %9139 = vmatprep.mubr.msk.bf16.mxu1 %vm2261_vm1, %v5876_v21  ;;  %9561 = vmatpush3.bf16.msra.mxu1 %v12187_v5  ;;  %v7896_v5 = vld [vmem:[%s13529_s8] ss:$0 sm:$0xff]  ;;  %s13533_s8 = sld [smem:[#allocation109_spill]] }
0x1bc4   : > { %9562 = vmatprep.subr.bf16.mxu1 %v11404_v0 }
0x1bc7   : > { %9564 = vmatpush3.bf16.msra.mxu1 %v12195_v7 }
0x1bc8   : > { %9565 = vmatprep.subr.bf16.mxu1 %v11404_v0 }
0x1bca   : > { %9140 = vmatmul.mubr.msk.bf16.gmra.mrb[84].mxu1 %vm2261_vm1, %v5877_v4 }
0x1bcb   : > { %9567 = vmatpush3.bf16.msra.mxu1 %v12221_v17  ;;  %9210 = vmatprep.mubr.msk.f32.mxu1 %vm11405_vm0, %v11406_v1 }
0x1bcc   : > { %9568 = vmatprep.subr.bf16.mxu1 %v11404_v0 }
0x1bcf   : > { %9570 = vmatpush3.bf16.msra.mxu1 %v12246_v30 }
0x1bd0   : > { %9571 = vmatprep.subr.bf16.mxu1 %v11404_v0 }
0x1bd3   : > { %9573 = vmatpush3.bf16.msra.mxu1 %v12263_v40 }
0x1bd4   : > { %9574 = vmatprep.subr.bf16.mxu1 %v11404_v0 }
0x1bd7   : > { %9576 = vmatpush3.bf16.msra.mxu1 %v12277_v49 }
0x1bd8   : > { %9577 = vmatprep.subr.bf16.mxu1 %v11404_v0 }
0x1bdb   : > { %9579 = vmatpush3.bf16.msra.mxu1 %v12285_v56  ;;  %v10317_v56 = vld [vmem:[%s12191_s17 + $0x18] sm:$0xff] }
0x1bdc   : > { %9580 = vmatprep.subr.bf16.mxu1 %v11404_v0 }
0x1bdf   : > { %9582 = vmatpush3.bf16.msra.mxu1 %v12291_v63  ;;  %v10318_v63 = vld [vmem:[%s12191_s17 + $0x8] sm:$0xff]  ;;  %s13530_s17 = sld [smem:[#allocation102_spill]] }
0x1c95   : > { %v9137_v7 = vpop.f32.mrb[80].mxu1 }
0x1c96   : > { %v6334_v17 = vadd.f32 %v9137_v7, %v7896_v5  ;;  %v6295_v30 = vpop.f32.mrb[81].mxu1 }
0x1c97   : > { %v6332_v40 = vadd.f32 %v7896_v5, %v6295_v30  ;;  %v9138_v23 = vpop.f32.mrb[82].mxu1 }
0x1c98   : > { %v6342_v33 = vadd.f32 %v10315_v41, %v6334_v17  ;;  %v6335_v28 = vadd.f32 %v9138_v23, %v7896_v5  ;;  %v6298_v49 = vpop.f32.mrb[83].mxu1 }
0x1c99   : > { %v6340_v48 = vadd.f32 %v10316_v53, %v6332_v40  ;;  %v6333_v39 = vadd.f32 %v7896_v5, %v6298_v49 }
0x1c9a   : > { %v6343_v51 = vadd.f32 %v10317_v56, %v6335_v28  ;;  %v13147_v25 = vmul.f32 0.70710677, %v6342_v33 }
0x1c9b   : > { %v13144_v13 = vmul.f32 0.70710677, %v6340_v48  ;;  %v6341_v24 = vadd.f32 %v10318_v63, %v6333_v39 }
0x1c9c   : > { %v13151_v10 = vmul.f32 0.70710677, %v6343_v51  ;;  %v6371_v22 = vmul.f32 %v13147_v25, %v13147_v25 }
0x1c9d   : > { %v13149_v37 = vmul.f32 0.70710677, %v6341_v24  ;;  %v9141_v60 = vpop.f32.mrb[84].mxu1  ;;  %v6369_v15 = vmul.f32 %v13144_v13, %v13144_v13 }
0x1c9e   : > { %v6338_v14 = vadd.f32 %v9141_v60, %v7896_v5  ;;  %v6311_v16 = vpop.f32.mrb[85].mxu1  ;;  %v6372_v8 = vmul.f32 %v13151_v10, %v13151_v10 }
0x1c9f   : > { %v6356_v32 = vadd.f32 %v13149_v37, %v13144_v13  ;;  %v6370_v4 = vmul.f32 %v13149_v37, %v13149_v37  ;;  %v6336_v21 = vadd.f32 %v7896_v5, %v6311_v16  ;;  %v9142_v46 = vpop.f32.mrb[86].mxu1 }
0x1ca0   : > { %v6346_v62 = vadd.f32 %v10319_v42, %v6338_v14  ;;  %v6339_v47 = vadd.f32 %v9142_v46, %v7896_v5  ;;  %v6314_v57 = vpop.f32.mrb[87].mxu1  ;;  %v10127_v42 = vld [vmem:[#allocation46 + $0x4] ss:$8 sps:$4 sm:$0xff]  }
0x1ca1   : > { %v6357_v2 = vadd.f32 %v6356_v32, %v13147_v25  ;;  %v6377_v3 = vadd.f32 %v6370_v4, %v6369_v15  ;;  %v6344_v34 = vadd.f32 %v10320_v20, %v6336_v21  ;;  %v6337_v19 = vadd.f32 %v7896_v5, %v6314_v57  ;;  %v10125_v57 = vld [vmem:[#allocation46] ss:$8 sps:$4 sm:$0xff]   ;;  %v10136_v20 = vld [vmem:[#allocation46 + $0x34] ss:$8 sps:$4 sm:$0xff]  }
0x1ca2   : > { %v6347_v11 = vadd.f32 %v10321_v26, %v6339_v47  ;;  %v13171_v50 = vmul.f32 0.70710677, %v6346_v62  ;;  %v10140_v26 = vld [vmem:[#allocation46 + $0x50] ss:$8 sps:$4 sm:$0xff]  }
0x1ca3   : > { %v6378_v59 = vadd.f32 %v6377_v3, %v6371_v22  ;;  %v13167_v58 = vmul.f32 0.70710677, %v6344_v34  ;;  %v6358_v35 = vadd.f32 %v6357_v2, %v13151_v10  ;;  %v6345_v31 = vadd.f32 %v10322_v54, %v6337_v19  ;;  %v10130_v3 = vld [vmem:[#allocation46 + $0x14] ss:$8 sps:$4 sm:$0xff]   ;;  %v10139_v34 = vld [vmem:[#allocation46 + $0x44] ss:$8 sps:$4 sm:$0xff]  }
0x1ca4   : > { %v13178_v43 = vmul.f32 0.70710677, %v6347_v11  ;;  %v6375_v55 = vmul.f32 %v13171_v50, %v13171_v50  ;;  %v10137_v19 = vld [vmem:[#allocation46 + $0x40] ss:$8 sps:$4 sm:$0xff]   ;;  %v10146_v54 = vld [vmem:[#allocation46 + $0x70] ss:$8 sps:$4 sm:$0xff]  }
0x1ca5   : > { %v6359_v27 = vadd.f32 %v6358_v35, %v13167_v58  ;;  %v6373_v12 = vmul.f32 %v13167_v58, %v13167_v58  ;;  %v6379_v36 = vadd.f32 %v6378_v59, %v6372_v8  ;;  %v13176_v6 = vmul.f32 0.70710677, %v6345_v31  ;;  %v10142_v8 = vld [vmem:[#allocation46 + $0x54] ss:$8 sps:$4 sm:$0xff]   ;;  %v10143_v11 = vld [vmem:[#allocation46 + $0x60] ss:$8 sps:$4 sm:$0xff]  }
0x1ca6   : > { %v6376_v17 = vmul.f32 %v13178_v43, %v13178_v43  ;;  %v10145_v59 = vld [vmem:[#allocation46 + $0x64] ss:$8 sps:$4 sm:$0xff]   ;;  %v10148_v35 = vld [vmem:[#allocation46 + $0x74] ss:$8 sps:$4 sm:$0xff]  }
0x1ca7   : > { %v6380_v29 = vadd.f32 %v6379_v36, %v6373_v12  ;;  %v6360_v45 = vadd.f32 %v6359_v27, %v13176_v6  ;;  %v6374_v38 = vmul.f32 %v13176_v6, %v13176_v6  ;;  %v10149_v31 = vld [vmem:[#allocation47 + $0x40] sm:$0xff]   ;;  %v10151_v12 = vld [vmem:[#allocation47 + $0x48] sm:$0xff]  }
0x1ca8   : > { %v10150_v27 = vld [vmem:[#allocation47] sm:$0xff]   ;;  %8359 = vmatprep.subr.bf16.mxu1 %v10149_v31  ;;  %v10152_v36 = vld [vmem:[#allocation47 + $0x8] sm:$0xff]  }
0x1ca9   : > { %v6361_v5 = vadd.f32 %v6360_v45, %v13171_v50  ;;  %v6381_v7 = vadd.f32 %v6380_v29, %v6374_v38  ;;  %v10158_v31 = vld [vmem:[#allocation47 + $0x20] sm:$0xff]  }
0x1cab   : > { %v6362_v30 = vadd.f32 %v6361_v5, %v13178_v43  ;;  %v6382_v40 = vadd.f32 %v6381_v7, %v6375_v55 }
0x1cad   : > { %v6363_v23 = vrot.slane %v6362_v30, 4  ;;  %v6383_v41 = vadd.f32 %v6382_v40, %v6376_v17 }
0x1caf   : > { %v6364_v33 = vadd.f32 %v6363_v23, %v6362_v30  ;;  %v6384_v28 = vrot.slane %v6383_v41, 4 }
0x1cb1   : > { %v6365_v49 = vrot.slane %v6364_v33, 2  ;;  %v6385_v53 = vadd.f32 %v6384_v28, %v6383_v41  ;;  %v7899_v41 = vld [vmem:[%s13530_s17] ss:$0 sm:$0xff]  ;;  %s7945_s17 = sshll.u32 %s11671_s18, 8 }
0x1cb3   : > { %v6366_v48 = vadd.f32 %v6365_v49, %v6364_v33  ;;  %v6386_v39 = vrot.slane %v6385_v53, 2 }
0x1cb5   : > { %v6367_v56 = vrot.slane %v6366_v48, 1  ;;  %v6387_v51 = vadd.f32 %v6386_v39, %v6385_v53 }
0x1cb7   : > { %v6368_v63 = vadd.f32 %v6367_v56, %v6366_v48  ;;  %v6388_v24 = vrot.slane %v6387_v51, 1 }
0x1cb9   : > { %9176 = vmatmul.mubr.f32.vlgmr.msra.gmra.mrb[80].mxu0 %v6368_v63  ;;  %v6389_v60 = vadd.f32 %v6388_v24, %v6387_v51  ;;  %v7900_v63 = vld [vmem:[%s13531_s13] ss:$0 sm:$0xff]  ;;  %s7219_s13 = sshll.u32 %s12870_s15, 4  ;;  %s13254_s13 = int_to_ptr.vmem [resolvable:$true] %s7219_s13 }
0x1cba   : > { %9585 = vmatpush3.bf16.msra.mxu0 %v12297_v9  ;;  %9221 = vmatprep.mubr.msk.f32.mxu0 %vm11405_vm0, %v11406_v1  ;;  %s11165_s2 = scalar_lea.vmem %s13254_s13, 256  ;;  %p11172_p13 = scmp.lt.s32.totalorder %s13254_s13, %s11170_s6 }
0x1cbb   : > { %9211 = vmatmul.mubr.f32.vlgmr.msra.gmra.mrb[88].mxu1 %v6389_v60  ;;  %9586 = vmatprep.subr.bf16.mxu0 %v11404_v0  ;;  %p11166_p4 = scmp.ne.s32.totalorder %s13254_s13, %s11165_s2  ;;  %p11173_p5 = scmp.lt.s32.totalorder %s11171_s14, %s11165_s2 }
0x1cbc   : > { %8360 = vmatpush3.bf16.msra.mxu1 %v10150_v27  ;;  %v10159_v27 = vld [vmem:[#allocation47 + $0x68] sm:$0xff]  }
0x1cbd   : > { %8361 = vmatprep.subr.bf16.mxu1 %v10151_v12  ;;  %v10160_v12 = vld [vmem:[#allocation47 + $0x28] sm:$0xff]   ;;  %p11167_p10 = pnand %p11166_p4, %p13534_p9  ;;  %p11174_p7 = por %p11173_p5, %p11172_p13 }
0x1cbe   : > { %9588 = vmatpush3.bf16.msra.mxu0 %v12309_v18 }
0x1cbf   : > { %9589 = vmatprep.subr.bf16.mxu0 %v11404_v0  ;;  %p11168_p12 = pneg %p11167_p10 }
0x1cc0   : > { %8362 = vmatpush3.bf16.msra.mxu1 %v10152_v36  ;;  %v10161_v36 = vld [vmem:[#allocation47 + $0x70] sm:$0xff]  }
0x1cc1   : > { %p11175_p1 = pnand %p11174_p7, %p11168_p12 }
0x1d8c   : > { %v6456_v14 = vpop.f32.mrb[80].mxu0 }
0x1d8d   : > { %v6460_v16 = vmul.f32 0.00390625, %v6456_v14  ;;  %v9177_v15 = vpop.f32.mrb[81].mxu0 }
0x1d8e   : > { %v6527_v32 = vpop.f32.mrb[88].mxu1 }
0x1d8f   : > { %v6532_v4 = vmul.f32 %v6460_v16, %v6460_v16  ;;  %v6531_v21 = vmul.f32 0.00390625, %v6527_v32  ;;  %v9212_v46 = vpop.f32.mrb[89].mxu1  ;;  %9222 = vmatmul.mubr.msk.f32.vlgmr.msra.gmra.mrb[82].mxu0 %vm2261_vm1, %v6460_v16 }
0x1d90   : > { %9591 = vmatpush3.bf16.msra.mxu0 %v12297_v9  ;;  %9232 = vmatprep.mubr.msk.f32.mxu0 %vm11405_vm0, %v11406_v1  ;;  %v10128_v9 = vld [vmem:[#allocation46 + $0x10] ss:$8 sps:$4 sm:$0xff]   ;;  %v10133_v1 = vld [vmem:[#allocation46 + $0x24] ss:$8 sps:$4 sm:$0xff]  }
0x1d91   : > { %v6533_v22 = vsub.f32 %v6531_v21, %v6532_v4  ;;  %9592 = vmatprep.subr.bf16.mxu0 %v11404_v0  ;;  %v10131_v0 = vld [vmem:[#allocation46 + $0x20] ss:$8 sps:$4 sm:$0xff]  }
0x1d93   : > { %v6534_v62 = vmax.f32 %v6533_v22, 0.0 }
0x1d94   : > { %9594 = vmatpush3.bf16.msra.mxu0 %v12309_v18  ;;  %v10134_v18 = vld [vmem:[#allocation46 + $0x30] ss:$8 sps:$4 sm:$0xff]  }
0x1d95   : > { %v6535_v47 = vadd.f32 1e-06, %v6534_v62  ;;  %6830 = vmatprep.subr.bf16.mxu0 %v10127_v42 }
0x1d97   : > { %10279 = vrsqrt.f32 %v6535_v47 }
0x1da1   : > { %v10280_v2 = vpop.eup %10279 }
0x1da2   : > { %9233 = vmatmul.mubr.msk.f32.vlgmr.msra.gmra.mrb[84].mxu0 %vm2261_vm1, %v10280_v2 }
0x1da3   : > { %6831 = vmatpush1.bf16.msra.mxu0 %v10125_v57  ;;  %6862 = vmatprep.mubr.bf16.mxu0 %v11410_v44 }
0x1da4   : > { %6832 = vmatprep.subr.bf16.mxu0 %v10130_v3 }
0x1da7   : > { %6833 = vmatpush1.bf16.msra.mxu0 %v10128_v9 }
0x1da8   : > { %6834 = vmatprep.subr.bf16.mxu0 %v10133_v1 }
0x1dab   : > { %6835 = vmatpush1.bf16.msra.mxu0 %v10131_v0 }
0x1dac   : > { %6836 = vmatprep.subr.bf16.mxu0 %v10136_v20 }
0x1daf   : > { %6837 = vmatpush1.bf16.msra.mxu0 %v10134_v18 }
0x1db0   : > { %6838 = vmatprep.subr.bf16.mxu0 %v10139_v34 }
0x1db3   : > { %6839 = vmatpush1.bf16.msra.mxu0 %v10137_v19 }
0x1db4   : > { %6840 = vmatprep.subr.bf16.mxu0 %v10142_v8 }
0x1db7   : > { %6841 = vmatpush1.bf16.msra.mxu0 %v10140_v26  ;;  %v10153_v26 = vld [vmem:[#allocation47 + $0x50] sm:$0xff]  }
0x1db8   : > { %6842 = vmatprep.subr.bf16.mxu0 %v10145_v59  ;;  %8363 = vmatprep.subr.bf16.mxu1 %v10153_v26  ;;  %v10155_v59 = vld [vmem:[#allocation47 + $0x58] sm:$0xff]  }
0x1dbb   : > { %6843 = vmatpush1.bf16.msra.mxu0 %v10143_v11  ;;  %v10154_v11 = vld [vmem:[#allocation47 + $0x10] sm:$0xff]  }
0x1dbc   : > { %6844 = vmatprep.subr.bf16.mxu0 %v10148_v35  ;;  %8364 = vmatpush3.bf16.msra.mxu1 %v10154_v11  ;;  %v10156_v35 = vld [vmem:[#allocation47 + $0x18] sm:$0xff]  }
0x1dbd   : > { %8365 = vmatprep.subr.bf16.mxu1 %v10155_v59 }
0x1dbf   : > { %6845 = vmatpush1.bf16.msra.mxu0 %v10146_v54  ;;  %v10157_v54 = vld [vmem:[#allocation47 + $0x60] sm:$0xff]  }
0x1dc0   : > { %8366 = vmatpush3.bf16.msra.mxu1 %v10156_v35 }
0x1dc1   : > { %8367 = vmatprep.subr.bf16.mxu1 %v10157_v54 }
0x1dc4   : > { %8368 = vmatpush3.bf16.msra.mxu1 %v10158_v31 }
0x1dc5   : > { %8369 = vmatprep.subr.bf16.mxu1 %v10159_v27 }
0x1dc8   : > { %8370 = vmatpush3.bf16.msra.mxu1 %v10160_v12 }
0x1dc9   : > { %8371 = vmatprep.subr.bf16.mxu1 %v10161_v36 }
0x1e62   : > { %v6606_v29 = vpop.f32.mrb[82].mxu0 }
0x1e63   : > { %v9223_v45 = vpop.f32.mrb[83].mxu0  ;;  %v6686_v38 = vrot.slane %v6606_v29, %v12418_v52  ;;  %v10163_v29 = vld [vmem:[#allocation47 + $0x78] sm:$0xff]  }
0x1e64   : > { %v10164_v45 = vld [vmem:[#allocation47 + $0x38] sm:$0xff]  }
0x1e65   : > { %v6687_v5 = vsub.f32 %v13144_v13, %v6686_v38  ;;  %v6688_v30 = vsub.f32 %v13149_v37, %v6686_v38  ;;  %v6689_v40 = vsub.f32 %v13147_v25, %v6686_v38  ;;  %v6690_v23 = vsub.f32 %v13151_v10, %v6686_v38 }
0x1e66   : > { %v6691_v33 = vsub.f32 %v13167_v58, %v6686_v38  ;;  %v6692_v28 = vsub.f32 %v13176_v6, %v6686_v38  ;;  %v6693_v49 = vsub.f32 %v13171_v50, %v6686_v38  ;;  %v6694_v53 = vsub.f32 %v13178_v43, %v6686_v38  ;;  %v2036_v38 = vld [vmem:[%s13532_s5] sm:$0x3]  ;;  %s13252_s5 = scalar_lea.hbm %s13533_s8, %s7945_s17 }
0x1e75   : > { %v6679_v55 = vpop.f32.mrb[84].mxu0 }
0x1e76   : > { %v6698_v7 = vrot.slane %v6679_v55, %v12418_v52  ;;  %v9234_v17 = vpop.f32.mrb[85].mxu0  ;;  %v13220_v55 = vrot.slane %v2036_v38, %v12418_v52 }
0x1e78   : > { %v6699_v48 = vmul.f32 %v6698_v7, %v6687_v5  ;;  %v6700_v39 = vmul.f32 %v6698_v7, %v6688_v30  ;;  %v6701_v56 = vmul.f32 %v6698_v7, %v6689_v40  ;;  %v6702_v51 = vmul.f32 %v6698_v7, %v6690_v23 }
0x1e79   : > { %v6703_v24 = vmul.f32 %v6698_v7, %v6691_v33  ;;  %v6704_v60 = vmul.f32 %v6698_v7, %v6692_v28  ;;  %v6705_v14 = vmul.f32 %v6698_v7, %v6693_v49  ;;  %v6706_v16 = vmul.f32 %v6698_v7, %v6694_v53 }
0x1e7a   : > { %v6713_v15 = vmul.f32 %v7899_v41, %v6699_v48  ;;  %v6714_v32 = vmul.f32 %v7899_v41, %v6700_v39  ;;  %v6715_v4 = vmul.f32 %v7899_v41, %v6701_v56  ;;  %v6716_v21 = vmul.f32 %v7899_v41, %v6702_v51 }
0x1e7b   : > { %v6717_v46 = vmul.f32 %v7899_v41, %v6703_v24  ;;  %v6718_v22 = vmul.f32 %v7899_v41, %v6704_v60  ;;  %v6719_v42 = vmul.f32 %v7899_v41, %v6705_v14  ;;  %v6720_v62 = vmul.f32 %v7899_v41, %v6706_v16 }
0x1e7c   : > { %v6727_v47 = vadd.f32 %v7900_v63, %v6713_v15  ;;  %v6728_v57 = vadd.f32 %v7900_v63, %v6714_v32  ;;  %v6729_v2 = vadd.f32 %v7900_v63, %v6715_v4  ;;  %v6730_v9 = vadd.f32 %v7900_v63, %v6716_v21 }
0x1e7d   : > { %v6731_v3 = vadd.f32 %v7900_v63, %v6717_v46  ;;  %v6732_v1 = vadd.f32 %v7900_v63, %v6718_v22  ;;  %v6733_v0 = vadd.f32 %v7900_v63, %v6719_v42  ;;  %v6734_v20 = vadd.f32 %v7900_v63, %v6720_v62 }
0x1e7e   : > { %v6735_v18 = vpack.c.bf16 %v6728_v57, %v6727_v47  ;;  %v6736_v34 = vpack.c.bf16 %v6730_v9, %v6729_v2  ;;  %v13223_v5 = vrot.slane %v2036_v38, %v12684_v61 }
0x1e7f   : > { %v6737_v19 = vpack.c.bf16 %v6732_v1, %v6731_v3  ;;  %v6738_v8 = vpack.c.bf16 %v6734_v20, %v6733_v0 }
0x1e80   : > { %6863 = vmatmul.mubr.bf16.vlgmr.msra.gmra.mrb[88].mxu0 %v6735_v18 }
0x1e81   : > { %6872 = vmatprep.mubr.bf16.mxu0 %v11410_v44 }
0x1e88   : > { %6873 = vmatmul.mubr.bf16.gmra.mrb[92].mxu0 %v6736_v34 }
0x1e89   : > { %6882 = vmatprep.mubr.bf16.mxu0 %v11410_v44 }
0x1e90   : > { %6883 = vmatmul.mubr.bf16.gmra.mrb[96].mxu0 %v6737_v19 }
0x1e91   : > { %6892 = vmatprep.mubr.bf16.mxu0 %v11410_v44  ;;  %v10162_v44 = vld [vmem:[#allocation47 + $0x30] sm:$0xff]  }
0x1e92   : > { %8372 = vmatpush3.bf16.msra.mxu1 %v10162_v44 }
0x1e93   : > { %8373 = vmatprep.subr.bf16.mxu1 %v10163_v29 }
0x1e96   : > { %8374 = vmatpush3.bf16.msra.mxu1 %v10164_v45 }
0x1e98   : > { %6893 = vmatmul.mubr.bf16.gmra.mrb[100].mxu0 %v6738_v8 }
0x1f53   : > { %v6864_v7 = vpop.f32.mrb[88].mxu0 }
0x1f54   : > { %v6865_v17 = vadd.f32 %v6864_v7, %v13220_v55  ;;  %v6866_v30 = vpop.f32.mrb[89].mxu0 }
0x1f55   : > { %v6867_v40 = vadd.f32 %v6866_v30, %v13223_v5  ;;  %v6868_v23 = vpop.f32.mrb[90].mxu0 }
0x1f56   : > { %v6919_v41 = vmul.f32 0.70710677, %v6865_v17  ;;  %v6869_v33 = vadd.f32 %v6868_v23, %v13220_v55  ;;  %v6870_v28 = vpop.f32.mrb[91].mxu0  ;;  %v6903_v3 = vmul.f32 0.5, %v6865_v17 }
0x1f57   : > { %v6920_v49 = vmul.f32 0.70710677, %v6867_v40  ;;  %v6871_v53 = vadd.f32 %v6870_v28, %v13223_v5  ;;  %v6904_v34 = vmul.f32 0.5, %v6867_v40 }
0x1f58   : > { %10281 = verf.f32 %v6919_v41  ;;  %v6921_v52 = vmul.f32 0.70710677, %v6869_v33  ;;  %v6905_v1 = vmul.f32 0.5, %v6869_v33 }
0x1f59   : > { %10283 = verf.f32 %v6920_v49  ;;  %v6922_v48 = vmul.f32 0.70710677, %v6871_v53  ;;  %v6906_v19 = vmul.f32 0.5, %v6871_v53 }
0x1f5a   : > { %10285 = verf.f32 %v6921_v52 }
0x1f5b   : > { %10287 = verf.f32 %v6922_v48  ;;  %v6874_v61 = vpop.f32.mrb[92].mxu0 }
0x1f5c   : > { %v6875_v39 = vadd.f32 %v6874_v61, %v13220_v55  ;;  %v6876_v56 = vpop.f32.mrb[93].mxu0 }
0x1f5d   : > { %v6877_v51 = vadd.f32 %v6876_v56, %v13223_v5  ;;  %v6878_v63 = vpop.f32.mrb[94].mxu0 }
0x1f5e   : > { %v6923_v24 = vmul.f32 0.70710677, %v6875_v39  ;;  %v6879_v60 = vadd.f32 %v6878_v63, %v13220_v55  ;;  %v6880_v14 = vpop.f32.mrb[95].mxu0  ;;  %v6907_v53 = vmul.f32 0.5, %v6875_v39 }
0x1f5f   : > { %v6924_v16 = vmul.f32 0.70710677, %v6877_v51  ;;  %v6881_v15 = vadd.f32 %v6880_v14, %v13223_v5  ;;  %v6908_v63 = vmul.f32 0.5, %v6877_v51 }
0x1f60   : > { %10289 = verf.f32 %v6923_v24  ;;  %v6925_v32 = vmul.f32 0.70710677, %v6879_v60  ;;  %v6909_v52 = vmul.f32 0.5, %v6879_v60 }
0x1f61   : > { %10291 = verf.f32 %v6924_v16  ;;  %v6926_v4 = vmul.f32 0.70710677, %v6881_v15  ;;  %v6910_v24 = vmul.f32 0.5, %v6881_v15 }
0x1f62   : > { %v10282_v21 = vpop.eup %10281  ;;  %10293 = verf.f32 %v6925_v32 }
0x1f63   : > { %v10284_v46 = vpop.eup %10283  ;;  %v6951_v22 = vadd.f32 1.0, %v10282_v21  ;;  %10295 = verf.f32 %v6926_v4  ;;  %v6884_v42 = vpop.f32.mrb[96].mxu0 }
0x1f64   : > { %v10286_v62 = vpop.eup %10285  ;;  %v6952_v47 = vadd.f32 1.0, %v10284_v46  ;;  %v13234_v57 = vadd.f32 %v6884_v42, %v13220_v55  ;;  %v6886_v2 = vpop.f32.mrb[97].mxu0 }
0x1f65   : > { %v10288_v9 = vpop.eup %10287  ;;  %v6953_v0 = vadd.f32 1.0, %v10286_v62  ;;  %v13237_v20 = vadd.f32 %v6886_v2, %v13223_v5  ;;  %v6888_v18 = vpop.f32.mrb[98].mxu0  ;;  %v6967_v59 = vmul.f32 %v6951_v22, %v6903_v3 }
0x1f66   : > { %v6954_v8 = vadd.f32 1.0, %v10288_v9  ;;  %v6927_v26 = vmul.f32 0.70710677, %v13234_v57  ;;  %v6890_v11 = vpop.f32.mrb[99].mxu0  ;;  %v6889_v31 = vadd.f32 %v6888_v18, %v13220_v55  ;;  %v6968_v27 = vmul.f32 %v6952_v47, %v6904_v34 }
0x1f67   : > { %v6969_v35 = vmul.f32 %v6953_v0, %v6905_v1  ;;  %v6928_v54 = vmul.f32 0.70710677, %v13237_v20  ;;  %v6891_v36 = vadd.f32 %v6890_v11, %v13223_v5  ;;  %v6911_v18 = vmul.f32 0.5, %v13234_v57 }
0x1f68   : > { %v6970_v12 = vmul.f32 %v6954_v8, %v6906_v19  ;;  %10297 = verf.f32 %v6927_v26  ;;  %v6929_v29 = vmul.f32 0.70710677, %v6889_v31  ;;  %v6913_v34 = vmul.f32 0.5, %v6889_v31 }
0x1f69   : > { %v6983_v44 = vpack.c.bf16 %v6969_v35, %v6967_v59  ;;  %10299 = verf.f32 %v6928_v54  ;;  %v6930_v38 = vmul.f32 0.70710677, %v6891_v36  ;;  %v6914_v8 = vmul.f32 0.5, %v6891_v36 }
0x1f6a   : > { %v10290_v45 = vpop.eup %10289  ;;  %v6984_v7 = vpack.c.bf16 %v6970_v12, %v6968_v27  ;;  %10301 = verf.f32 %v6929_v29 }
0x1f6b   : > { %v10292_v17 = vpop.eup %10291  ;;  %v6955_v30 = vadd.f32 1.0, %v10290_v45  ;;  %v6894_v40 = vpop.f32.mrb[100].mxu0  ;;  %10303 = verf.f32 %v6930_v38 }
0x1f6c   : > { %v10294_v23 = vpop.eup %10293  ;;  %v6956_v41 = vadd.f32 1.0, %v10292_v17  ;;  %v6895_v33 = vadd.f32 %v6894_v40, %v13220_v55  ;;  %v6896_v28 = vpop.f32.mrb[101].mxu0  ;;  %7125 = vmatprep.mubr.bf16.mxu1 %v6984_v7 }
0x1f6d   : > { %v10296_v49 = vpop.eup %10295  ;;  %v6957_v48 = vadd.f32 1.0, %v10294_v23  ;;  %v6897_v61 = vadd.f32 %v6896_v28, %v13223_v5  ;;  %v6898_v56 = vpop.f32.mrb[102].mxu0  ;;  %7126 = vmatmul.mubr.bf16.vlgmr.msra.gmra.mrb[92].mxu1 %v6983_v44  ;;  %v6971_v4 = vmul.f32 %v6955_v30, %v6907_v53 }
0x1f6e   : > { %v6958_v14 = vadd.f32 1.0, %v10296_v49  ;;  %v6931_v16 = vmul.f32 0.70710677, %v6895_v33  ;;  %v6900_v32 = vpop.f32.mrb[103].mxu0  ;;  %v6899_v22 = vadd.f32 %v6898_v56, %v13220_v55  ;;  %v6972_v42 = vmul.f32 %v6956_v41, %v6908_v63 }
0x1f6f   : > { %v6973_v21 = vmul.f32 %v6957_v48, %v6909_v52  ;;  %v6932_v46 = vmul.f32 0.70710677, %v6897_v61  ;;  %v6901_v39 = vadd.f32 %v6900_v32, %v13223_v5  ;;  %v6912_v5 = vmul.f32 0.5, %v13237_v20 }
0x1f70   : > { %v6974_v62 = vmul.f32 %v6958_v14, %v6910_v24  ;;  %10305 = verf.f32 %v6931_v16  ;;  %v6933_v60 = vmul.f32 0.70710677, %v6899_v22  ;;  %v6915_v57 = vmul.f32 0.5, %v6895_v33 }
0x1f71   : > { %10307 = verf.f32 %v6932_v46  ;;  %v6985_v47 = vpack.c.bf16 %v6973_v21, %v6971_v4  ;;  %v6934_v9 = vmul.f32 0.70710677, %v6901_v39  ;;  %v6917_v31 = vmul.f32 0.5, %v6899_v22 }
0x1f72   : > { %v10298_v2 = vpop.eup %10297  ;;  %v6986_v51 = vpack.c.bf16 %v6974_v62, %v6972_v42  ;;  %10309 = verf.f32 %v6933_v60  ;;  %v6916_v36 = vmul.f32 0.5, %v6897_v61  ;;  %v6918_v30 = vmul.f32 0.5, %v6901_v39 }
0x1f73   : > { %v10300_v15 = vpop.eup %10299  ;;  %v6959_v3 = vadd.f32 1.0, %v10298_v2  ;;  %10311 = verf.f32 %v6934_v9 }
0x1f74   : > { %7133 = vmatprep.mubr.bf16.mxu1 %v6986_v51  ;;  %v10302_v1 = vpop.eup %10301  ;;  %v6960_v0 = vadd.f32 1.0, %v10300_v15 }
0x1f75   : > { %7134 = vmatmul.mubr.bf16.gmra.mrb[96].mxu1 %v6985_v47  ;;  %v10304_v55 = vpop.eup %10303  ;;  %v6961_v19 = vadd.f32 1.0, %v10302_v1  ;;  %v6975_v11 = vmul.f32 %v6959_v3, %v6911_v18 }
0x1f76   : > { %v6962_v26 = vadd.f32 1.0, %v10304_v55  ;;  %v6976_v35 = vmul.f32 %v6960_v0, %v6912_v5 }
0x1f77   : > { %v6977_v59 = vmul.f32 %v6961_v19, %v6913_v34 }
0x1f78   : > { %v6978_v54 = vmul.f32 %v6962_v26, %v6914_v8 }
0x1f79   : > { %v6987_v12 = vpack.c.bf16 %v6977_v59, %v6975_v11 }
0x1f7a   : > { %v10306_v27 = vpop.eup %10305  ;;  %v6988_v29 = vpack.c.bf16 %v6978_v54, %v6976_v35 }
0x1f7b   : > { %v10308_v44 = vpop.eup %10307  ;;  %v6963_v45 = vadd.f32 1.0, %v10306_v27 }
0x1f7c   : > { %v10310_v38 = vpop.eup %10309  ;;  %v6964_v7 = vadd.f32 1.0, %v10308_v44  ;;  %7141 = vmatprep.mubr.bf16.mxu1 %v6988_v29 }
0x1f7d   : > { %v10312_v17 = vpop.eup %10311  ;;  %v6965_v20 = vadd.f32 1.0, %v10310_v38  ;;  %7142 = vmatmul.mubr.bf16.gmra.mrb[100].mxu1 %v6987_v12  ;;  %v6979_v23 = vmul.f32 %v6963_v45, %v6915_v57 }
0x1f7e   : > { %v6966_v40 = vadd.f32 1.0, %v10312_v17  ;;  %v6980_v28 = vmul.f32 %v6964_v7, %v6916_v36 }
0x1f7f   : > { %v6981_v41 = vmul.f32 %v6965_v20, %v6917_v31 }
0x1f80   : > { %v6982_v49 = vmul.f32 %v6966_v40, %v6918_v30 }
0x1f81   : > { %v6989_v53 = vpack.c.bf16 %v6981_v41, %v6979_v23 }
0x1f82   : > { %v6990_v52 = vpack.c.bf16 %v6982_v49, %v6980_v28 }
0x1f84   : > { %7149 = vmatprep.mubr.bf16.mxu1 %v6990_v52 }
0x1f85   : > { %7150 = vmatmul.mubr.bf16.gmra.mrb[104].mxu1 %v6989_v53 }
0x1f86   : > { %11178 = shalt.err (!%p11175_p1)
}
0x1f87   : > { %s11179_s15 = scalar_lea.hbm %s13252_s5, 256  ;;  %s11183_s4 = scalar_lea.hbm %s13533_s8, 512 }
0x1f88   : > { %p11180_p3 = scmp.ne.s32.totalorder %s13252_s5, %s11179_s15  ;;  %p11184_p0 = scmp.lt.u32.totalorder %s13252_s5, %s13533_s8 }
0x1f89   : > { %p11185_p2 = scmp.lt.u32.totalorder %s11183_s4, %s11179_s15  ;;  %p11187_p4 = scmp.lt.u32.totalorder %s11179_s15, %s13252_s5 }
0x1f8a   : > { %p11181_p6 = pnand %p11180_p3, %p13534_p9 }
0x1f8b   : > { %p11186_p8 = por %p11185_p2, %p11184_p0 }
0x1f8c   : > { %p11182_p11 = pneg %p11181_p6 }
0x1f8d   : > { %p11188_p10 = por %p11187_p4, %p11186_p8 }
0x1f8f   : > { %p11189_p12 = pnand %p11188_p10, %p11182_p11 }
0x1f91   : > { %11192 = shalt.err (!%p11189_p12)
}
0x1f92   : > { %s13412_s14 = smov 128   ;;  %s13535_s6 = sld [smem:[#allocation107_spill]] }
0x1f93   : > { %s13413_s2 = smov 8   ;;  %s7723_s17 = sshll.u32 %s12104_s19, 6 }
0x1f94   : > { %9724 = dma.vmem_to_hbm [thread:$0]  (%p13534_p9), %s13254_s13, 256, %s13252_s5, %s7190_s1, %s13412_s14, %s13412_s14, %s13413_s2  }
0x1f95   : > { %s13283_s15 = scalar_lea.vmem [#allocation49], %s7723_s17  ;;  %s13536_s1 = sld [smem:[#allocation108_spill]] }
0x1f96   : > { %s7944_s13 = sshll.u32 %s11671_s18, 10  ;;  %s7203_s5 = sshll.u32 %s13283_s15, 4  ;;  %s13303_s5 = int_to_ptr.vmem [resolvable:$true] %s7203_s5 }
0x1f97   : > { %s11193_s17 = scalar_lea.vmem %s13303_s5, 1024  ;;  %s11414_s18 = smov [#allocation49]  }
0x1f98   : > { %v7917_v48 = vld [vmem:[%s13535_s6] ss:$0 sm:$0xff]  ;;  %s7185_s6 = scalar_lea.sflag [#allocation4], %s12104_s19  ;;  %p11194_p13 = scmp.ne.s32.totalorder %s13303_s5, %s11193_s17 }
0x1f99   : > { %s11197_s14 = sshll.u32 %s11414_s18, 4  ;;  %s11198_s14 = int_to_ptr.vmem [resolvable:$false] %s11197_s14 }
0x1f9a   : > { %p11195_p5 = pnand %p11194_p13, %p13534_p9  ;;  %s11199_s2 = scalar_lea.vmem %s11198_s14, 2048 }
0x1f9b   : > { %s13301_s4 = scalar_lea.hbm %s13536_s1, %s7944_s13  ;;  %p11200_p1 = scmp.lt.s32.totalorder %s13303_s5, %s11198_s14 }
0x1f9c   : > { %p11196_p7 = pneg %p11195_p5  ;;  %p11201_p3 = scmp.lt.s32.totalorder %s11199_s2, %s11193_s17 }
0x1f9e   : > { %p11202_p6 = por %p11201_p3, %p11200_p1 }
0x1fa0   : > { %p11203_p11 = pnand %p11202_p6, %p11196_p7 }
0x2040   : > { %v8375_v33 = vpop.f32.mrb[92].mxu1 }
0x2041   : > { %v8376_v61 = vpop.f32.mrb[93].mxu1 }
0x2042   : > { %v8377_v56 = vadd.f32 %v8376_v61, %v8375_v33  ;;  %v8378_v63 = vpop.f32.mrb[94].mxu1 }
0x2043   : > { %v8379_v24 = vpop.f32.mrb[95].mxu1 }
0x2044   : > { %v7128_v14 = vadd.f32 %v8377_v56, %v7917_v48  ;;  %v8380_v16 = vadd.f32 %v8379_v24, %v8378_v63 }
0x2046   : > { %v7158_v32 = vadd.f32 %v7128_v14, %v13144_v13  ;;  %v7131_v4 = vadd.f32 %v8380_v16, %v7917_v48 }
0x2048   : > { %v7166_v21 = vmul.f32 0.70710677, %v7158_v32  ;;  %v7159_v46 = vadd.f32 %v7131_v4, %v13149_v37  ;;  %v8381_v22 = vpop.f32.mrb[96].mxu1 }
0x2049   : > { %v8382_v42 = vpop.f32.mrb[97].mxu1 }
0x204a   : > { %7174 = vst [vmem:[%s13283_s15] sm:$0xff] %v7166_v21  ;;  %v7167_v62 = vmul.f32 0.70710677, %v7159_v46  ;;  %v8383_v39 = vadd.f32 %v8382_v42, %v8381_v22  ;;  %v8384_v60 = vpop.f32.mrb[98].mxu1 }
0x204b   : > { %v8385_v47 = vpop.f32.mrb[99].mxu1 }
0x204c   : > { %7175 = vst [vmem:[%s13283_s15 + $0x8] sm:$0xff] %v7167_v62  ;;  %v7136_v2 = vadd.f32 %v8383_v39, %v7917_v48  ;;  %v8386_v13 = vadd.f32 %v8385_v47, %v8384_v60 }
0x204e   : > { %v7160_v9 = vadd.f32 %v7136_v2, %v13147_v25  ;;  %v7139_v51 = vadd.f32 %v8386_v13, %v7917_v48 }
0x2050   : > { %v7168_v37 = vmul.f32 0.70710677, %v7160_v9  ;;  %v7161_v15 = vadd.f32 %v7139_v51, %v13151_v10  ;;  %v8387_v3 = vpop.f32.mrb[100].mxu1 }
0x2051   : > { %v8388_v0 = vpop.f32.mrb[101].mxu1 }
0x2052   : > { %7176 = vst [vmem:[%s13283_s15 + $0x10] sm:$0xff] %v7168_v37  ;;  %v7169_v1 = vmul.f32 0.70710677, %v7161_v15  ;;  %v8389_v55 = vadd.f32 %v8388_v0, %v8387_v3  ;;  %v8390_v18 = vpop.f32.mrb[102].mxu1 }
0x2053   : > { %v8391_v34 = vpop.f32.mrb[103].mxu1 }
0x2054   : > { %7177 = vst [vmem:[%s13283_s15 + $0x18] sm:$0xff] %v7169_v1  ;;  %v7144_v19 = vadd.f32 %v8389_v55, %v7917_v48  ;;  %v8392_v5 = vadd.f32 %v8391_v34, %v8390_v18 }
0x2056   : > { %v7162_v8 = vadd.f32 %v7144_v19, %v13167_v58  ;;  %v7147_v25 = vadd.f32 %v8392_v5, %v7917_v48 }
0x2058   : > { %v7170_v26 = vmul.f32 0.70710677, %v7162_v8  ;;  %v7163_v10 = vadd.f32 %v7147_v25, %v13176_v6  ;;  %v8393_v11 = vpop.f32.mrb[104].mxu1 }
0x2059   : > { %v8394_v59 = vpop.f32.mrb[105].mxu1 }
0x205a   : > { %7178 = vst [vmem:[%s13283_s15 + $0x20] sm:$0xff] %v7170_v26  ;;  %v7171_v35 = vmul.f32 0.70710677, %v7163_v10  ;;  %v8395_v54 = vadd.f32 %v8394_v59, %v8393_v11  ;;  %v8396_v27 = vpop.f32.mrb[106].mxu1 }
0x205b   : > { %v8397_v12 = vpop.f32.mrb[107].mxu1 }
0x205c   : > { %7179 = vst [vmem:[%s13283_s15 + $0x28] sm:$0xff] %v7171_v35  ;;  %v7152_v44 = vadd.f32 %v8395_v54, %v7917_v48  ;;  %v8398_v58 = vadd.f32 %v8397_v12, %v8396_v27 }
0x205e   : > { %v7164_v29 = vadd.f32 %v7152_v44, %v13171_v50  ;;  %v7155_v45 = vadd.f32 %v8398_v58, %v7917_v48 }
0x2060   : > { %v7172_v6 = vmul.f32 0.70710677, %v7164_v29  ;;  %v7165_v38 = vadd.f32 %v7155_v45, %v13178_v43 }
0x2062   : > { %7180 = vst [vmem:[%s13283_s15 + $0x30] sm:$0xff] %v7172_v6  ;;  %v7173_v7 = vmul.f32 0.70710677, %v7165_v38 }
0x2064   : > { %7181 = vst [vmem:[%s13283_s15 + $0x38] sm:$0xff] %v7173_v7 }
0x2065   : > { %11206 = shalt.err (!%p11203_p11)
}
0x2066   : > { %s11207_s15 = scalar_lea.hbm %s13301_s4, 1024  ;;  %s11211_s13 = scalar_lea.hbm %s13536_s1, 2048 }
0x2067   : > { %p11208_p0 = scmp.ne.s32.totalorder %s13301_s4, %s11207_s15  ;;  %p11212_p4 = scmp.lt.u32.totalorder %s13301_s4, %s13536_s1 }
0x2068   : > { %p11213_p10 = scmp.lt.u32.totalorder %s11211_s13, %s11207_s15  ;;  %p11215_p13 = scmp.lt.u32.totalorder %s11207_s15, %s13301_s4 }
0x2069   : > { %p11209_p2 = pnand %p11208_p0, %p13534_p9 }
0x206a   : > { %p11214_p12 = por %p11213_p10, %p11212_p4 }
0x206b   : > { %p11210_p8 = pneg %p11209_p2 }
0x206c   : > { %p11216_p5 = por %p11215_p13, %p11214_p12 }
0x206e   : > { %p11217_p7 = pnand %p11216_p5, %p11210_p8 }
0x2070   : > { %11220 = shalt.err (!%p11217_p7)
}
0x2071   : > { %s13537_s14 = smov 8   ;;  %s13538_s2 = smov 128  }
0x2072   : > { %9723 = dma.vmem_to_hbm [thread:$0]  (%p13534_p9), %s13303_s5, 1024, %s13301_s4, %s7185_s6, %s13538_s2, %s13538_s2, %s13537_s14  }
0x2073 PF: > { %s7234_s17 = sand.u32 1, %s11311_s0   ;;  %p13539_p1 = scmp.ne.s32.totalorder %s13488_s3, 0 }
0x2074   : > { %p13540_p3 = scmp.ge.s32.totalorder %s11323_s11, 2  ;;  %s7235_s18 = scalar_lea.sflag [#allocation4], %s7234_s17 }
0x2076   : > { %p9820_p6 = pnand %p13540_p3, %p13539_p1 }
0x2078   : > { %11302 = dma.done.wait (!%p9820_p6), %s7235_s18, 1024  }
0x2079   : > { %11304 = vsyncadd (!%p9820_p6), %s7235_s18, 4294966272  ;;  %s7244_s9 = scalar_lea.sflag [#allocation51], %s7234_s17 }
0x207a   : > { %11306 = dma.done.wait (!%p9820_p6), %s7244_s9, 256  }
0x207b   : > { %11308 = vsyncadd (!%p9820_p6), %s7244_s9, 4294967040  ;;  %p123_p9 = scmp.ge.s32.totalorder %s12034_s28, 4   ;;  %s13541_s0 = smov %s11315_s7 }
0x207c   : > { %s13542_s7 = smov %s11319_s10  ;;  %s13543_s10 = smov %s12046_s12 }
0x207d   : > { %s13544_s11 = smov %s12034_s28  ;;  %125 = sbr.rel (!%p123_p9) target bundleno = 113 (0x71), region = 422 }
0x2084   :  { %7249 = vsyncpa [#allocation3], 1 }
0x2085   :  { %7251 = vsyncpa [#allocation3 + $0x1], 1 }
0x2086   :  { %7252 = vsyncpa [#allocation6], 1 }
0x2087   :  { %7253 = vsyncpa [#allocation9], 1 }
0x2088   :  { %7254 = vsyncpa [#allocation12], 1 }
0x2089   :  { %7255 = vsyncpa [#allocation15], 1 }
0x208a   :  { %7256 = vsyncpa [#allocation18], 1 }
0x208b   :  { %7257 = vsyncpa [#allocation21], 1 }
0x208c   :  { %7258 = vsyncpa [#allocation24], 1 }
0x208d   :  { %7259 = vsyncpa [#allocation27], 1 }
0x208e   :  { %7260 = vsyncpa [#allocation30], 1 }
0x208f   :  { %7261 = vsyncpa [#allocation33], 1 }
0x2090   :  { %7262 = vsyncpa [#allocation36], 1 }
0x2091   :  { %7263 = vsyncpa [#allocation39], 1 }
0x2092   :  { %7264 = vsyncpa [#allocation42], 1 }
0x2093   :  { %7265 = vsyncpa [#allocation45], 1 }
0x2094   :  { %7266 = vsyncpa [#allocation48], 1 }
0x2095   :  { %7267 = vsyncpa [#allocation4], 1 }
0x2096   :  { %7269 = vsyncpa [#allocation4 + $0x1], 1 }
0x2097   :  { %7270 = vsyncpa [#allocation51], 1 }
0x2098   :  { %7272 = vsyncpa [#allocation51 + $0x1], 1 }

</bundles_post_ra>
